<compile_context>
chip_gen: v7x
topology: tpu7x:2x2x1
jax: 0.10.0
libtpu: 0.0.40
codegen_flags: <defaults>
</compile_context>

<pallas_src>
import jax
import jax.numpy as jnp
from jax import lax
from jax.experimental import pallas as pl
from jax.experimental.pallas import tpu as pltpu

# Scaled-down hyperparameters consistent with the module
# (input_dim=1792 -> 256, hidden_dim=512 -> 128, num_layers=2, nhead=8).
INPUT_DIM = 256
HIDDEN_DIM = 128
NUM_LAYERS = 2
NHEAD = 8          # head_dim = 32 (unused: softmax over 1 key is identity)
LN_EPS = 1e-5


def _layernorm(x, g, b):
    """LayerNorm over the lane axis with fused moments (single logical pass)."""
    mu = jnp.mean(x, axis=-1, keepdims=True)
    ms = jnp.mean(x * x, axis=-1, keepdims=True)
    var = jnp.maximum(ms - mu * mu, 0.0)
    return (x - mu) * lax.rsqrt(var + LN_EPS) * g + b


def _detector_kernel(x_ref,
                     wvo_ref, bvo_ref, ln1g_ref, ln1b_ref,
                     w1_ref, b1_ref, w2_ref, b2_ref,
                     ln2g_ref, ln2b_ref,
                     fw1t_ref, fb1t_ref, fw2t_ref, fb2t_ref,
                     out_ref):
    # h is (row_block, E); kept in f32 for residual/LayerNorm math.
    h = x_ref[...].astype(jnp.float32)

    for l in range(NUM_LAYERS):  # statically unrolled
        # --- self-attention (seq len == 1 -> softmax == 1; Wv@Wo pre-folded) ---
        attn = jnp.dot(h.astype(jnp.bfloat16), wvo_ref[l],
                       preferred_element_type=jnp.float32) + bvo_ref[l]
        h = _layernorm(h + attn, ln1g_ref[l], ln1b_ref[l])

        # --- feed-forward: linear1 -> ReLU -> linear2 (post-norm) ---
        ff = jnp.maximum(
            jnp.dot(h.astype(jnp.bfloat16), w1_ref[l],
                    preferred_element_type=jnp.float32) + b1_ref[l], 0.0)
        ff = jnp.dot(ff.astype(jnp.bfloat16), w2_ref[l],
                     preferred_element_type=jnp.float32) + b2_ref[l]
        h = _layernorm(h + ff, ln2g_ref[l], ln2b_ref[l])

    # --- fc head evaluated feature-major so the output is lane-dense ---
    hT = jnp.transpose(h).astype(jnp.bfloat16)                       # (E, rb)
    z1 = jnp.maximum(
        jnp.dot(fw1t_ref[...], hT, preferred_element_type=jnp.float32)
        + fb1t_ref[...], 0.0)                                        # (H, rb)
    z2 = jnp.dot(fw2t_ref[...], z1.astype(jnp.bfloat16),
                 preferred_element_type=jnp.float32) + fb2t_ref[...]  # (1, rb)
    out_ref[...] = jax.nn.sigmoid(z2)                                 # lane-dense store


def fake_video_detector(x, params, row_block=256):
    """x: (batch, 1, input_dim) -- mirrors the PyTorch call. Returns (batch,).

    row_block=256 targets the 256-wide MXU on v6e/v7x; use 128 on v5e if desired.
    """
    N = x.shape[0]
    E = x.shape[-1]
    x2 = x.reshape(N, E)                                   # squeeze(1)

    # Fold the attention value/output projections offline (exact for seq_len==1).
    wv = params["wv"].astype(jnp.float32)
    wo = params["wo"].astype(jnp.float32)
    wvo = jnp.einsum("lij,ljk->lik", wv, wo)                              # (L,E,E)
    bvo = jnp.einsum("lij,ljk->lik",
                     params["bv"].astype(jnp.float32), wo) + params["bo"]  # (L,1,E)

    # Grid sizing with padding (no batch-multiple requirement).
    num_tiles = pl.cdiv(N, row_block)
    n_pad = num_tiles * row_block
    x_bf = x2.astype(jnp.bfloat16)
    if n_pad != N:
        x_bf = jnp.pad(x_bf, ((0, n_pad - N), (0, 0)))

    bf = lambda a: a.astype(jnp.bfloat16)
    f32 = lambda a: a.astype(jnp.float32)
    param_list = [
        bf(wvo), f32(bvo), f32(params["ln1g"]), f32(params["ln1b"]),
        bf(params["w1"]), f32(params["b1"]), bf(params["w2"]), f32(params["b2"]),
        f32(params["ln2g"]), f32(params["ln2b"]),
        bf(params["fw1_t"]), f32(params["fb1_t"]),
        bf(params["fw2_t"]), f32(params["fb2_t"]),
    ]

    def full_spec(p):
        nd = p.ndim
        return pl.BlockSpec(tuple(p.shape), lambda i, nd=nd: (0,) * nd)

    in_specs = [pl.BlockSpec((row_block, E), lambda i: (i, 0))]
    in_specs += [full_spec(p) for p in param_list]
    # Lane-dense output: one (1, row_block) block per grid step of a (1, n_pad) row.
    out_spec = pl.BlockSpec((1, row_block), lambda i: (0, i))

    out = pl.pallas_call(
        _detector_kernel,
        out_shape=jax.ShapeDtypeStruct((1, n_pad), jnp.float32),
        grid_spec=pltpu.PrefetchScalarGridSpec(
            num_scalar_prefetch=0,
            grid=(num_tiles,),
            in_specs=in_specs,
            out_specs=out_spec,
        ),
        compiler_params=pltpu.CompilerParams(
            dimension_semantics=("parallel",)),
    )(x_bf, *param_list)
    return out[0, :N]                                       # final .squeeze(-1)


def init_params(key, input_dim=INPUT_DIM, hidden_dim=HIDDEN_DIM,
                num_layers=NUM_LAYERS):
    """Deterministic synthetic parameters (shapes follow the nn.Module __init__)."""
    E, H, L = input_dim, hidden_dim, num_layers
    k = jax.random.split(key, 16)
    s = lambda fan_in: 1.0 / jnp.sqrt(jnp.float32(fan_in))
    return {
        # value projection (slice of in_proj_weight) and attention out_proj,
        # stored pre-transposed as (in, out), stacked over layers.
        "wv":   jax.random.normal(k[0], (L, E, E), jnp.float32) * s(E),
        "bv":   jax.random.normal(k[1], (L, 1, E), jnp.float32) * 0.02,
        "wo":   jax.random.normal(k[2], (L, E, E), jnp.float32) * s(E),
        "bo":   jax.random.normal(k[3], (L, 1, E), jnp.float32) * 0.02,
        "ln1g": 1.0 + jax.random.normal(k[4], (L, 1, E), jnp.float32) * 0.02,
        "ln1b": jax.random.normal(k[5], (L, 1, E), jnp.float32) * 0.02,
        # feed-forward: linear1 (E->H), linear2 (H->E), pre-transposed (in, out).
        "w1":   jax.random.normal(k[6], (L, E, H), jnp.float32) * s(E),
        "b1":   jax.random.normal(k[7], (L, 1, H), jnp.float32) * 0.02,
        "w2":   jax.random.normal(k[8], (L, H, E), jnp.float32) * s(H),
        "b2":   jax.random.normal(k[9], (L, 1, E), jnp.float32) * 0.02,
        "ln2g": 1.0 + jax.random.normal(k[10], (L, 1, E), jnp.float32) * 0.02,
        "ln2b": jax.random.normal(k[11], (L, 1, E), jnp.float32) * 0.02,
        # fc head stored feature-major (PyTorch (out, in) layout) so the kernel
        # evaluates it in transposed form and emits a lane-dense output row.
        "fw1_t": jax.random.normal(k[12], (H, E), jnp.float32) * s(E),
        "fb1_t": jax.random.normal(k[13], (H, 1), jnp.float32) * 0.02,
        "fw2_t": jax.random.normal(k[14], (1, H), jnp.float32) * s(H),
        "fb2_t": jax.random.normal(k[15], (1, 1), jnp.float32) * 0.02,
    }


def _layernorm_ref(x, g, b):
    mu = jnp.mean(x, axis=-1, keepdims=True)
    var = jnp.mean((x - mu) ** 2, axis=-1, keepdims=True)
    return (x - mu) * lax.rsqrt(var + LN_EPS) * g + b


def reference_forward(x, params):
    """Pure-JAX f32 reference with unfolded weights (for tolerance checking)."""
    h = x.reshape(x.shape[0], x.shape[-1]).astype(jnp.float32)
    for l in range(NUM_LAYERS):
        v = h @ params["wv"][l] + params["bv"][l]
        attn = v @ params["wo"][l] + params["bo"][l]
        h = _layernorm_ref(h + attn, params["ln1g"][l], params["ln1b"][l])
        ff = jnp.maximum(h @ params["w1"][l] + params["b1"][l], 0.0)
        ff = ff @ params["w2"][l] + params["b2"][l]
        h = _layernorm_ref(h + ff, params["ln2g"][l], params["ln2b"][l])
    z = jnp.maximum(h @ params["fw1_t"].T + params["fb1_t"].T, 0.0)
    z = z @ params["fw2_t"].T + params["fb2_t"].T
    return jax.nn.sigmoid(z)[:, 0]


if __name__ == "__main__":
    key = jax.random.PRNGKey(0)
    k_x, k_p = jax.random.split(key)
    batch = 300   # not a multiple of row_block -> exercises cdiv/padding; grid = 2
    x = jax.random.normal(k_x, (batch, 1, INPUT_DIM), jnp.float32)
    params = init_params(k_p)

    out = jax.block_until_ready(fake_video_detector(x, params))
    ref = jax.block_until_ready(reference_forward(x, params))

    assert out.shape == (batch,)
    assert bool(jnp.all(jnp.isfinite(out)))
    assert bool(jnp.all((out >= 0.0) & (out <= 1.0)))          # sigmoid range
    assert float(jnp.max(jnp.abs(out - ref))) < 5e-2           # bf16-matmul tolerance
    print("KERNEL_OK")
</pallas_src>

<mosaic_0001>
module attributes {stable_mosaic.version = 11 : i64} {
  func.func @_detector_kernel(%arg0: i32, %arg1: memref<256x256xbf16, #tpu.memory_space<vmem>>, %arg2: memref<2x256x256xbf16, #tpu.memory_space<vmem>>, %arg3: memref<2x1x256xf32, #tpu.memory_space<vmem>>, %arg4: memref<2x1x256xf32, #tpu.memory_space<vmem>>, %arg5: memref<2x1x256xf32, #tpu.memory_space<vmem>>, %arg6: memref<2x256x128xbf16, #tpu.memory_space<vmem>>, %arg7: memref<2x1x128xf32, #tpu.memory_space<vmem>>, %arg8: memref<2x128x256xbf16, #tpu.memory_space<vmem>>, %arg9: memref<2x1x256xf32, #tpu.memory_space<vmem>>, %arg10: memref<2x1x256xf32, #tpu.memory_space<vmem>>, %arg11: memref<2x1x256xf32, #tpu.memory_space<vmem>>, %arg12: memref<128x256xbf16, #tpu.memory_space<vmem>>, %arg13: memref<128x1xf32, #tpu.memory_space<vmem>>, %arg14: memref<1x128xbf16, #tpu.memory_space<vmem>>, %arg15: memref<1x1xf32, #tpu.memory_space<vmem>>, %arg16: memref<1x256xf32, #tpu.memory_space<vmem>>) attributes {dimension_semantics = [#tpu.dimension_semantics<parallel>], iteration_bounds = array<i64: 2>, scalar_prefetch = 0 : i64, scratch_operands = 0 : i64, tpu.core_type = #tpu.core_type<tc>, window_params = [{transform_indices = @transform_0, window_bounds = array<i64: 256, 256>}, {pipeline_mode = #tpu.pipeline_mode<synchronous>, transform_indices = @transform_1, window_bounds = array<i64: 2, 256, 256>}, {pipeline_mode = #tpu.pipeline_mode<synchronous>, transform_indices = @transform_2, window_bounds = array<i64: 2, 1, 256>}, {pipeline_mode = #tpu.pipeline_mode<synchronous>, transform_indices = @transform_3, window_bounds = array<i64: 2, 1, 256>}, {pipeline_mode = #tpu.pipeline_mode<synchronous>, transform_indices = @transform_4, window_bounds = array<i64: 2, 1, 256>}, {pipeline_mode = #tpu.pipeline_mode<synchronous>, transform_indices = @transform_5, window_bounds = array<i64: 2, 256, 128>}, {pipeline_mode = #tpu.pipeline_mode<synchronous>, transform_indices = @transform_6, window_bounds = array<i64: 2, 1, 128>}, {pipeline_mode = #tpu.pipeline_mode<synchronous>, transform_indices = @transform_7, window_bounds = array<i64: 2, 128, 256>}, {pipeline_mode = #tpu.pipeline_mode<synchronous>, transform_indices = @transform_8, window_bounds = array<i64: 2, 1, 256>}, {pipeline_mode = #tpu.pipeline_mode<synchronous>, transform_indices = @transform_9, window_bounds = array<i64: 2, 1, 256>}, {pipeline_mode = #tpu.pipeline_mode<synchronous>, transform_indices = @transform_10, window_bounds = array<i64: 2, 1, 256>}, {pipeline_mode = #tpu.pipeline_mode<synchronous>, transform_indices = @transform_11, window_bounds = array<i64: 128, 256>}, {pipeline_mode = #tpu.pipeline_mode<synchronous>, transform_indices = @transform_12, window_bounds = array<i64: 128, 1>}, {pipeline_mode = #tpu.pipeline_mode<synchronous>, transform_indices = @transform_13, window_bounds = array<i64: 1, 128>}, {pipeline_mode = #tpu.pipeline_mode<synchronous>, transform_indices = @transform_14, window_bounds = array<i64: 1, 1>}, {transform_indices = @transform_15, window_bounds = array<i64: 1, 256>}]} {
    %c0 = arith.constant 0 : index
    %c0_0 = arith.constant 0 : index
    %0 = vector.load %arg1[%c0, %c0_0] : memref<256x256xbf16, #tpu.memory_space<vmem>>, vector<256x256xbf16>
    %1 = arith.extf %0 : vector<256x256xbf16> to vector<256x256xf32>
    %2 = arith.truncf %1 : vector<256x256xf32> to vector<256x256xbf16>
    %c0_1 = arith.constant 0 : index
    %c0_2 = arith.constant 0 : index
    %c0_3 = arith.constant 0 : index
    %3 = vector.load %arg2[%c0_1, %c0_2, %c0_3] : memref<2x256x256xbf16, #tpu.memory_space<vmem>>, vector<1x256x256xbf16>
    %4 = vector.shape_cast %3 : vector<1x256x256xbf16> to vector<256x256xbf16>
    %cst = arith.constant dense<0.000000e+00> : vector<256x256xf32>
    %5 = tpu.matmul %2, %4, %cst {dimension_numbers = #tpu.dot_dimension_numbers<[1], [0], [0], [1], [0, 0, 1, 1], [], []>} : vector<256x256xbf16>, vector<256x256xbf16>, vector<256x256xf32> -> vector<256x256xf32>
    %c0_4 = arith.constant 0 : index
    %c0_5 = arith.constant 0 : index
    %c0_6 = arith.constant 0 : index
    %6 = vector.load %arg3[%c0_4, %c0_5, %c0_6] : memref<2x1x256xf32, #tpu.memory_space<vmem>>, vector<1x1x256xf32>
    %7 = vector.shape_cast %6 : vector<1x1x256xf32> to vector<1x256xf32>
    %8 = vector.broadcast %7 : vector<1x256xf32> to vector<256x256xf32>
    %9 = arith.addf %5, %8 : vector<256x256xf32>
    %10 = arith.addf %1, %9 : vector<256x256xf32>
    %c0_7 = arith.constant 0 : index
    %c0_8 = arith.constant 0 : index
    %c0_9 = arith.constant 0 : index
    %11 = vector.load %arg4[%c0_7, %c0_8, %c0_9] : memref<2x1x256xf32, #tpu.memory_space<vmem>>, vector<1x1x256xf32>
    %12 = vector.shape_cast %11 : vector<1x1x256xf32> to vector<1x256xf32>
    %c0_10 = arith.constant 0 : index
    %c0_11 = arith.constant 0 : index
    %c0_12 = arith.constant 0 : index
    %13 = vector.load %arg5[%c0_10, %c0_11, %c0_12] : memref<2x1x256xf32, #tpu.memory_space<vmem>>, vector<1x1x256xf32>
    %14 = vector.shape_cast %13 : vector<1x1x256xf32> to vector<1x256xf32>
    %cst_13 = arith.constant dense<0.000000e+00> : vector<256xf32>
    %15 = vector.multi_reduction <add>, %10, %cst_13 [1] : vector<256x256xf32> to vector<256xf32>
    %16 = vector.shape_cast %15 : vector<256xf32> to vector<256x1xf32>
    %cst_14 = arith.constant 2.560000e+02 : f32
    %17 = vector.broadcast %cst_14 : f32 to vector<256x1xf32>
    %18 = arith.divf %16, %17 : vector<256x1xf32>
    %19 = arith.mulf %10, %10 : vector<256x256xf32>
    %cst_15 = arith.constant dense<0.000000e+00> : vector<256xf32>
    %20 = vector.multi_reduction <add>, %19, %cst_15 [1] : vector<256x256xf32> to vector<256xf32>
    %21 = vector.shape_cast %20 : vector<256xf32> to vector<256x1xf32>
    %cst_16 = arith.constant 2.560000e+02 : f32
    %22 = vector.broadcast %cst_16 : f32 to vector<256x1xf32>
    %23 = arith.divf %21, %22 : vector<256x1xf32>
    %24 = arith.mulf %18, %18 : vector<256x1xf32>
    %25 = arith.subf %23, %24 : vector<256x1xf32>
    %cst_17 = arith.constant 0.000000e+00 : f32
    %26 = vector.broadcast %cst_17 : f32 to vector<256x1xf32>
    %27 = arith.maximumf %25, %26 : vector<256x1xf32>
    %28 = vector.broadcast %18 : vector<256x1xf32> to vector<256x256xf32>
    %29 = arith.subf %10, %28 : vector<256x256xf32>
    %cst_18 = arith.constant 9.99999974E-6 : f32
    %30 = vector.broadcast %cst_18 : f32 to vector<256x1xf32>
    %31 = arith.addf %27, %30 : vector<256x1xf32>
    %32 = math.rsqrt %31 : vector<256x1xf32>
    %33 = vector.broadcast %32 : vector<256x1xf32> to vector<256x256xf32>
    %34 = arith.mulf %29, %33 : vector<256x256xf32>
    %35 = vector.broadcast %12 : vector<1x256xf32> to vector<256x256xf32>
    %36 = arith.mulf %34, %35 : vector<256x256xf32>
    %37 = vector.broadcast %14 : vector<1x256xf32> to vector<256x256xf32>
    %38 = arith.addf %36, %37 : vector<256x256xf32>
    %39 = arith.truncf %38 : vector<256x256xf32> to vector<256x256xbf16>
    %c0_19 = arith.constant 0 : index
    %c0_20 = arith.constant 0 : index
    %c0_21 = arith.constant 0 : index
    %40 = vector.load %arg6[%c0_19, %c0_20, %c0_21] : memref<2x256x128xbf16, #tpu.memory_space<vmem>>, vector<1x256x128xbf16>
    %41 = vector.shape_cast %40 : vector<1x256x128xbf16> to vector<256x128xbf16>
    %cst_22 = arith.constant dense<0.000000e+00> : vector<256x128xf32>
    %42 = tpu.matmul %39, %41, %cst_22 {dimension_numbers = #tpu.dot_dimension_numbers<[1], [0], [0], [1], [0, 0, 1, 1], [], []>} : vector<256x256xbf16>, vector<256x128xbf16>, vector<256x128xf32> -> vector<256x128xf32>
    %c0_23 = arith.constant 0 : index
    %c0_24 = arith.constant 0 : index
    %c0_25 = arith.constant 0 : index
    %43 = vector.load %arg7[%c0_23, %c0_24, %c0_25] : memref<2x1x128xf32, #tpu.memory_space<vmem>>, vector<1x1x128xf32>
    %44 = vector.shape_cast %43 : vector<1x1x128xf32> to vector<1x128xf32>
    %45 = vector.broadcast %44 : vector<1x128xf32> to vector<256x128xf32>
    %46 = arith.addf %42, %45 : vector<256x128xf32>
    %cst_26 = arith.constant 0.000000e+00 : f32
    %47 = vector.broadcast %cst_26 : f32 to vector<256x128xf32>
    %48 = arith.maximumf %46, %47 : vector<256x128xf32>
    %49 = arith.truncf %48 : vector<256x128xf32> to vector<256x128xbf16>
    %c0_27 = arith.constant 0 : index
    %c0_28 = arith.constant 0 : index
    %c0_29 = arith.constant 0 : index
    %50 = vector.load %arg8[%c0_27, %c0_28, %c0_29] : memref<2x128x256xbf16, #tpu.memory_space<vmem>>, vector<1x128x256xbf16>
    %51 = vector.shape_cast %50 : vector<1x128x256xbf16> to vector<128x256xbf16>
    %cst_30 = arith.constant dense<0.000000e+00> : vector<256x256xf32>
    %52 = tpu.matmul %49, %51, %cst_30 {dimension_numbers = #tpu.dot_dimension_numbers<[1], [0], [0], [1], [0, 0, 1, 1], [], []>} : vector<256x128xbf16>, vector<128x256xbf16>, vector<256x256xf32> -> vector<256x256xf32>
    %c0_31 = arith.constant 0 : index
    %c0_32 = arith.constant 0 : index
    %c0_33 = arith.constant 0 : index
    %53 = vector.load %arg9[%c0_31, %c0_32, %c0_33] : memref<2x1x256xf32, #tpu.memory_space<vmem>>, vector<1x1x256xf32>
    %54 = vector.shape_cast %53 : vector<1x1x256xf32> to vector<1x256xf32>
    %55 = vector.broadcast %54 : vector<1x256xf32> to vector<256x256xf32>
    %56 = arith.addf %52, %55 : vector<256x256xf32>
    %57 = arith.addf %38, %56 : vector<256x256xf32>
    %c0_34 = arith.constant 0 : index
    %c0_35 = arith.constant 0 : index
    %c0_36 = arith.constant 0 : index
    %58 = vector.load %arg10[%c0_34, %c0_35, %c0_36] : memref<2x1x256xf32, #tpu.memory_space<vmem>>, vector<1x1x256xf32>
    %59 = vector.shape_cast %58 : vector<1x1x256xf32> to vector<1x256xf32>
    %c0_37 = arith.constant 0 : index
    %c0_38 = arith.constant 0 : index
    %c0_39 = arith.constant 0 : index
    %60 = vector.load %arg11[%c0_37, %c0_38, %c0_39] : memref<2x1x256xf32, #tpu.memory_space<vmem>>, vector<1x1x256xf32>
    %61 = vector.shape_cast %60 : vector<1x1x256xf32> to vector<1x256xf32>
    %cst_40 = arith.constant dense<0.000000e+00> : vector<256xf32>
    %62 = vector.multi_reduction <add>, %57, %cst_40 [1] : vector<256x256xf32> to vector<256xf32>
    %63 = vector.shape_cast %62 : vector<256xf32> to vector<256x1xf32>
    %cst_41 = arith.constant 2.560000e+02 : f32
    %64 = vector.broadcast %cst_41 : f32 to vector<256x1xf32>
    %65 = arith.divf %63, %64 : vector<256x1xf32>
    %66 = arith.mulf %57, %57 : vector<256x256xf32>
    %cst_42 = arith.constant dense<0.000000e+00> : vector<256xf32>
    %67 = vector.multi_reduction <add>, %66, %cst_42 [1] : vector<256x256xf32> to vector<256xf32>
    %68 = vector.shape_cast %67 : vector<256xf32> to vector<256x1xf32>
    %cst_43 = arith.constant 2.560000e+02 : f32
    %69 = vector.broadcast %cst_43 : f32 to vector<256x1xf32>
    %70 = arith.divf %68, %69 : vector<256x1xf32>
    %71 = arith.mulf %65, %65 : vector<256x1xf32>
    %72 = arith.subf %70, %71 : vector<256x1xf32>
    %cst_44 = arith.constant 0.000000e+00 : f32
    %73 = vector.broadcast %cst_44 : f32 to vector<256x1xf32>
    %74 = arith.maximumf %72, %73 : vector<256x1xf32>
    %75 = vector.broadcast %65 : vector<256x1xf32> to vector<256x256xf32>
    %76 = arith.subf %57, %75 : vector<256x256xf32>
    %cst_45 = arith.constant 9.99999974E-6 : f32
    %77 = vector.broadcast %cst_45 : f32 to vector<256x1xf32>
    %78 = arith.addf %74, %77 : vector<256x1xf32>
    %79 = math.rsqrt %78 : vector<256x1xf32>
    %80 = vector.broadcast %79 : vector<256x1xf32> to vector<256x256xf32>
    %81 = arith.mulf %76, %80 : vector<256x256xf32>
    %82 = vector.broadcast %59 : vector<1x256xf32> to vector<256x256xf32>
    %83 = arith.mulf %81, %82 : vector<256x256xf32>
    %84 = vector.broadcast %61 : vector<1x256xf32> to vector<256x256xf32>
    %85 = arith.addf %83, %84 : vector<256x256xf32>
    %86 = arith.truncf %85 : vector<256x256xf32> to vector<256x256xbf16>
    %c1 = arith.constant 1 : index
    %c0_46 = arith.constant 0 : index
    %c0_47 = arith.constant 0 : index
    %87 = vector.load %arg2[%c1, %c0_46, %c0_47] : memref<2x256x256xbf16, #tpu.memory_space<vmem>>, vector<1x256x256xbf16>
    %88 = vector.shape_cast %87 : vector<1x256x256xbf16> to vector<256x256xbf16>
    %cst_48 = arith.constant dense<0.000000e+00> : vector<256x256xf32>
    %89 = tpu.matmul %86, %88, %cst_48 {dimension_numbers = #tpu.dot_dimension_numbers<[1], [0], [0], [1], [0, 0, 1, 1], [], []>} : vector<256x256xbf16>, vector<256x256xbf16>, vector<256x256xf32> -> vector<256x256xf32>
    %c1_49 = arith.constant 1 : index
    %c0_50 = arith.constant 0 : index
    %c0_51 = arith.constant 0 : index
    %90 = vector.load %arg3[%c1_49, %c0_50, %c0_51] : memref<2x1x256xf32, #tpu.memory_space<vmem>>, vector<1x1x256xf32>
    %91 = vector.shape_cast %90 : vector<1x1x256xf32> to vector<1x256xf32>
    %92 = vector.broadcast %91 : vector<1x256xf32> to vector<256x256xf32>
    %93 = arith.addf %89, %92 : vector<256x256xf32>
    %94 = arith.addf %85, %93 : vector<256x256xf32>
    %c1_52 = arith.constant 1 : index
    %c0_53 = arith.constant 0 : index
    %c0_54 = arith.constant 0 : index
    %95 = vector.load %arg4[%c1_52, %c0_53, %c0_54] : memref<2x1x256xf32, #tpu.memory_space<vmem>>, vector<1x1x256xf32>
    %96 = vector.shape_cast %95 : vector<1x1x256xf32> to vector<1x256xf32>
    %c1_55 = arith.constant 1 : index
    %c0_56 = arith.constant 0 : index
    %c0_57 = arith.constant 0 : index
    %97 = vector.load %arg5[%c1_55, %c0_56, %c0_57] : memref<2x1x256xf32, #tpu.memory_space<vmem>>, vector<1x1x256xf32>
    %98 = vector.shape_cast %97 : vector<1x1x256xf32> to vector<1x256xf32>
    %cst_58 = arith.constant dense<0.000000e+00> : vector<256xf32>
    %99 = vector.multi_reduction <add>, %94, %cst_58 [1] : vector<256x256xf32> to vector<256xf32>
    %100 = vector.shape_cast %99 : vector<256xf32> to vector<256x1xf32>
    %cst_59 = arith.constant 2.560000e+02 : f32
    %101 = vector.broadcast %cst_59 : f32 to vector<256x1xf32>
    %102 = arith.divf %100, %101 : vector<256x1xf32>
    %103 = arith.mulf %94, %94 : vector<256x256xf32>
    %cst_60 = arith.constant dense<0.000000e+00> : vector<256xf32>
    %104 = vector.multi_reduction <add>, %103, %cst_60 [1] : vector<256x256xf32> to vector<256xf32>
    %105 = vector.shape_cast %104 : vector<256xf32> to vector<256x1xf32>
    %cst_61 = arith.constant 2.560000e+02 : f32
    %106 = vector.broadcast %cst_61 : f32 to vector<256x1xf32>
    %107 = arith.divf %105, %106 : vector<256x1xf32>
    %108 = arith.mulf %102, %102 : vector<256x1xf32>
    %109 = arith.subf %107, %108 : vector<256x1xf32>
    %cst_62 = arith.constant 0.000000e+00 : f32
    %110 = vector.broadcast %cst_62 : f32 to vector<256x1xf32>
    %111 = arith.maximumf %109, %110 : vector<256x1xf32>
    %112 = vector.broadcast %102 : vector<256x1xf32> to vector<256x256xf32>
    %113 = arith.subf %94, %112 : vector<256x256xf32>
    %cst_63 = arith.constant 9.99999974E-6 : f32
    %114 = vector.broadcast %cst_63 : f32 to vector<256x1xf32>
    %115 = arith.addf %111, %114 : vector<256x1xf32>
    %116 = math.rsqrt %115 : vector<256x1xf32>
    %117 = vector.broadcast %116 : vector<256x1xf32> to vector<256x256xf32>
    %118 = arith.mulf %113, %117 : vector<256x256xf32>
    %119 = vector.broadcast %96 : vector<1x256xf32> to vector<256x256xf32>
    %120 = arith.mulf %118, %119 : vector<256x256xf32>
    %121 = vector.broadcast %98 : vector<1x256xf32> to vector<256x256xf32>
    %122 = arith.addf %120, %121 : vector<256x256xf32>
    %123 = arith.truncf %122 : vector<256x256xf32> to vector<256x256xbf16>
    %c1_64 = arith.constant 1 : index
    %c0_65 = arith.constant 0 : index
    %c0_66 = arith.constant 0 : index
    %124 = vector.load %arg6[%c1_64, %c0_65, %c0_66] : memref<2x256x128xbf16, #tpu.memory_space<vmem>>, vector<1x256x128xbf16>
    %125 = vector.shape_cast %124 : vector<1x256x128xbf16> to vector<256x128xbf16>
    %cst_67 = arith.constant dense<0.000000e+00> : vector<256x128xf32>
    %126 = tpu.matmul %123, %125, %cst_67 {dimension_numbers = #tpu.dot_dimension_numbers<[1], [0], [0], [1], [0, 0, 1, 1], [], []>} : vector<256x256xbf16>, vector<256x128xbf16>, vector<256x128xf32> -> vector<256x128xf32>
    %c1_68 = arith.constant 1 : index
    %c0_69 = arith.constant 0 : index
    %c0_70 = arith.constant 0 : index
    %127 = vector.load %arg7[%c1_68, %c0_69, %c0_70] : memref<2x1x128xf32, #tpu.memory_space<vmem>>, vector<1x1x128xf32>
    %128 = vector.shape_cast %127 : vector<1x1x128xf32> to vector<1x128xf32>
    %129 = vector.broadcast %128 : vector<1x128xf32> to vector<256x128xf32>
    %130 = arith.addf %126, %129 : vector<256x128xf32>
    %cst_71 = arith.constant 0.000000e+00 : f32
    %131 = vector.broadcast %cst_71 : f32 to vector<256x128xf32>
    %132 = arith.maximumf %130, %131 : vector<256x128xf32>
    %133 = arith.truncf %132 : vector<256x128xf32> to vector<256x128xbf16>
    %c1_72 = arith.constant 1 : index
    %c0_73 = arith.constant 0 : index
    %c0_74 = arith.constant 0 : index
    %134 = vector.load %arg8[%c1_72, %c0_73, %c0_74] : memref<2x128x256xbf16, #tpu.memory_space<vmem>>, vector<1x128x256xbf16>
    %135 = vector.shape_cast %134 : vector<1x128x256xbf16> to vector<128x256xbf16>
    %cst_75 = arith.constant dense<0.000000e+00> : vector<256x256xf32>
    %136 = tpu.matmul %133, %135, %cst_75 {dimension_numbers = #tpu.dot_dimension_numbers<[1], [0], [0], [1], [0, 0, 1, 1], [], []>} : vector<256x128xbf16>, vector<128x256xbf16>, vector<256x256xf32> -> vector<256x256xf32>
    %c1_76 = arith.constant 1 : index
    %c0_77 = arith.constant 0 : index
    %c0_78 = arith.constant 0 : index
    %137 = vector.load %arg9[%c1_76, %c0_77, %c0_78] : memref<2x1x256xf32, #tpu.memory_space<vmem>>, vector<1x1x256xf32>
    %138 = vector.shape_cast %137 : vector<1x1x256xf32> to vector<1x256xf32>
    %139 = vector.broadcast %138 : vector<1x256xf32> to vector<256x256xf32>
    %140 = arith.addf %136, %139 : vector<256x256xf32>
    %141 = arith.addf %122, %140 : vector<256x256xf32>
    %c1_79 = arith.constant 1 : index
    %c0_80 = arith.constant 0 : index
    %c0_81 = arith.constant 0 : index
    %142 = vector.load %arg10[%c1_79, %c0_80, %c0_81] : memref<2x1x256xf32, #tpu.memory_space<vmem>>, vector<1x1x256xf32>
    %143 = vector.shape_cast %142 : vector<1x1x256xf32> to vector<1x256xf32>
    %c1_82 = arith.constant 1 : index
    %c0_83 = arith.constant 0 : index
    %c0_84 = arith.constant 0 : index
    %144 = vector.load %arg11[%c1_82, %c0_83, %c0_84] : memref<2x1x256xf32, #tpu.memory_space<vmem>>, vector<1x1x256xf32>
    %145 = vector.shape_cast %144 : vector<1x1x256xf32> to vector<1x256xf32>
    %cst_85 = arith.constant dense<0.000000e+00> : vector<256xf32>
    %146 = vector.multi_reduction <add>, %141, %cst_85 [1] : vector<256x256xf32> to vector<256xf32>
    %147 = vector.shape_cast %146 : vector<256xf32> to vector<256x1xf32>
    %cst_86 = arith.constant 2.560000e+02 : f32
    %148 = vector.broadcast %cst_86 : f32 to vector<256x1xf32>
    %149 = arith.divf %147, %148 : vector<256x1xf32>
    %150 = arith.mulf %141, %141 : vector<256x256xf32>
    %cst_87 = arith.constant dense<0.000000e+00> : vector<256xf32>
    %151 = vector.multi_reduction <add>, %150, %cst_87 [1] : vector<256x256xf32> to vector<256xf32>
    %152 = vector.shape_cast %151 : vector<256xf32> to vector<256x1xf32>
    %cst_88 = arith.constant 2.560000e+02 : f32
    %153 = vector.broadcast %cst_88 : f32 to vector<256x1xf32>
    %154 = arith.divf %152, %153 : vector<256x1xf32>
    %155 = arith.mulf %149, %149 : vector<256x1xf32>
    %156 = arith.subf %154, %155 : vector<256x1xf32>
    %cst_89 = arith.constant 0.000000e+00 : f32
    %157 = vector.broadcast %cst_89 : f32 to vector<256x1xf32>
    %158 = arith.maximumf %156, %157 : vector<256x1xf32>
    %159 = vector.broadcast %149 : vector<256x1xf32> to vector<256x256xf32>
    %160 = arith.subf %141, %159 : vector<256x256xf32>
    %cst_90 = arith.constant 9.99999974E-6 : f32
    %161 = vector.broadcast %cst_90 : f32 to vector<256x1xf32>
    %162 = arith.addf %158, %161 : vector<256x1xf32>
    %163 = math.rsqrt %162 : vector<256x1xf32>
    %164 = vector.broadcast %163 : vector<256x1xf32> to vector<256x256xf32>
    %165 = arith.mulf %160, %164 : vector<256x256xf32>
    %166 = vector.broadcast %143 : vector<1x256xf32> to vector<256x256xf32>
    %167 = arith.mulf %165, %166 : vector<256x256xf32>
    %168 = vector.broadcast %145 : vector<1x256xf32> to vector<256x256xf32>
    %169 = arith.addf %167, %168 : vector<256x256xf32>
    %170 = tpu.transpose %169, [1, 0] : vector<256x256xf32> -> vector<256x256xf32>
    %171 = arith.truncf %170 : vector<256x256xf32> to vector<256x256xbf16>
    %c0_91 = arith.constant 0 : index
    %c0_92 = arith.constant 0 : index
    %172 = vector.load %arg12[%c0_91, %c0_92] : memref<128x256xbf16, #tpu.memory_space<vmem>>, vector<128x256xbf16>
    %cst_93 = arith.constant dense<0.000000e+00> : vector<128x256xf32>
    %173 = tpu.matmul %172, %171, %cst_93 {dimension_numbers = #tpu.dot_dimension_numbers<[1], [0], [0], [1], [0, 0, 1, 1], [], []>} : vector<128x256xbf16>, vector<256x256xbf16>, vector<128x256xf32> -> vector<128x256xf32>
    %c0_94 = arith.constant 0 : index
    %c0_95 = arith.constant 0 : index
    %174 = vector.load %arg13[%c0_94, %c0_95] : memref<128x1xf32, #tpu.memory_space<vmem>>, vector<128x1xf32>
    %175 = vector.broadcast %174 : vector<128x1xf32> to vector<128x256xf32>
    %176 = arith.addf %173, %175 : vector<128x256xf32>
    %cst_96 = arith.constant 0.000000e+00 : f32
    %177 = vector.broadcast %cst_96 : f32 to vector<128x256xf32>
    %178 = arith.maximumf %176, %177 : vector<128x256xf32>
    %c0_97 = arith.constant 0 : index
    %c0_98 = arith.constant 0 : index
    %179 = vector.load %arg14[%c0_97, %c0_98] : memref<1x128xbf16, #tpu.memory_space<vmem>>, vector<1x128xbf16>
    %180 = arith.truncf %178 : vector<128x256xf32> to vector<128x256xbf16>
    %cst_99 = arith.constant dense<0.000000e+00> : vector<1x256xf32>
    %181 = tpu.matmul %179, %180, %cst_99 {dimension_numbers = #tpu.dot_dimension_numbers<[1], [0], [0], [1], [0, 0, 1, 1], [], []>} : vector<1x128xbf16>, vector<128x256xbf16>, vector<1x256xf32> -> vector<1x256xf32>
    %c0_100 = arith.constant 0 : index
    %c0_101 = arith.constant 0 : index
    %182 = vector.load %arg15[%c0_100, %c0_101] : memref<1x1xf32, #tpu.memory_space<vmem>>, vector<1x1xf32>
    %183 = vector.broadcast %182 : vector<1x1xf32> to vector<1x256xf32>
    %184 = arith.addf %181, %183 : vector<1x256xf32>
    %185 = arith.negf %184 : vector<1x256xf32>
    %186 = math.exp %185 : vector<1x256xf32>
    %cst_102 = arith.constant 1.000000e+00 : f32
    %187 = vector.broadcast %cst_102 : f32 to vector<1x256xf32>
    %188 = arith.addf %187, %186 : vector<1x256xf32>
    %189 = arith.divf %187, %188 : vector<1x256xf32>
    %c0_103 = arith.constant 0 : index
    %c0_104 = arith.constant 0 : index
    %190 = vector.load %arg16[%c0_103, %c0_104] : memref<1x256xf32, #tpu.memory_space<vmem>>, vector<1x256xf32>
    tpu.vector_store %arg16[%c0_103, %c0_104], %189 {strides = array<i32>} : memref<1x256xf32, #tpu.memory_space<vmem>>, vector<1x256xf32>,
    return
  }
  func.func @transform_0(%arg0: i32) -> (i32, i32) {
    %c0_i32 = arith.constant 0 : i32
    %c0_i32_0 = arith.constant 0 : i32
    return %arg0, %c0_i32 : i32, i32
  }
  func.func @transform_1(%arg0: i32) -> (i32, i32, i32) {
    %c0_i32 = arith.constant 0 : i32
    %c0_i32_0 = arith.constant 0 : i32
    %c0_i32_1 = arith.constant 0 : i32
    %c0_i32_2 = arith.constant 0 : i32
    return %c0_i32, %c0_i32_0, %c0_i32_1 : i32, i32, i32
  }
  func.func @transform_2(%arg0: i32) -> (i32, i32, i32) {
    %c0_i32 = arith.constant 0 : i32
    %c0_i32_0 = arith.constant 0 : i32
    %c0_i32_1 = arith.constant 0 : i32
    %c0_i32_2 = arith.constant 0 : i32
    return %c0_i32, %c0_i32_0, %c0_i32_1 : i32, i32, i32
  }
  func.func @transform_3(%arg0: i32) -> (i32, i32, i32) {
    %c0_i32 = arith.constant 0 : i32
    %c0_i32_0 = arith.constant 0 : i32
    %c0_i32_1 = arith.constant 0 : i32
    %c0_i32_2 = arith.constant 0 : i32
    return %c0_i32, %c0_i32_0, %c0_i32_1 : i32, i32, i32
  }
  func.func @transform_4(%arg0: i32) -> (i32, i32, i32) {
    %c0_i32 = arith.constant 0 : i32
    %c0_i32_0 = arith.constant 0 : i32
    %c0_i32_1 = arith.constant 0 : i32
    %c0_i32_2 = arith.constant 0 : i32
    return %c0_i32, %c0_i32_0, %c0_i32_1 : i32, i32, i32
  }
  func.func @transform_5(%arg0: i32) -> (i32, i32, i32) {
    %c0_i32 = arith.constant 0 : i32
    %c0_i32_0 = arith.constant 0 : i32
    %c0_i32_1 = arith.constant 0 : i32
    %c0_i32_2 = arith.constant 0 : i32
    return %c0_i32, %c0_i32_0, %c0_i32_1 : i32, i32, i32
  }
  func.func @transform_6(%arg0: i32) -> (i32, i32, i32) {
    %c0_i32 = arith.constant 0 : i32
    %c0_i32_0 = arith.constant 0 : i32
    %c0_i32_1 = arith.constant 0 : i32
    %c0_i32_2 = arith.constant 0 : i32
    return %c0_i32, %c0_i32_0, %c0_i32_1 : i32, i32, i32
  }
  func.func @transform_7(%arg0: i32) -> (i32, i32, i32) {
    %c0_i32 = arith.constant 0 : i32
    %c0_i32_0 = arith.constant 0 : i32
    %c0_i32_1 = arith.constant 0 : i32
    %c0_i32_2 = arith.constant 0 : i32
    return %c0_i32, %c0_i32_0, %c0_i32_1 : i32, i32, i32
  }
  func.func @transform_8(%arg0: i32) -> (i32, i32, i32) {
    %c0_i32 = arith.constant 0 : i32
    %c0_i32_0 = arith.constant 0 : i32
    %c0_i32_1 = arith.constant 0 : i32
    %c0_i32_2 = arith.constant 0 : i32
    return %c0_i32, %c0_i32_0, %c0_i32_1 : i32, i32, i32
  }
  func.func @transform_9(%arg0: i32) -> (i32, i32, i32) {
    %c0_i32 = arith.constant 0 : i32
    %c0_i32_0 = arith.constant 0 : i32
    %c0_i32_1 = arith.constant 0 : i32
    %c0_i32_2 = arith.constant 0 : i32
    return %c0_i32, %c0_i32_0, %c0_i32_1 : i32, i32, i32
  }
  func.func @transform_10(%arg0: i32) -> (i32, i32, i32) {
    %c0_i32 = arith.constant 0 : i32
    %c0_i32_0 = arith.constant 0 : i32
    %c0_i32_1 = arith.constant 0 : i32
    %c0_i32_2 = arith.constant 0 : i32
    return %c0_i32, %c0_i32_0, %c0_i32_1 : i32, i32, i32
  }
  func.func @transform_11(%arg0: i32) -> (i32, i32) {
    %c0_i32 = arith.constant 0 : i32
    %c0_i32_0 = arith.constant 0 : i32
    %c0_i32_1 = arith.constant 0 : i32
    return %c0_i32, %c0_i32_0 : i32, i32
  }
  func.func @transform_12(%arg0: i32) -> (i32, i32) {
    %c0_i32 = arith.constant 0 : i32
    %c0_i32_0 = arith.constant 0 : i32
    %c0_i32_1 = arith.constant 0 : i32
    return %c0_i32, %c0_i32_0 : i32, i32
  }
  func.func @transform_13(%arg0: i32) -> (i32, i32) {
    %c0_i32 = arith.constant 0 : i32
    %c0_i32_0 = arith.constant 0 : i32
    %c0_i32_1 = arith.constant 0 : i32
    return %c0_i32, %c0_i32_0 : i32, i32
  }
  func.func @transform_14(%arg0: i32) -> (i32, i32) {
    %c0_i32 = arith.constant 0 : i32
    %c0_i32_0 = arith.constant 0 : i32
    %c0_i32_1 = arith.constant 0 : i32
    return %c0_i32, %c0_i32_0 : i32, i32
  }
  func.func @transform_15(%arg0: i32) -> (i32, i32) {
    %c0_i32 = arith.constant 0 : i32
    %c0_i32_0 = arith.constant 0 : i32
    return %c0_i32, %arg0 : i32, i32
  }
}

</mosaic_0001>

<bundles_post_ra>
// kernel: tpu_custom_call.1
= control target key start
LH: loop header
LB: loop body
LE: loop exit
PB: predicated region body
PF: predicated region fallthrough
CT: control target
= control target key end

     0   :  { %s13446_s0 = inlined_call_operand.hbm [shape: bf16[512,256], index: 0, kind: input, shape index: {}]   ;;  %s13447_s1 = inlined_call_operand.hbm [shape: bf16[2,256,256], index: 1, kind: input, shape index: {}]   ;;  %s13448_s2 = inlined_call_operand.vmem [shape: f32[2,1,256], index: 2, kind: input, shape index: {}]   ;;  %s13449_s3 = inlined_call_operand.vmem [shape: f32[2,1,256], index: 3, kind: input, shape index: {}]   ;;  %s13450_s4 = inlined_call_operand.vmem [shape: f32[2,1,256], index: 4, kind: input, shape index: {}]   ;;  %s13451_s5 = inlined_call_operand.hbm [shape: bf16[2,256,128], index: 5, kind: input, shape index: {}]   ;;  %s13452_s6 = inlined_call_operand.vmem [shape: f32[2,1,128], index: 6, kind: input, shape index: {}]   ;;  %s13453_s7 = inlined_call_operand.hbm [shape: bf16[2,128,256], index: 7, kind: input, shape index: {}]   ;;  %s13454_s8 = inlined_call_operand.vmem [shape: f32[2,1,256], index: 8, kind: input, shape index: {}]   ;;  %s13455_s9 = inlined_call_operand.vmem [shape: f32[2,1,256], index: 9, kind: input, shape index: {}]   ;;  %s13456_s10 = inlined_call_operand.vmem [shape: f32[2,1,256], index: 10, kind: input, shape index: {}]   ;;  %s13457_s11 = inlined_call_operand.vmem [shape: bf16[128,256], index: 11, kind: input, shape index: {}]   ;;  %s13458_s12 = inlined_call_operand.vmem [shape: f32[128,1], index: 12, kind: input, shape index: {}]   ;;  %s13459_s13 = inlined_call_operand.vmem [shape: bf16[1,128], index: 13, kind: input, shape index: {}]   ;;  %s13460_s14 = inlined_call_operand.<no memory space> [shape: f32[1,1], index: 14, kind: input, shape index: {}]   ;;  %s13461_s15 = inlined_call_operand.hbm [shape: f32[1,512], index: 15, kind: output, shape index: {}]  }
   0x1   :  { %13697 = sst [smem:[#allocation59_spill]] %s13447_s1  ;;  %v20_v0 = vstv %s13460_s14 }
   0x2   :  { %13698 = sst [smem:[#allocation60_spill]] %s13455_s9  ;;  %21 = vst [vmem:[#allocation2] sm:$0x1] %v20_v0 }
   0x3   :  { %13699 = sst [smem:[#allocation61_spill]] %s13456_s10 }
   0x4   :  { %13700 = sst [smem:[#allocation62_spill]] %s13457_s11 }
   0x5   :  { %13701 = sst [smem:[#allocation63_spill]] %s13458_s12 }
   0x6   :  { %13702 = sst [smem:[#allocation64_spill]] %s13459_s13 }
   0x7   :  { %13703 = sst [smem:[#allocation65_spill]] %s13461_s15 }
   0x8   :  { %22 = vsyncpa [#allocation4], 0 }
   0x9   :  { %24 = vsyncpa [#allocation4 + $0x1], 0 }
   0xa   :  { %25 = vsyncpa [#allocation7], 0 }
   0xb   :  { %26 = vsyncpa [#allocation10], 0 }
   0xc   :  { %27 = vsyncpa [#allocation5], 0 }
   0xd   :  { %29 = vsyncpa [#allocation5 + $0x1], 0  ;;  %s8544_s20 = smov 0   ;;  %s8546_s21 = smov 0  }
   0xe   :  { %s8548_s22 = smov 0   ;;  %s8550_s23 = smov 0  }
   0xf LB: > { %13704 = sst [smem:[#allocation16_spill]] %s8436_s20  ;;  %s8565_s14 = sadd.s32 4294967295, %s8448_s23   ;;  %s8448_s23 = sphi %s8550_s23, %s14168_s23   ;;  %s8444_s22 = sphi %s8548_s22, %s14167_s22   ;;  %s8440_s21 = sphi %s8546_s21, %s14166_s21   ;;  %s8436_s20 = sphi %s8544_s20, %s14165_s20  }
  0x10   : > { %s7020_s24 = sadd.s32 4294967294, %s8448_s23   ;;  %p55_p0 = scmp.ne.s32.totalorder %s8440_s21, %s8436_s20 }
  0x11   : > { %p13465_p1 = scmp.eq.s32.totalorder %s8565_s14, 0  ;;  %p379_p3 = scmp.eq.s32.totalorder %s7020_s24, 1 }
  0x12   : > { %p7021_p5 = scmp.ge.s32.totalorder %s8448_s23, 1  ;;  %p386_p7 = scmp.lt.s32.totalorder %s8448_s23, 3 }
  0x13   : > { %p8574_p4 = por %p13465_p1, %p55_p0  ;;  %p8579_p6 = por %p379_p3, %p55_p0 }
  0x14   : > { %p8584_p8 = pnand %p7021_p5, %p386_p7  ;;  %s8450_s28 = smov [#allocation6]  }
  0x15   : > { %s13705_s25 = scalar_select %p8574_p4, 1, 0 }
  0x16   : > { %s13706_s26 = scalar_select %p8579_p6, 1, 0 }
  0x17   : > { %s13708_s27 = scalar_select %p8584_p8, 1, 0 }
  0x18   : > { %13707 = sst [smem:[#allocation17_spill]] %s13706_s26  ;;  %s398_s29 = sshll.u32 %s8450_s28, 4  ;;  %s8588_s29 = int_to_ptr.vmem [resolvable:$true] %s398_s29 }
  0x19   : > { %p7471_p9 = pneg %p8584_p8  ;;  %s8451_s16 = smov [#allocation8]  }
  0x1a   : > { %s420_s17 = sshll.u32 %s8451_s16, 4  ;;  %s13710_s1 = sld [smem:[#allocation59_spill]]  ;;  %s8599_s17 = int_to_ptr.vmem [resolvable:$true] %s420_s17 }
  0x1b   : > { %p8595_p11 = pnand %p7471_p9, %p13465_p1 }
  0x1d   : > { %p8609_p13 = pneg %p8595_p11 }
  0x20   : > { %s8260_s24 = scalar_lea.hbm %s13710_s1, 8192 }
  0x21   : > { %p8261_p12 = scmp.ne.s32.totalorder %s13710_s1, %s8260_s24  ;;  %p8267_p5 = scmp.lt.u32.totalorder %s8260_s24, %s13710_s1 }
  0x23   : > { %p8263_p0 = pnand %p8609_p13, %p8261_p12 }
  0x25   : > { %p8264_p3 = pneg %p8263_p0 }
  0x27   : > { %p8269_p7 = pnand %p8267_p5, %p8264_p3 }
  0x29   : > { %8272 = shalt.err (!%p8269_p7)
}
  0x2a   : > { %s8273_s26 = scalar_lea.vmem %s8588_s29, 8192  ;;  %p8281_p2 = scmp.lt.s32.totalorder %s8588_s29, %s8588_s29 }
  0x2b   : > { %p8274_p9 = scmp.ne.s32.totalorder %s8588_s29, %s8273_s26  ;;  %p8282_p6 = scmp.lt.s32.totalorder %s8273_s26, %s8273_s26 }
  0x2d   : > { %p8276_p10 = pnand %p8274_p9, %p8609_p13  ;;  %p8283_p12 = por %p8282_p6, %p8281_p2 }
  0x2f   : > { %p8277_p1 = pneg %p8276_p10 }
  0x31   : > { %p8284_p0 = pnand %p8283_p12, %p8277_p1 }
  0x33   : > { %8287 = shalt.err (!%p8284_p0)
}
  0x34   : > { %s13469_s18 = smov 128   ;;  %s13471_s15 = smov 8  }
  0x35   : > { %7474 = dma.hbm_to_vmem [thread:$0]  (!%p8595_p11), %s13710_s1, 8192, %s8588_s29, [#allocation7], %s13469_s18, %s13469_s18, %s13471_s15  }
  0x36   : > { %s8288_s26 = scalar_lea.hbm %s13451_s5, 4096 }
  0x37   : > { %p8289_p1 = scmp.ne.s32.totalorder %s13451_s5, %s8288_s26  ;;  %p8295_p10 = scmp.lt.u32.totalorder %s8288_s26, %s13451_s5 }
  0x39   : > { %p8291_p2 = pnand %p8289_p1, %p8609_p13 }
  0x3b   : > { %p8292_p6 = pneg %p8291_p2 }
  0x3d   : > { %p8297_p3 = pnand %p8295_p10, %p8292_p6 }
  0x3f   : > { %8300 = shalt.err (!%p8297_p3)
}
  0x40   : > { %s8301_s29 = scalar_lea.vmem %s8599_s17, 4096  ;;  %p8309_p12 = scmp.lt.s32.totalorder %s8599_s17, %s8599_s17 }
  0x41   : > { %p8302_p5 = scmp.ne.s32.totalorder %s8599_s17, %s8301_s29  ;;  %p8310_p0 = scmp.lt.s32.totalorder %s8301_s29, %s8301_s29 }
  0x43   : > { %p8304_p7 = pnand %p8302_p5, %p8609_p13  ;;  %p8311_p1 = por %p8310_p0, %p8309_p12 }
  0x45   : > { %p8305_p9 = pneg %p8304_p7 }
  0x47   : > { %p8312_p2 = pnand %p8311_p1, %p8305_p9 }
  0x49   : > { %8315 = shalt.err (!%p8312_p2)
}
  0x4a   : > { %s8454_s12 = smov 64   ;;  %s8455_s10 = smov 4  }
  0x4b   : > { %7477 = dma.hbm_to_vmem [thread:$0]  (!%p8595_p11), %s13451_s5, 4096, %s8599_s17, [#allocation7], %s8454_s12, %s8454_s12, %s8455_s10  }
  0x4c   : > { %s8456_s19 = smov [#allocation9]   ;;  %s8657_s28 = sadd.s32 1, %s8448_s23  }
  0x4d   : > { %s436_s24 = sshll.u32 %s8456_s19, 4  ;;  %s8316_s29 = scalar_lea.hbm %s13453_s7, 4096  ;;  %s437_s24 = int_to_ptr.vmem [resolvable:$true] %s436_s24 }
  0x4e   : > { %p8317_p6 = scmp.ne.s32.totalorder %s13453_s7, %s8316_s29  ;;  %p8323_p5 = scmp.lt.u32.totalorder %s8316_s29, %s13453_s7 }
  0x50   : > { %p8319_p10 = pnand %p8317_p6, %p8609_p13 }
  0x52   : > { %p8320_p3 = pneg %p8319_p10 }
  0x54   : > { %p8325_p7 = pnand %p8323_p5, %p8320_p3 }
  0x56   : > { %8328 = shalt.err (!%p8325_p7)
}
  0x57   : > { %s8329_s17 = scalar_lea.vmem %s437_s24, 4096  ;;  %p8337_p1 = scmp.lt.s32.totalorder %s437_s24, %s437_s24 }
  0x58   : > { %p8330_p9 = scmp.ne.s32.totalorder %s437_s24, %s8329_s17  ;;  %p8338_p2 = scmp.lt.s32.totalorder %s8329_s17, %s8329_s17 }
  0x5a   : > { %p8332_p12 = pnand %p8330_p9, %p8609_p13  ;;  %p8339_p4 = por %p8338_p2, %p8337_p1 }
  0x5c   : > { %p8333_p0 = pneg %p8332_p12 }
  0x5e   : > { %p8340_p8 = pnand %p8339_p4, %p8333_p0 }
  0x60   : > { %8343 = shalt.err (!%p8340_p8)
}
  0x61   : > { %s13712_s18 = smov 8   ;;  %s13713_s15 = smov 128  }
  0x62   : > { %7480 = dma.hbm_to_vmem [thread:$0]  (!%p8595_p11), %s13453_s7, 4096, %s437_s24, [#allocation10], %s13713_s15, %s13713_s15, %s13712_s18  }
  0x63   : > { %s39_s20 = ssub.s32 %s8448_s23, %s8657_s28  ;;  %s42_s30 = sadd.s32 1, %s8444_s22 }
  0x64   : > { %p40_p4 = scmp.eq.s32.totalorder %s39_s20, 0  ;;  %p49_p8 = scmp.ne.s32.totalorder %s8444_s22, %s8440_s21 }
  0x65   : > { %p50_p13 = scmp.eq.s32.totalorder %s8448_s23, 0  ;;  %p7492_p6 = scmp.lt.s32.totalorder %s8448_s23, 2 }
  0x66   : > { %s8688_s12 = scalar_select %p40_p4, %s8444_s22, %s42_s30  }
  0x67   : > { %p51_p10 = por %p50_p13, %p49_p8  ;;  %p13714_p3 = scmp.eq.s32.totalorder %s8565_s14, 1 }
  0x68   : > { %s471_s11 = sand.u32 1, %s8444_s22   ;;  %s7229_s13 = sshll.u32 %s8448_s23, 12 }
  0x69   : > { %p8692_p5 = por %p13714_p3, %p49_p8  ;;  %s7026_s19 = sshll.u32 %s471_s11, 8 }
  0x6a   : > { %s8701_s24 = scalar_lea.hbm %s13446_s0, %s7229_s13  ;;  %s475_s29 = scalar_lea.vmem [#allocation3], %s7026_s19 }
  0x6b   : > { %s483_s17 = sshll.u32 %s475_s29, 4  ;;  %p8703_p11 = pnand %p7492_p6, %p51_p10  ;;  %s8707_s17 = int_to_ptr.vmem [resolvable:$true] %s483_s17 }
  0x6c   : > { %s8709_s9 = scalar_lea.sflag [#allocation4], %s471_s11  ;;  %s8344_s20 = scalar_lea.hbm %s8701_s24, 4096 }
  0x6d   : > { %p8345_p7 = scmp.ne.s32.totalorder %s8701_s24, %s8344_s20  ;;  %p8346_p9 = pneg %p8703_p11 }
  0x6e   : > { %s8349_s19 = scalar_lea.hbm %s13446_s0, 8192  ;;  %p8350_p1 = scmp.lt.u32.totalorder %s8701_s24, %s13446_s0 }
  0x6f   : > { %p8347_p12 = pnand %p8346_p9, %p8345_p7  ;;  %p8351_p2 = scmp.lt.u32.totalorder %s8349_s19, %s8344_s20 }
  0x70   : > { %p8353_p8 = scmp.lt.u32.totalorder %s8344_s20, %s8701_s24 }
  0x71   : > { %p8348_p0 = pneg %p8347_p12  ;;  %p8352_p4 = por %p8351_p2, %p8350_p1 }
  0x73   : > { %p8354_p13 = por %p8353_p8, %p8352_p4 }
  0x75   : > { %p8355_p6 = pnand %p8354_p13, %p8348_p0 }
  0x77   : > { %8358 = shalt.err (!%p8355_p6)
}
  0x78   : > { %s8359_s11 = scalar_lea.vmem %s8707_s17, 4096  ;;  %s8457_s29 = smov [#allocation3]  }
  0x79   : > { %p8360_p10 = scmp.ne.s32.totalorder %s8707_s17, %s8359_s11  ;;  %s8364_s30 = sshll.u32 %s8457_s29, 4  ;;  %s8365_s30 = int_to_ptr.vmem [resolvable:$false] %s8364_s30 }
  0x7a   : > { %s8366_s13 = scalar_lea.vmem %s8365_s30, 8192  ;;  %p8367_p12 = scmp.lt.s32.totalorder %s8707_s17, %s8365_s30 }
  0x7b   : > { %p8362_p3 = pnand %p8360_p10, %p8346_p9  ;;  %p8368_p1 = scmp.lt.s32.totalorder %s8366_s13, %s8359_s11 }
  0x7d   : > { %p8363_p7 = pneg %p8362_p3  ;;  %p8369_p2 = por %p8368_p1, %p8367_p12 }
  0x7f   : > { %p8370_p4 = pnand %p8369_p2, %p8363_p7 }
  0x81   : > { %8373 = shalt.err (!%p8370_p4)
}
  0x82   : > { %7484 = dma.hbm_to_vmem [thread:$0]  (!%p8703_p11), %s8701_s24, 4096, %s8707_s17, %s8709_s9, %s13713_s15, %s13713_s15, %s13712_s18  }
  0x83   : > { %p13717_p9 = scmp.ne.s32.totalorder %s13708_s27, 0 }
  0x85   : > { %495 = sbr.rel (%p13717_p9) target bundleno = 3090 (0xc12), region = 80 }
  0x8c   : > { %s8743_s20 = sand.u32 1, %s8440_s21   ;;  %p13718_p0 = scmp.ne.s32.totalorder %s13705_s25, 0 }
  0x8d   : > { %s7031_s19 = sshll.u32 %s8743_s20, 8  ;;  %s498_s16 = scalar_lea.sflag [#allocation4], %s8743_s20 }
  0x8e   : > { %s8747_s26 = scalar_lea.vmem [#allocation3], %s7031_s19 }
  0x8f   : > { %8419 = dma.done.wait (%p13718_p0), %s498_s16, 4096  }
  0x90   : > { %8421 = vsyncadd (%p13718_p0), %s498_s16, 4294963200  ;;  %p13719_p11 = scmp.eq.s32.totalorder %s8565_s14, 0 }
  0x92   : > { %8423 = dma.done.wait (%p13719_p11), [#allocation7], 12288   ;;  %p13720_p8 = pmov %p13719_p11 }
  0x94   : > { %8425 = vsyncadd (%p13720_p8), [#allocation7], 4294955008  ;;  %p13721_p13 = pmov %p13720_p8 }
  0x95   : > { %p13722_p6 = pmov %p13720_p8 }
  0x96   : > { %8427 = dma.done.wait (%p13721_p13), [#allocation10], 4096  }
  0x97   : > { %8429 = vsyncadd (%p13722_p6), [#allocation10], 4294963200  ;;  %v7764_v1 = vld [vmem:[#allocation6 + $0x4] ss:$8 sps:$4 sm:$0xff]   ;;  %v7766_v2 = vld [vmem:[#allocation6] ss:$8 sps:$4 sm:$0xff]  }
  0x98   : > { %1023 = vmatprep.subr.bf16.mxu0 %v7764_v1  ;;  %v7767_v3 = vld [vmem:[#allocation6 + $0x14] ss:$8 sps:$4 sm:$0xff]   ;;  %v7769_v4 = vld [vmem:[#allocation6 + $0x10] ss:$8 sps:$4 sm:$0xff]   ;;  %v7770_v5 = vld [vmem:[#allocation6 + $0x24] ss:$8 sps:$4 sm:$0xff]  }
  0x99   : > { %1024 = vmatpush1.bf16.msra.mxu0 %v7766_v2  ;;  %v7772_v6 = vld [vmem:[#allocation6 + $0x20] ss:$8 sps:$4 sm:$0xff]   ;;  %v7773_v7 = vld [vmem:[#allocation6 + $0x34] ss:$8 sps:$4 sm:$0xff]   ;;  %v7775_v8 = vld [vmem:[#allocation6 + $0x30] ss:$8 sps:$4 sm:$0xff]  }
  0x9a   : > { %1025 = vmatprep.subr.bf16.mxu0 %v7767_v3  ;;  %v7776_v9 = vld [vmem:[#allocation6 + $0x44] ss:$8 sps:$4 sm:$0xff]   ;;  %v7778_v10 = vld [vmem:[#allocation6 + $0x40] ss:$8 sps:$4 sm:$0xff]   ;;  %v7779_v11 = vld [vmem:[#allocation6 + $0x54] ss:$8 sps:$4 sm:$0xff]  }
  0x9b   : > { %v7781_v12 = vld [vmem:[#allocation6 + $0x50] ss:$8 sps:$4 sm:$0xff]   ;;  %v7782_v13 = vld [vmem:[#allocation6 + $0x64] ss:$8 sps:$4 sm:$0xff]   ;;  %v7784_v17 = vld [vmem:[#allocation6 + $0x60] ss:$8 sps:$4 sm:$0xff]  }
  0x9c   : > { %v8762_v14 = vld [vmem:[%s8747_s26] sm:$0xff]  ;;  %v8765_v15 = vld [vmem:[%s8747_s26 + $0x8] sm:$0xff]  ;;  %v7785_v18 = vld [vmem:[#allocation6 + $0x74] ss:$8 sps:$4 sm:$0xff]   ;;  %s13858_s19 = sld [smem:[#allocation60_spill]]  ;;  %s13861_s25 = sld [smem:[#allocation61_spill]] }
  0x9d   : > { %1026 = vmatpush1.bf16.msra.mxu0 %v7769_v4  ;;  %v7037_v16 = vcombine.high %v8762_v14, %v8765_v15  ;;  %v7787_v19 = vld [vmem:[#allocation6 + $0x70] ss:$8 sps:$4 sm:$0xff]   ;;  %v7788_v20 = vld [vmem:[#allocation6 + $0x84] ss:$8 sps:$4 sm:$0xff]   ;;  %v7790_v21 = vld [vmem:[#allocation6 + $0x80] ss:$8 sps:$4 sm:$0xff]   ;;  %v7036_v38 = vcombine.low %v8762_v14, %v8765_v15 }
  0x9e   : > { %1027 = vmatprep.subr.bf16.mxu0 %v7770_v5  ;;  %v7791_v22 = vld [vmem:[#allocation6 + $0x94] ss:$8 sps:$4 sm:$0xff]   ;;  %v7793_v23 = vld [vmem:[#allocation6 + $0x90] ss:$8 sps:$4 sm:$0xff]   ;;  %v7794_v24 = vld [vmem:[#allocation6 + $0xa4] ss:$8 sps:$4 sm:$0xff]  }
  0x9f   : > { %1055 = vmatprep.mubr.bf16.mxu0 %v7037_v16  ;;  %v7796_v25 = vld [vmem:[#allocation6 + $0xa0] ss:$8 sps:$4 sm:$0xff]   ;;  %v7797_v26 = vld [vmem:[#allocation6 + $0xb4] ss:$8 sps:$4 sm:$0xff]   ;;  %v7799_v27 = vld [vmem:[#allocation6 + $0xb0] ss:$8 sps:$4 sm:$0xff]  }
  0xa0   : > { %v7800_v28 = vld [vmem:[#allocation6 + $0xc4] ss:$8 sps:$4 sm:$0xff]   ;;  %v7802_v29 = vld [vmem:[#allocation6 + $0xc0] ss:$8 sps:$4 sm:$0xff]   ;;  %v7803_v30 = vld [vmem:[#allocation6 + $0xd4] ss:$8 sps:$4 sm:$0xff]  }
  0xa1   : > { %1028 = vmatpush1.bf16.msra.mxu0 %v7772_v6  ;;  %v7805_v31 = vld [vmem:[#allocation6 + $0xd0] ss:$8 sps:$4 sm:$0xff]   ;;  %v7806_v32 = vld [vmem:[#allocation6 + $0xe4] ss:$8 sps:$4 sm:$0xff]   ;;  %v7808_v33 = vld [vmem:[#allocation6 + $0xe0] ss:$8 sps:$4 sm:$0xff]  }
  0xa2   : > { %1029 = vmatprep.subr.bf16.mxu0 %v7773_v7  ;;  %v7809_v34 = vld [vmem:[#allocation6 + $0xf4] ss:$8 sps:$4 sm:$0xff]   ;;  %v7811_v35 = vld [vmem:[#allocation6 + $0xf0] ss:$8 sps:$4 sm:$0xff]   ;;  %v8780_v40 = vld [vmem:[%s8747_s26 + $0x20] sm:$0xff]  ;;  %s14154_s24 = sld [smem:[#allocation62_spill]] }
  0xa3   : > { %v8770_v36 = vld [vmem:[%s8747_s26 + $0x10] sm:$0xff]  ;;  %v8773_v37 = vld [vmem:[%s8747_s26 + $0x18] sm:$0xff]  ;;  %v8783_v41 = vld [vmem:[%s8747_s26 + $0x28] sm:$0xff]  ;;  %s14155_s9 = sld [smem:[#allocation63_spill]]  ;;  %s14156_s18 = sld [smem:[#allocation64_spill]] }
  0xa4   : > { %v7039_v39 = vcombine.high %v8770_v36, %v8773_v37  ;;  %v7038_v42 = vcombine.low %v8770_v36, %v8773_v37  ;;  %v7041_v43 = vcombine.high %v8780_v40, %v8783_v41  ;;  %v8790_v44 = vld [vmem:[%s8747_s26 + $0x30] sm:$0xff]  ;;  %v8793_v45 = vld [vmem:[%s8747_s26 + $0x38] sm:$0xff]  ;;  %v7040_v46 = vcombine.low %v8780_v40, %v8783_v41  ;;  %v8800_v48 = vld [vmem:[%s8747_s26 + $0x40] sm:$0xff]  ;;  %s7035_s15 = sshll.u32 %s8743_s20, 1  ;;  %s7230_s17 = sshll.u32 %s8565_s14, 5 }
  0xa5   : > { %1030 = vmatpush1.bf16.msra.mxu0 %v7775_v8  ;;  %v7043_v47 = vcombine.high %v8790_v44, %v8793_v45  ;;  %v8803_v49 = vld [vmem:[%s8747_s26 + $0x48] sm:$0xff]  ;;  %v7042_v50 = vcombine.low %v8790_v44, %v8793_v45  ;;  %v8810_v52 = vld [vmem:[%s8747_s26 + $0x50] sm:$0xff]  ;;  %v8813_v53 = vld [vmem:[%s8747_s26 + $0x58] sm:$0xff]  ;;  %s559_s1 = scalar_lea.vmem [#allocation11], %s7035_s15  ;;  %s14160_s13 = sld [smem:[#allocation65_spill]] }
  0xa6   : > { %1031 = vmatprep.subr.bf16.mxu0 %v7776_v9  ;;  %v7045_v51 = vcombine.high %v8800_v48, %v8803_v49  ;;  %v7044_v54 = vcombine.low %v8800_v48, %v8803_v49  ;;  %v7047_v55 = vcombine.high %v8810_v52, %v8813_v53  ;;  %v8820_v56 = vld [vmem:[%s8747_s26 + $0x60] sm:$0xff]  ;;  %v8823_v57 = vld [vmem:[%s8747_s26 + $0x68] sm:$0xff]  ;;  %v7046_v58 = vcombine.low %v8810_v52, %v8813_v53  ;;  %v8830_v60 = vld [vmem:[%s8747_s26 + $0x70] sm:$0xff]  ;;  %s6921_s11 = sshll.u32 %s559_s1, 4  ;;  %s8460_s14 = smov [#allocation11]   ;;  %s13404_s11 = int_to_ptr.vmem [resolvable:$true] %s6921_s11 }
  0xa7   : > { %v7049_v59 = vcombine.high %v8820_v56, %v8823_v57  ;;  %v8833_v61 = vld [vmem:[%s8747_s26 + $0x78] sm:$0xff]  ;;  %v7048_v62 = vcombine.low %v8820_v56, %v8823_v57  ;;  %v8840_v0 = vld [vmem:[%s8747_s26 + $0x80] sm:$0xff]  ;;  %v8843_v1 = vld [vmem:[%s8747_s26 + $0x88] sm:$0xff]  ;;  %s8374_s27 = scalar_lea.vmem %s13404_s11, 32 }
  0xa8   : > { %v7051_v63 = vcombine.high %v8830_v60, %v8833_v61  ;;  %v7050_v2 = vcombine.low %v8830_v60, %v8833_v61  ;;  %v7053_v3 = vcombine.high %v8840_v0, %v8843_v1  ;;  %v8850_v4 = vld [vmem:[%s8747_s26 + $0x90] sm:$0xff]  ;;  %v8853_v5 = vld [vmem:[%s8747_s26 + $0x98] sm:$0xff]  ;;  %v7052_v6 = vcombine.low %v8840_v0, %v8843_v1  ;;  %v8860_v8 = vld [vmem:[%s8747_s26 + $0xa0] sm:$0xff]  ;;  %p8375_p10 = scmp.ne.s32.totalorder %s13404_s11, %s8374_s27 }
  0xa9   : > { %1032 = vmatpush1.bf16.msra.mxu0 %v7778_v10  ;;  %v7055_v7 = vcombine.high %v8850_v4, %v8853_v5  ;;  %v8863_v9 = vld [vmem:[%s8747_s26 + $0xa8] sm:$0xff]  ;;  %v7054_v10 = vcombine.low %v8850_v4, %v8853_v5 }
  0xaa   : > { %1033 = vmatprep.subr.bf16.mxu0 %v7779_v11  ;;  %v7057_v11 = vcombine.high %v8860_v8, %v8863_v9  ;;  %v7056_v16 = vcombine.low %v8860_v8, %v8863_v9  ;;  %p8376_p3 = pnand %p8375_p10, %p8692_p5 }
  0xab   : > { %s13402_s16 = scalar_lea.hbm %s14160_s13, %s7230_s17 }
  0xac   : > { %p8377_p7 = pneg %p8376_p3 }
  0xad   : > { %1034 = vmatpush1.bf16.msra.mxu0 %v7781_v12  ;;  %v8870_v12 = vld [vmem:[%s8747_s26 + $0xb0] sm:$0xff] }
  0xae   : > { %1035 = vmatprep.subr.bf16.mxu0 %v7782_v13  ;;  %v8873_v13 = vld [vmem:[%s8747_s26 + $0xb8] sm:$0xff] }
  0xb1   : > { %1036 = vmatpush1.bf16.msra.mxu0 %v7784_v17  ;;  %v7059_v17 = vcombine.high %v8870_v12, %v8873_v13 }
  0xb2   : > { %1037 = vmatprep.subr.bf16.mxu0 %v7785_v18  ;;  %v8880_v18 = vld [vmem:[%s8747_s26 + $0xc0] sm:$0xff] }
  0xb5   : > { %1038 = vmatpush1.bf16.msra.mxu0 %v7787_v19  ;;  %v8883_v19 = vld [vmem:[%s8747_s26 + $0xc8] sm:$0xff] }
  0xb6   : > { %1039 = vmatprep.subr.bf16.mxu0 %v7788_v20  ;;  %v7058_v20 = vcombine.low %v8870_v12, %v8873_v13 }
  0xb9   : > { %1040 = vmatpush1.bf16.msra.mxu0 %v7790_v21  ;;  %v7061_v21 = vcombine.high %v8880_v18, %v8883_v19 }
  0xba   : > { %1041 = vmatprep.subr.bf16.mxu0 %v7791_v22  ;;  %v8890_v22 = vld [vmem:[%s8747_s26 + $0xd0] sm:$0xff] }
  0xbd   : > { %1042 = vmatpush1.bf16.msra.mxu0 %v7793_v23  ;;  %v8893_v23 = vld [vmem:[%s8747_s26 + $0xd8] sm:$0xff] }
  0xbe   : > { %1043 = vmatprep.subr.bf16.mxu0 %v7794_v24  ;;  %v7060_v24 = vcombine.low %v8880_v18, %v8883_v19 }
  0xc1   : > { %1044 = vmatpush1.bf16.msra.mxu0 %v7796_v25  ;;  %v7063_v25 = vcombine.high %v8890_v22, %v8893_v23 }
  0xc2   : > { %1045 = vmatprep.subr.bf16.mxu0 %v7797_v26  ;;  %v8900_v26 = vld [vmem:[%s8747_s26 + $0xe0] sm:$0xff] }
  0xc5   : > { %1046 = vmatpush1.bf16.msra.mxu0 %v7799_v27  ;;  %v8903_v27 = vld [vmem:[%s8747_s26 + $0xe8] sm:$0xff] }
  0xc6   : > { %1047 = vmatprep.subr.bf16.mxu0 %v7800_v28  ;;  %v7062_v28 = vcombine.low %v8890_v22, %v8893_v23 }
  0xc9   : > { %1048 = vmatpush1.bf16.msra.mxu0 %v7802_v29  ;;  %v7065_v29 = vcombine.high %v8900_v26, %v8903_v27 }
  0xca   : > { %1049 = vmatprep.subr.bf16.mxu0 %v7803_v30  ;;  %v8910_v30 = vld [vmem:[%s8747_s26 + $0xf0] sm:$0xff] }
  0xcd   : > { %1050 = vmatpush1.bf16.msra.mxu0 %v7805_v31  ;;  %v8913_v31 = vld [vmem:[%s8747_s26 + $0xf8] sm:$0xff]  ;;  %s6907_s26 = scalar_lea.sflag [#allocation5], %s8743_s20 }
  0xce   : > { %1051 = vmatprep.subr.bf16.mxu0 %v7806_v32  ;;  %v7064_v32 = vcombine.low %v8900_v26, %v8903_v27 }
  0xd1   : > { %1052 = vmatpush1.bf16.msra.mxu0 %v7808_v33  ;;  %v7067_v33 = vcombine.high %v8910_v30, %v8913_v31 }
  0xd2   : > { %1053 = vmatprep.subr.bf16.mxu0 %v7809_v34  ;;  %v7066_v34 = vcombine.low %v8910_v30, %v8913_v31 }
  0xd5   : > { %1054 = vmatpush1.bf16.msra.mxu0 %v7811_v35  ;;  %v13476_v35 = vlaneseq }
  0xd8   : > { %1056 = vmatmul.mubr.bf16.vlgmr.msra.gmra.mrb[0].mxu0 %v7036_v38  ;;  %v8922_v38 = vshrl.u32 %v13476_v35, 7 }
  0xd9   : > { %1065 = vmatprep.mubr.bf16.mxu0 %v7039_v39 }
  0xda   : > { %13723 = vst [vmem:[#allocation18_spill] sm:$0xff] %v8922_v38  ;;  %v8925_v39 = vsub.s32 0, %v8922_v38 }
  0xdc   : > { %13724 = vst [vmem:[#allocation19_spill] sm:$0xff] %v8925_v39 }
  0xe0   : > { %1066 = vmatmul.mubr.bf16.gmra.mrb[4].mxu0 %v7038_v42  ;;  %v691_v42 = vld [vmem:[%s13448_s2] sm:$0x3] }
  0xe1   : > { %1075 = vmatprep.mubr.bf16.mxu0 %v7041_v43  ;;  %v8931_v43 = vsub.s32 1, %v8922_v38 }
  0xe3   : > { %13725 = vst [vmem:[#allocation20_spill] sm:$0xff] %v8931_v43 }
  0xe8   : > { %1076 = vmatmul.mubr.bf16.gmra.mrb[8].mxu0 %v7040_v46  ;;  %v8934_v46 = vrot.slane %v691_v42, %v8925_v39 }
  0xe9   : > { %1085 = vmatprep.mubr.bf16.mxu0 %v7043_v47  ;;  %v8937_v47 = vrot.slane %v691_v42, %v8931_v43  ;;  %v601_v42 = vunpack.c.l.bf16 %v8773_v37 }
  0xf0   : > { %1086 = vmatmul.mubr.bf16.gmra.mrb[12].mxu0 %v7042_v50  ;;  %v595_v50 = vunpack.c.l.bf16 %v8762_v14 }
  0xf1   : > { %1095 = vmatprep.mubr.bf16.mxu0 %v7045_v51 }
  0xf8   : > { %1096 = vmatmul.mubr.bf16.gmra.mrb[16].mxu0 %v7044_v54  ;;  %v596_v54 = vunpack.c.h.bf16 %v8762_v14 }
  0xf9   : > { %1105 = vmatprep.mubr.bf16.mxu0 %v7047_v55 }
 0x100   : > { %1106 = vmatmul.mubr.bf16.gmra.mrb[20].mxu0 %v7046_v58 }
 0x101   : > { %1115 = vmatprep.mubr.bf16.mxu0 %v7049_v59  ;;  %v597_v59 = vunpack.c.l.bf16 %v8765_v15 }
 0x108   : > { %1116 = vmatmul.mubr.bf16.gmra.mrb[24].mxu0 %v7048_v62 }
 0x109   : > { %1125 = vmatprep.mubr.bf16.mxu0 %v7051_v63 }
 0x110   : > { %1126 = vmatmul.mubr.bf16.gmra.mrb[28].mxu0 %v7050_v2  ;;  %v598_v2 = vunpack.c.h.bf16 %v8765_v15 }
 0x111   : > { %1135 = vmatprep.mubr.bf16.mxu0 %v7053_v3 }
 0x118   : > { %1136 = vmatmul.mubr.bf16.gmra.mrb[32].mxu0 %v7052_v6 }
 0x119   : > { %1145 = vmatprep.mubr.bf16.mxu0 %v7055_v7 }
 0x120   : > { %1146 = vmatmul.mubr.bf16.gmra.mrb[36].mxu0 %v7054_v10 }
 0x121   : > { %1155 = vmatprep.mubr.bf16.mxu0 %v7057_v11 }
 0x128   : > { %1156 = vmatmul.mubr.bf16.gmra.mrb[40].mxu0 %v7056_v16 }
 0x129   : > { %1165 = vmatprep.mubr.bf16.mxu0 %v7059_v17 }
 0x130   : > { %1166 = vmatmul.mubr.bf16.gmra.mrb[44].mxu0 %v7058_v20 }
 0x131   : > { %1175 = vmatprep.mubr.bf16.mxu0 %v7061_v21  ;;  %v599_v21 = vunpack.c.l.bf16 %v8770_v36 }
 0x138   : > { %1176 = vmatmul.mubr.bf16.gmra.mrb[48].mxu0 %v7060_v24 }
 0x139   : > { %1185 = vmatprep.mubr.bf16.mxu0 %v7063_v25  ;;  %v600_v25 = vunpack.c.h.bf16 %v8770_v36 }
 0x140   : > { %1186 = vmatmul.mubr.bf16.gmra.mrb[52].mxu0 %v7062_v28 }
 0x141   : > { %1195 = vmatprep.mubr.bf16.mxu0 %v7065_v29 }
 0x148   : > { %1196 = vmatmul.mubr.bf16.gmra.mrb[56].mxu0 %v7064_v32 }
 0x149   : > { %1205 = vmatprep.mubr.bf16.mxu0 %v7067_v33 }
 0x150   : > { %1206 = vmatmul.mubr.bf16.gmra.mrb[60].mxu0 %v7066_v34 }
 0x1ab   : > { %v1057_v51 = vpop.f32.mrb[0].mxu0 }
 0x1ac   : > { %v1058_v55 = vadd.f32 %v1057_v51, %v8934_v46  ;;  %v1059_v58 = vpop.f32.mrb[1].mxu0 }
 0x1ad   : > { %v1060_v62 = vadd.f32 %v1059_v58, %v8937_v47  ;;  %v1061_v63 = vpop.f32.mrb[2].mxu0 }
 0x1ae   : > { %v8945_v3 = vadd.f32 %v1058_v55, %v595_v50  ;;  %v1062_v6 = vadd.f32 %v1061_v63, %v8934_v46  ;;  %v1063_v7 = vpop.f32.mrb[3].mxu0 }
 0x1af   : > { %v8948_v10 = vadd.f32 %v1060_v62, %v596_v54  ;;  %v1064_v11 = vadd.f32 %v1063_v7, %v8937_v47  ;;  %v602_v54 = vunpack.c.h.bf16 %v8773_v37 }
 0x1b0   : > { %v8951_v14 = vadd.f32 %v1062_v6, %v597_v59  ;;  %v1411_v16 = vmul.f32 %v8945_v3, %v8945_v3 }
 0x1b1   : > { %v8955_v17 = vadd.f32 %v1064_v11, %v598_v2  ;;  %v1282_v20 = vadd.f32 %v8948_v10, %v8945_v3  ;;  %v1412_v15 = vmul.f32 %v8948_v10, %v8948_v10 }
 0x1b2   : > { %v1413_v29 = vmul.f32 %v8951_v14, %v8951_v14 }
 0x1b3   : > { %v1067_v24 = vpop.f32.mrb[4].mxu0  ;;  %1283 = vadd.xlane.f32.xlu0 %v1282_v20  ;;  %v1475_v28 = vadd.f32 %v1412_v15, %v1411_v16  ;;  %v1414_v32 = vmul.f32 %v8955_v17, %v8955_v17  ;;  %v1285_v36 = vadd.f32 %v8955_v17, %v8951_v14  ;;  %v603_v20 = vunpack.c.l.bf16 %v8780_v40 }
 0x1b4   : > { %v1068_v33 = vadd.f32 %v1067_v24, %v8934_v46  ;;  %v1069_v34 = vpop.f32.mrb[5].mxu0 }
 0x1b5   : > { %v1070_v50 = vadd.f32 %v1069_v34, %v8937_v47  ;;  %v1071_v51 = vpop.f32.mrb[6].mxu0  ;;  %1476 = vadd.xlane.f32.xlu1 %v1475_v28  ;;  %v1478_v2 = vadd.f32 %v1414_v32, %v1413_v29 }
 0x1b6   : > { %v8973_v55 = vadd.f32 %v1068_v33, %v599_v21  ;;  %v1072_v58 = vadd.f32 %v1071_v51, %v8934_v46  ;;  %v1073_v59 = vpop.f32.mrb[7].mxu0  ;;  %v604_v21 = vunpack.c.h.bf16 %v8780_v40  ;;  %v605_v33 = vunpack.c.l.bf16 %v8783_v41 }
 0x1b7   : > { %v8976_v62 = vadd.f32 %v1070_v50, %v600_v25  ;;  %v1074_v63 = vadd.f32 %v1073_v59, %v8937_v47  ;;  %1286 = vadd.xlane.f32.xlu0 %v1285_v36  ;;  %v606_v40 = vunpack.c.h.bf16 %v8783_v41 }
 0x1b8   : > { %v8979_v6 = vadd.f32 %v1072_v58, %v601_v42  ;;  %v1415_v11 = vmul.f32 %v8973_v55, %v8973_v55 }
 0x1b9   : > { %v8981_v7 = vadd.f32 %v1074_v63, %v602_v54  ;;  %1479 = vadd.xlane.f32.xlu1 %v1478_v2  ;;  %v1288_v37 = vadd.f32 %v8976_v62, %v8973_v55  ;;  %v1416_v16 = vmul.f32 %v8976_v62, %v8976_v62 }
 0x1ba   : > { %v1417_v25 = vmul.f32 %v8979_v6, %v8979_v6 }
 0x1bb   : > { %v1077_v15 = vpop.f32.mrb[8].mxu0  ;;  %1289 = vadd.xlane.f32.xlu0 %v1288_v37  ;;  %v1291_v24 = vadd.f32 %v8981_v7, %v8979_v6  ;;  %v1418_v28 = vmul.f32 %v8981_v7, %v8981_v7  ;;  %v1481_v50 = vadd.f32 %v1416_v16, %v1415_v11 }
 0x1bc   : > { %v1078_v29 = vadd.f32 %v1077_v15, %v8934_v46  ;;  %v1079_v32 = vpop.f32.mrb[9].mxu0  ;;  %v607_v15 = vunpack.c.l.bf16 %v8790_v44 }
 0x1bd   : > { %v1080_v34 = vadd.f32 %v1079_v32, %v8937_v47  ;;  %v1081_v42 = vpop.f32.mrb[10].mxu0  ;;  %1292 = vadd.xlane.f32.xlu1 %v1291_v24  ;;  %v1484_v63 = vadd.f32 %v1418_v28, %v1417_v25  ;;  %v608_v25 = vunpack.c.h.bf16 %v8790_v44  ;;  %v610_v44 = vunpack.c.h.bf16 %v8793_v45 }
 0x1be   : > { %v9001_v51 = vadd.f32 %v1078_v29, %v603_v20  ;;  %v1082_v54 = vadd.f32 %v1081_v42, %v8934_v46  ;;  %v1083_v36 = vpop.f32.mrb[11].mxu0  ;;  %v7844_v20 = vld [vmem:[#allocation8 + $0x40] sm:$0xff]   ;;  %v609_v42 = vunpack.c.l.bf16 %v8793_v45 }
 0x1bf   : > { %v9004_v58 = vadd.f32 %v1080_v34, %v604_v21  ;;  %v1084_v59 = vadd.f32 %v1083_v36, %v8937_v47  ;;  %1482 = vadd.xlane.f32.xlu0 %v1481_v50  ;;  %v7845_v21 = vld [vmem:[#allocation8] sm:$0xff]   ;;  %7231 = vmatprep.subr.bf16.mxu1 %v7844_v20 }
 0x1c0   : > { %v9007_v2 = vadd.f32 %v1082_v54, %v605_v33  ;;  %v1419_v11 = vmul.f32 %v9001_v51, %v9001_v51  ;;  %7232 = vmatpush3.bf16.msra.mxu1 %v7845_v21  ;;  %v7847_v21 = vld [vmem:[#allocation8 + $0x8] sm:$0xff]  }
 0x1c1   : > { %v9009_v37 = vadd.f32 %v1084_v59, %v606_v40  ;;  %1485 = vadd.xlane.f32.xlu1 %v1484_v63  ;;  %v1294_v41 = vadd.f32 %v9004_v58, %v9001_v51  ;;  %v1420_v16 = vmul.f32 %v9004_v58, %v9004_v58 }
 0x1c2   : > { %v1421_v29 = vmul.f32 %v9007_v2, %v9007_v2 }
 0x1c3   : > { %v1087_v24 = vpop.f32.mrb[12].mxu0  ;;  %1295 = vadd.xlane.f32.xlu0 %v1294_v41  ;;  %v1297_v28 = vadd.f32 %v9009_v37, %v9007_v2  ;;  %v1422_v32 = vmul.f32 %v9009_v37, %v9009_v37  ;;  %v1487_v54 = vadd.f32 %v1420_v16, %v1419_v11  ;;  %v7846_v41 = vld [vmem:[#allocation8 + $0x48] sm:$0xff]  }
 0x1c4   : > { %v1088_v33 = vadd.f32 %v1087_v24, %v8934_v46  ;;  %v1089_v34 = vpop.f32.mrb[13].mxu0  ;;  %7233 = vmatprep.subr.bf16.mxu1 %v7846_v41 }
 0x1c5   : > { %v1090_v40 = vadd.f32 %v1089_v34, %v8937_v47  ;;  %v1091_v50 = vpop.f32.mrb[14].mxu0  ;;  %1298 = vadd.xlane.f32.xlu1 %v1297_v28  ;;  %v1490_v35 = vadd.f32 %v1422_v32, %v1421_v29  ;;  %7234 = vmatpush3.bf16.msra.mxu1 %v7847_v21  ;;  %v612_v32 = vunpack.c.h.bf16 %v8800_v48 }
 0x1c6   : > { %v9029_v36 = vadd.f32 %v1088_v33, %v607_v15  ;;  %v1092_v59 = vadd.f32 %v1091_v50, %v8934_v46  ;;  %v1093_v63 = vpop.f32.mrb[15].mxu0  ;;  %v611_v15 = vunpack.c.l.bf16 %v8800_v48  ;;  %v614_v48 = vunpack.c.h.bf16 %v8803_v49 }
 0x1c7   : > { %v9032_v20 = vadd.f32 %v1090_v40, %v608_v25  ;;  %v1094_v24 = vadd.f32 %v1093_v63, %v8937_v47  ;;  %1488 = vadd.xlane.f32.xlu0 %v1487_v54  ;;  %v7848_v25 = vld [vmem:[#allocation8 + $0x50] sm:$0xff]  }
 0x1c8   : > { %v9035_v38 = vadd.f32 %v1092_v59, %v609_v42  ;;  %v1423_v28 = vmul.f32 %v9029_v36, %v9029_v36  ;;  %v7849_v42 = vld [vmem:[#allocation8 + $0x10] sm:$0xff]   ;;  %7235 = vmatprep.subr.bf16.mxu1 %v7848_v25 }
 0x1c9   : > { %v9039_v45 = vadd.f32 %v1094_v24, %v610_v44  ;;  %1491 = vadd.xlane.f32.xlu1 %v1490_v35  ;;  %v1300_v11 = vadd.f32 %v9032_v20, %v9029_v36  ;;  %v1424_v16 = vmul.f32 %v9032_v20, %v9032_v20  ;;  %v613_v44 = vunpack.c.l.bf16 %v8803_v49  ;;  %7236 = vmatpush3.bf16.msra.mxu1 %v7849_v42 }
 0x1ca   : > { %13726 = vst [vmem:[#allocation21_spill] sm:$0xff] %v9035_v38  ;;  %v1425_v35 = vmul.f32 %v9035_v38, %v9035_v38 }
 0x1cb   : > { %13727 = vst [vmem:[#allocation22_spill] sm:$0xff] %v9039_v45  ;;  %v1097_v29 = vpop.f32.mrb[16].mxu0  ;;  %1301 = vadd.xlane.f32.xlu0 %v1300_v11  ;;  %v1303_v33 = vadd.f32 %v9039_v45, %v9035_v38  ;;  %v1426_v34 = vmul.f32 %v9039_v45, %v9039_v45  ;;  %v1493_v63 = vadd.f32 %v1424_v16, %v1423_v28  ;;  %v7850_v11 = vld [vmem:[#allocation8 + $0x58] sm:$0xff]  }
 0x1cc   : > { %v1098_v40 = vadd.f32 %v1097_v29, %v8934_v46  ;;  %v1099_v50 = vpop.f32.mrb[17].mxu0  ;;  %v7851_v38 = vld [vmem:[#allocation8 + $0x18] sm:$0xff]   ;;  %7237 = vmatprep.subr.bf16.mxu1 %v7850_v11 }
 0x1cd   : > { %v1100_v54 = vadd.f32 %v1099_v50, %v8937_v47  ;;  %v1101_v59 = vpop.f32.mrb[18].mxu0  ;;  %1304 = vadd.xlane.f32.xlu1 %v1303_v33  ;;  %v1496_v25 = vadd.f32 %v1426_v34, %v1425_v35  ;;  %7238 = vmatpush3.bf16.msra.mxu1 %v7851_v38  ;;  %v7852_v33 = vld [vmem:[#allocation8 + $0x60] sm:$0xff]   ;;  %v616_v34 = vunpack.c.h.bf16 %v8810_v52 }
 0x1ce   : > { %v9057_v41 = vadd.f32 %v1098_v40, %v611_v15  ;;  %v1102_v24 = vadd.f32 %v1101_v59, %v8934_v46  ;;  %v1103_v21 = vpop.f32.mrb[19].mxu0  ;;  %7239 = vmatprep.subr.bf16.mxu1 %v7852_v33 }
 0x1cf   : > { %v9060_v45 = vadd.f32 %v1100_v54, %v612_v32  ;;  %v1104_v29 = vadd.f32 %v1103_v21, %v8937_v47  ;;  %1494 = vadd.xlane.f32.xlu0 %v1493_v63  ;;  %v615_v32 = vunpack.c.l.bf16 %v8810_v52  ;;  %v7853_v54 = vld [vmem:[#allocation8 + $0x20] sm:$0xff]   ;;  %v618_v52 = vunpack.c.h.bf16 %v8813_v53 }
 0x1d0   : > { %v9063_v50 = vadd.f32 %v1102_v24, %v613_v44  ;;  %v1427_v49 = vmul.f32 %v9057_v41, %v9057_v41 }
 0x1d1   : > { %v9067_v28 = vadd.f32 %v1104_v29, %v614_v48  ;;  %1497 = vadd.xlane.f32.xlu1 %v1496_v25  ;;  %v1306_v16 = vadd.f32 %v9060_v45, %v9057_v41  ;;  %v1428_v15 = vmul.f32 %v9060_v45, %v9060_v45  ;;  %v617_v48 = vunpack.c.l.bf16 %v8813_v53  ;;  %7240 = vmatpush3.bf16.msra.mxu1 %v7853_v54 }
 0x1d2   : > { %13728 = vst [vmem:[#allocation23_spill] sm:$0xff] %v9063_v50  ;;  %v1429_v40 = vmul.f32 %v9063_v50, %v9063_v50 }
 0x1d3   : > { %13729 = vst [vmem:[#allocation24_spill] sm:$0xff] %v9067_v28  ;;  %v1107_v35 = vpop.f32.mrb[20].mxu0  ;;  %1307 = vadd.xlane.f32.xlu0 %v1306_v16  ;;  %v1309_v42 = vadd.f32 %v9067_v28, %v9063_v50  ;;  %v1430_v44 = vmul.f32 %v9067_v28, %v9067_v28  ;;  %v1499_v21 = vadd.f32 %v1428_v15, %v1427_v49  ;;  %v7854_v16 = vld [vmem:[#allocation8 + $0x68] sm:$0xff]  }
 0x1d4   : > { %v1108_v59 = vadd.f32 %v1107_v35, %v8934_v46  ;;  %v1109_v38 = vpop.f32.mrb[21].mxu0  ;;  %v7855_v50 = vld [vmem:[#allocation8 + $0x28] sm:$0xff]   ;;  %7241 = vmatprep.subr.bf16.mxu1 %v7854_v16 }
 0x1d5   : > { %v1110_v63 = vadd.f32 %v1109_v38, %v8937_v47  ;;  %v1111_v24 = vpop.f32.mrb[22].mxu0  ;;  %1310 = vadd.xlane.f32.xlu1 %v1309_v42  ;;  %v1502_v33 = vadd.f32 %v1430_v44, %v1429_v40  ;;  %7242 = vmatpush3.bf16.msra.mxu1 %v7855_v50  ;;  %v7856_v42 = vld [vmem:[#allocation8 + $0x70] sm:$0xff]   ;;  %v620_v44 = vunpack.c.h.bf16 %v8820_v56 }
 0x1d6   : > { %v9085_v11 = vadd.f32 %v1108_v59, %v615_v32  ;;  %v1112_v29 = vadd.f32 %v1111_v24, %v8934_v46  ;;  %v1113_v25 = vpop.f32.mrb[23].mxu0  ;;  %7243 = vmatprep.subr.bf16.mxu1 %v7856_v42 }
 0x1d7   : > { %v9088_v28 = vadd.f32 %v1110_v63, %v616_v34  ;;  %v1114_v35 = vadd.f32 %v1113_v25, %v8937_v47  ;;  %1500 = vadd.xlane.f32.xlu0 %v1499_v21  ;;  %v619_v34 = vunpack.c.l.bf16 %v8820_v56  ;;  %v7857_v63 = vld [vmem:[#allocation8 + $0x30] sm:$0xff]   ;;  %v622_v56 = vunpack.c.h.bf16 %v8823_v57 }
 0x1d8   : > { %v9091_v38 = vadd.f32 %v1112_v29, %v617_v48  ;;  %v1431_v53 = vmul.f32 %v9085_v11, %v9085_v11 }
 0x1d9   : > { %v9095_v49 = vadd.f32 %v1114_v35, %v618_v52  ;;  %1503 = vadd.xlane.f32.xlu1 %v1502_v33  ;;  %v1312_v15 = vadd.f32 %v9088_v28, %v9085_v11  ;;  %v1432_v32 = vmul.f32 %v9088_v28, %v9088_v28  ;;  %v621_v52 = vunpack.c.l.bf16 %v8823_v57  ;;  %7244 = vmatpush3.bf16.msra.mxu1 %v7857_v63 }
 0x1da   : > { %13730 = vst [vmem:[#allocation25_spill] sm:$0xff] %v9091_v38  ;;  %v1433_v59 = vmul.f32 %v9091_v38, %v9091_v38 }
 0x1db   : > { %13731 = vst [vmem:[#allocation26_spill] sm:$0xff] %v9095_v49  ;;  %v1117_v40 = vpop.f32.mrb[24].mxu0  ;;  %1313 = vadd.xlane.f32.xlu0 %v1312_v15  ;;  %v1315_v54 = vadd.f32 %v9095_v49, %v9091_v38  ;;  %v1434_v48 = vmul.f32 %v9095_v49, %v9095_v49  ;;  %v1505_v25 = vadd.f32 %v1432_v32, %v1431_v53  ;;  %v7858_v15 = vld [vmem:[#allocation8 + $0x78] sm:$0xff]  }
 0x1dc   : > { %v1118_v24 = vadd.f32 %v1117_v40, %v8934_v46  ;;  %v1119_v50 = vpop.f32.mrb[25].mxu0  ;;  %v7859_v38 = vld [vmem:[#allocation8 + $0x38] sm:$0xff]   ;;  %7245 = vmatprep.subr.bf16.mxu1 %v7858_v15 }
 0x1dd   : > { %v1120_v21 = vadd.f32 %v1119_v50, %v8937_v47  ;;  %v1121_v29 = vpop.f32.mrb[26].mxu0  ;;  %1316 = vadd.xlane.f32.xlu1 %v1315_v54  ;;  %v1508_v42 = vadd.f32 %v1434_v48, %v1433_v59  ;;  %7246 = vmatpush3.bf16.msra.mxu1 %v7859_v38  ;;  %v624_v59 = vunpack.c.h.bf16 %v8830_v60  ;;  %v625_v38 = vunpack.c.l.bf16 %v8833_v61 }
 0x1de   : > { %v9113_v16 = vadd.f32 %v1118_v24, %v619_v34  ;;  %v1122_v35 = vadd.f32 %v1121_v29, %v8934_v46  ;;  %v1123_v33 = vpop.f32.mrb[27].mxu0 }
 0x1df   : > { %v9116_v49 = vadd.f32 %v1120_v21, %v620_v44  ;;  %v1124_v40 = vadd.f32 %v1123_v33, %v8937_v47  ;;  %1506 = vadd.xlane.f32.xlu0 %v1505_v25  ;;  %v623_v44 = vunpack.c.l.bf16 %v8830_v60  ;;  %v626_v60 = vunpack.c.h.bf16 %v8833_v61 }
 0x1e0   : > { %v9119_v50 = vadd.f32 %v1122_v35, %v621_v52  ;;  %v1435_v57 = vmul.f32 %v9113_v16, %v9113_v16 }
 0x1e1   : > { %v9123_v53 = vadd.f32 %v1124_v40, %v622_v56  ;;  %1509 = vadd.xlane.f32.xlu1 %v1508_v42  ;;  %v1318_v32 = vadd.f32 %v9116_v49, %v9113_v16  ;;  %v1436_v34 = vmul.f32 %v9116_v49, %v9116_v49 }
 0x1e2   : > { %v1437_v63 = vmul.f32 %v9119_v50, %v9119_v50 }
 0x1e3   : > { %13732 = vst [vmem:[#allocation27_spill] sm:$0xff] %v9123_v53  ;;  %v1127_v54 = vpop.f32.mrb[28].mxu0  ;;  %1319 = vadd.xlane.f32.xlu0 %v1318_v32  ;;  %v1321_v48 = vadd.f32 %v9123_v53, %v9119_v50  ;;  %v1438_v24 = vmul.f32 %v9123_v53, %v9123_v53  ;;  %v1511_v25 = vadd.f32 %v1436_v34, %v1435_v57 }
 0x1e4   : > { %v1128_v52 = vadd.f32 %v1127_v54, %v8934_v46  ;;  %v1129_v21 = vpop.f32.mrb[29].mxu0 }
 0x1e5   : > { %v1130_v29 = vadd.f32 %v1129_v21, %v8937_v47  ;;  %v1131_v56 = vpop.f32.mrb[30].mxu0  ;;  %1322 = vadd.xlane.f32.xlu1 %v1321_v48  ;;  %v1514_v32 = vadd.f32 %v1438_v24, %v1437_v63  ;;  %v628_v48 = vunpack.c.h.bf16 %v8840_v0 }
 0x1e6   : > { %v9141_v35 = vadd.f32 %v1128_v52, %v623_v44  ;;  %v1132_v33 = vadd.f32 %v1131_v56, %v8934_v46  ;;  %v1133_v15 = vpop.f32.mrb[31].mxu0  ;;  %v627_v44 = vunpack.c.l.bf16 %v8840_v0  ;;  %v630_v0 = vunpack.c.h.bf16 %v8843_v1 }
 0x1e7   : > { %v9144_v40 = vadd.f32 %v1130_v29, %v624_v59  ;;  %v1134_v42 = vadd.f32 %v1133_v15, %v8937_v47  ;;  %1512 = vadd.xlane.f32.xlu0 %v1511_v25  ;;  %v629_v29 = vunpack.c.l.bf16 %v8843_v1 }
 0x1e8   : > { %v9147_v54 = vadd.f32 %v1132_v33, %v625_v38  ;;  %v1439_v57 = vmul.f32 %v9141_v35, %v9141_v35 }
 0x1e9   : > { %v9149_v53 = vadd.f32 %v1134_v42, %v626_v60  ;;  %1515 = vadd.xlane.f32.xlu1 %v1514_v32  ;;  %v1324_v61 = vadd.f32 %v9144_v40, %v9141_v35  ;;  %v1440_v34 = vmul.f32 %v9144_v40, %v9144_v40 }
 0x1ea   : > { %13733 = vst [vmem:[#allocation28_spill] sm:$0xff] %v9147_v54  ;;  %v1441_v24 = vmul.f32 %v9147_v54, %v9147_v54 }
 0x1eb   : > { %13734 = vst [vmem:[#allocation29_spill] sm:$0xff] %v9149_v53  ;;  %v1137_v59 = vpop.f32.mrb[32].mxu0  ;;  %1325 = vadd.xlane.f32.xlu0 %v1324_v61  ;;  %v1327_v63 = vadd.f32 %v9149_v53, %v9147_v54  ;;  %v1442_v52 = vmul.f32 %v9149_v53, %v9149_v53  ;;  %v1517_v25 = vadd.f32 %v1440_v34, %v1439_v57 }
 0x1ec   : > { %v1138_v21 = vadd.f32 %v1137_v59, %v8934_v46  ;;  %v1139_v38 = vpop.f32.mrb[33].mxu0 }
 0x1ed   : > { %v1140_v56 = vadd.f32 %v1139_v38, %v8937_v47  ;;  %v1141_v60 = vpop.f32.mrb[34].mxu0  ;;  %1328 = vadd.xlane.f32.xlu1 %v1327_v63  ;;  %v1520_v59 = vadd.f32 %v1442_v52, %v1441_v24  ;;  %v632_v63 = vunpack.c.h.bf16 %v8850_v4 }
 0x1ee   : > { %v9169_v33 = vadd.f32 %v1138_v21, %v627_v44  ;;  %v1142_v15 = vadd.f32 %v1141_v60, %v8934_v46  ;;  %v1143_v42 = vpop.f32.mrb[35].mxu0  ;;  %v631_v44 = vunpack.c.l.bf16 %v8850_v4  ;;  %v634_v4 = vunpack.c.h.bf16 %v8853_v5 }
 0x1ef   : > { %v9172_v32 = vadd.f32 %v1140_v56, %v628_v48  ;;  %v1144_v61 = vadd.f32 %v1143_v42, %v8937_v47  ;;  %1518 = vadd.xlane.f32.xlu0 %v1517_v25  ;;  %v633_v56 = vunpack.c.l.bf16 %v8853_v5 }
 0x1f0   : > { %v9175_v53 = vadd.f32 %v1142_v15, %v629_v29  ;;  %v1443_v57 = vmul.f32 %v9169_v33, %v9169_v33 }
 0x1f1   : > { %v9177_v54 = vadd.f32 %v1144_v61, %v630_v0  ;;  %1521 = vadd.xlane.f32.xlu1 %v1520_v59  ;;  %v1330_v1 = vadd.f32 %v9172_v32, %v9169_v33  ;;  %v1444_v34 = vmul.f32 %v9172_v32, %v9172_v32 }
 0x1f2   : > { %13735 = vst [vmem:[#allocation30_spill] sm:$0xff] %v9175_v53  ;;  %v1445_v52 = vmul.f32 %v9175_v53, %v9175_v53 }
 0x1f3   : > { %13736 = vst [vmem:[#allocation31_spill] sm:$0xff] %v9177_v54  ;;  %v1147_v48 = vpop.f32.mrb[36].mxu0  ;;  %1331 = vadd.xlane.f32.xlu0 %v1330_v1  ;;  %v1333_v24 = vadd.f32 %v9177_v54, %v9175_v53  ;;  %v1446_v21 = vmul.f32 %v9177_v54, %v9177_v54  ;;  %v1523_v25 = vadd.f32 %v1444_v34, %v1443_v57 }
 0x1f4   : > { %v1148_v38 = vadd.f32 %v1147_v48, %v8934_v46  ;;  %v1149_v29 = vpop.f32.mrb[37].mxu0 }
 0x1f5   : > { %v1150_v60 = vadd.f32 %v1149_v29, %v8937_v47  ;;  %v1151_v0 = vpop.f32.mrb[38].mxu0  ;;  %1334 = vadd.xlane.f32.xlu1 %v1333_v24  ;;  %v1526_v48 = vadd.f32 %v1446_v21, %v1445_v52  ;;  %v636_v24 = vunpack.c.h.bf16 %v8860_v8 }
 0x1f6   : > { %v9197_v15 = vadd.f32 %v1148_v38, %v631_v44  ;;  %v1152_v42 = vadd.f32 %v1151_v0, %v8934_v46  ;;  %v1153_v61 = vpop.f32.mrb[39].mxu0  ;;  %v635_v44 = vunpack.c.l.bf16 %v8860_v8  ;;  %v638_v8 = vunpack.c.h.bf16 %v8863_v9 }
 0x1f7   : > { %v9200_v59 = vadd.f32 %v1150_v60, %v632_v63  ;;  %v1154_v1 = vadd.f32 %v1153_v61, %v8937_v47  ;;  %1524 = vadd.xlane.f32.xlu0 %v1523_v25  ;;  %v637_v60 = vunpack.c.l.bf16 %v8863_v9 }
 0x1f8   : > { %v9203_v54 = vadd.f32 %v1152_v42, %v633_v56  ;;  %v1447_v57 = vmul.f32 %v9197_v15, %v9197_v15 }
 0x1f9   : > { %v9205_v53 = vadd.f32 %v1154_v1, %v634_v4  ;;  %1527 = vadd.xlane.f32.xlu1 %v1526_v48  ;;  %v1336_v5 = vadd.f32 %v9200_v59, %v9197_v15  ;;  %v1448_v34 = vmul.f32 %v9200_v59, %v9200_v59 }
 0x1fa   : > { %13737 = vst [vmem:[#allocation32_spill] sm:$0xff] %v9203_v54  ;;  %v1449_v21 = vmul.f32 %v9203_v54, %v9203_v54 }
 0x1fb   : > { %13738 = vst [vmem:[#allocation33_spill] sm:$0xff] %v9205_v53  ;;  %v1157_v63 = vpop.f32.mrb[40].mxu0  ;;  %1337 = vadd.xlane.f32.xlu0 %v1336_v5  ;;  %v1339_v52 = vadd.f32 %v9205_v53, %v9203_v54  ;;  %v1450_v38 = vmul.f32 %v9205_v53, %v9205_v53  ;;  %v1529_v25 = vadd.f32 %v1448_v34, %v1447_v57 }
 0x1fc   : > { %v1158_v29 = vadd.f32 %v1157_v63, %v8934_v46  ;;  %v1159_v56 = vpop.f32.mrb[41].mxu0 }
 0x1fd   : > { %v1160_v0 = vadd.f32 %v1159_v56, %v8937_v47  ;;  %v1161_v4 = vpop.f32.mrb[42].mxu0  ;;  %1340 = vadd.xlane.f32.xlu1 %v1339_v52  ;;  %v1532_v63 = vadd.f32 %v1450_v38, %v1449_v21  ;;  %v640_v52 = vunpack.c.h.bf16 %v8870_v12 }
 0x1fe   : > { %v9225_v42 = vadd.f32 %v1158_v29, %v635_v44  ;;  %v1162_v61 = vadd.f32 %v1161_v4, %v8934_v46  ;;  %v1163_v1 = vpop.f32.mrb[43].mxu0  ;;  %v639_v44 = vunpack.c.l.bf16 %v8870_v12  ;;  %v642_v12 = vunpack.c.h.bf16 %v8873_v13 }
 0x1ff   : > { %v9228_v48 = vadd.f32 %v1160_v0, %v636_v24  ;;  %v1164_v5 = vadd.f32 %v1163_v1, %v8937_v47  ;;  %1530 = vadd.xlane.f32.xlu0 %v1529_v25  ;;  %v641_v0 = vunpack.c.l.bf16 %v8873_v13 }
 0x200   : > { %v9231_v53 = vadd.f32 %v1162_v61, %v637_v60  ;;  %v1451_v57 = vmul.f32 %v9225_v42, %v9225_v42 }
 0x201   : > { %v9233_v54 = vadd.f32 %v1164_v5, %v638_v8  ;;  %1533 = vadd.xlane.f32.xlu1 %v1532_v63  ;;  %v1342_v9 = vadd.f32 %v9228_v48, %v9225_v42  ;;  %v1452_v34 = vmul.f32 %v9228_v48, %v9228_v48 }
 0x202   : > { %13739 = vst [vmem:[#allocation34_spill] sm:$0xff] %v9231_v53  ;;  %v1453_v38 = vmul.f32 %v9231_v53, %v9231_v53 }
 0x203   : > { %13740 = vst [vmem:[#allocation35_spill] sm:$0xff] %v9233_v54  ;;  %v1167_v24 = vpop.f32.mrb[44].mxu0  ;;  %1343 = vadd.xlane.f32.xlu0 %v1342_v9  ;;  %v1345_v21 = vadd.f32 %v9233_v54, %v9231_v53  ;;  %v1454_v29 = vmul.f32 %v9233_v54, %v9233_v54  ;;  %v1535_v25 = vadd.f32 %v1452_v34, %v1451_v57 }
 0x204   : > { %v1168_v56 = vadd.f32 %v1167_v24, %v8934_v46  ;;  %v1169_v60 = vpop.f32.mrb[45].mxu0 }
 0x205   : > { %v1170_v4 = vadd.f32 %v1169_v60, %v8937_v47  ;;  %v1171_v8 = vpop.f32.mrb[46].mxu0  ;;  %1346 = vadd.xlane.f32.xlu1 %v1345_v21  ;;  %v1538_v24 = vadd.f32 %v1454_v29, %v1453_v38  ;;  %v644_v21 = vunpack.c.h.bf16 %v8880_v18 }
 0x206   : > { %v9253_v61 = vadd.f32 %v1168_v56, %v639_v44  ;;  %v1172_v1 = vadd.f32 %v1171_v8, %v8934_v46  ;;  %v1173_v5 = vpop.f32.mrb[47].mxu0  ;;  %v643_v44 = vunpack.c.l.bf16 %v8880_v18  ;;  %v646_v18 = vunpack.c.h.bf16 %v8883_v19 }
 0x207   : > { %v9256_v63 = vadd.f32 %v1170_v4, %v640_v52  ;;  %v1174_v9 = vadd.f32 %v1173_v5, %v8937_v47  ;;  %1536 = vadd.xlane.f32.xlu0 %v1535_v25  ;;  %v645_v4 = vunpack.c.l.bf16 %v8883_v19 }
 0x208   : > { %v9259_v54 = vadd.f32 %v1172_v1, %v641_v0  ;;  %v1455_v57 = vmul.f32 %v9253_v61, %v9253_v61 }
 0x209   : > { %v9261_v53 = vadd.f32 %v1174_v9, %v642_v12  ;;  %1539 = vadd.xlane.f32.xlu1 %v1538_v24  ;;  %v1348_v13 = vadd.f32 %v9256_v63, %v9253_v61  ;;  %v1456_v34 = vmul.f32 %v9256_v63, %v9256_v63 }
 0x20a   : > { %13741 = vst [vmem:[#allocation36_spill] sm:$0xff] %v9259_v54  ;;  %v1457_v29 = vmul.f32 %v9259_v54, %v9259_v54 }
 0x20b   : > { %13742 = vst [vmem:[#allocation37_spill] sm:$0xff] %v9261_v53  ;;  %v1177_v52 = vpop.f32.mrb[48].mxu0  ;;  %1349 = vadd.xlane.f32.xlu0 %v1348_v13  ;;  %v1351_v38 = vadd.f32 %v9261_v53, %v9259_v54  ;;  %v1458_v56 = vmul.f32 %v9261_v53, %v9261_v53  ;;  %v1541_v25 = vadd.f32 %v1456_v34, %v1455_v57 }
 0x20c   : > { %v1178_v60 = vadd.f32 %v1177_v52, %v8934_v46  ;;  %v1179_v0 = vpop.f32.mrb[49].mxu0 }
 0x20d   : > { %v1180_v8 = vadd.f32 %v1179_v0, %v8937_v47  ;;  %v1181_v12 = vpop.f32.mrb[50].mxu0  ;;  %1352 = vadd.xlane.f32.xlu1 %v1351_v38  ;;  %v1544_v52 = vadd.f32 %v1458_v56, %v1457_v29  ;;  %v648_v38 = vunpack.c.h.bf16 %v8890_v22 }
 0x20e   : > { %v9281_v1 = vadd.f32 %v1178_v60, %v643_v44  ;;  %v1182_v5 = vadd.f32 %v1181_v12, %v8934_v46  ;;  %v1183_v9 = vpop.f32.mrb[51].mxu0  ;;  %v647_v44 = vunpack.c.l.bf16 %v8890_v22  ;;  %v650_v22 = vunpack.c.h.bf16 %v8893_v23 }
 0x20f   : > { %v9284_v24 = vadd.f32 %v1180_v8, %v644_v21  ;;  %v1184_v13 = vadd.f32 %v1183_v9, %v8937_v47  ;;  %1542 = vadd.xlane.f32.xlu0 %v1541_v25  ;;  %v649_v8 = vunpack.c.l.bf16 %v8893_v23 }
 0x210   : > { %v9287_v53 = vadd.f32 %v1182_v5, %v645_v4  ;;  %v1459_v57 = vmul.f32 %v9281_v1, %v9281_v1 }
 0x211   : > { %v9289_v54 = vadd.f32 %v1184_v13, %v646_v18  ;;  %1545 = vadd.xlane.f32.xlu1 %v1544_v52  ;;  %v1354_v19 = vadd.f32 %v9284_v24, %v9281_v1  ;;  %v1460_v34 = vmul.f32 %v9284_v24, %v9284_v24 }
 0x212   : > { %13743 = vst [vmem:[#allocation38_spill] sm:$0xff] %v9287_v53  ;;  %v1461_v56 = vmul.f32 %v9287_v53, %v9287_v53 }
 0x213   : > { %13744 = vst [vmem:[#allocation39_spill] sm:$0xff] %v9289_v54  ;;  %v1187_v21 = vpop.f32.mrb[52].mxu0  ;;  %1355 = vadd.xlane.f32.xlu0 %v1354_v19  ;;  %v1357_v29 = vadd.f32 %v9289_v54, %v9287_v53  ;;  %v1462_v60 = vmul.f32 %v9289_v54, %v9289_v54  ;;  %v1547_v25 = vadd.f32 %v1460_v34, %v1459_v57 }
 0x214   : > { %v1188_v0 = vadd.f32 %v1187_v21, %v8934_v46  ;;  %v1189_v4 = vpop.f32.mrb[53].mxu0 }
 0x215   : > { %v1190_v12 = vadd.f32 %v1189_v4, %v8937_v47  ;;  %v1191_v18 = vpop.f32.mrb[54].mxu0  ;;  %1358 = vadd.xlane.f32.xlu1 %v1357_v29  ;;  %v1550_v21 = vadd.f32 %v1462_v60, %v1461_v56  ;;  %v652_v29 = vunpack.c.h.bf16 %v8900_v26 }
 0x216   : > { %v9309_v5 = vadd.f32 %v1188_v0, %v647_v44  ;;  %v1192_v9 = vadd.f32 %v1191_v18, %v8934_v46  ;;  %v1193_v13 = vpop.f32.mrb[55].mxu0  ;;  %v651_v44 = vunpack.c.l.bf16 %v8900_v26  ;;  %v654_v26 = vunpack.c.h.bf16 %v8903_v27 }
 0x217   : > { %v9312_v52 = vadd.f32 %v1190_v12, %v648_v38  ;;  %v1194_v19 = vadd.f32 %v1193_v13, %v8937_v47  ;;  %1548 = vadd.xlane.f32.xlu0 %v1547_v25  ;;  %v653_v12 = vunpack.c.l.bf16 %v8903_v27 }
 0x218   : > { %v9315_v54 = vadd.f32 %v1192_v9, %v649_v8  ;;  %v1463_v57 = vmul.f32 %v9309_v5, %v9309_v5 }
 0x219   : > { %v9317_v53 = vadd.f32 %v1194_v19, %v650_v22  ;;  %1551 = vadd.xlane.f32.xlu1 %v1550_v21  ;;  %v1360_v23 = vadd.f32 %v9312_v52, %v9309_v5  ;;  %v1464_v34 = vmul.f32 %v9312_v52, %v9312_v52 }
 0x21a   : > { %13745 = vst [vmem:[#allocation40_spill] sm:$0xff] %v9315_v54  ;;  %v1465_v60 = vmul.f32 %v9315_v54, %v9315_v54 }
 0x21b   : > { %13746 = vst [vmem:[#allocation41_spill] sm:$0xff] %v9317_v53  ;;  %v1197_v38 = vpop.f32.mrb[56].mxu0  ;;  %1361 = vadd.xlane.f32.xlu0 %v1360_v23  ;;  %v1363_v56 = vadd.f32 %v9317_v53, %v9315_v54  ;;  %v1466_v0 = vmul.f32 %v9317_v53, %v9317_v53  ;;  %v1553_v25 = vadd.f32 %v1464_v34, %v1463_v57 }
 0x21c   : > { %v1198_v4 = vadd.f32 %v1197_v38, %v8934_v46  ;;  %v1199_v8 = vpop.f32.mrb[57].mxu0 }
 0x21d   : > { %v1200_v18 = vadd.f32 %v1199_v8, %v8937_v47  ;;  %v1201_v22 = vpop.f32.mrb[58].mxu0  ;;  %1364 = vadd.xlane.f32.xlu1 %v1363_v56  ;;  %v1556_v38 = vadd.f32 %v1466_v0, %v1465_v60  ;;  %v656_v56 = vunpack.c.h.bf16 %v8910_v30 }
 0x21e   : > { %v9337_v9 = vadd.f32 %v1198_v4, %v651_v44  ;;  %v1202_v13 = vadd.f32 %v1201_v22, %v8934_v46  ;;  %v1203_v19 = vpop.f32.mrb[59].mxu0  ;;  %v655_v44 = vunpack.c.l.bf16 %v8910_v30  ;;  %v658_v30 = vunpack.c.h.bf16 %v8913_v31 }
 0x21f   : > { %v9340_v21 = vadd.f32 %v1200_v18, %v652_v29  ;;  %v1204_v23 = vadd.f32 %v1203_v19, %v8937_v47  ;;  %1554 = vadd.xlane.f32.xlu0 %v1553_v25  ;;  %v657_v18 = vunpack.c.l.bf16 %v8913_v31 }
 0x220   : > { %v9343_v53 = vadd.f32 %v1202_v13, %v653_v12  ;;  %v1467_v57 = vmul.f32 %v9337_v9, %v9337_v9 }
 0x221   : > { %v9345_v54 = vadd.f32 %v1204_v23, %v654_v26  ;;  %1557 = vadd.xlane.f32.xlu1 %v1556_v38  ;;  %v1366_v27 = vadd.f32 %v9340_v21, %v9337_v9  ;;  %v1468_v34 = vmul.f32 %v9340_v21, %v9340_v21 }
 0x222   : > { %13747 = vst [vmem:[#allocation42_spill] sm:$0xff] %v9343_v53  ;;  %v1469_v0 = vmul.f32 %v9343_v53, %v9343_v53 }
 0x223   : > { %13748 = vst [vmem:[#allocation43_spill] sm:$0xff] %v9345_v54  ;;  %v1207_v29 = vpop.f32.mrb[60].mxu0  ;;  %1367 = vadd.xlane.f32.xlu0 %v1366_v27  ;;  %v1369_v60 = vadd.f32 %v9345_v54, %v9343_v53  ;;  %v1470_v4 = vmul.f32 %v9345_v54, %v9345_v54  ;;  %v1559_v25 = vadd.f32 %v1468_v34, %v1467_v57 }
 0x224   : > { %v1208_v8 = vadd.f32 %v1207_v29, %v8934_v46  ;;  %v1209_v12 = vpop.f32.mrb[61].mxu0 }
 0x225   : > { %v1210_v22 = vadd.f32 %v1209_v12, %v8937_v47  ;;  %v1211_v26 = vpop.f32.mrb[62].mxu0  ;;  %1370 = vadd.xlane.f32.xlu1 %v1369_v60  ;;  %v1562_v29 = vadd.f32 %v1470_v4, %v1469_v0 }
 0x226   : > { %v9365_v13 = vadd.f32 %v1208_v8, %v655_v44  ;;  %v1212_v19 = vadd.f32 %v1211_v26, %v8934_v46  ;;  %v1213_v23 = vpop.f32.mrb[63].mxu0 }
 0x227   : > { %v9368_v38 = vadd.f32 %v1210_v22, %v656_v56  ;;  %v1214_v27 = vadd.f32 %v1213_v23, %v8937_v47  ;;  %1560 = vadd.xlane.f32.xlu0 %v1559_v25 }
 0x228   : > { %v9371_v54 = vadd.f32 %v1212_v19, %v657_v18  ;;  %v1471_v57 = vmul.f32 %v9365_v13, %v9365_v13 }
 0x229   : > { %13749 = vst [vmem:[#allocation44_spill] sm:$0xff] %v9368_v38  ;;  %v9373_v53 = vadd.f32 %v1214_v27, %v658_v30  ;;  %1563 = vadd.xlane.f32.xlu1 %v1562_v29  ;;  %v1372_v31 = vadd.f32 %v9368_v38, %v9365_v13  ;;  %v1472_v46 = vmul.f32 %v9368_v38, %v9368_v38 }
 0x22a   : > { %13750 = vst [vmem:[#allocation45_spill] sm:$0xff] %v9371_v54  ;;  %v1473_v34 = vmul.f32 %v9371_v54, %v9371_v54 }
 0x22b   : > { %13751 = vst [vmem:[#allocation46_spill] sm:$0xff] %v9373_v53  ;;  %1373 = vadd.xlane.f32.xlu0 %v1372_v31  ;;  %v1375_v47 = vadd.f32 %v9373_v53, %v9371_v54  ;;  %v1474_v44 = vmul.f32 %v9373_v53, %v9373_v53  ;;  %v1565_v56 = vadd.f32 %v1472_v46, %v1471_v57 }
 0x22d   : > { %1376 = vadd.xlane.f32.xlu1 %v1375_v47  ;;  %v1568_v60 = vadd.f32 %v1474_v44, %v1473_v34 }
 0x22f   : > { %1566 = vadd.xlane.f32.xlu0 %v1565_v56 }
 0x231   : > { %1569 = vadd.xlane.f32.xlu1 %v1568_v60 }
 0x240   : > { %v1284_v0 = vpop.xlane.xlu0 %1283 }
 0x241   : > { %v9387_v4 = vmul.f32 0.00390625, %v1284_v0 }
 0x242   : > { %v1477_v8 = vpop.xlane.xlu1 %1476 }
 0x243   : > { %v1571_v12 = vmul.f32 0.00390625, %v1477_v8  ;;  %v1603_v18 = vmul.f32 %v9387_v4, %v9387_v4 }
 0x244   : > { %v1287_v22 = vpop.xlane.xlu0 %1286 }
 0x245   : > { %v1635_v26 = vsub.f32 %v1571_v12, %v1603_v18  ;;  %v9391_v30 = vmul.f32 0.00390625, %v1287_v22 }
 0x246   : > { %v1480_v25 = vpop.xlane.xlu1 %1479 }
 0x247   : > { %v1667_v19 = vmax.f32 %v1635_v26, 0.0  ;;  %v1572_v23 = vmul.f32 0.00390625, %v1480_v25  ;;  %v1604_v27 = vmul.f32 %v9391_v30, %v9391_v30 }
 0x248   : > { %v1290_v29 = vpop.xlane.xlu0 %1289 }
 0x249   : > { %v1763_v31 = vadd.f32 1e-05, %v1667_v19  ;;  %v9395_v57 = vmul.f32 0.00390625, %v1290_v29  ;;  %v1636_v46 = vsub.f32 %v1572_v23, %v1604_v27 }
 0x24a   : > { %v1293_v47 = vpop.xlane.xlu1 %1292 }
 0x24b   : > { %7996 = vrsqrt.f32 %v1763_v31  ;;  %v9397_v34 = vmul.f32 0.00390625, %v1293_v47  ;;  %v1668_v44 = vmax.f32 %v1636_v46, 0.0  ;;  %v1605_v60 = vmul.f32 %v9395_v57, %v9395_v57  ;;  %v1280_v47 = vld [vmem:[%s13449_s3] sm:$0x3] }
 0x24c   : > { %v1483_v56 = vpop.xlane.xlu0 %1482 }
 0x24d   : > { %v1573_v0 = vmul.f32 0.00390625, %v1483_v56  ;;  %v1764_v8 = vadd.f32 1e-05, %v1668_v44  ;;  %v1606_v22 = vmul.f32 %v9397_v34, %v9397_v34 }
 0x24e   : > { %v1486_v12 = vpop.xlane.xlu1 %1485 }
 0x24f   : > { %v1637_v18 = vsub.f32 %v1573_v0, %v1605_v60  ;;  %v1574_v26 = vmul.f32 0.00390625, %v1486_v12  ;;  %7998 = vrsqrt.f32 %v1764_v8 }
 0x250   : > { %v1296_v25 = vpop.xlane.xlu0 %1295 }
 0x251   : > { %v1669_v19 = vmax.f32 %v1637_v18, 0.0  ;;  %v1638_v23 = vsub.f32 %v1574_v26, %v1606_v22  ;;  %v9403_v27 = vmul.f32 0.00390625, %v1296_v25  ;;  %v1281_v18 = vld [vmem:[%s13450_s4] sm:$0x3]  ;;  %v1700_v22 = vsub.f32 %v8948_v10, %v9387_v4 }
 0x252   : > { %v1299_v29 = vpop.xlane.xlu1 %1298  ;;  %v9418_v25 = vrot.slane %v1280_v47, %v8925_v39  ;;  %v9428_v10 = vrot.slane %v1281_v18, %v8925_v39  ;;  %v9431_v54 = vrot.slane %v1281_v18, %v8931_v43 }
 0x253   : > { %v1765_v31 = vadd.f32 1e-05, %v1669_v19  ;;  %v1670_v46 = vmax.f32 %v1638_v23, 0.0  ;;  %v9408_v44 = vmul.f32 0.00390625, %v1299_v29  ;;  %v1607_v8 = vmul.f32 %v9403_v27, %v9403_v27 }
 0x254   : > { %v1489_v56 = vpop.xlane.xlu0 %1488  ;;  %v9421_v19 = vrot.slane %v1280_v47, %v8931_v43  ;;  %v1701_v47 = vsub.f32 %v8951_v14, %v9391_v30  ;;  %v1705_v43 = vsub.f32 %v8979_v6, %v9397_v34  ;;  %v1706_v14 = vsub.f32 %v8981_v7, %v9397_v34 }
 0x255   : > { %v7997_v60 = vpop.eup %7996  ;;  %8000 = vrsqrt.f32 %v1765_v31  ;;  %v1766_v0 = vadd.f32 1e-05, %v1670_v46  ;;  %v1575_v12 = vmul.f32 0.00390625, %v1489_v56  ;;  %v1608_v29 = vmul.f32 %v9408_v44, %v9408_v44 }
 0x256   : > { %v1492_v26 = vpop.xlane.xlu1 %1491  ;;  %v1699_v46 = vsub.f32 %v8945_v3, %v9387_v4  ;;  %v1828_v53 = vmul.f32 %v7997_v60, %v1700_v22  ;;  %v1703_v3 = vsub.f32 %v8973_v55, %v9395_v57  ;;  %v1704_v4 = vsub.f32 %v8976_v62, %v9395_v57 }
 0x257   : > { %8002 = vrsqrt.f32 %v1766_v0  ;;  %v1639_v23 = vsub.f32 %v1575_v12, %v1607_v8  ;;  %v1576_v31 = vmul.f32 0.00390625, %v1492_v26  ;;  %v1702_v26 = vsub.f32 %v8955_v17, %v9391_v30 }
 0x258   : > { %v1302_v56 = vpop.xlane.xlu0 %1301  ;;  %v1827_v18 = vmul.f32 %v7997_v60, %v1699_v46  ;;  %v1903_v30 = vmul.f32 %v9421_v19, %v1828_v53 }
 0x259   : > { %v1671_v0 = vmax.f32 %v1639_v23, 0.0  ;;  %v1640_v8 = vsub.f32 %v1576_v31, %v1608_v29  ;;  %v9435_v12 = vmul.f32 0.00390625, %v1302_v56  ;;  %v7999_v38 = vpop.eup %7998 }
 0x25a   : > { %v1305_v22 = vpop.xlane.xlu1 %1304  ;;  %v1830_v17 = vmul.f32 %v7999_v38, %v1702_v26  ;;  %v1829_v55 = vmul.f32 %v7999_v38, %v1701_v47  ;;  %v1902_v46 = vmul.f32 %v9418_v25, %v1827_v18  ;;  %v1708_v26 = vsub.f32 %v9004_v58, %v9403_v27 }
 0x25b   : > { %v1767_v23 = vadd.f32 1e-05, %v1671_v0  ;;  %v1672_v29 = vmax.f32 %v1640_v8, 0.0  ;;  %v9447_v31 = vmul.f32 0.00390625, %v1305_v22  ;;  %v1609_v62 = vmul.f32 %v9435_v12, %v9435_v12  ;;  %v7862_v0 = vld [vmem:[#allocation9 + $0x4] ss:$8 sps:$4 sm:$0xff]  }
 0x25c   : > { %v1495_v56 = vpop.xlane.xlu0 %1494  ;;  %v1905_v60 = vmul.f32 %v9421_v19, %v1830_v17  ;;  %v1904_v8 = vmul.f32 %v9418_v25, %v1829_v55  ;;  %2525 = vmatprep.subr.bf16.mxu1 %v7862_v0 }
 0x25d   : > { %8004 = vrsqrt.f32 %v1767_v23  ;;  %v1768_v39 = vadd.f32 1e-05, %v1672_v29  ;;  %v1577_v57 = vmul.f32 0.00390625, %v1495_v56  ;;  %v1610_v7 = vmul.f32 %v9447_v31, %v9447_v31 }
 0x25e   : > { %v1498_v34 = vpop.xlane.xlu1 %1497  ;;  %v9462_v23 = vadd.f32 %v9431_v54, %v1903_v30  ;;  %v9465_v29 = vadd.f32 %v9431_v54, %v1905_v60  ;;  %v9475_v30 = vadd.f32 %v9428_v10, %v1902_v46 }
 0x25f   : > { %v8001_v53 = vpop.eup %8000  ;;  %8006 = vrsqrt.f32 %v1768_v39  ;;  %v1641_v38 = vsub.f32 %v1577_v57, %v1609_v62  ;;  %v1578_v47 = vmul.f32 0.00390625, %v1498_v34  ;;  %v9470_v62 = vadd.f32 %v9428_v10, %v1904_v8 }
 0x260   : > { %v1308_v22 = vpop.xlane.xlu0 %1307  ;;  %13752 = vst [vmem:[#allocation47_spill] sm:$0xff] %v9465_v29  ;;  %v1832_v56 = vmul.f32 %v8001_v53, %v1704_v4  ;;  %v2042_v58 = vpack.c.bf16 %v9465_v29, %v9462_v23  ;;  %v1709_v4 = vsub.f32 %v9007_v2, %v9408_v44  ;;  %v1831_v0 = vmul.f32 %v8001_v53, %v1703_v3 }
 0x261   : > { %v8003_v18 = vpop.eup %8002  ;;  %v1673_v17 = vmax.f32 %v1641_v38, 0.0  ;;  %v1642_v6 = vsub.f32 %v1578_v47, %v1610_v7  ;;  %v9467_v39 = vmul.f32 0.00390625, %v1308_v22  ;;  %13753 = vst [vmem:[#allocation48_spill] sm:$0xff] %v9470_v62  ;;  %v7860_v38 = vld [vmem:[#allocation9] ss:$8 sps:$4 sm:$0xff]   ;;  %v2041_v8 = vpack.c.bf16 %v9470_v62, %v9475_v30 }
 0x262   : > { %v1311_v55 = vpop.xlane.xlu1 %1310  ;;  %v1834_v57 = vmul.f32 %v8003_v18, %v1706_v14  ;;  %v1907_v34 = vmul.f32 %v9421_v19, %v1832_v56  ;;  %2240 = vmatprep.mubr.bf16.mxu1 %v2042_v58  ;;  %v1833_v29 = vmul.f32 %v8003_v18, %v1705_v43  ;;  %v7865_v14 = vld [vmem:[#allocation9 + $0x14] ss:$8 sps:$4 sm:$0xff]   ;;  %v1710_v3 = vsub.f32 %v9009_v37, %v9408_v44 }
 0x263   : > { %v1769_v60 = vadd.f32 1e-05, %v1673_v17  ;;  %v1674_v7 = vmax.f32 %v1642_v6, 0.0  ;;  %v9480_v47 = vmul.f32 0.00390625, %v1311_v55  ;;  %v1611_v2 = vmul.f32 %v9467_v39, %v9467_v39  ;;  %2241 = vmatmul.mubr.bf16.vlgmr.msra.gmra.mrb[0].mxu1 %v2041_v8 }
 0x264   : > { %v1501_v22 = vpop.xlane.xlu0 %1500  ;;  %v1909_v46 = vmul.f32 %v9421_v19, %v1834_v57  ;;  %v9492_v55 = vadd.f32 %v9431_v54, %v1907_v34  ;;  %2526 = vmatpush1.bf16.msra.mxu1 %v7860_v38  ;;  %v1908_v34 = vmul.f32 %v9418_v25, %v1833_v29 }
 0x265   : > { %8008 = vrsqrt.f32 %v1769_v60  ;;  %v1770_v56 = vadd.f32 1e-05, %v1674_v7  ;;  %v1579_v17 = vmul.f32 0.00390625, %v1501_v22  ;;  %v1612_v6 = vmul.f32 %v9480_v47, %v9480_v47  ;;  %v7863_v7 = vld [vmem:[#allocation9 + $0x10] ss:$8 sps:$4 sm:$0xff]   ;;  %2527 = vmatprep.subr.bf16.mxu1 %v7865_v14  ;;  %v13756_v14 = vld [vmem:[#allocation21_spill] sm:$0xff] }
 0x266   : > { %v1504_v53 = vpop.xlane.xlu1 %1503  ;;  %13754 = vst [vmem:[#allocation49_spill] sm:$0xff] %v9492_v55  ;;  %v9495_v43 = vadd.f32 %v9431_v54, %v1909_v46  ;;  %v1906_v60 = vmul.f32 %v9418_v25, %v1831_v0  ;;  %v7868_v46 = vld [vmem:[#allocation9 + $0x24] ss:$8 sps:$4 sm:$0xff]   ;;  %v9511_v37 = vadd.f32 %v9428_v10, %v1908_v34 }
 0x267   : > { %v8005_v18 = vpop.eup %8004  ;;  %8010 = vrsqrt.f32 %v1770_v56  ;;  %v1643_v58 = vsub.f32 %v1579_v17, %v1611_v2  ;;  %v1580_v57 = vmul.f32 0.00390625, %v1504_v53  ;;  %v1712_v56 = vsub.f32 %v9032_v20, %v9435_v12 }
 0x268   : > { %13755 = vst [vmem:[#allocation50_spill] sm:$0xff] %v9495_v43  ;;  %v1314_v44 = vpop.xlane.xlu0 %1313  ;;  %v2044_v8 = vpack.c.bf16 %v9495_v43, %v9492_v55  ;;  %v1836_v22 = vmul.f32 %v8005_v18, %v1708_v26  ;;  %v9508_v53 = vadd.f32 %v9428_v10, %v1906_v60  ;;  %v1713_v43 = vsub.f32 %v13756_v14, %v9447_v31 }
 0x269   : > { %v8007_v62 = vpop.eup %8006  ;;  %v1675_v2 = vmax.f32 %v1643_v58, 0.0  ;;  %v1644_v0 = vsub.f32 %v1580_v57, %v1612_v6  ;;  %v9505_v38 = vmul.f32 0.00390625, %v1314_v44  ;;  %v13757_v6 = vsub.f32 %v9001_v51, %v9403_v27  ;;  %2528 = vmatpush1.bf16.msra.mxu1 %v7863_v7  ;;  %v7866_v57 = vld [vmem:[#allocation9 + $0x20] ss:$8 sps:$4 sm:$0xff]  }
 0x26a   : > { %v1317_v17 = vpop.xlane.xlu1 %1316  ;;  %2248 = vmatprep.mubr.bf16.mxu1 %v2044_v8  ;;  %v1838_v29 = vmul.f32 %v8007_v62, %v1710_v3  ;;  %v1911_v26 = vmul.f32 %v9421_v19, %v1836_v22  ;;  %v2043_v60 = vpack.c.bf16 %v9511_v37, %v9508_v53  ;;  %v1837_v34 = vmul.f32 %v8007_v62, %v1709_v4  ;;  %v7871_v22 = vld [vmem:[#allocation9 + $0x34] ss:$8 sps:$4 sm:$0xff]   ;;  %v13758_v27 = vld [vmem:[#allocation22_spill] sm:$0xff] }
 0x26b   : > { %v1771_v55 = vadd.f32 1e-05, %v1675_v2  ;;  %v1676_v20 = vmax.f32 %v1644_v0, 0.0  ;;  %v1835_v58 = vmul.f32 %v8005_v18, %v13757_v6  ;;  %v9519_v44 = vmul.f32 0.00390625, %v1317_v17  ;;  %2529 = vmatprep.subr.bf16.mxu1 %v7868_v46 }
 0x26c   : > { %v1507_v8 = vpop.xlane.xlu0 %1506  ;;  %v1913_v3 = vmul.f32 %v9421_v19, %v1838_v29  ;;  %v1613_v0 = vmul.f32 %v9505_v38, %v9505_v38  ;;  %v1714_v18 = vsub.f32 %v13758_v27, %v9447_v31  ;;  %2249 = vmatmul.mubr.bf16.gmra.mrb[4].mxu1 %v2043_v60  ;;  %v9531_v14 = vadd.f32 %v9431_v54, %v1911_v26 }
 0x26d   : > { %8012 = vrsqrt.f32 %v1771_v55  ;;  %v1772_v2 = vadd.f32 1e-05, %v1676_v20  ;;  %v1581_v51 = vmul.f32 0.00390625, %v1507_v8  ;;  %v1614_v7 = vmul.f32 %v9519_v44, %v9519_v44  ;;  %2530 = vmatpush1.bf16.msra.mxu1 %v7866_v57  ;;  %v7869_v20 = vld [vmem:[#allocation9 + $0x30] ss:$8 sps:$4 sm:$0xff]  }
 0x26e   : > { %v1510_v17 = vpop.xlane.xlu1 %1509  ;;  %13759 = vst [vmem:[#allocation21_spill] sm:$0xff] %v9531_v14  ;;  %v9534_v62 = vadd.f32 %v9431_v54, %v1913_v3  ;;  %v1910_v29 = vmul.f32 %v9418_v25, %v1835_v58  ;;  %v1912_v26 = vmul.f32 %v9418_v25, %v1837_v34  ;;  %2531 = vmatprep.subr.bf16.mxu1 %v7871_v22  ;;  %v7874_v3 = vld [vmem:[#allocation9 + $0x44] ss:$8 sps:$4 sm:$0xff]  }
 0x26f   : > { %v8009_v4 = vpop.eup %8008  ;;  %8014 = vrsqrt.f32 %v1772_v2  ;;  %v1645_v55 = vsub.f32 %v1581_v51, %v1613_v0  ;;  %v1582_v46 = vmul.f32 0.00390625, %v1510_v17  ;;  %v1716_v2 = vsub.f32 %v9060_v45, %v9467_v39  ;;  %v13761_v22 = vld [vmem:[#allocation23_spill] sm:$0xff] }
 0x270   : > { %13760 = vst [vmem:[#allocation22_spill] sm:$0xff] %v9534_v62  ;;  %v1320_v6 = vpop.xlane.xlu0 %1319  ;;  %v2046_v60 = vpack.c.bf16 %v9534_v62, %v9531_v14  ;;  %v1840_v8 = vmul.f32 %v8009_v4, %v1712_v56  ;;  %v9547_v17 = vadd.f32 %v9428_v10, %v1910_v29  ;;  %v9550_v31 = vadd.f32 %v9428_v10, %v1912_v26 }
 0x271   : > { %v8011_v27 = vpop.eup %8010  ;;  %v1677_v0 = vmax.f32 %v1645_v55, 0.0  ;;  %v1646_v58 = vsub.f32 %v1582_v46, %v1614_v7  ;;  %v9544_v57 = vmul.f32 0.00390625, %v1320_v6  ;;  %v1717_v62 = vsub.f32 %v13761_v22, %v9480_v47  ;;  %2532 = vmatpush1.bf16.msra.mxu1 %v7869_v20  ;;  %v7872_v46 = vld [vmem:[#allocation9 + $0x40] ss:$8 sps:$4 sm:$0xff]  }
 0x272   : > { %v1323_v51 = vpop.xlane.xlu1 %1322  ;;  %2256 = vmatprep.mubr.bf16.mxu1 %v2046_v60  ;;  %v1842_v34 = vmul.f32 %v8011_v27, %v1714_v18  ;;  %v1915_v56 = vmul.f32 %v9421_v19, %v1840_v8  ;;  %v13762_v7 = vsub.f32 %v9029_v36, %v9435_v12  ;;  %v2045_v29 = vpack.c.bf16 %v9550_v31, %v9547_v17  ;;  %v13763_v36 = vld [vmem:[#allocation24_spill] sm:$0xff] }
 0x273   : > { %v1773_v14 = vadd.f32 1e-05, %v1677_v0  ;;  %v1678_v45 = vmax.f32 %v1646_v58, 0.0  ;;  %v9558_v6 = vmul.f32 0.00390625, %v1323_v51  ;;  %v1841_v26 = vmul.f32 %v8011_v27, %v1713_v43  ;;  %2533 = vmatprep.subr.bf16.mxu1 %v7874_v3 }
 0x274   : > { %v1839_v55 = vmul.f32 %v8009_v4, %v13762_v7  ;;  %v1513_v60 = vpop.xlane.xlu0 %1512  ;;  %v1917_v18 = vmul.f32 %v9421_v19, %v1842_v34  ;;  %v1615_v0 = vmul.f32 %v9544_v57, %v9544_v57  ;;  %v1718_v12 = vsub.f32 %v13763_v36, %v9480_v47  ;;  %2257 = vmatmul.mubr.bf16.gmra.mrb[8].mxu1 %v2045_v29 }
 0x275   : > { %8016 = vrsqrt.f32 %v1773_v14  ;;  %v1774_v8 = vadd.f32 1e-05, %v1678_v45  ;;  %v1583_v58 = vmul.f32 0.00390625, %v1513_v60  ;;  %v1616_v4 = vmul.f32 %v9558_v6, %v9558_v6  ;;  %2534 = vmatpush1.bf16.msra.mxu1 %v7872_v46 }
 0x276   : > { %v1516_v20 = vpop.xlane.xlu1 %1515  ;;  %v9570_v51 = vadd.f32 %v9431_v54, %v1915_v56  ;;  %v9573_v43 = vadd.f32 %v9431_v54, %v1917_v18  ;;  %v1914_v34 = vmul.f32 %v9418_v25, %v1839_v55  ;;  %v1719_v47 = vsub.f32 %v9085_v11, %v9505_v38 }
 0x277   : > { %v8013_v14 = vpop.eup %8012  ;;  %8018 = vrsqrt.f32 %v1774_v8  ;;  %v1647_v3 = vsub.f32 %v1583_v58, %v1615_v0  ;;  %v1584_v27 = vmul.f32 0.00390625, %v1516_v20  ;;  %v1916_v56 = vmul.f32 %v9418_v25, %v1841_v26 }
 0x278   : > { %v1326_v22 = vpop.xlane.xlu0 %1325  ;;  %v2048_v45 = vpack.c.bf16 %v9573_v43, %v9570_v51  ;;  %v1844_v7 = vmul.f32 %v8013_v14, %v1716_v2  ;;  %v1720_v60 = vsub.f32 %v9088_v28, %v9505_v38  ;;  %v9586_v46 = vadd.f32 %v9428_v10, %v1914_v34  ;;  %v13764_v2 = vld [vmem:[#allocation25_spill] sm:$0xff] }
 0x279   : > { %v8015_v29 = vpop.eup %8014  ;;  %v1679_v18 = vmax.f32 %v1647_v3, 0.0  ;;  %v1648_v8 = vsub.f32 %v1584_v27, %v1616_v4  ;;  %v9583_v0 = vmul.f32 0.00390625, %v1326_v22  ;;  %v9589_v11 = vadd.f32 %v9428_v10, %v1916_v56 }
 0x27a   : > { %v1329_v55 = vpop.xlane.xlu1 %1328  ;;  %2264 = vmatprep.mubr.bf16.mxu1 %v2048_v45  ;;  %v1846_v58 = vmul.f32 %v8015_v29, %v1718_v12  ;;  %v1919_v26 = vmul.f32 %v9421_v19, %v1844_v7  ;;  %v1721_v36 = vsub.f32 %v13764_v2, %v9519_v44  ;;  %v13765_v38 = vsub.f32 %v9057_v41, %v9467_v39 }
 0x27b   : > { %v1775_v20 = vadd.f32 1e-05, %v1679_v18  ;;  %v1680_v28 = vmax.f32 %v1648_v8, 0.0  ;;  %v9597_v3 = vmul.f32 0.00390625, %v1329_v55  ;;  %v2047_v27 = vpack.c.bf16 %v9589_v11, %v9586_v46  ;;  %v13766_v18 = vld [vmem:[#allocation26_spill] sm:$0xff] }
 0x27c   : > { %v1843_v4 = vmul.f32 %v8013_v14, %v13765_v38  ;;  %v1519_v34 = vpop.xlane.xlu0 %1518  ;;  %v1921_v22 = vmul.f32 %v9421_v19, %v1846_v58  ;;  %v1845_v12 = vmul.f32 %v8015_v29, %v1717_v62  ;;  %v1617_v56 = vmul.f32 %v9583_v0, %v9583_v0 }
 0x27d   : > { %8020 = vrsqrt.f32 %v1775_v20  ;;  %v1776_v45 = vadd.f32 1e-05, %v1680_v28  ;;  %v1585_v7 = vmul.f32 0.00390625, %v1519_v34  ;;  %v1722_v8 = vsub.f32 %v13766_v18, %v9519_v44  ;;  %2265 = vmatmul.mubr.bf16.gmra.mrb[12].mxu1 %v2047_v27 }
 0x27e   : > { %v1618_v41 = vmul.f32 %v9597_v3, %v9597_v3  ;;  %v1522_v39 = vpop.xlane.xlu1 %1521  ;;  %v9609_v14 = vadd.f32 %v9431_v54, %v1919_v26  ;;  %v9612_v55 = vadd.f32 %v9431_v54, %v1921_v22  ;;  %v1918_v2 = vmul.f32 %v9418_v25, %v1843_v4 }
 0x27f   : > { %v8017_v62 = vpop.eup %8016  ;;  %8022 = vrsqrt.f32 %v1776_v45  ;;  %v1649_v29 = vsub.f32 %v1585_v7, %v1617_v56  ;;  %v1586_v58 = vmul.f32 0.00390625, %v1522_v39  ;;  %v1723_v44 = vsub.f32 %v9113_v16, %v9544_v57 }
 0x280   : > { %v1332_v20 = vpop.xlane.xlu0 %1331  ;;  %v2050_v28 = vpack.c.bf16 %v9612_v55, %v9609_v14  ;;  %v1920_v38 = vmul.f32 %v9418_v25, %v1845_v12  ;;  %v1848_v26 = vmul.f32 %v8017_v62, %v1720_v60  ;;  %v1724_v34 = vsub.f32 %v9116_v49, %v9544_v57 }
 0x281   : > { %v8019_v27 = vpop.eup %8018  ;;  %v1681_v22 = vmax.f32 %v1649_v29, 0.0  ;;  %v1650_v45 = vsub.f32 %v1586_v58, %v1618_v41  ;;  %v9622_v56 = vmul.f32 0.00390625, %v1332_v20  ;;  %v9625_v4 = vadd.f32 %v9428_v10, %v1918_v2 }
 0x282   : > { %v1335_v7 = vpop.xlane.xlu1 %1334  ;;  %2272 = vmatprep.mubr.bf16.mxu1 %v2050_v28  ;;  %v9628_v16 = vadd.f32 %v9428_v10, %v1920_v38  ;;  %v1850_v18 = vmul.f32 %v8019_v27, %v1722_v8  ;;  %v1923_v12 = vmul.f32 %v9421_v19, %v1848_v26  ;;  %v1725_v60 = vsub.f32 %v9119_v50, %v9558_v6  ;;  %v13767_v50 = vld [vmem:[#allocation27_spill] sm:$0xff] }
 0x283   : > { %v1777_v39 = vadd.f32 1e-05, %v1681_v22  ;;  %v1682_v49 = vmax.f32 %v1650_v45, 0.0  ;;  %v1847_v57 = vmul.f32 %v8017_v62, %v1719_v47  ;;  %v9633_v41 = vmul.f32 0.00390625, %v1335_v7 }
 0x284   : > { %v2049_v29 = vpack.c.bf16 %v9628_v16, %v9625_v4  ;;  %v1525_v58 = vpop.xlane.xlu0 %1524  ;;  %v1925_v2 = vmul.f32 %v9421_v19, %v1850_v18  ;;  %v1849_v20 = vmul.f32 %v8019_v27, %v1721_v36  ;;  %v1619_v8 = vmul.f32 %v9622_v56, %v9622_v56 }
 0x285   : > { %8024 = vrsqrt.f32 %v1777_v39  ;;  %v1778_v28 = vadd.f32 1e-05, %v1682_v49  ;;  %v1587_v38 = vmul.f32 0.00390625, %v1525_v58  ;;  %v1726_v26 = vsub.f32 %v13767_v50, %v9558_v6 }
 0x286   : > { %2273 = vmatmul.mubr.bf16.gmra.mrb[16].mxu1 %v2049_v29  ;;  %v1620_v47 = vmul.f32 %v9633_v41, %v9633_v41  ;;  %v1528_v62 = vpop.xlane.xlu1 %1527  ;;  %v9645_v22 = vadd.f32 %v9431_v54, %v1923_v12  ;;  %v9648_v45 = vadd.f32 %v9431_v54, %v1925_v2  ;;  %v1922_v18 = vmul.f32 %v9418_v25, %v1847_v57 }
 0x287   : > { %v8021_v36 = vpop.eup %8020  ;;  %8026 = vrsqrt.f32 %v1778_v28  ;;  %v1651_v27 = vsub.f32 %v1587_v38, %v1619_v8  ;;  %v1588_v7 = vmul.f32 0.00390625, %v1528_v62  ;;  %v1727_v6 = vsub.f32 %v9141_v35, %v9583_v0 }
 0x288   : > { %13768 = vst [vmem:[#allocation23_spill] sm:$0xff] %v9645_v22  ;;  %13769 = vst [vmem:[#allocation24_spill] sm:$0xff] %v9648_v45  ;;  %v1338_v39 = vpop.xlane.xlu0 %1337  ;;  %v2052_v49 = vpack.c.bf16 %v9648_v45, %v9645_v22  ;;  %v1924_v29 = vmul.f32 %v9418_v25, %v1849_v20  ;;  %v1852_v12 = vmul.f32 %v8021_v36, %v1724_v34  ;;  %v13770_v34 = vld [vmem:[#allocation28_spill] sm:$0xff] }
 0x289   : > { %v8023_v58 = vpop.eup %8022  ;;  %v1728_v2 = vsub.f32 %v9144_v40, %v9583_v0  ;;  %v1683_v50 = vmax.f32 %v1651_v27, 0.0  ;;  %v1652_v28 = vsub.f32 %v1588_v7, %v1620_v47  ;;  %v9658_v8 = vmul.f32 0.00390625, %v1338_v39 }
 0x28a   : > { %v1341_v38 = vpop.xlane.xlu1 %1340  ;;  %2280 = vmatprep.mubr.bf16.mxu1 %v2052_v49  ;;  %v9661_v57 = vadd.f32 %v9428_v10, %v1922_v18  ;;  %v9664_v35 = vadd.f32 %v9428_v10, %v1924_v29  ;;  %v1854_v62 = vmul.f32 %v8023_v58, %v1726_v26  ;;  %v1927_v20 = vmul.f32 %v9421_v19, %v1852_v12  ;;  %v13771_v12 = vld [vmem:[#allocation29_spill] sm:$0xff] }
 0x28b   : > { %v1729_v45 = vsub.f32 %v13770_v34, %v9597_v3  ;;  %v1779_v22 = vadd.f32 1e-05, %v1683_v50  ;;  %v1684_v40 = vmax.f32 %v1652_v28, 0.0  ;;  %v1851_v0 = vmul.f32 %v8021_v36, %v1723_v44 }
 0x28c   : > { %v9669_v47 = vmul.f32 0.00390625, %v1341_v38  ;;  %v2051_v27 = vpack.c.bf16 %v9664_v35, %v9661_v57  ;;  %v1531_v7 = vpop.xlane.xlu0 %1530  ;;  %v1929_v18 = vmul.f32 %v9421_v19, %v1854_v62  ;;  %v1853_v39 = vmul.f32 %v8023_v58, %v1725_v60 }
 0x28d   : > { %8028 = vrsqrt.f32 %v1779_v22  ;;  %v1780_v49 = vadd.f32 1e-05, %v1684_v40  ;;  %v1621_v26 = vmul.f32 %v9658_v8, %v9658_v8  ;;  %v1589_v29 = vmul.f32 0.00390625, %v1531_v7 }
 0x28e   : > { %v1730_v50 = vsub.f32 %v13771_v12, %v9597_v3  ;;  %2281 = vmatmul.mubr.bf16.gmra.mrb[20].mxu1 %v2051_v27  ;;  %v1622_v44 = vmul.f32 %v9669_v47, %v9669_v47  ;;  %v1534_v36 = vpop.xlane.xlu1 %1533  ;;  %v9681_v28 = vadd.f32 %v9431_v54, %v1927_v20  ;;  %v9684_v38 = vadd.f32 %v9431_v54, %v1929_v18 }
 0x28f   : > { %v8025_v60 = vpop.eup %8024  ;;  %8030 = vrsqrt.f32 %v1780_v49  ;;  %v1653_v22 = vsub.f32 %v1589_v29, %v1621_v26  ;;  %v1590_v58 = vmul.f32 0.00390625, %v1534_v36  ;;  %v1926_v62 = vmul.f32 %v9418_v25, %v1851_v0 }
 0x290   : > { %13772 = vst [vmem:[#allocation25_spill] sm:$0xff] %v9681_v28  ;;  %13773 = vst [vmem:[#allocation26_spill] sm:$0xff] %v9684_v38  ;;  %v1731_v3 = vsub.f32 %v9169_v33, %v9622_v56  ;;  %v1344_v34 = vpop.xlane.xlu0 %1343  ;;  %v2054_v40 = vpack.c.bf16 %v9684_v38, %v9681_v28  ;;  %v1928_v27 = vmul.f32 %v9418_v25, %v1853_v39 }
 0x291   : > { %v1856_v20 = vmul.f32 %v8025_v60, %v1728_v2  ;;  %v8027_v7 = vpop.eup %8026  ;;  %v1732_v18 = vsub.f32 %v9172_v32, %v9622_v56  ;;  %v1685_v12 = vmax.f32 %v1653_v22, 0.0  ;;  %v1654_v49 = vsub.f32 %v1590_v58, %v1622_v44  ;;  %v13774_v2 = vld [vmem:[#allocation30_spill] sm:$0xff] }
 0x292   : > { %v9694_v26 = vmul.f32 0.00390625, %v1344_v34  ;;  %v1347_v29 = vpop.xlane.xlu1 %1346  ;;  %2288 = vmatprep.mubr.bf16.mxu1 %v2054_v40  ;;  %v9697_v0 = vadd.f32 %v9428_v10, %v1926_v62  ;;  %v9700_v33 = vadd.f32 %v9428_v10, %v1928_v27  ;;  %v1858_v36 = vmul.f32 %v8027_v7, %v1730_v50 }
 0x293   : > { %v1931_v39 = vmul.f32 %v9421_v19, %v1856_v20  ;;  %v1733_v38 = vsub.f32 %v13774_v2, %v9633_v41  ;;  %v1781_v28 = vadd.f32 1e-05, %v1685_v12  ;;  %v1686_v32 = vmax.f32 %v1654_v49, 0.0  ;;  %v13775_v20 = vld [vmem:[#allocation31_spill] sm:$0xff] }
 0x294   : > { %v1855_v56 = vmul.f32 %v8025_v60, %v1727_v6  ;;  %v9705_v44 = vmul.f32 0.00390625, %v1347_v29  ;;  %v2053_v22 = vpack.c.bf16 %v9700_v33, %v9697_v0  ;;  %v1537_v58 = vpop.xlane.xlu0 %1536  ;;  %v1933_v62 = vmul.f32 %v9421_v19, %v1858_v36 }
 0x295   : > { %v1857_v34 = vmul.f32 %v8027_v7, %v1729_v45  ;;  %8032 = vrsqrt.f32 %v1781_v28  ;;  %v1782_v40 = vadd.f32 1e-05, %v1686_v32  ;;  %v1623_v50 = vmul.f32 %v9694_v26, %v9694_v26 }
 0x296   : > { %v1591_v27 = vmul.f32 0.00390625, %v1537_v58  ;;  %v1734_v12 = vsub.f32 %v13775_v20, %v9633_v41  ;;  %2289 = vmatmul.mubr.bf16.gmra.mrb[24].mxu1 %v2053_v22  ;;  %v1624_v6 = vmul.f32 %v9705_v44, %v9705_v44  ;;  %v1540_v60 = vpop.xlane.xlu1 %1539  ;;  %v9717_v49 = vadd.f32 %v9431_v54, %v1931_v39 }
 0x297   : > { %v9720_v29 = vadd.f32 %v9431_v54, %v1933_v62  ;;  %v8029_v45 = vpop.eup %8028  ;;  %8034 = vrsqrt.f32 %v1782_v40  ;;  %v1592_v7 = vmul.f32 0.00390625, %v1540_v60  ;;  %v1930_v36 = vmul.f32 %v9418_v25, %v1855_v56 }
 0x298   : > { %13776 = vst [vmem:[#allocation27_spill] sm:$0xff] %v9717_v49  ;;  %v1655_v28 = vsub.f32 %v1591_v27, %v1623_v50  ;;  %v1735_v41 = vsub.f32 %v9197_v15, %v9658_v8  ;;  %v1350_v2 = vpop.xlane.xlu0 %1349  ;;  %v1932_v22 = vmul.f32 %v9418_v25, %v1857_v34  ;;  %v1860_v39 = vmul.f32 %v8029_v45, %v1732_v18  ;;  %v13778_v18 = vld [vmem:[#allocation32_spill] sm:$0xff] }
 0x299   : > { %13777 = vst [vmem:[#allocation28_spill] sm:$0xff] %v9720_v29  ;;  %v2056_v32 = vpack.c.bf16 %v9720_v29, %v9717_v49  ;;  %v8031_v58 = vpop.eup %8030  ;;  %v1736_v62 = vsub.f32 %v9200_v59, %v9658_v8  ;;  %v1656_v40 = vsub.f32 %v1592_v7, %v1624_v6  ;;  %v9730_v50 = vmul.f32 0.00390625, %v1350_v2 }
 0x29a   : > { %v1687_v20 = vmax.f32 %v1655_v28, 0.0  ;;  %v1353_v27 = vpop.xlane.xlu1 %1352  ;;  %v9733_v56 = vadd.f32 %v9428_v10, %v1930_v36  ;;  %v9736_v15 = vadd.f32 %v9428_v10, %v1932_v22  ;;  %v1862_v60 = vmul.f32 %v8031_v58, %v1734_v12 }
 0x29b   : > { %2296 = vmatprep.mubr.bf16.mxu1 %v2056_v32  ;;  %v1935_v34 = vmul.f32 %v9421_v19, %v1860_v39  ;;  %v1737_v29 = vsub.f32 %v13778_v18, %v9669_v47  ;;  %v1688_v59 = vmax.f32 %v1656_v40, 0.0  ;;  %v1859_v8 = vmul.f32 %v8029_v45, %v1731_v3  ;;  %v13779_v39 = vld [vmem:[#allocation33_spill] sm:$0xff] }
 0x29c   : > { %v1783_v49 = vadd.f32 1e-05, %v1687_v20  ;;  %v9741_v6 = vmul.f32 0.00390625, %v1353_v27  ;;  %v2055_v28 = vpack.c.bf16 %v9736_v15, %v9733_v56  ;;  %v1543_v7 = vpop.xlane.xlu0 %1542  ;;  %v1937_v36 = vmul.f32 %v9421_v19, %v1862_v60 }
 0x29d   : > { %v1861_v2 = vmul.f32 %v8031_v58, %v1733_v38  ;;  %v1784_v32 = vadd.f32 1e-05, %v1688_v59  ;;  %v1625_v12 = vmul.f32 %v9730_v50, %v9730_v50  ;;  %v1593_v22 = vmul.f32 0.00390625, %v1543_v7 }
 0x29e   : > { %8036 = vrsqrt.f32 %v1783_v49  ;;  %v1738_v20 = vsub.f32 %v13779_v39, %v9669_v47  ;;  %2297 = vmatmul.mubr.bf16.gmra.mrb[28].mxu1 %v2055_v28  ;;  %v1626_v3 = vmul.f32 %v9741_v6, %v9741_v6  ;;  %v1546_v45 = vpop.xlane.xlu1 %1545  ;;  %v9753_v40 = vadd.f32 %v9431_v54, %v1935_v34 }
 0x29f   : > { %v9756_v27 = vadd.f32 %v9431_v54, %v1937_v36  ;;  %v8033_v38 = vpop.eup %8032  ;;  %8038 = vrsqrt.f32 %v1784_v32  ;;  %v1657_v49 = vsub.f32 %v1593_v22, %v1625_v12  ;;  %v1594_v58 = vmul.f32 0.00390625, %v1546_v45 }
 0x2a0   : > { %13780 = vst [vmem:[#allocation29_spill] sm:$0xff] %v9753_v40  ;;  %v1934_v60 = vmul.f32 %v9418_v25, %v1859_v8  ;;  %v1739_v47 = vsub.f32 %v9225_v42, %v9694_v26  ;;  %v1356_v18 = vpop.xlane.xlu0 %1355  ;;  %v1936_v28 = vmul.f32 %v9418_v25, %v1861_v2  ;;  %v1864_v34 = vmul.f32 %v8033_v38, %v1736_v62  ;;  %v13782_v62 = vld [vmem:[#allocation34_spill] sm:$0xff] }
 0x2a1   : > { %13781 = vst [vmem:[#allocation30_spill] sm:$0xff] %v9756_v27  ;;  %v2058_v59 = vpack.c.bf16 %v9756_v27, %v9753_v40  ;;  %v8035_v7 = vpop.eup %8034  ;;  %v1740_v36 = vsub.f32 %v9228_v48, %v9694_v26  ;;  %v1689_v39 = vmax.f32 %v1657_v49, 0.0  ;;  %v1658_v32 = vsub.f32 %v1594_v58, %v1626_v3 }
 0x2a2   : > { %v9766_v12 = vmul.f32 0.00390625, %v1356_v18  ;;  %v1359_v22 = vpop.xlane.xlu1 %1358  ;;  %v9769_v8 = vadd.f32 %v9428_v10, %v1934_v60  ;;  %v9772_v42 = vadd.f32 %v9428_v10, %v1936_v28  ;;  %v1866_v45 = vmul.f32 %v8035_v7, %v1738_v20 }
 0x2a3   : > { %2304 = vmatprep.mubr.bf16.mxu1 %v2058_v59  ;;  %v1939_v2 = vmul.f32 %v9421_v19, %v1864_v34  ;;  %v1741_v27 = vsub.f32 %v13782_v62, %v9705_v44  ;;  %v1785_v40 = vadd.f32 1e-05, %v1689_v39  ;;  %v1690_v48 = vmax.f32 %v1658_v32, 0.0  ;;  %v13783_v34 = vld [vmem:[#allocation35_spill] sm:$0xff] }
 0x2a4   : > { %v1863_v26 = vmul.f32 %v8033_v38, %v1735_v41  ;;  %v9777_v3 = vmul.f32 0.00390625, %v1359_v22  ;;  %v2057_v49 = vpack.c.bf16 %v9772_v42, %v9769_v8  ;;  %v1549_v58 = vpop.xlane.xlu0 %1548  ;;  %v1941_v60 = vmul.f32 %v9421_v19, %v1866_v45 }
 0x2a5   : > { %v1865_v18 = vmul.f32 %v8035_v7, %v1737_v29  ;;  %8040 = vrsqrt.f32 %v1785_v40  ;;  %v1786_v59 = vadd.f32 1e-05, %v1690_v48  ;;  %v1627_v20 = vmul.f32 %v9766_v12, %v9766_v12 }
 0x2a6   : > { %v1595_v28 = vmul.f32 0.00390625, %v1549_v58  ;;  %v1742_v39 = vsub.f32 %v13783_v34, %v9705_v44  ;;  %2305 = vmatmul.mubr.bf16.gmra.mrb[32].mxu1 %v2057_v49  ;;  %v1628_v41 = vmul.f32 %v9777_v3, %v9777_v3  ;;  %v1552_v38 = vpop.xlane.xlu1 %1551  ;;  %v9789_v32 = vadd.f32 %v9431_v54, %v1939_v2 }
 0x2a7   : > { %v9792_v22 = vadd.f32 %v9431_v54, %v1941_v60  ;;  %8042 = vrsqrt.f32 %v1786_v59  ;;  %v1596_v7 = vmul.f32 0.00390625, %v1552_v38  ;;  %v1938_v45 = vmul.f32 %v9418_v25, %v1863_v26 }
 0x2a8   : > { %13784 = vst [vmem:[#allocation31_spill] sm:$0xff] %v9789_v32  ;;  %v8037_v29 = vpop.eup %8036  ;;  %v1659_v40 = vsub.f32 %v1595_v28, %v1627_v20  ;;  %v1743_v44 = vsub.f32 %v9253_v61, %v9730_v50  ;;  %v1362_v62 = vpop.xlane.xlu0 %1361  ;;  %v1940_v49 = vmul.f32 %v9418_v25, %v1865_v18  ;;  %v1744_v60 = vsub.f32 %v9256_v63, %v9730_v50 }
 0x2a9   : > { %13785 = vst [vmem:[#allocation32_spill] sm:$0xff] %v9792_v22  ;;  %v2060_v48 = vpack.c.bf16 %v9792_v22, %v9789_v32  ;;  %v1868_v2 = vmul.f32 %v8037_v29, %v1740_v36  ;;  %v8039_v58 = vpop.eup %8038  ;;  %v1660_v59 = vsub.f32 %v1596_v7, %v1628_v41  ;;  %v9802_v20 = vmul.f32 0.00390625, %v1362_v62  ;;  %v13786_v36 = vld [vmem:[#allocation36_spill] sm:$0xff] }
 0x2aa   : > { %v1691_v34 = vmax.f32 %v1659_v40, 0.0  ;;  %v1365_v28 = vpop.xlane.xlu1 %1364  ;;  %v9805_v26 = vadd.f32 %v9428_v10, %v1938_v45  ;;  %v9808_v61 = vadd.f32 %v9428_v10, %v1940_v49  ;;  %v1870_v38 = vmul.f32 %v8039_v58, %v1742_v39 }
 0x2ab   : > { %2312 = vmatprep.mubr.bf16.mxu1 %v2060_v48  ;;  %v1943_v18 = vmul.f32 %v9421_v19, %v1868_v2  ;;  %v1745_v22 = vsub.f32 %v13786_v36, %v9741_v6  ;;  %v1692_v63 = vmax.f32 %v1660_v59, 0.0  ;;  %v1867_v50 = vmul.f32 %v8037_v29, %v1739_v47  ;;  %v13787_v2 = vld [vmem:[#allocation37_spill] sm:$0xff] }
 0x2ac   : > { %v1787_v32 = vadd.f32 1e-05, %v1691_v34  ;;  %v9813_v41 = vmul.f32 0.00390625, %v1365_v28  ;;  %v2059_v40 = vpack.c.bf16 %v9808_v61, %v9805_v26  ;;  %v1555_v7 = vpop.xlane.xlu0 %1554  ;;  %v1945_v45 = vmul.f32 %v9421_v19, %v1870_v38 }
 0x2ad   : > { %v1869_v62 = vmul.f32 %v8039_v58, %v1741_v27  ;;  %v1788_v48 = vadd.f32 1e-05, %v1692_v63  ;;  %v1629_v39 = vmul.f32 %v9802_v20, %v9802_v20  ;;  %v1597_v49 = vmul.f32 0.00390625, %v1555_v7 }
 0x2ae   : > { %8044 = vrsqrt.f32 %v1787_v32  ;;  %v1746_v34 = vsub.f32 %v13787_v2, %v9741_v6  ;;  %2313 = vmatmul.mubr.bf16.gmra.mrb[36].mxu1 %v2059_v40  ;;  %v1630_v47 = vmul.f32 %v9813_v41, %v9813_v41  ;;  %v1558_v29 = vpop.xlane.xlu1 %1557  ;;  %v9825_v59 = vadd.f32 %v9431_v54, %v1943_v18 }
 0x2af   : > { %v9828_v28 = vadd.f32 %v9431_v54, %v1945_v45  ;;  %v8041_v27 = vpop.eup %8040  ;;  %8046 = vrsqrt.f32 %v1788_v48  ;;  %v1661_v32 = vsub.f32 %v1597_v49, %v1629_v39  ;;  %v1598_v58 = vmul.f32 0.00390625, %v1558_v29 }
 0x2b0   : > { %13788 = vst [vmem:[#allocation33_spill] sm:$0xff] %v9825_v59  ;;  %v1942_v38 = vmul.f32 %v9418_v25, %v1867_v50  ;;  %v1747_v6 = vsub.f32 %v9281_v1, %v9766_v12  ;;  %v1368_v36 = vpop.xlane.xlu0 %1367  ;;  %v1944_v40 = vmul.f32 %v9418_v25, %v1869_v62  ;;  %v1872_v18 = vmul.f32 %v8041_v27, %v1744_v60  ;;  %v13790_v60 = vld [vmem:[#allocation38_spill] sm:$0xff] }
 0x2b1   : > { %13789 = vst [vmem:[#allocation34_spill] sm:$0xff] %v9828_v28  ;;  %v2062_v63 = vpack.c.bf16 %v9828_v28, %v9825_v59  ;;  %v8043_v7 = vpop.eup %8042  ;;  %v1748_v45 = vsub.f32 %v9284_v24, %v9766_v12  ;;  %v1693_v2 = vmax.f32 %v1661_v32, 0.0  ;;  %v1662_v48 = vsub.f32 %v1598_v58, %v1630_v47 }
 0x2b2   : > { %v9838_v39 = vmul.f32 0.00390625, %v1368_v36  ;;  %v1371_v49 = vpop.xlane.xlu1 %1370  ;;  %v9841_v50 = vadd.f32 %v9428_v10, %v1942_v38  ;;  %v9844_v1 = vadd.f32 %v9428_v10, %v1944_v40  ;;  %v1874_v29 = vmul.f32 %v8043_v7, %v1746_v34 }
 0x2b3   : > { %2320 = vmatprep.mubr.bf16.mxu1 %v2062_v63  ;;  %v1947_v62 = vmul.f32 %v9421_v19, %v1872_v18  ;;  %v1749_v28 = vsub.f32 %v13790_v60, %v9777_v3  ;;  %v1789_v59 = vadd.f32 1e-05, %v1693_v2  ;;  %v1694_v24 = vmax.f32 %v1662_v48, 0.0  ;;  %v13791_v18 = vld [vmem:[#allocation39_spill] sm:$0xff] }
 0x2b4   : > { %v1871_v12 = vmul.f32 %v8041_v27, %v1743_v44  ;;  %v9849_v47 = vmul.f32 0.00390625, %v1371_v49  ;;  %v2061_v32 = vpack.c.bf16 %v9844_v1, %v9841_v50  ;;  %v1561_v58 = vpop.xlane.xlu0 %1560  ;;  %v1949_v38 = vmul.f32 %v9421_v19, %v1874_v29 }
 0x2b5   : > { %v1873_v36 = vmul.f32 %v8043_v7, %v1745_v22  ;;  %8048 = vrsqrt.f32 %v1789_v59  ;;  %v1790_v63 = vadd.f32 1e-05, %v1694_v24  ;;  %v1631_v34 = vmul.f32 %v9838_v39, %v9838_v39 }
 0x2b6   : > { %v1599_v40 = vmul.f32 0.00390625, %v1561_v58  ;;  %v1750_v2 = vsub.f32 %v13791_v18, %v9777_v3  ;;  %2321 = vmatmul.mubr.bf16.gmra.mrb[40].mxu1 %v2061_v32  ;;  %v1632_v44 = vmul.f32 %v9849_v47, %v9849_v47  ;;  %v1564_v27 = vpop.xlane.xlu1 %1563  ;;  %v9861_v48 = vadd.f32 %v9431_v54, %v1947_v62 }
 0x2b7   : > { %v9864_v49 = vadd.f32 %v9431_v54, %v1949_v38  ;;  %8050 = vrsqrt.f32 %v1790_v63  ;;  %v1600_v7 = vmul.f32 0.00390625, %v1564_v27  ;;  %v1946_v29 = vmul.f32 %v9418_v25, %v1871_v12  ;;  %v7877_v12 = vld [vmem:[#allocation9 + $0x54] ss:$8 sps:$4 sm:$0xff]  }
 0x2b8   : > { %13792 = vst [vmem:[#allocation35_spill] sm:$0xff] %v9861_v48  ;;  %v8045_v22 = vpop.eup %8044  ;;  %v1663_v59 = vsub.f32 %v1599_v40, %v1631_v34  ;;  %v1751_v3 = vsub.f32 %v9309_v5, %v9802_v20  ;;  %v1374_v60 = vpop.xlane.xlu0 %1373  ;;  %v1948_v32 = vmul.f32 %v9418_v25, %v1873_v36  ;;  %v1752_v38 = vsub.f32 %v9312_v52, %v9802_v20  ;;  %v7875_v40 = vld [vmem:[#allocation9 + $0x50] ss:$8 sps:$4 sm:$0xff]  }
 0x2b9   : > { %13793 = vst [vmem:[#allocation36_spill] sm:$0xff] %v9864_v49  ;;  %v2064_v24 = vpack.c.bf16 %v9864_v49, %v9861_v48  ;;  %v1876_v62 = vmul.f32 %v8045_v22, %v1748_v45  ;;  %v8047_v58 = vpop.eup %8046  ;;  %v1664_v63 = vsub.f32 %v1600_v7, %v1632_v44  ;;  %v9874_v34 = vmul.f32 0.00390625, %v1374_v60  ;;  %v13796_v48 = vld [vmem:[#allocation40_spill] sm:$0xff]  ;;  %2535 = vmatprep.subr.bf16.mxu1 %v7877_v12 }
 0x2ba   : > { %v1695_v18 = vmax.f32 %v1663_v59, 0.0  ;;  %v1377_v27 = vpop.xlane.xlu1 %1376  ;;  %v9877_v5 = vadd.f32 %v9428_v10, %v1946_v29  ;;  %v9880_v49 = vadd.f32 %v9428_v10, %v1948_v32  ;;  %v1878_v36 = vmul.f32 %v8047_v58, %v1750_v2  ;;  %2536 = vmatpush1.bf16.msra.mxu1 %v7875_v40 }
 0x2bb   : > { %2328 = vmatprep.mubr.bf16.mxu1 %v2064_v24  ;;  %v1951_v45 = vmul.f32 %v9421_v19, %v1876_v62  ;;  %v1753_v52 = vsub.f32 %v13796_v48, %v9813_v41  ;;  %v1696_v44 = vmax.f32 %v1664_v63, 0.0  ;;  %v1875_v59 = vmul.f32 %v8045_v22, %v1747_v6  ;;  %v13797_v6 = vld [vmem:[#allocation41_spill] sm:$0xff] }
 0x2bc   : > { %13794 = vst [vmem:[#allocation37_spill] sm:$0xff] %v9877_v5  ;;  %13795 = vst [vmem:[#allocation38_spill] sm:$0xff] %v9880_v49  ;;  %v1791_v20 = vadd.f32 1e-05, %v1695_v18  ;;  %v9885_v7 = vmul.f32 0.00390625, %v1377_v27  ;;  %v2063_v60 = vpack.c.bf16 %v9880_v49, %v9877_v5  ;;  %v1567_v29 = vpop.xlane.xlu0 %1566  ;;  %v1953_v24 = vmul.f32 %v9421_v19, %v1878_v36 }
 0x2bd   : > { %v1877_v32 = vmul.f32 %v8047_v58, %v1749_v28  ;;  %v1792_v2 = vadd.f32 1e-05, %v1696_v44  ;;  %v1633_v62 = vmul.f32 %v9874_v34, %v9874_v34  ;;  %v1601_v48 = vmul.f32 0.00390625, %v1567_v29  ;;  %v7880_v18 = vld [vmem:[#allocation9 + $0x64] ss:$8 sps:$4 sm:$0xff]  }
 0x2be   : > { %8052 = vrsqrt.f32 %v1791_v20  ;;  %v1754_v22 = vsub.f32 %v13797_v6, %v9813_v41  ;;  %2329 = vmatmul.mubr.bf16.gmra.mrb[44].mxu1 %v2063_v60  ;;  %v1634_v63 = vmul.f32 %v9885_v7, %v9885_v7  ;;  %v1570_v12 = vpop.xlane.xlu1 %1569  ;;  %v9897_v27 = vadd.f32 %v9431_v54, %v1951_v45  ;;  %v7878_v58 = vld [vmem:[#allocation9 + $0x60] ss:$8 sps:$4 sm:$0xff]   ;;  %2537 = vmatprep.subr.bf16.mxu1 %v7880_v18 }
 0x2bf   : > { %v9900_v28 = vadd.f32 %v9431_v54, %v1953_v24  ;;  %v8049_v40 = vpop.eup %8048  ;;  %8054 = vrsqrt.f32 %v1792_v2  ;;  %v1665_v36 = vsub.f32 %v1601_v48, %v1633_v62  ;;  %v1602_v20 = vmul.f32 0.00390625, %v1570_v12  ;;  %2538 = vmatpush1.bf16.msra.mxu1 %v7878_v58  ;;  %v7883_v2 = vld [vmem:[#allocation9 + $0x74] ss:$8 sps:$4 sm:$0xff]   ;;  %v7881_v12 = vld [vmem:[#allocation9 + $0x70] ss:$8 sps:$4 sm:$0xff]  }
 0x2c0   : > { %v1950_v44 = vmul.f32 %v9418_v25, %v1875_v59  ;;  %v1952_v60 = vmul.f32 %v9418_v25, %v1877_v32  ;;  %v1880_v29 = vmul.f32 %v8049_v40, %v1752_v38  ;;  %v1879_v6 = vmul.f32 %v8049_v40, %v1751_v3  ;;  %2539 = vmatprep.subr.bf16.mxu1 %v7883_v2 }
 0x2c1   : > { %v2066_v41 = vpack.c.bf16 %v9900_v28, %v9897_v27  ;;  %v8051_v45 = vpop.eup %8050  ;;  %v1697_v49 = vmax.f32 %v1665_v36, 0.0  ;;  %v1666_v24 = vsub.f32 %v1602_v20, %v1634_v63 }
 0x2c2   : > { %v9907_v5 = vadd.f32 %v9428_v10, %v1950_v44  ;;  %v9910_v62 = vadd.f32 %v9428_v10, %v1952_v60  ;;  %v1882_v59 = vmul.f32 %v8051_v45, %v1754_v22  ;;  %v1955_v48 = vmul.f32 %v9421_v19, %v1880_v29  ;;  %v13798_v60 = vld [vmem:[#allocation42_spill] sm:$0xff] }
 0x2c3   : > { %2336 = vmatprep.mubr.bf16.mxu1 %v2066_v41  ;;  %v1881_v18 = vmul.f32 %v8051_v45, %v1753_v52  ;;  %v1793_v32 = vadd.f32 1e-05, %v1697_v49  ;;  %v1698_v38 = vmax.f32 %v1666_v24, 0.0  ;;  %v1954_v58 = vmul.f32 %v9418_v25, %v1879_v6  ;;  %2540 = vmatpush1.bf16.msra.mxu1 %v7881_v12 }
 0x2c4   : > { %v2065_v3 = vpack.c.bf16 %v9910_v62, %v9907_v5  ;;  %v1957_v63 = vmul.f32 %v9421_v19, %v1882_v59  ;;  %v1755_v22 = vsub.f32 %v9337_v9, %v9838_v39  ;;  %v1756_v49 = vsub.f32 %v9340_v21, %v9838_v39  ;;  %v13799_v9 = vld [vmem:[#allocation43_spill] sm:$0xff] }
 0x2c5   : > { %v1956_v40 = vmul.f32 %v9418_v25, %v1881_v18  ;;  %8056 = vrsqrt.f32 %v1793_v32  ;;  %v1794_v36 = vadd.f32 1e-05, %v1698_v38  ;;  %v9923_v52 = vadd.f32 %v9431_v54, %v1955_v48 }
 0x2c6   : > { %2337 = vmatmul.mubr.bf16.gmra.mrb[48].mxu1 %v2065_v3  ;;  %v9926_v20 = vadd.f32 %v9431_v54, %v1957_v63  ;;  %v1757_v29 = vsub.f32 %v13798_v60, %v9849_v47  ;;  %v1758_v6 = vsub.f32 %v13799_v9, %v9849_v47  ;;  %v9938_v39 = vadd.f32 %v9428_v10, %v1954_v58  ;;  %v13800_v63 = vld [vmem:[#allocation44_spill] sm:$0xff] }
 0x2c7   : > { %v9929_v44 = vadd.f32 %v9428_v10, %v1956_v40  ;;  %8058 = vrsqrt.f32 %v1794_v36  ;;  %v1759_v3 = vsub.f32 %v9365_v13, %v9874_v34  ;;  %v1760_v58 = vsub.f32 %v13800_v63, %v9874_v34 }
 0x2c8   : > { %v8053_v41 = vpop.eup %8052  ;;  %v2068_v21 = vpack.c.bf16 %v9926_v20, %v9923_v52 }
 0x2c9   : > { %v1884_v45 = vmul.f32 %v8053_v41, %v1756_v49  ;;  %v1883_v24 = vmul.f32 %v8053_v41, %v1755_v22  ;;  %v8055_v2 = vpop.eup %8054  ;;  %v2067_v59 = vpack.c.bf16 %v9929_v44, %v9938_v39  ;;  %v13801_v41 = vld [vmem:[#allocation45_spill] sm:$0xff] }
 0x2ca   : > { %2344 = vmatprep.mubr.bf16.mxu1 %v2068_v21  ;;  %v1886_v48 = vmul.f32 %v8055_v2, %v1758_v6  ;;  %v1885_v12 = vmul.f32 %v8055_v2, %v1757_v29  ;;  %v1761_v60 = vsub.f32 %v13801_v41, %v9885_v7  ;;  %v13802_v29 = vld [vmem:[#allocation46_spill] sm:$0xff] }
 0x2cb   : > { %v1959_v18 = vmul.f32 %v9421_v19, %v1884_v45  ;;  %v1958_v32 = vmul.f32 %v9418_v25, %v1883_v24  ;;  %v1762_v13 = vsub.f32 %v13802_v29, %v9885_v7 }
 0x2cc   : > { %v1961_v47 = vmul.f32 %v9421_v19, %v1886_v48  ;;  %v1960_v38 = vmul.f32 %v9418_v25, %v1885_v12 }
 0x2cd   : > { %v9951_v40 = vadd.f32 %v9431_v54, %v1959_v18  ;;  %v9966_v9 = vadd.f32 %v9428_v10, %v1958_v32 }
 0x2ce   : > { %2345 = vmatmul.mubr.bf16.gmra.mrb[52].mxu1 %v2067_v59  ;;  %v9954_v22 = vadd.f32 %v9431_v54, %v1961_v47  ;;  %v9957_v36 = vadd.f32 %v9428_v10, %v1960_v38 }
 0x2cf   : > { %v8057_v49 = vpop.eup %8056 }
 0x2d0   : > { %v2070_v34 = vpack.c.bf16 %v9954_v22, %v9951_v40  ;;  %v1888_v6 = vmul.f32 %v8057_v49, %v1760_v58  ;;  %v1887_v21 = vmul.f32 %v8057_v49, %v1759_v3  ;;  %v2069_v24 = vpack.c.bf16 %v9957_v36, %v9966_v9 }
 0x2d1   : > { %v8059_v45 = vpop.eup %8058 }
 0x2d2   : > { %2352 = vmatprep.mubr.bf16.mxu1 %v2070_v34  ;;  %v1890_v2 = vmul.f32 %v8059_v45, %v1762_v13  ;;  %v1963_v59 = vmul.f32 %v9421_v19, %v1888_v6  ;;  %v1889_v48 = vmul.f32 %v8059_v45, %v1761_v60  ;;  %v1962_v7 = vmul.f32 %v9418_v25, %v1887_v21 }
 0x2d4   : > { %v1965_v18 = vmul.f32 %v9421_v19, %v1890_v2  ;;  %v1964_v12 = vmul.f32 %v9418_v25, %v1889_v48  ;;  %v9975_v47 = vadd.f32 %v9431_v54, %v1963_v59  ;;  %v9986_v63 = vadd.f32 %v9428_v10, %v1962_v7 }
 0x2d5   : > { %v13530_v19 = vmov 0  }
 0x2d6   : > { %2353 = vmatmul.mubr.bf16.gmra.mrb[56].mxu1 %v2069_v24  ;;  %v9978_v32 = vadd.f32 %v9431_v54, %v1965_v18  ;;  %v9981_v38 = vadd.f32 %v9428_v10, %v1964_v12  ;;  %v9994_v54 = vld [vmem:[%s13452_s6] ss:$0 sm:$0xff] }
 0x2d8   : > { %v2072_v3 = vpack.c.bf16 %v9978_v32, %v9975_v47  ;;  %v2071_v25 = vpack.c.bf16 %v9981_v38, %v9986_v63 }
 0x2da   : > { %2360 = vmatprep.mubr.bf16.mxu1 %v2072_v3 }
 0x2de   : > { %2361 = vmatmul.mubr.bf16.gmra.mrb[60].mxu1 %v2071_v25 }
 0x2df   : > { %2557 = vmatprep.mubr.bf16.mxu1 %v13530_v19 }
 0x336   : > { %v7247_v58 = vpop.f32.mrb[0].mxu1 }
 0x337   : > { %v7248_v49 = vpop.f32.mrb[1].mxu1 }
 0x338   : > { %v7249_v41 = vadd.f32 %v7248_v49, %v7247_v58  ;;  %v7250_v60 = vpop.f32.mrb[2].mxu1 }
 0x339   : > { %v7251_v29 = vpop.f32.mrb[3].mxu1 }
 0x33a   : > { %v2243_v10 = vadd.f32 %v7249_v41, %v9994_v54  ;;  %v7252_v13 = vadd.f32 %v7251_v29, %v7250_v60 }
 0x33c   : > { %v2246_v34 = vadd.f32 %v7252_v13, %v9994_v54  ;;  %v2369_v6 = vmax.f32 %v2243_v10, 0.0 }
 0x33e   : > { %v2370_v21 = vmax.f32 %v2246_v34, 0.0 }
 0x33f   : > { %v7253_v45 = vpop.f32.mrb[4].mxu1 }
 0x340   : > { %v7254_v24 = vpop.f32.mrb[5].mxu1  ;;  %v2401_v2 = vpack.c.bf16 %v2370_v21, %v2369_v6 }
 0x341   : > { %v7255_v59 = vadd.f32 %v7254_v24, %v7253_v45  ;;  %v7256_v48 = vpop.f32.mrb[6].mxu1 }
 0x342   : > { %v7257_v18 = vpop.f32.mrb[7].mxu1  ;;  %2558 = vmatmul.mubr.bf16.vlgmr.msra.gmra.mrb[64].mxu1 %v2401_v2 }
 0x343   : > { %v2251_v7 = vadd.f32 %v7255_v59, %v9994_v54  ;;  %v7258_v12 = vadd.f32 %v7257_v18, %v7256_v48  ;;  %2567 = vmatprep.mubr.bf16.mxu1 %v13530_v19 }
 0x345   : > { %v2254_v3 = vadd.f32 %v7258_v12, %v9994_v54  ;;  %v2371_v25 = vmax.f32 %v2251_v7, 0.0 }
 0x347   : > { %v2372_v58 = vmax.f32 %v2254_v3, 0.0  ;;  %v7259_v49 = vpop.f32.mrb[8].mxu1 }
 0x348   : > { %v7260_v41 = vpop.f32.mrb[9].mxu1 }
 0x349   : > { %v7261_v60 = vadd.f32 %v7260_v41, %v7259_v49  ;;  %v7262_v29 = vpop.f32.mrb[10].mxu1  ;;  %v2402_v10 = vpack.c.bf16 %v2372_v58, %v2371_v25 }
 0x34a   : > { %v7263_v13 = vpop.f32.mrb[11].mxu1 }
 0x34b   : > { %v2259_v34 = vadd.f32 %v7261_v60, %v9994_v54  ;;  %v7264_v6 = vadd.f32 %v7263_v13, %v7262_v29  ;;  %2568 = vmatmul.mubr.bf16.gmra.mrb[68].mxu1 %v2402_v10 }
 0x34c   : > { %2577 = vmatprep.mubr.bf16.mxu1 %v13530_v19 }
 0x34d   : > { %v2262_v21 = vadd.f32 %v7264_v6, %v9994_v54  ;;  %v2373_v45 = vmax.f32 %v2259_v34, 0.0 }
 0x34f   : > { %v2374_v24 = vmax.f32 %v2262_v21, 0.0 }
 0x350   : > { %v7265_v2 = vpop.f32.mrb[12].mxu1 }
 0x351   : > { %v7266_v59 = vpop.f32.mrb[13].mxu1  ;;  %v2403_v7 = vpack.c.bf16 %v2374_v24, %v2373_v45 }
 0x352   : > { %v7267_v48 = vadd.f32 %v7266_v59, %v7265_v2  ;;  %v7268_v18 = vpop.f32.mrb[14].mxu1 }
 0x353   : > { %v7269_v12 = vpop.f32.mrb[15].mxu1  ;;  %2578 = vmatmul.mubr.bf16.gmra.mrb[72].mxu1 %v2403_v7 }
 0x354   : > { %v2267_v3 = vadd.f32 %v7267_v48, %v9994_v54  ;;  %v7270_v25 = vadd.f32 %v7269_v12, %v7268_v18  ;;  %2587 = vmatprep.mubr.bf16.mxu1 %v13530_v19 }
 0x356   : > { %v2270_v58 = vadd.f32 %v7270_v25, %v9994_v54  ;;  %v2375_v49 = vmax.f32 %v2267_v3, 0.0 }
 0x358   : > { %v2376_v41 = vmax.f32 %v2270_v58, 0.0 }
 0x359   : > { %v7271_v60 = vpop.f32.mrb[16].mxu1 }
 0x35a   : > { %v7272_v29 = vpop.f32.mrb[17].mxu1  ;;  %v2404_v34 = vpack.c.bf16 %v2376_v41, %v2375_v49 }
 0x35b   : > { %v7273_v10 = vadd.f32 %v7272_v29, %v7271_v60  ;;  %v7274_v13 = vpop.f32.mrb[18].mxu1 }
 0x35c   : > { %v7275_v6 = vpop.f32.mrb[19].mxu1  ;;  %2588 = vmatmul.mubr.bf16.gmra.mrb[76].mxu1 %v2404_v34 }
 0x35d   : > { %v2275_v21 = vadd.f32 %v7273_v10, %v9994_v54  ;;  %v7276_v45 = vadd.f32 %v7275_v6, %v7274_v13  ;;  %2597 = vmatprep.mubr.bf16.mxu1 %v13530_v19 }
 0x35f   : > { %v2278_v24 = vadd.f32 %v7276_v45, %v9994_v54  ;;  %v2377_v2 = vmax.f32 %v2275_v21, 0.0 }
 0x361   : > { %v2378_v59 = vmax.f32 %v2278_v24, 0.0  ;;  %v7277_v48 = vpop.f32.mrb[20].mxu1 }
 0x362   : > { %v7278_v18 = vpop.f32.mrb[21].mxu1 }
 0x363   : > { %v7279_v7 = vadd.f32 %v7278_v18, %v7277_v48  ;;  %v7280_v12 = vpop.f32.mrb[22].mxu1  ;;  %v2405_v3 = vpack.c.bf16 %v2378_v59, %v2377_v2 }
 0x364   : > { %v7281_v25 = vpop.f32.mrb[23].mxu1 }
 0x365   : > { %v2283_v58 = vadd.f32 %v7279_v7, %v9994_v54  ;;  %v7282_v49 = vadd.f32 %v7281_v25, %v7280_v12  ;;  %2598 = vmatmul.mubr.bf16.gmra.mrb[80].mxu1 %v2405_v3 }
 0x366   : > { %2607 = vmatprep.mubr.bf16.mxu1 %v13530_v19 }
 0x367   : > { %v2286_v41 = vadd.f32 %v7282_v49, %v9994_v54  ;;  %v2379_v60 = vmax.f32 %v2283_v58, 0.0 }
 0x369   : > { %v2380_v29 = vmax.f32 %v2286_v41, 0.0  ;;  %v7283_v10 = vpop.f32.mrb[24].mxu1 }
 0x36a   : > { %v7284_v13 = vpop.f32.mrb[25].mxu1 }
 0x36b   : > { %v7285_v34 = vadd.f32 %v7284_v13, %v7283_v10  ;;  %v7286_v6 = vpop.f32.mrb[26].mxu1  ;;  %v2406_v21 = vpack.c.bf16 %v2380_v29, %v2379_v60 }
 0x36c   : > { %v7287_v45 = vpop.f32.mrb[27].mxu1 }
 0x36d   : > { %v2291_v24 = vadd.f32 %v7285_v34, %v9994_v54  ;;  %v7288_v2 = vadd.f32 %v7287_v45, %v7286_v6  ;;  %2608 = vmatmul.mubr.bf16.gmra.mrb[84].mxu1 %v2406_v21 }
 0x36e   : > { %2617 = vmatprep.mubr.bf16.mxu1 %v13530_v19 }
 0x36f   : > { %v2294_v59 = vadd.f32 %v7288_v2, %v9994_v54  ;;  %v2381_v48 = vmax.f32 %v2291_v24, 0.0 }
 0x371   : > { %v2382_v18 = vmax.f32 %v2294_v59, 0.0  ;;  %v7289_v7 = vpop.f32.mrb[28].mxu1 }
 0x372   : > { %v7290_v12 = vpop.f32.mrb[29].mxu1 }
 0x373   : > { %v7291_v3 = vadd.f32 %v7290_v12, %v7289_v7  ;;  %v7292_v25 = vpop.f32.mrb[30].mxu1  ;;  %v2407_v58 = vpack.c.bf16 %v2382_v18, %v2381_v48 }
 0x374   : > { %v7293_v49 = vpop.f32.mrb[31].mxu1 }
 0x375   : > { %v2299_v41 = vadd.f32 %v7291_v3, %v9994_v54  ;;  %v7294_v60 = vadd.f32 %v7293_v49, %v7292_v25  ;;  %2618 = vmatmul.mubr.bf16.gmra.mrb[88].mxu1 %v2407_v58 }
 0x376   : > { %2627 = vmatprep.mubr.bf16.mxu1 %v13530_v19 }
 0x377   : > { %v2302_v29 = vadd.f32 %v7294_v60, %v9994_v54  ;;  %v2383_v10 = vmax.f32 %v2299_v41, 0.0 }
 0x379   : > { %v2384_v13 = vmax.f32 %v2302_v29, 0.0  ;;  %v7295_v34 = vpop.f32.mrb[32].mxu1 }
 0x37a   : > { %v7296_v6 = vpop.f32.mrb[33].mxu1 }
 0x37b   : > { %v7297_v21 = vadd.f32 %v7296_v6, %v7295_v34  ;;  %v7298_v45 = vpop.f32.mrb[34].mxu1  ;;  %v2408_v24 = vpack.c.bf16 %v2384_v13, %v2383_v10 }
 0x37c   : > { %v7299_v2 = vpop.f32.mrb[35].mxu1 }
 0x37d   : > { %v2307_v59 = vadd.f32 %v7297_v21, %v9994_v54  ;;  %v7300_v48 = vadd.f32 %v7299_v2, %v7298_v45  ;;  %2628 = vmatmul.mubr.bf16.gmra.mrb[92].mxu1 %v2408_v24 }
 0x37e   : > { %2637 = vmatprep.mubr.bf16.mxu1 %v13530_v19 }
 0x37f   : > { %v2310_v18 = vadd.f32 %v7300_v48, %v9994_v54  ;;  %v2385_v7 = vmax.f32 %v2307_v59, 0.0 }
 0x381   : > { %v2386_v12 = vmax.f32 %v2310_v18, 0.0  ;;  %v7301_v3 = vpop.f32.mrb[36].mxu1 }
 0x382   : > { %v7302_v25 = vpop.f32.mrb[37].mxu1 }
 0x383   : > { %v7303_v58 = vadd.f32 %v7302_v25, %v7301_v3  ;;  %v7304_v49 = vpop.f32.mrb[38].mxu1  ;;  %v2409_v41 = vpack.c.bf16 %v2386_v12, %v2385_v7 }
 0x384   : > { %v7305_v60 = vpop.f32.mrb[39].mxu1 }
 0x385   : > { %v2315_v29 = vadd.f32 %v7303_v58, %v9994_v54  ;;  %v7306_v10 = vadd.f32 %v7305_v60, %v7304_v49  ;;  %2638 = vmatmul.mubr.bf16.gmra.mrb[96].mxu1 %v2409_v41 }
 0x386   : > { %2647 = vmatprep.mubr.bf16.mxu1 %v13530_v19 }
 0x387   : > { %v2318_v13 = vadd.f32 %v7306_v10, %v9994_v54  ;;  %v2387_v34 = vmax.f32 %v2315_v29, 0.0 }
 0x389   : > { %v2388_v6 = vmax.f32 %v2318_v13, 0.0  ;;  %v7307_v21 = vpop.f32.mrb[40].mxu1 }
 0x38a   : > { %v7308_v45 = vpop.f32.mrb[41].mxu1 }
 0x38b   : > { %v7309_v24 = vadd.f32 %v7308_v45, %v7307_v21  ;;  %v7310_v2 = vpop.f32.mrb[42].mxu1  ;;  %v2410_v59 = vpack.c.bf16 %v2388_v6, %v2387_v34 }
 0x38c   : > { %v7311_v48 = vpop.f32.mrb[43].mxu1 }
 0x38d   : > { %v2323_v18 = vadd.f32 %v7309_v24, %v9994_v54  ;;  %v7312_v7 = vadd.f32 %v7311_v48, %v7310_v2  ;;  %2648 = vmatmul.mubr.bf16.gmra.mrb[100].mxu1 %v2410_v59 }
 0x38e   : > { %2657 = vmatprep.mubr.bf16.mxu1 %v13530_v19 }
 0x38f   : > { %v2326_v12 = vadd.f32 %v7312_v7, %v9994_v54  ;;  %v2389_v3 = vmax.f32 %v2323_v18, 0.0 }
 0x391   : > { %v2390_v25 = vmax.f32 %v2326_v12, 0.0  ;;  %v7313_v58 = vpop.f32.mrb[44].mxu1 }
 0x392   : > { %v7314_v49 = vpop.f32.mrb[45].mxu1 }
 0x393   : > { %v7315_v41 = vadd.f32 %v7314_v49, %v7313_v58  ;;  %v7316_v60 = vpop.f32.mrb[46].mxu1  ;;  %v2411_v29 = vpack.c.bf16 %v2390_v25, %v2389_v3 }
 0x394   : > { %v7317_v10 = vpop.f32.mrb[47].mxu1 }
 0x395   : > { %v2331_v13 = vadd.f32 %v7315_v41, %v9994_v54  ;;  %v7318_v34 = vadd.f32 %v7317_v10, %v7316_v60  ;;  %2658 = vmatmul.mubr.bf16.gmra.mrb[104].mxu1 %v2411_v29 }
 0x396   : > { %2667 = vmatprep.mubr.bf16.mxu1 %v13530_v19 }
 0x397   : > { %v2334_v6 = vadd.f32 %v7318_v34, %v9994_v54  ;;  %v2391_v21 = vmax.f32 %v2331_v13, 0.0 }
 0x399   : > { %v2392_v45 = vmax.f32 %v2334_v6, 0.0  ;;  %v7319_v24 = vpop.f32.mrb[48].mxu1 }
 0x39a   : > { %v7320_v2 = vpop.f32.mrb[49].mxu1 }
 0x39b   : > { %v7321_v59 = vadd.f32 %v7320_v2, %v7319_v24  ;;  %v7322_v48 = vpop.f32.mrb[50].mxu1  ;;  %v2412_v18 = vpack.c.bf16 %v2392_v45, %v2391_v21 }
 0x39c   : > { %v7323_v7 = vpop.f32.mrb[51].mxu1 }
 0x39d   : > { %v2339_v12 = vadd.f32 %v7321_v59, %v9994_v54  ;;  %v7324_v3 = vadd.f32 %v7323_v7, %v7322_v48  ;;  %2668 = vmatmul.mubr.bf16.gmra.mrb[108].mxu1 %v2412_v18 }
 0x39e   : > { %2677 = vmatprep.mubr.bf16.mxu1 %v13530_v19 }
 0x39f   : > { %v2342_v25 = vadd.f32 %v7324_v3, %v9994_v54  ;;  %v2393_v58 = vmax.f32 %v2339_v12, 0.0 }
 0x3a1   : > { %v2394_v49 = vmax.f32 %v2342_v25, 0.0  ;;  %v7325_v41 = vpop.f32.mrb[52].mxu1 }
 0x3a2   : > { %v7326_v60 = vpop.f32.mrb[53].mxu1 }
 0x3a3   : > { %v7327_v29 = vadd.f32 %v7326_v60, %v7325_v41  ;;  %v7328_v10 = vpop.f32.mrb[54].mxu1  ;;  %v2413_v13 = vpack.c.bf16 %v2394_v49, %v2393_v58 }
 0x3a4   : > { %v7329_v34 = vpop.f32.mrb[55].mxu1 }
 0x3a5   : > { %v2347_v6 = vadd.f32 %v7327_v29, %v9994_v54  ;;  %v7330_v21 = vadd.f32 %v7329_v34, %v7328_v10  ;;  %2678 = vmatmul.mubr.bf16.gmra.mrb[112].mxu1 %v2413_v13 }
 0x3a6   : > { %2687 = vmatprep.mubr.bf16.mxu1 %v13530_v19 }
 0x3a7   : > { %v2350_v45 = vadd.f32 %v7330_v21, %v9994_v54  ;;  %v2395_v24 = vmax.f32 %v2347_v6, 0.0 }
 0x3a9   : > { %v2396_v2 = vmax.f32 %v2350_v45, 0.0  ;;  %v7331_v59 = vpop.f32.mrb[56].mxu1 }
 0x3aa   : > { %v7332_v48 = vpop.f32.mrb[57].mxu1 }
 0x3ab   : > { %v7333_v18 = vadd.f32 %v7332_v48, %v7331_v59  ;;  %v7334_v7 = vpop.f32.mrb[58].mxu1  ;;  %v2414_v12 = vpack.c.bf16 %v2396_v2, %v2395_v24 }
 0x3ac   : > { %v7335_v3 = vpop.f32.mrb[59].mxu1 }
 0x3ad   : > { %v2355_v25 = vadd.f32 %v7333_v18, %v9994_v54  ;;  %v7336_v58 = vadd.f32 %v7335_v3, %v7334_v7  ;;  %2688 = vmatmul.mubr.bf16.gmra.mrb[116].mxu1 %v2414_v12  ;;  %v7884_v7 = vld [vmem:[#allocation6 + $0x100] ss:$8 sps:$4 sm:$0xff]   ;;  %v7886_v12 = vld [vmem:[#allocation6 + $0x104] ss:$8 sps:$4 sm:$0xff]  }
 0x3ae   : > { %2697 = vmatprep.mubr.bf16.mxu1 %v13530_v19  ;;  %3780 = vmatprep.subr.bf16.mxu0 %v7886_v12  ;;  %v2433_v3 = vld [vmem:[%s13454_s8] sm:$0x3] }
 0x3af   : > { %v2358_v49 = vadd.f32 %v7336_v58, %v9994_v54  ;;  %v2397_v41 = vmax.f32 %v2355_v25, 0.0  ;;  %3781 = vmatpush1.bf16.msra.mxu0 %v7884_v7  ;;  %v7889_v25 = vld [vmem:[#allocation6 + $0x114] ss:$8 sps:$4 sm:$0xff]   ;;  %v13803_v58 = vld [vmem:[#allocation19_spill] sm:$0xff] }
 0x3b0   : > { %3782 = vmatprep.subr.bf16.mxu0 %v7889_v25 }
 0x3b1   : > { %v2398_v60 = vmax.f32 %v2358_v49, 0.0  ;;  %v7337_v29 = vpop.f32.mrb[60].mxu1  ;;  %v10047_v49 = vrot.slane %v2433_v3, %v13803_v58  ;;  %v13809_v58 = vld [vmem:[#allocation49_spill] sm:$0xff] }
 0x3b2   : > { %v7338_v10 = vpop.f32.mrb[61].mxu1 }
 0x3b3   : > { %v7339_v13 = vadd.f32 %v7338_v10, %v7337_v29  ;;  %v7340_v34 = vpop.f32.mrb[62].mxu1  ;;  %v2415_v6 = vpack.c.bf16 %v2398_v60, %v2397_v41  ;;  %v7887_v41 = vld [vmem:[#allocation6 + $0x110] ss:$8 sps:$4 sm:$0xff]   ;;  %v7890_v10 = vld [vmem:[#allocation6 + $0x120] ss:$8 sps:$4 sm:$0xff]  }
 0x3b4   : > { %v7341_v21 = vpop.f32.mrb[63].mxu1  ;;  %v13804_v60 = vld [vmem:[#allocation20_spill] sm:$0xff]  ;;  %3783 = vmatpush1.bf16.msra.mxu0 %v7887_v41  ;;  %v13807_v41 = vld [vmem:[#allocation47_spill] sm:$0xff] }
 0x3b5   : > { %v2363_v45 = vadd.f32 %v7339_v13, %v9994_v54  ;;  %v7342_v24 = vadd.f32 %v7341_v21, %v7340_v34  ;;  %2698 = vmatmul.mubr.bf16.gmra.mrb[120].mxu1 %v2415_v6  ;;  %v10050_v29 = vrot.slane %v2433_v3, %v13804_v60  ;;  %v13805_v3 = vld [vmem:[#allocation48_spill] sm:$0xff] }
 0x3b6   : > { %2707 = vmatprep.mubr.bf16.mxu1 %v13530_v19 }
 0x3b7   : > { %v2366_v2 = vadd.f32 %v7342_v24, %v9994_v54  ;;  %v2399_v59 = vmax.f32 %v2363_v45, 0.0  ;;  %v7892_v54 = vld [vmem:[#allocation6 + $0x124] ss:$8 sps:$4 sm:$0xff]   ;;  %v7895_v24 = vld [vmem:[#allocation6 + $0x134] ss:$8 sps:$4 sm:$0xff]  }
 0x3b8   : > { %3784 = vmatprep.subr.bf16.mxu0 %v7892_v54 }
 0x3b9   : > { %v2400_v48 = vmax.f32 %v2366_v2, 0.0  ;;  %3785 = vmatpush1.bf16.msra.mxu0 %v7890_v10 }
 0x3ba   : > { %3786 = vmatprep.subr.bf16.mxu0 %v7895_v24 }
 0x3bb   : > { %v2416_v18 = vpack.c.bf16 %v2400_v48, %v2399_v59 }
 0x3bd   : > { %2708 = vmatmul.mubr.bf16.gmra.mrb[124].mxu1 %v2416_v18  ;;  %v7893_v18 = vld [vmem:[#allocation6 + $0x130] ss:$8 sps:$4 sm:$0xff]  }
 0x3be   : > { %3787 = vmatpush1.bf16.msra.mxu0 %v7893_v18 }
 0x415   : > { %v2559_v13 = vpop.f32.mrb[64].mxu1 }
 0x416   : > { %v2560_v34 = vadd.f32 %v2559_v13, %v10047_v49  ;;  %v2561_v6 = vpop.f32.mrb[65].mxu1 }
 0x417   : > { %v2562_v21 = vadd.f32 %v2561_v6, %v10050_v29  ;;  %v2563_v45 = vpop.f32.mrb[66].mxu1 }
 0x418   : > { %v10055_v2 = vadd.f32 %v2560_v34, %v9475_v30  ;;  %v2564_v59 = vadd.f32 %v2563_v45, %v10047_v49  ;;  %v2565_v48 = vpop.f32.mrb[67].mxu1  ;;  %v7896_v34 = vld [vmem:[#allocation6 + $0x140] ss:$8 sps:$4 sm:$0xff]  }
 0x419   : > { %v10059_v7 = vadd.f32 %v2562_v21, %v9462_v23  ;;  %v2566_v12 = vadd.f32 %v2565_v48, %v10050_v29  ;;  %v7898_v23 = vld [vmem:[#allocation6 + $0x144] ss:$8 sps:$4 sm:$0xff]  }
 0x41a   : > { %v10063_v25 = vadd.f32 %v2564_v59, %v13805_v3  ;;  %v2912_v13 = vmul.f32 %v10055_v2, %v10055_v2  ;;  %3788 = vmatprep.subr.bf16.mxu0 %v7898_v23  ;;  %v7901_v59 = vld [vmem:[#allocation6 + $0x154] ss:$8 sps:$4 sm:$0xff]  }
 0x41b   : > { %v10066_v54 = vadd.f32 %v2566_v12, %v13807_v41  ;;  %v2784_v30 = vadd.f32 %v10059_v7, %v10055_v2  ;;  %v2913_v10 = vmul.f32 %v10059_v7, %v10059_v7  ;;  %3789 = vmatpush1.bf16.msra.mxu0 %v7896_v34  ;;  %v7902_v34 = vld [vmem:[#allocation6 + $0x160] ss:$8 sps:$4 sm:$0xff]  }
 0x41c   : > { %13806 = vst [vmem:[#allocation39_spill] sm:$0xff] %v10063_v25  ;;  %v2914_v45 = vmul.f32 %v10063_v25, %v10063_v25  ;;  %3790 = vmatprep.subr.bf16.mxu0 %v7901_v59  ;;  %v7907_v59 = vld [vmem:[#allocation6 + $0x174] ss:$8 sps:$4 sm:$0xff]  }
 0x41d   : > { %13808 = vst [vmem:[#allocation40_spill] sm:$0xff] %v10066_v54  ;;  %2785 = vadd.xlane.f32.xlu0 %v2784_v30  ;;  %v2787_v21 = vadd.f32 %v10066_v54, %v10063_v25  ;;  %v2915_v24 = vmul.f32 %v10066_v54, %v10066_v54  ;;  %v2976_v41 = vadd.f32 %v2913_v10, %v2912_v13  ;;  %v7899_v25 = vld [vmem:[#allocation6 + $0x150] ss:$8 sps:$4 sm:$0xff]   ;;  %v13811_v13 = vld [vmem:[#allocation50_spill] sm:$0xff] }
 0x41e   : > { %v2569_v6 = vpop.f32.mrb[68].mxu1 }
 0x41f   : > { %v2570_v48 = vadd.f32 %v2569_v6, %v10047_v49  ;;  %v2571_v12 = vpop.f32.mrb[69].mxu1  ;;  %2788 = vadd.xlane.f32.xlu1 %v2787_v21  ;;  %v2979_v6 = vadd.f32 %v2915_v24, %v2914_v45  ;;  %3791 = vmatpush1.bf16.msra.mxu0 %v7899_v25 }
 0x420   : > { %v2572_v3 = vadd.f32 %v2571_v12, %v10050_v29  ;;  %v2573_v18 = vpop.f32.mrb[70].mxu1  ;;  %v7904_v12 = vld [vmem:[#allocation6 + $0x164] ss:$8 sps:$4 sm:$0xff]  }
 0x421   : > { %v10083_v30 = vadd.f32 %v2570_v48, %v9508_v53  ;;  %v2574_v19 = vadd.f32 %v2573_v18, %v10047_v49  ;;  %v2575_v60 = vpop.f32.mrb[71].mxu1  ;;  %2977 = vadd.xlane.f32.xlu0 %v2976_v41  ;;  %3792 = vmatprep.subr.bf16.mxu0 %v7904_v12 }
 0x422   : > { %v10087_v54 = vadd.f32 %v2572_v3, %v13809_v58  ;;  %v2576_v23 = vadd.f32 %v2575_v60, %v10050_v29 }
 0x423   : > { %v10091_v21 = vadd.f32 %v2574_v19, %v9511_v37  ;;  %2980 = vadd.xlane.f32.xlu1 %v2979_v6  ;;  %v2916_v58 = vmul.f32 %v10083_v30, %v10083_v30  ;;  %3793 = vmatpush1.bf16.msra.mxu0 %v7902_v34 }
 0x424   : > { %v10094_v53 = vadd.f32 %v2576_v23, %v13811_v13  ;;  %v2790_v10 = vadd.f32 %v10087_v54, %v10083_v30  ;;  %v2917_v60 = vmul.f32 %v10087_v54, %v10087_v54  ;;  %3794 = vmatprep.subr.bf16.mxu0 %v7907_v59  ;;  %v7910_v59 = vld [vmem:[#allocation6 + $0x184] ss:$8 sps:$4 sm:$0xff]  }
 0x425   : > { %13810 = vst [vmem:[#allocation41_spill] sm:$0xff] %v10091_v21  ;;  %v2918_v19 = vmul.f32 %v10091_v21, %v10091_v21 }
 0x426   : > { %13812 = vst [vmem:[#allocation42_spill] sm:$0xff] %v10094_v53  ;;  %v2579_v45 = vpop.f32.mrb[72].mxu1  ;;  %2791 = vadd.xlane.f32.xlu0 %v2790_v10  ;;  %v2793_v37 = vadd.f32 %v10094_v53, %v10091_v21  ;;  %v2919_v24 = vmul.f32 %v10094_v53, %v10094_v53  ;;  %v2982_v41 = vadd.f32 %v2917_v60, %v2916_v58  ;;  %v7905_v10 = vld [vmem:[#allocation6 + $0x170] ss:$8 sps:$4 sm:$0xff]   ;;  %v13813_v21 = vld [vmem:[#allocation21_spill] sm:$0xff]  ;;  %v13814_v58 = vld [vmem:[#allocation22_spill] sm:$0xff] }
 0x427   : > { %v2580_v48 = vadd.f32 %v2579_v45, %v10047_v49  ;;  %v2581_v3 = vpop.f32.mrb[73].mxu1  ;;  %3795 = vmatpush1.bf16.msra.mxu0 %v7905_v10 }
 0x428   : > { %v2582_v18 = vadd.f32 %v2581_v3, %v10050_v29  ;;  %v2583_v25 = vpop.f32.mrb[74].mxu1  ;;  %2794 = vadd.xlane.f32.xlu1 %v2793_v37  ;;  %v2985_v45 = vadd.f32 %v2919_v24, %v2918_v19  ;;  %3796 = vmatprep.subr.bf16.mxu0 %v7910_v59  ;;  %v7916_v59 = vld [vmem:[#allocation6 + $0x1a4] ss:$8 sps:$4 sm:$0xff]  }
 0x429   : > { %v10111_v23 = vadd.f32 %v2580_v48, %v9547_v17  ;;  %v2584_v6 = vadd.f32 %v2583_v25, %v10047_v49  ;;  %v2585_v13 = vpop.f32.mrb[75].mxu1  ;;  %v7908_v25 = vld [vmem:[#allocation6 + $0x180] ss:$8 sps:$4 sm:$0xff]  }
 0x42a   : > { %v10115_v53 = vadd.f32 %v2582_v18, %v13813_v21  ;;  %v2586_v12 = vadd.f32 %v2585_v13, %v10050_v29  ;;  %2983 = vadd.xlane.f32.xlu0 %v2982_v41 }
 0x42b   : > { %v10119_v3 = vadd.f32 %v2584_v6, %v9550_v31  ;;  %v2920_v34 = vmul.f32 %v10111_v23, %v10111_v23  ;;  %3797 = vmatpush1.bf16.msra.mxu0 %v7908_v25 }
 0x42c   : > { %v10122_v60 = vadd.f32 %v2586_v12, %v13814_v58  ;;  %2986 = vadd.xlane.f32.xlu1 %v2985_v45  ;;  %v2796_v17 = vadd.f32 %v10115_v53, %v10111_v23  ;;  %v2921_v21 = vmul.f32 %v10115_v53, %v10115_v53 }
 0x42d   : > { %v2922_v19 = vmul.f32 %v10119_v3, %v10119_v3 }
 0x42e   : > { %13815 = vst [vmem:[#allocation43_spill] sm:$0xff] %v10122_v60  ;;  %2797 = vadd.xlane.f32.xlu0 %v2796_v17  ;;  %v2799_v31 = vadd.f32 %v10122_v60, %v10119_v3  ;;  %v2923_v24 = vmul.f32 %v10122_v60, %v10122_v60  ;;  %v2988_v13 = vadd.f32 %v2921_v21, %v2920_v34  ;;  %v7913_v60 = vld [vmem:[#allocation6 + $0x194] ss:$8 sps:$4 sm:$0xff]  }
 0x42f   : > { %v2589_v37 = vpop.f32.mrb[76].mxu1  ;;  %3798 = vmatprep.subr.bf16.mxu0 %v7913_v60 }
 0x430   : > { %v2590_v48 = vadd.f32 %v2589_v37, %v10047_v49  ;;  %v2591_v18 = vpop.f32.mrb[77].mxu1  ;;  %2800 = vadd.xlane.f32.xlu1 %v2799_v31  ;;  %v2991_v37 = vadd.f32 %v2923_v24, %v2922_v19 }
 0x431   : > { %v2592_v41 = vadd.f32 %v2591_v18, %v10050_v29  ;;  %v2593_v6 = vpop.f32.mrb[78].mxu1 }
 0x432   : > { %v10139_v10 = vadd.f32 %v2590_v48, %v9586_v46  ;;  %v2594_v12 = vadd.f32 %v2593_v6, %v10047_v49  ;;  %v2595_v45 = vpop.f32.mrb[79].mxu1  ;;  %2989 = vadd.xlane.f32.xlu0 %v2988_v13  ;;  %v7911_v46 = vld [vmem:[#allocation6 + $0x190] ss:$8 sps:$4 sm:$0xff]  }
 0x433   : > { %v10143_v58 = vadd.f32 %v2592_v41, %v9570_v51  ;;  %v2596_v17 = vadd.f32 %v2595_v45, %v10050_v29  ;;  %3799 = vmatpush1.bf16.msra.mxu0 %v7911_v46  ;;  %v7914_v41 = vld [vmem:[#allocation6 + $0x1a0] ss:$8 sps:$4 sm:$0xff]  }
 0x434   : > { %v10147_v18 = vadd.f32 %v2594_v12, %v9589_v11  ;;  %v2924_v34 = vmul.f32 %v10139_v10, %v10139_v10  ;;  %2992 = vadd.xlane.f32.xlu1 %v2991_v37  ;;  %3800 = vmatprep.subr.bf16.mxu0 %v7916_v59  ;;  %v7922_v59 = vld [vmem:[#allocation6 + $0x1c4] ss:$8 sps:$4 sm:$0xff]  }
 0x435   : > { %v10152_v21 = vadd.f32 %v2596_v17, %v9573_v43  ;;  %v2802_v51 = vadd.f32 %v10143_v58, %v10139_v10  ;;  %v2925_v31 = vmul.f32 %v10143_v58, %v10143_v58 }
 0x436   : > { %v2926_v24 = vmul.f32 %v10147_v18, %v10147_v18 }
 0x437   : > { %2803 = vadd.xlane.f32.xlu0 %v2802_v51  ;;  %v2805_v11 = vadd.f32 %v10152_v21, %v10147_v18  ;;  %v2927_v43 = vmul.f32 %v10152_v21, %v10152_v21  ;;  %v2994_v13 = vadd.f32 %v2925_v31, %v2924_v34  ;;  %3801 = vmatpush1.bf16.msra.mxu0 %v7914_v41 }
 0x438   : > { %v2599_v19 = vpop.f32.mrb[80].mxu1 }
 0x439   : > { %v2600_v48 = vadd.f32 %v2599_v19, %v10047_v49  ;;  %v2601_v25 = vpop.f32.mrb[81].mxu1  ;;  %2806 = vadd.xlane.f32.xlu1 %v2805_v11  ;;  %v2997_v51 = vadd.f32 %v2927_v43, %v2926_v24  ;;  %v7919_v19 = vld [vmem:[#allocation6 + $0x1b4] ss:$8 sps:$4 sm:$0xff]  }
 0x43a   : > { %v2602_v6 = vadd.f32 %v2601_v25, %v10050_v29  ;;  %v2603_v60 = vpop.f32.mrb[82].mxu1  ;;  %3802 = vmatprep.subr.bf16.mxu0 %v7919_v19  ;;  %v13817_v19 = vld [vmem:[#allocation23_spill] sm:$0xff] }
 0x43b   : > { %v10167_v12 = vadd.f32 %v2600_v48, %v9625_v4  ;;  %v2604_v45 = vadd.f32 %v2603_v60, %v10047_v49  ;;  %v2605_v17 = vpop.f32.mrb[83].mxu1  ;;  %2995 = vadd.xlane.f32.xlu0 %v2994_v13  ;;  %v7917_v4 = vld [vmem:[#allocation6 + $0x1b0] ss:$8 sps:$4 sm:$0xff]  }
 0x43c   : > { %v10171_v37 = vadd.f32 %v2602_v6, %v9609_v14  ;;  %v2606_v46 = vadd.f32 %v2605_v17, %v10050_v29  ;;  %3803 = vmatpush1.bf16.msra.mxu0 %v7917_v4  ;;  %v7920_v6 = vld [vmem:[#allocation6 + $0x1c0] ss:$8 sps:$4 sm:$0xff]  }
 0x43d   : > { %v10175_v25 = vadd.f32 %v2604_v45, %v9628_v16  ;;  %v2928_v34 = vmul.f32 %v10167_v12, %v10167_v12  ;;  %2998 = vadd.xlane.f32.xlu1 %v2997_v51  ;;  %3804 = vmatprep.subr.bf16.mxu0 %v7922_v59 }
 0x43e   : > { %v10180_v31 = vadd.f32 %v2606_v46, %v9612_v55  ;;  %v2808_v14 = vadd.f32 %v10171_v37, %v10167_v12  ;;  %v2929_v11 = vmul.f32 %v10171_v37, %v10171_v37 }
 0x43f   : > { %v2930_v43 = vmul.f32 %v10175_v25, %v10175_v25 }
 0x440   : > { %13816 = vst [vmem:[#allocation44_spill] sm:$0xff] %v10180_v31  ;;  %v2609_v24 = vpop.f32.mrb[84].mxu1  ;;  %2809 = vadd.xlane.f32.xlu0 %v2808_v14  ;;  %v2811_v16 = vadd.f32 %v10180_v31, %v10175_v25  ;;  %v2931_v55 = vmul.f32 %v10180_v31, %v10180_v31  ;;  %v3000_v45 = vadd.f32 %v2929_v11, %v2928_v34  ;;  %v7925_v31 = vld [vmem:[#allocation6 + $0x1d4] ss:$8 sps:$4 sm:$0xff]  }
 0x441   : > { %v2610_v48 = vadd.f32 %v2609_v24, %v10047_v49  ;;  %v2611_v41 = vpop.f32.mrb[85].mxu1  ;;  %3805 = vmatpush1.bf16.msra.mxu0 %v7920_v6  ;;  %v13819_v11 = vld [vmem:[#allocation24_spill] sm:$0xff] }
 0x442   : > { %v2612_v60 = vadd.f32 %v2611_v41, %v10050_v29  ;;  %v2613_v13 = vpop.f32.mrb[86].mxu1  ;;  %2812 = vadd.xlane.f32.xlu1 %v2811_v16  ;;  %v3003_v24 = vadd.f32 %v2931_v55, %v2930_v43  ;;  %3806 = vmatprep.subr.bf16.mxu0 %v7925_v31 }
 0x443   : > { %v10195_v17 = vadd.f32 %v2610_v48, %v9661_v57  ;;  %v2614_v46 = vadd.f32 %v2613_v13, %v10047_v49  ;;  %v2615_v51 = vpop.f32.mrb[87].mxu1  ;;  %v7923_v57 = vld [vmem:[#allocation6 + $0x1d0] ss:$8 sps:$4 sm:$0xff]  }
 0x444   : > { %v10199_v4 = vadd.f32 %v2612_v60, %v13817_v19  ;;  %v2616_v14 = vadd.f32 %v2615_v51, %v10050_v29  ;;  %3001 = vadd.xlane.f32.xlu0 %v3000_v45  ;;  %v7928_v60 = vld [vmem:[#allocation6 + $0x1e4] ss:$8 sps:$4 sm:$0xff]  }
 0x445   : > { %v10203_v41 = vadd.f32 %v2614_v46, %v9664_v35  ;;  %v2932_v34 = vmul.f32 %v10195_v17, %v10195_v17  ;;  %3807 = vmatpush1.bf16.msra.mxu0 %v7923_v57  ;;  %v7926_v46 = vld [vmem:[#allocation6 + $0x1e0] ss:$8 sps:$4 sm:$0xff]  }
 0x446   : > { %v10208_v16 = vadd.f32 %v2616_v14, %v13819_v11  ;;  %3004 = vadd.xlane.f32.xlu1 %v3003_v24  ;;  %v2814_v59 = vadd.f32 %v10199_v4, %v10195_v17  ;;  %v2933_v48 = vmul.f32 %v10199_v4, %v10199_v4  ;;  %3808 = vmatprep.subr.bf16.mxu0 %v7928_v60  ;;  %v13821_v11 = vld [vmem:[#allocation25_spill] sm:$0xff] }
 0x447   : > { %13818 = vst [vmem:[#allocation45_spill] sm:$0xff] %v10203_v41  ;;  %v2934_v55 = vmul.f32 %v10203_v41, %v10203_v41 }
 0x448   : > { %13820 = vst [vmem:[#allocation46_spill] sm:$0xff] %v10208_v16  ;;  %v2619_v43 = vpop.f32.mrb[88].mxu1  ;;  %2815 = vadd.xlane.f32.xlu0 %v2814_v59  ;;  %v2817_v35 = vadd.f32 %v10208_v16, %v10203_v41  ;;  %v2935_v6 = vmul.f32 %v10208_v16, %v10208_v16  ;;  %v3006_v19 = vadd.f32 %v2933_v48, %v2932_v34  ;;  %v7931_v41 = vld [vmem:[#allocation6 + $0x1f4] ss:$8 sps:$4 sm:$0xff]   ;;  %v13822_v48 = vld [vmem:[#allocation26_spill] sm:$0xff] }
 0x449   : > { %v2620_v13 = vadd.f32 %v2619_v43, %v10047_v49  ;;  %v2621_v45 = vpop.f32.mrb[89].mxu1  ;;  %3809 = vmatpush1.bf16.msra.mxu0 %v7926_v46 }
 0x44a   : > { %v2622_v51 = vadd.f32 %v2621_v45, %v10050_v29  ;;  %v2623_v31 = vpop.f32.mrb[90].mxu1  ;;  %2818 = vadd.xlane.f32.xlu1 %v2817_v35  ;;  %v3009_v16 = vadd.f32 %v2935_v6, %v2934_v55  ;;  %3810 = vmatprep.subr.bf16.mxu0 %v7931_v41 }
 0x44b   : > { %v10223_v14 = vadd.f32 %v2620_v13, %v9697_v0  ;;  %v2624_v24 = vadd.f32 %v2623_v31, %v10047_v49  ;;  %v2625_v57 = vpop.f32.mrb[91].mxu1  ;;  %v7929_v0 = vld [vmem:[#allocation6 + $0x1f0] ss:$8 sps:$4 sm:$0xff]  }
 0x44c   : > { %v10227_v59 = vadd.f32 %v2622_v51, %v13821_v11  ;;  %v2626_v43 = vadd.f32 %v2625_v57, %v10050_v29  ;;  %3007 = vadd.xlane.f32.xlu0 %v3006_v19 }
 0x44d   : > { %v10231_v45 = vadd.f32 %v2624_v24, %v9700_v33  ;;  %v2936_v34 = vmul.f32 %v10223_v14, %v10223_v14  ;;  %3811 = vmatpush1.bf16.msra.mxu0 %v7929_v0 }
 0x44e   : > { %v10236_v35 = vadd.f32 %v2626_v43, %v13822_v48  ;;  %3010 = vadd.xlane.f32.xlu1 %v3009_v16  ;;  %v2820_v60 = vadd.f32 %v10227_v59, %v10223_v14  ;;  %v2937_v13 = vmul.f32 %v10227_v59, %v10227_v59  ;;  %v13824_v43 = vld [vmem:[#allocation27_spill] sm:$0xff] }
 0x44f   : > { %v2938_v6 = vmul.f32 %v10231_v45, %v10231_v45 }
 0x450   : > { %13823 = vst [vmem:[#allocation48_spill] sm:$0xff] %v10236_v35  ;;  %v2629_v55 = vpop.f32.mrb[92].mxu1  ;;  %2821 = vadd.xlane.f32.xlu0 %v2820_v60  ;;  %v2823_v33 = vadd.f32 %v10236_v35, %v10231_v45  ;;  %v2939_v46 = vmul.f32 %v10236_v35, %v10236_v35  ;;  %v3012_v41 = vadd.f32 %v2937_v13, %v2936_v34 }
 0x451   : > { %v2630_v16 = vadd.f32 %v2629_v55, %v10047_v49  ;;  %v2631_v51 = vpop.f32.mrb[93].mxu1 }
 0x452   : > { %v2632_v31 = vadd.f32 %v2631_v51, %v10050_v29  ;;  %v2633_v19 = vpop.f32.mrb[94].mxu1  ;;  %2824 = vadd.xlane.f32.xlu1 %v2823_v33  ;;  %v3015_v60 = vadd.f32 %v2939_v46, %v2938_v6  ;;  %v13826_v51 = vld [vmem:[#allocation28_spill] sm:$0xff] }
 0x453   : > { %v10251_v24 = vadd.f32 %v2630_v16, %v9733_v56  ;;  %v2634_v57 = vadd.f32 %v2633_v19, %v10047_v49  ;;  %v2635_v11 = vpop.f32.mrb[95].mxu1 }
 0x454   : > { %v10255_v0 = vadd.f32 %v2632_v31, %v13824_v43  ;;  %v2636_v48 = vadd.f32 %v2635_v11, %v10050_v29  ;;  %3013 = vadd.xlane.f32.xlu0 %v3012_v41 }
 0x455   : > { %v10259_v55 = vadd.f32 %v2634_v57, %v9736_v15  ;;  %v2940_v34 = vmul.f32 %v10251_v24, %v10251_v24 }
 0x456   : > { %v10262_v35 = vadd.f32 %v2636_v48, %v13826_v51  ;;  %3016 = vadd.xlane.f32.xlu1 %v3015_v60  ;;  %v2826_v56 = vadd.f32 %v10255_v0, %v10251_v24  ;;  %v2941_v13 = vmul.f32 %v10255_v0, %v10255_v0  ;;  %v13828_v60 = vld [vmem:[#allocation29_spill] sm:$0xff] }
 0x457   : > { %13825 = vst [vmem:[#allocation47_spill] sm:$0xff] %v10259_v55  ;;  %v2942_v15 = vmul.f32 %v10259_v55, %v10259_v55 }
 0x458   : > { %13827 = vst [vmem:[#allocation49_spill] sm:$0xff] %v10262_v35  ;;  %v2639_v33 = vpop.f32.mrb[96].mxu1  ;;  %2827 = vadd.xlane.f32.xlu0 %v2826_v56  ;;  %v2829_v6 = vadd.f32 %v10262_v35, %v10259_v55  ;;  %v2943_v46 = vmul.f32 %v10262_v35, %v10262_v35  ;;  %v3018_v57 = vadd.f32 %v2941_v13, %v2940_v34 }
 0x459   : > { %v2640_v16 = vadd.f32 %v2639_v33, %v10047_v49  ;;  %v2641_v31 = vpop.f32.mrb[97].mxu1 }
 0x45a   : > { %v2642_v19 = vadd.f32 %v2641_v31, %v10050_v29  ;;  %v2643_v41 = vpop.f32.mrb[98].mxu1  ;;  %2830 = vadd.xlane.f32.xlu1 %v2829_v6  ;;  %v3021_v35 = vadd.f32 %v2943_v46, %v2942_v15  ;;  %v13830_v31 = vld [vmem:[#allocation30_spill] sm:$0xff] }
 0x45b   : > { %v10279_v11 = vadd.f32 %v2640_v16, %v9769_v8  ;;  %v2644_v43 = vadd.f32 %v2643_v41, %v10047_v49  ;;  %v2645_v48 = vpop.f32.mrb[99].mxu1 }
 0x45c   : > { %v10283_v51 = vadd.f32 %v2642_v19, %v13828_v60  ;;  %v2646_v56 = vadd.f32 %v2645_v48, %v10050_v29  ;;  %3019 = vadd.xlane.f32.xlu0 %v3018_v57 }
 0x45d   : > { %v10287_v33 = vadd.f32 %v2644_v43, %v9772_v42  ;;  %v2944_v34 = vmul.f32 %v10279_v11, %v10279_v11 }
 0x45e   : > { %v10290_v55 = vadd.f32 %v2646_v56, %v13830_v31  ;;  %3022 = vadd.xlane.f32.xlu1 %v3021_v35  ;;  %v2832_v8 = vadd.f32 %v10283_v51, %v10279_v11  ;;  %v2945_v13 = vmul.f32 %v10283_v51, %v10283_v51  ;;  %v13832_v56 = vld [vmem:[#allocation31_spill] sm:$0xff] }
 0x45f   : > { %13829 = vst [vmem:[#allocation50_spill] sm:$0xff] %v10287_v33  ;;  %v2946_v42 = vmul.f32 %v10287_v33, %v10287_v33 }
 0x460   : > { %13831 = vst [vmem:[#allocation21_spill] sm:$0xff] %v10290_v55  ;;  %v2649_v6 = vpop.f32.mrb[100].mxu1  ;;  %2833 = vadd.xlane.f32.xlu0 %v2832_v8  ;;  %v2835_v15 = vadd.f32 %v10290_v55, %v10287_v33  ;;  %v2947_v35 = vmul.f32 %v10290_v55, %v10290_v55  ;;  %v3024_v57 = vadd.f32 %v2945_v13, %v2944_v34 }
 0x461   : > { %v2650_v46 = vadd.f32 %v2649_v6, %v10047_v49  ;;  %v2651_v16 = vpop.f32.mrb[101].mxu1 }
 0x462   : > { %v2652_v19 = vadd.f32 %v2651_v16, %v10050_v29  ;;  %v2653_v41 = vpop.f32.mrb[102].mxu1  ;;  %2836 = vadd.xlane.f32.xlu1 %v2835_v15  ;;  %v3027_v55 = vadd.f32 %v2947_v35, %v2946_v42  ;;  %v13834_v16 = vld [vmem:[#allocation32_spill] sm:$0xff] }
 0x463   : > { %v10307_v43 = vadd.f32 %v2650_v46, %v9805_v26  ;;  %v2654_v48 = vadd.f32 %v2653_v41, %v10047_v49  ;;  %v2655_v60 = vpop.f32.mrb[103].mxu1 }
 0x464   : > { %v10311_v31 = vadd.f32 %v2652_v19, %v13832_v56  ;;  %v2656_v8 = vadd.f32 %v2655_v60, %v10050_v29  ;;  %3025 = vadd.xlane.f32.xlu0 %v3024_v57 }
 0x465   : > { %v10315_v6 = vadd.f32 %v2654_v48, %v9808_v61  ;;  %v2948_v34 = vmul.f32 %v10307_v43, %v10307_v43 }
 0x466   : > { %v10318_v33 = vadd.f32 %v2656_v8, %v13834_v16  ;;  %3028 = vadd.xlane.f32.xlu1 %v3027_v55  ;;  %v2838_v26 = vadd.f32 %v10311_v31, %v10307_v43  ;;  %v2949_v13 = vmul.f32 %v10311_v31, %v10311_v31  ;;  %v13837_v8 = vld [vmem:[#allocation33_spill] sm:$0xff] }
 0x467   : > { %13833 = vst [vmem:[#allocation22_spill] sm:$0xff] %v10315_v6  ;;  %v2950_v61 = vmul.f32 %v10315_v6, %v10315_v6 }
 0x468   : > { %13835 = vst [vmem:[#allocation23_spill] sm:$0xff] %v10318_v33  ;;  %v2659_v15 = vpop.f32.mrb[104].mxu1  ;;  %2839 = vadd.xlane.f32.xlu0 %v2838_v26  ;;  %v2841_v42 = vadd.f32 %v10318_v33, %v10315_v6  ;;  %v2951_v55 = vmul.f32 %v10318_v33, %v10318_v33  ;;  %v3030_v57 = vadd.f32 %v2949_v13, %v2948_v34 }
 0x469   : > { %v2660_v35 = vadd.f32 %v2659_v15, %v10047_v49  ;;  %v2661_v46 = vpop.f32.mrb[105].mxu1 }
 0x46a   : > { %v2662_v19 = vadd.f32 %v2661_v46, %v10050_v29  ;;  %v2663_v41 = vpop.f32.mrb[106].mxu1  ;;  %2842 = vadd.xlane.f32.xlu1 %v2841_v42  ;;  %v3033_v33 = vadd.f32 %v2951_v55, %v2950_v61  ;;  %v13840_v46 = vld [vmem:[#allocation34_spill] sm:$0xff] }
 0x46b   : > { %v10335_v48 = vadd.f32 %v2660_v35, %v9841_v50  ;;  %v2664_v60 = vadd.f32 %v2663_v41, %v10047_v49  ;;  %v2665_v56 = vpop.f32.mrb[107].mxu1 }
 0x46c   : > { %v10339_v16 = vadd.f32 %v2662_v19, %v13837_v8  ;;  %v2666_v26 = vadd.f32 %v2665_v56, %v10050_v29  ;;  %3031 = vadd.xlane.f32.xlu0 %v3030_v57 }
 0x46d   : > { %13836 = vst [vmem:[#allocation24_spill] sm:$0xff] %v10335_v48  ;;  %v10343_v15 = vadd.f32 %v2664_v60, %v9844_v1  ;;  %v2952_v34 = vmul.f32 %v10335_v48, %v10335_v48  ;;  %v13842_v60 = vld [vmem:[#allocation37_spill] sm:$0xff] }
 0x46e   : > { %13838 = vst [vmem:[#allocation25_spill] sm:$0xff] %v10339_v16  ;;  %v10346_v6 = vadd.f32 %v2666_v26, %v13840_v46  ;;  %3034 = vadd.xlane.f32.xlu1 %v3033_v33  ;;  %v2844_v50 = vadd.f32 %v10339_v16, %v10335_v48  ;;  %v2953_v13 = vmul.f32 %v10339_v16, %v10339_v16  ;;  %v13843_v46 = vld [vmem:[#allocation35_spill] sm:$0xff] }
 0x46f   : > { %13839 = vst [vmem:[#allocation26_spill] sm:$0xff] %v10343_v15  ;;  %v2954_v1 = vmul.f32 %v10343_v15, %v10343_v15 }
 0x470   : > { %13841 = vst [vmem:[#allocation27_spill] sm:$0xff] %v10346_v6  ;;  %v2669_v42 = vpop.f32.mrb[108].mxu1  ;;  %2845 = vadd.xlane.f32.xlu0 %v2844_v50  ;;  %v2847_v61 = vadd.f32 %v10346_v6, %v10343_v15  ;;  %v2955_v33 = vmul.f32 %v10346_v6, %v10346_v6  ;;  %v3036_v57 = vadd.f32 %v2953_v13, %v2952_v34 }
 0x471   : > { %v2670_v55 = vadd.f32 %v2669_v42, %v10047_v49  ;;  %v2671_v35 = vpop.f32.mrb[109].mxu1  ;;  %v13844_v42 = vld [vmem:[#allocation38_spill] sm:$0xff] }
 0x472   : > { %v2672_v19 = vadd.f32 %v2671_v35, %v10050_v29  ;;  %v2673_v41 = vpop.f32.mrb[110].mxu1  ;;  %2848 = vadd.xlane.f32.xlu1 %v2847_v61  ;;  %v3039_v6 = vadd.f32 %v2955_v33, %v2954_v1  ;;  %v13845_v35 = vld [vmem:[#allocation36_spill] sm:$0xff] }
 0x473   : > { %v10363_v56 = vadd.f32 %v2670_v55, %v13842_v60  ;;  %v2674_v8 = vadd.f32 %v2673_v41, %v10047_v49  ;;  %v2675_v26 = vpop.f32.mrb[111].mxu1 }
 0x474   : > { %v10367_v50 = vadd.f32 %v2672_v19, %v13843_v46  ;;  %v2676_v15 = vadd.f32 %v2675_v26, %v10050_v29  ;;  %3037 = vadd.xlane.f32.xlu0 %v3036_v57 }
 0x475   : > { %v10371_v16 = vadd.f32 %v2674_v8, %v13844_v42  ;;  %v2956_v13 = vmul.f32 %v10363_v56, %v10363_v56 }
 0x476   : > { %v10374_v48 = vadd.f32 %v2676_v15, %v13845_v35  ;;  %3040 = vadd.xlane.f32.xlu1 %v3039_v6  ;;  %v2850_v34 = vadd.f32 %v10367_v50, %v10363_v56  ;;  %v2957_v61 = vmul.f32 %v10367_v50, %v10367_v50 }
 0x477   : > { %v2958_v33 = vmul.f32 %v10371_v16, %v10371_v16 }
 0x478   : > { %v2679_v55 = vpop.f32.mrb[112].mxu1  ;;  %2851 = vadd.xlane.f32.xlu0 %v2850_v34  ;;  %v2853_v1 = vadd.f32 %v10374_v48, %v10371_v16  ;;  %v2959_v6 = vmul.f32 %v10374_v48, %v10374_v48  ;;  %v3042_v60 = vadd.f32 %v2957_v61, %v2956_v13 }
 0x479   : > { %v2680_v15 = vadd.f32 %v2679_v55, %v10047_v49  ;;  %v2681_v19 = vpop.f32.mrb[113].mxu1 }
 0x47a   : > { %v2682_v41 = vadd.f32 %v2681_v19, %v10050_v29  ;;  %v2683_v57 = vpop.f32.mrb[114].mxu1  ;;  %2854 = vadd.xlane.f32.xlu1 %v2853_v1  ;;  %v3045_v34 = vadd.f32 %v2959_v6, %v2958_v33 }
 0x47b   : > { %v10391_v8 = vadd.f32 %v2680_v15, %v9907_v5  ;;  %v2684_v26 = vadd.f32 %v2683_v57, %v10047_v49  ;;  %v2685_v46 = vpop.f32.mrb[115].mxu1 }
 0x47c   : > { %v10395_v42 = vadd.f32 %v2682_v41, %v9897_v27  ;;  %v2686_v35 = vadd.f32 %v2685_v46, %v10050_v29  ;;  %3043 = vadd.xlane.f32.xlu0 %v3042_v60 }
 0x47d   : > { %v10399_v55 = vadd.f32 %v2684_v26, %v9910_v62  ;;  %v2960_v13 = vmul.f32 %v10391_v8, %v10391_v8 }
 0x47e   : > { %v10402_v19 = vadd.f32 %v2686_v35, %v9900_v28  ;;  %3046 = vadd.xlane.f32.xlu1 %v3045_v34  ;;  %v2856_v5 = vadd.f32 %v10395_v42, %v10391_v8  ;;  %v2961_v27 = vmul.f32 %v10395_v42, %v10395_v42 }
 0x47f   : > { %v2962_v62 = vmul.f32 %v10399_v55, %v10399_v55 }
 0x480   : > { %v2689_v61 = vpop.f32.mrb[116].mxu1  ;;  %2857 = vadd.xlane.f32.xlu0 %v2856_v5  ;;  %v2859_v1 = vadd.f32 %v10402_v19, %v10399_v55  ;;  %v2963_v28 = vmul.f32 %v10402_v19, %v10402_v19  ;;  %v3048_v57 = vadd.f32 %v2961_v27, %v2960_v13 }
 0x481   : > { %v2690_v33 = vadd.f32 %v2689_v61, %v10047_v49  ;;  %v2691_v6 = vpop.f32.mrb[117].mxu1 }
 0x482   : > { %v2692_v15 = vadd.f32 %v2691_v6, %v10050_v29  ;;  %v2693_v41 = vpop.f32.mrb[118].mxu1  ;;  %2860 = vadd.xlane.f32.xlu1 %v2859_v1  ;;  %v3051_v5 = vadd.f32 %v2963_v28, %v2962_v62 }
 0x483   : > { %v10419_v60 = vadd.f32 %v2690_v33, %v9938_v39  ;;  %v2694_v26 = vadd.f32 %v2693_v41, %v10047_v49  ;;  %v2695_v46 = vpop.f32.mrb[119].mxu1 }
 0x484   : > { %v10423_v35 = vadd.f32 %v2692_v15, %v9923_v52  ;;  %v2696_v34 = vadd.f32 %v2695_v46, %v10050_v29  ;;  %3049 = vadd.xlane.f32.xlu0 %v3048_v57 }
 0x485   : > { %13846 = vst [vmem:[#allocation28_spill] sm:$0xff] %v10419_v60  ;;  %v10427_v61 = vadd.f32 %v2694_v26, %v9929_v44  ;;  %v2964_v13 = vmul.f32 %v10419_v60, %v10419_v60 }
 0x486   : > { %13847 = vst [vmem:[#allocation29_spill] sm:$0xff] %v10423_v35  ;;  %v10430_v6 = vadd.f32 %v2696_v34, %v9926_v20  ;;  %3052 = vadd.xlane.f32.xlu1 %v3051_v5  ;;  %v2862_v39 = vadd.f32 %v10423_v35, %v10419_v60  ;;  %v2965_v52 = vmul.f32 %v10423_v35, %v10423_v35 }
 0x487   : > { %13848 = vst [vmem:[#allocation30_spill] sm:$0xff] %v10427_v61  ;;  %v2966_v44 = vmul.f32 %v10427_v61, %v10427_v61 }
 0x488   : > { %13849 = vst [vmem:[#allocation31_spill] sm:$0xff] %v10430_v6  ;;  %v2699_v27 = vpop.f32.mrb[120].mxu1  ;;  %2863 = vadd.xlane.f32.xlu0 %v2862_v39  ;;  %v2865_v1 = vadd.f32 %v10430_v6, %v10427_v61  ;;  %v2967_v20 = vmul.f32 %v10430_v6, %v10430_v6  ;;  %v3054_v41 = vadd.f32 %v2965_v52, %v2964_v13 }
 0x489   : > { %v2700_v62 = vadd.f32 %v2699_v27, %v10047_v49  ;;  %v2701_v28 = vpop.f32.mrb[121].mxu1 }
 0x48a   : > { %v2702_v33 = vadd.f32 %v2701_v28, %v10050_v29  ;;  %v2703_v15 = vpop.f32.mrb[122].mxu1  ;;  %2866 = vadd.xlane.f32.xlu1 %v2865_v1  ;;  %v3057_v39 = vadd.f32 %v2967_v20, %v2966_v44 }
 0x48b   : > { %v10447_v57 = vadd.f32 %v2700_v62, %v9966_v9  ;;  %v2704_v26 = vadd.f32 %v2703_v15, %v10047_v49  ;;  %v2705_v46 = vpop.f32.mrb[123].mxu1 }
 0x48c   : > { %v10451_v34 = vadd.f32 %v2702_v33, %v9951_v40  ;;  %v2706_v5 = vadd.f32 %v2705_v46, %v10050_v29  ;;  %3055 = vadd.xlane.f32.xlu0 %v3054_v41 }
 0x48d   : > { %13850 = vst [vmem:[#allocation32_spill] sm:$0xff] %v10447_v57  ;;  %v10455_v27 = vadd.f32 %v2704_v26, %v9957_v36  ;;  %v2968_v13 = vmul.f32 %v10447_v57, %v10447_v57 }
 0x48e   : > { %13851 = vst [vmem:[#allocation33_spill] sm:$0xff] %v10451_v34  ;;  %v10458_v28 = vadd.f32 %v2706_v5, %v9954_v22  ;;  %3058 = vadd.xlane.f32.xlu1 %v3057_v39  ;;  %v2868_v9 = vadd.f32 %v10451_v34, %v10447_v57  ;;  %v2969_v40 = vmul.f32 %v10451_v34, %v10451_v34 }
 0x48f   : > { %13852 = vst [vmem:[#allocation34_spill] sm:$0xff] %v10455_v27  ;;  %v2970_v36 = vmul.f32 %v10455_v27, %v10455_v27 }
 0x490   : > { %13853 = vst [vmem:[#allocation37_spill] sm:$0xff] %v10458_v28  ;;  %2869 = vadd.xlane.f32.xlu0 %v2868_v9  ;;  %v2709_v52 = vpop.f32.mrb[124].mxu1  ;;  %v2871_v1 = vadd.f32 %v10458_v28, %v10455_v27  ;;  %v2971_v22 = vmul.f32 %v10458_v28, %v10458_v28  ;;  %v3060_v15 = vadd.f32 %v2969_v40, %v2968_v13 }
 0x491   : > { %v2710_v44 = vadd.f32 %v2709_v52, %v10047_v49  ;;  %v2711_v20 = vpop.f32.mrb[125].mxu1 }
 0x492   : > { %v2712_v62 = vadd.f32 %v2711_v20, %v10050_v29  ;;  %2872 = vadd.xlane.f32.xlu1 %v2871_v1  ;;  %v2713_v33 = vpop.f32.mrb[126].mxu1  ;;  %v3063_v9 = vadd.f32 %v2971_v22, %v2970_v36 }
 0x493   : > { %v10475_v41 = vadd.f32 %v2710_v44, %v9986_v63  ;;  %v2714_v26 = vadd.f32 %v2713_v33, %v10047_v49  ;;  %v2715_v46 = vpop.f32.mrb[127].mxu1 }
 0x494   : > { %v10479_v5 = vadd.f32 %v2712_v62, %v9975_v47  ;;  %v2716_v39 = vadd.f32 %v2715_v46, %v10050_v29  ;;  %3061 = vadd.xlane.f32.xlu0 %v3060_v15 }
 0x495   : > { %13854 = vst [vmem:[#allocation35_spill] sm:$0xff] %v10475_v41  ;;  %v10483_v52 = vadd.f32 %v2714_v26, %v9981_v38  ;;  %v2972_v49 = vmul.f32 %v10475_v41, %v10475_v41 }
 0x496   : > { %13855 = vst [vmem:[#allocation38_spill] sm:$0xff] %v10479_v5  ;;  %v10486_v1 = vadd.f32 %v2716_v39, %v9978_v32  ;;  %3064 = vadd.xlane.f32.xlu1 %v3063_v9  ;;  %v2874_v63 = vadd.f32 %v10479_v5, %v10475_v41  ;;  %v2973_v47 = vmul.f32 %v10479_v5, %v10479_v5 }
 0x497   : > { %13856 = vst [vmem:[#allocation36_spill] sm:$0xff] %v10483_v52  ;;  %v2974_v38 = vmul.f32 %v10483_v52, %v10483_v52 }
 0x498   : > { %13857 = vst [vmem:[#allocation51_spill] sm:$0xff] %v10486_v1  ;;  %2875 = vadd.xlane.f32.xlu0 %v2874_v63  ;;  %v2877_v29 = vadd.f32 %v10486_v1, %v10483_v52  ;;  %v2975_v32 = vmul.f32 %v10486_v1, %v10486_v1  ;;  %v3066_v13 = vadd.f32 %v2973_v47, %v2972_v49 }
 0x49a   : > { %2878 = vadd.xlane.f32.xlu1 %v2877_v29  ;;  %v3069_v40 = vadd.f32 %v2975_v32, %v2974_v38 }
 0x49c   : > { %3067 = vadd.xlane.f32.xlu0 %v3066_v13 }
 0x49e   : > { %3070 = vadd.xlane.f32.xlu1 %v3069_v40 }
 0x4aa   : > { %v2786_v36 = vpop.xlane.xlu0 %2785 }
 0x4ab   : > { %v2880_v22 = vmul.f32 0.00390625, %v2786_v36 }
 0x4ac   : > { %v2789_v44 = vpop.xlane.xlu1 %2788 }
 0x4ad   : > { %v10500_v20 = vmul.f32 0.00390625, %v2789_v44  ;;  %v3104_v33 = vmul.f32 %v2880_v22, %v2880_v22 }
 0x4ae   : > { %v2978_v62 = vpop.xlane.xlu0 %2977 }
 0x4af   : > { %v3072_v15 = vmul.f32 0.00390625, %v2978_v62  ;;  %v3105_v39 = vmul.f32 %v10500_v20, %v10500_v20 }
 0x4b0   : > { %v2981_v26 = vpop.xlane.xlu1 %2980 }
 0x4b1   : > { %v3136_v46 = vsub.f32 %v3072_v15, %v3104_v33  ;;  %v3073_v9 = vmul.f32 0.00390625, %v2981_v26 }
 0x4b3   : > { %v2792_v63 = vpop.xlane.xlu0 %2791  ;;  %v3168_v29 = vmax.f32 %v3136_v46, 0.0  ;;  %v3137_v49 = vsub.f32 %v3073_v9, %v3105_v39 }
 0x4b4   : > { %v10504_v47 = vmul.f32 0.00390625, %v2792_v63 }
 0x4b5   : > { %v2795_v38 = vpop.xlane.xlu1 %2794  ;;  %v3264_v32 = vadd.f32 1e-05, %v3168_v29  ;;  %v3169_v13 = vmax.f32 %v3137_v49, 0.0 }
 0x4b6   : > { %v10506_v40 = vmul.f32 0.00390625, %v2795_v38  ;;  %v3106_v62 = vmul.f32 %v10504_v47, %v10504_v47 }
 0x4b7   : > { %v2984_v36 = vpop.xlane.xlu0 %2983  ;;  %8060 = vrsqrt.f32 %v3264_v32  ;;  %v3265_v44 = vadd.f32 1e-05, %v3169_v13  ;;  %v2782_v13 = vld [vmem:[%s13858_s19] sm:$0x3] }
 0x4b8   : > { %v3074_v33 = vmul.f32 0.00390625, %v2984_v36  ;;  %v3107_v46 = vmul.f32 %v10506_v40, %v10506_v40 }
 0x4b9   : > { %v2987_v15 = vpop.xlane.xlu1 %2986  ;;  %8062 = vrsqrt.f32 %v3265_v44 }
 0x4ba   : > { %v3138_v26 = vsub.f32 %v3074_v33, %v3106_v62  ;;  %v3075_v39 = vmul.f32 0.00390625, %v2987_v15 }
 0x4bb   : > { %v2798_v9 = vpop.xlane.xlu0 %2797 }
 0x4bc   : > { %v3170_v63 = vmax.f32 %v3138_v26, 0.0  ;;  %v3139_v29 = vsub.f32 %v3075_v39, %v3107_v46  ;;  %v10512_v49 = vmul.f32 0.00390625, %v2798_v9  ;;  %v3200_v26 = vsub.f32 %v10055_v2, %v2880_v22  ;;  %v13859_v9 = vld [vmem:[#allocation19_spill] sm:$0xff]  ;;  %v2783_v2 = vld [vmem:[%s13861_s25] sm:$0x3] }
 0x4bd   : > { %v2801_v38 = vpop.xlane.xlu1 %2800  ;;  %v3201_v46 = vsub.f32 %v10059_v7, %v2880_v22  ;;  %v13862_v7 = vld [vmem:[#allocation39_spill] sm:$0xff] }
 0x4be   : > { %v3266_v1 = vadd.f32 1e-05, %v3170_v63  ;;  %v3171_v32 = vmax.f32 %v3139_v29, 0.0  ;;  %v10517_v36 = vmul.f32 0.00390625, %v2801_v38  ;;  %v3108_v33 = vmul.f32 %v10512_v49, %v10512_v49  ;;  %v13860_v29 = vld [vmem:[#allocation20_spill] sm:$0xff] }
 0x4bf   : > { %v2990_v44 = vpop.xlane.xlu0 %2989  ;;  %v10524_v63 = vrot.slane %v2782_v13, %v13859_v9  ;;  %v10527_v52 = vrot.slane %v2782_v13, %v13860_v29  ;;  %v3202_v22 = vsub.f32 %v13862_v7, %v10500_v20  ;;  %v10542_v35 = vrot.slane %v2783_v2, %v13860_v29 }
 0x4c0   : > { %8064 = vrsqrt.f32 %v3266_v1  ;;  %v3267_v62 = vadd.f32 1e-05, %v3171_v32  ;;  %v3076_v15 = vmul.f32 0.00390625, %v2990_v44  ;;  %v3109_v1 = vmul.f32 %v10517_v36, %v10517_v36  ;;  %v13863_v44 = vld [vmem:[#allocation40_spill] sm:$0xff] }
 0x4c1   : > { %v2993_v39 = vpop.xlane.xlu1 %2992  ;;  %v8061_v38 = vpop.eup %8060  ;;  %v3203_v41 = vsub.f32 %v13863_v44, %v10500_v20  ;;  %v3204_v7 = vsub.f32 %v10083_v30, %v10504_v47 }
 0x4c2   : > { %8066 = vrsqrt.f32 %v3267_v62  ;;  %v3140_v5 = vsub.f32 %v3076_v15, %v3108_v33  ;;  %v3077_v32 = vmul.f32 0.00390625, %v2993_v39  ;;  %v3328_v28 = vmul.f32 %v8061_v38, %v3200_v26 }
 0x4c3   : > { %v3329_v27 = vmul.f32 %v8061_v38, %v3201_v46  ;;  %v8063_v34 = vpop.eup %8062  ;;  %v10547_v46 = vrot.slane %v2783_v2, %v13859_v9  ;;  %v13864_v2 = vld [vmem:[#allocation42_spill] sm:$0xff] }
 0x4c4   : > { %v2804_v13 = vpop.xlane.xlu0 %2803  ;;  %v3172_v62 = vmax.f32 %v3140_v5, 0.0  ;;  %v3141_v33 = vsub.f32 %v3077_v32, %v3109_v1  ;;  %v3330_v57 = vmul.f32 %v8063_v34, %v3202_v22  ;;  %v3331_v6 = vmul.f32 %v8063_v34, %v3203_v41 }
 0x4c5   : > { %v10538_v15 = vmul.f32 0.00390625, %v2804_v13  ;;  %v3404_v61 = vmul.f32 %v10527_v52, %v3329_v27  ;;  %v3403_v27 = vmul.f32 %v10524_v63, %v3328_v28  ;;  %v3205_v22 = vsub.f32 %v10087_v54, %v10504_v47 }
 0x4c6   : > { %v2807_v39 = vpop.xlane.xlu1 %2806  ;;  %v3268_v20 = vadd.f32 1e-05, %v3172_v62  ;;  %v3173_v26 = vmax.f32 %v3141_v33, 0.0  ;;  %v3406_v34 = vmul.f32 %v10527_v52, %v3331_v6  ;;  %v3405_v30 = vmul.f32 %v10524_v63, %v3330_v57 }
 0x4c7   : > { %v10549_v5 = vmul.f32 0.00390625, %v2807_v39  ;;  %v3110_v38 = vmul.f32 %v10538_v15, %v10538_v15  ;;  %v3207_v44 = vsub.f32 %v13864_v2, %v10506_v40  ;;  %v10561_v62 = vadd.f32 %v10542_v35, %v3404_v61 }
 0x4c8   : > { %v2996_v1 = vpop.xlane.xlu0 %2995  ;;  %8068 = vrsqrt.f32 %v3268_v20  ;;  %v3269_v41 = vadd.f32 1e-05, %v3173_v26  ;;  %v10564_v33 = vadd.f32 %v10542_v35, %v3406_v34  ;;  %v10571_v47 = vadd.f32 %v10547_v46, %v3403_v27  ;;  %v13867_v34 = vld [vmem:[#allocation41_spill] sm:$0xff] }
 0x4c9   : > { %v3078_v32 = vmul.f32 0.00390625, %v2996_v1  ;;  %13865 = vst [vmem:[#allocation39_spill] sm:$0xff] %v10561_v62  ;;  %v3111_v39 = vmul.f32 %v10549_v5, %v10549_v5  ;;  %v10574_v61 = vadd.f32 %v10547_v46, %v3405_v30  ;;  %v3208_v30 = vsub.f32 %v10111_v23, %v10512_v49 }
 0x4ca   : > { %v2999_v13 = vpop.xlane.xlu1 %2998  ;;  %13866 = vst [vmem:[#allocation40_spill] sm:$0xff] %v10564_v33  ;;  %v8065_v6 = vpop.eup %8064  ;;  %8070 = vrsqrt.f32 %v3269_v41  ;;  %v3543_v54 = vpack.c.bf16 %v10564_v33, %v10561_v62  ;;  %v3206_v41 = vsub.f32 %v13867_v34, %v10506_v40  ;;  %v3209_v40 = vsub.f32 %v10115_v53, %v10512_v49 }
 0x4cb   : > { %v3142_v28 = vsub.f32 %v3078_v32, %v3110_v38  ;;  %v3079_v57 = vmul.f32 0.00390625, %v2999_v13  ;;  %v3333_v26 = vmul.f32 %v8065_v6, %v3205_v22  ;;  %v3542_v33 = vpack.c.bf16 %v10574_v61, %v10571_v47 }
 0x4cc   : > { %v8067_v1 = vpop.eup %8066  ;;  %3812 = vmatprep.mubr.bf16.mxu0 %v3543_v54  ;;  %v3332_v29 = vmul.f32 %v8065_v6, %v3204_v7 }
 0x4cd   : > { %v2810_v20 = vpop.xlane.xlu0 %2809  ;;  %v3174_v38 = vmax.f32 %v3142_v28, 0.0  ;;  %v3143_v32 = vsub.f32 %v3079_v57, %v3111_v39  ;;  %v3335_v62 = vmul.f32 %v8067_v1, %v3207_v44  ;;  %v3408_v27 = vmul.f32 %v10527_v52, %v3333_v26  ;;  %3813 = vmatmul.mubr.bf16.vlgmr.msra.gmra.mrb[64].mxu0 %v3542_v33 }
 0x4ce   : > { %v10578_v2 = vmul.f32 0.00390625, %v2810_v20  ;;  %v3334_v60 = vmul.f32 %v8067_v1, %v3206_v41  ;;  %v3210_v28 = vsub.f32 %v10119_v3, %v10517_v36  ;;  %v3407_v49 = vmul.f32 %v10524_v63, %v3332_v29  ;;  %v13868_v1 = vld [vmem:[#allocation43_spill] sm:$0xff] }
 0x4cf   : > { %v2813_v13 = vpop.xlane.xlu1 %2812  ;;  %v3270_v22 = vadd.f32 1e-05, %v3174_v38  ;;  %v3175_v9 = vmax.f32 %v3143_v32, 0.0  ;;  %v3410_v44 = vmul.f32 %v10527_v52, %v3335_v62  ;;  %v10597_v53 = vadd.f32 %v10542_v35, %v3408_v27 }
 0x4d0   : > { %v10589_v39 = vmul.f32 0.00390625, %v2813_v13  ;;  %v3112_v23 = vmul.f32 %v10578_v2, %v10578_v2  ;;  %v3409_v26 = vmul.f32 %v10524_v63, %v3334_v60  ;;  %v3211_v34 = vsub.f32 %v13868_v1, %v10517_v36 }
 0x4d1   : > { %v3002_v57 = vpop.xlane.xlu0 %3001  ;;  %8072 = vrsqrt.f32 %v3270_v22  ;;  %v3271_v7 = vadd.f32 1e-05, %v3175_v9  ;;  %v10600_v3 = vadd.f32 %v10542_v35, %v3410_v44  ;;  %v3212_v41 = vsub.f32 %v10139_v10, %v10538_v15 }
 0x4d2   : > { %v3080_v6 = vmul.f32 0.00390625, %v3002_v57  ;;  %v3113_v20 = vmul.f32 %v10589_v39, %v10589_v39  ;;  %v8069_v33 = vpop.eup %8068  ;;  %v10613_v44 = vadd.f32 %v10547_v46, %v3409_v26  ;;  %v10616_v36 = vadd.f32 %v10547_v46, %v3407_v49 }
 0x4d3   : > { %v3005_v54 = vpop.xlane.xlu1 %3004  ;;  %8074 = vrsqrt.f32 %v3271_v7  ;;  %v3545_v32 = vpack.c.bf16 %v10600_v3, %v10597_v53  ;;  %v3337_v13 = vmul.f32 %v8069_v33, %v3209_v40  ;;  %v3213_v40 = vsub.f32 %v10143_v58, %v10538_v15 }
 0x4d4   : > { %v3144_v62 = vsub.f32 %v3080_v6, %v3112_v23  ;;  %v3081_v9 = vmul.f32 0.00390625, %v3005_v54  ;;  %v8071_v27 = vpop.eup %8070  ;;  %v3336_v23 = vmul.f32 %v8069_v33, %v3208_v30  ;;  %v3544_v26 = vpack.c.bf16 %v10613_v44, %v10616_v36 }
 0x4d5   : > { %v2816_v38 = vpop.xlane.xlu0 %2815  ;;  %3822 = vmatprep.mubr.bf16.mxu0 %v3545_v32  ;;  %v3339_v7 = vmul.f32 %v8071_v27, %v3211_v34  ;;  %v3412_v10 = vmul.f32 %v10527_v52, %v3337_v13 }
 0x4d6   : > { %v3176_v22 = vmax.f32 %v3144_v62, 0.0  ;;  %v3145_v29 = vsub.f32 %v3081_v9, %v3113_v20  ;;  %v10610_v57 = vmul.f32 0.00390625, %v2816_v38  ;;  %v3338_v20 = vmul.f32 %v8071_v27, %v3210_v28  ;;  %3823 = vmatmul.mubr.bf16.gmra.mrb[68].mxu0 %v3544_v26 }
 0x4d7   : > { %v2819_v60 = vpop.xlane.xlu1 %2818  ;;  %v3214_v62 = vsub.f32 %v10147_v18, %v10549_v5  ;;  %v3414_v1 = vmul.f32 %v10527_v52, %v3339_v7  ;;  %v10633_v18 = vadd.f32 %v10542_v35, %v3412_v10  ;;  %v3411_v38 = vmul.f32 %v10524_v63, %v3336_v23 }
 0x4d8   : > { %v3272_v6 = vadd.f32 1e-05, %v3176_v22  ;;  %v3177_v54 = vmax.f32 %v3145_v29, 0.0  ;;  %v10623_v9 = vmul.f32 0.00390625, %v2819_v60  ;;  %v3114_v30 = vmul.f32 %v10610_v57, %v10610_v57 }
 0x4d9   : > { %v3008_v49 = vpop.xlane.xlu0 %3007  ;;  %v10636_v33 = vadd.f32 %v10542_v35, %v3414_v1  ;;  %v3413_v22 = vmul.f32 %v10524_v63, %v3338_v20  ;;  %v3215_v29 = vsub.f32 %v10152_v21, %v10549_v5  ;;  %v3216_v60 = vsub.f32 %v10167_v12, %v10578_v2 }
 0x4da   : > { %8076 = vrsqrt.f32 %v3272_v6  ;;  %v3273_v34 = vadd.f32 1e-05, %v3177_v54  ;;  %v3082_v58 = vmul.f32 0.00390625, %v3008_v49  ;;  %v3115_v15 = vmul.f32 %v10623_v9, %v10623_v9 }
 0x4db   : > { %v3011_v28 = vpop.xlane.xlu1 %3010  ;;  %v8073_v32 = vpop.eup %8072  ;;  %v3547_v10 = vpack.c.bf16 %v10636_v33, %v10633_v18  ;;  %v10649_v1 = vadd.f32 %v10547_v46, %v3413_v22  ;;  %v10652_v21 = vadd.f32 %v10547_v46, %v3411_v38 }
 0x4dc   : > { %8078 = vrsqrt.f32 %v3273_v34  ;;  %v3146_v13 = vsub.f32 %v3082_v58, %v3114_v30  ;;  %v3083_v27 = vmul.f32 0.00390625, %v3011_v28  ;;  %v3341_v6 = vmul.f32 %v8073_v32, %v3213_v40 }
 0x4dd   : > { %v2822_v7 = vpop.xlane.xlu0 %2821  ;;  %v8075_v54 = vpop.eup %8074  ;;  %3832 = vmatprep.mubr.bf16.mxu0 %v3547_v10  ;;  %v3340_v34 = vmul.f32 %v8073_v32, %v3212_v41  ;;  %v3217_v40 = vsub.f32 %v10171_v37, %v10578_v2  ;;  %v3218_v28 = vsub.f32 %v10175_v25, %v10589_v39 }
 0x4de   : > { %v3178_v26 = vmax.f32 %v3146_v13, 0.0  ;;  %v3147_v23 = vsub.f32 %v3083_v27, %v3115_v15  ;;  %v10646_v49 = vmul.f32 0.00390625, %v2822_v7  ;;  %v3343_v5 = vmul.f32 %v8075_v54, %v3215_v29 }
 0x4df   : > { %v2825_v20 = vpop.xlane.xlu1 %2824  ;;  %v3416_v12 = vmul.f32 %v10527_v52, %v3341_v6  ;;  %v3342_v15 = vmul.f32 %v8075_v54, %v3214_v62  ;;  %v3546_v27 = vpack.c.bf16 %v10649_v1, %v10652_v21  ;;  %v3415_v7 = vmul.f32 %v10524_v63, %v3340_v34 }
 0x4e0   : > { %v3274_v30 = vadd.f32 1e-05, %v3178_v26  ;;  %v3179_v58 = vmax.f32 %v3147_v23, 0.0  ;;  %v10659_v13 = vmul.f32 0.00390625, %v2825_v20  ;;  %v3418_v22 = vmul.f32 %v10527_v52, %v3343_v5  ;;  %v13870_v23 = vld [vmem:[#allocation44_spill] sm:$0xff] }
 0x4e1   : > { %v3014_v38 = vpop.xlane.xlu0 %3013  ;;  %v3116_v41 = vmul.f32 %v10646_v49, %v10646_v49  ;;  %3833 = vmatmul.mubr.bf16.gmra.mrb[72].mxu0 %v3546_v27  ;;  %v10669_v25 = vadd.f32 %v10542_v35, %v3416_v12  ;;  %v3417_v26 = vmul.f32 %v10524_v63, %v3342_v15  ;;  %v3219_v20 = vsub.f32 %v13870_v23, %v10589_v39 }
 0x4e2   : > { %8080 = vrsqrt.f32 %v3274_v30  ;;  %v3275_v29 = vadd.f32 1e-05, %v3179_v58  ;;  %v3084_v37 = vmul.f32 0.00390625, %v3014_v38  ;;  %v3117_v2 = vmul.f32 %v10659_v13, %v10659_v13 }
 0x4e3   : > { %v3017_v62 = vpop.xlane.xlu1 %3016  ;;  %v10672_v32 = vadd.f32 %v10542_v35, %v3418_v22  ;;  %v3220_v5 = vsub.f32 %v10195_v17, %v10610_v57  ;;  %v10688_v39 = vadd.f32 %v10547_v46, %v3415_v7 }
 0x4e4   : > { %v8077_v10 = vpop.eup %8076  ;;  %8082 = vrsqrt.f32 %v3275_v29  ;;  %v3148_v6 = vsub.f32 %v3084_v37, %v3116_v41  ;;  %v3085_v54 = vmul.f32 0.00390625, %v3017_v62  ;;  %v10685_v29 = vadd.f32 %v10547_v46, %v3417_v26 }
 0x4e5   : > { %13869 = vst [vmem:[#allocation42_spill] sm:$0xff] %v10672_v32  ;;  %v2828_v30 = vpop.xlane.xlu0 %2827  ;;  %v3549_v12 = vpack.c.bf16 %v10672_v32, %v10669_v25  ;;  %v3345_v58 = vmul.f32 %v8077_v10, %v3217_v40  ;;  %v3344_v37 = vmul.f32 %v8077_v10, %v3216_v60  ;;  %v3221_v40 = vsub.f32 %v10199_v4, %v10610_v57 }
 0x4e6   : > { %v8079_v27 = vpop.eup %8078  ;;  %v3180_v38 = vmax.f32 %v3148_v6, 0.0  ;;  %v3149_v34 = vsub.f32 %v3085_v54, %v3117_v2  ;;  %v10682_v22 = vmul.f32 0.00390625, %v2828_v30  ;;  %13871 = vst [vmem:[#allocation41_spill] sm:$0xff] %v10685_v29  ;;  %v13872_v54 = vld [vmem:[#allocation45_spill] sm:$0xff]  ;;  %v3548_v30 = vpack.c.bf16 %v10685_v29, %v10688_v39 }
 0x4e7   : > { %v2831_v15 = vpop.xlane.xlu1 %2830  ;;  %3842 = vmatprep.mubr.bf16.mxu0 %v3549_v12  ;;  %v3347_v41 = vmul.f32 %v8079_v27, %v3219_v20  ;;  %v3420_v17 = vmul.f32 %v10527_v52, %v3345_v58  ;;  %v3346_v2 = vmul.f32 %v8079_v27, %v3218_v28  ;;  %v3222_v23 = vsub.f32 %v13872_v54, %v10623_v9 }
 0x4e8   : > { %v3276_v62 = vadd.f32 1e-05, %v3180_v38  ;;  %v3181_v6 = vmax.f32 %v3149_v34, 0.0  ;;  %v10695_v26 = vmul.f32 0.00390625, %v2831_v15  ;;  %v3118_v60 = vmul.f32 %v10682_v22, %v10682_v22 }
 0x4e9   : > { %v3020_v7 = vpop.xlane.xlu0 %3019  ;;  %v3422_v20 = vmul.f32 %v10527_v52, %v3347_v41  ;;  %3843 = vmatmul.mubr.bf16.gmra.mrb[76].mxu0 %v3548_v30  ;;  %v10705_v10 = vadd.f32 %v10542_v35, %v3420_v17  ;;  %v3419_v27 = vmul.f32 %v10524_v63, %v3344_v37  ;;  %v3421_v41 = vmul.f32 %v10524_v63, %v3346_v2 }
 0x4ea   : > { %8084 = vrsqrt.f32 %v3276_v62  ;;  %v3277_v12 = vadd.f32 1e-05, %v3181_v6  ;;  %v3086_v4 = vmul.f32 0.00390625, %v3020_v7  ;;  %v3119_v57 = vmul.f32 %v10695_v26, %v10695_v26  ;;  %v13874_v62 = vld [vmem:[#allocation46_spill] sm:$0xff] }
 0x4eb   : > { %v3023_v28 = vpop.xlane.xlu1 %3022  ;;  %v10708_v58 = vadd.f32 %v10542_v35, %v3422_v20  ;;  %v3223_v6 = vsub.f32 %v13874_v62, %v10623_v9  ;;  %v3224_v54 = vsub.f32 %v10223_v14, %v10646_v49  ;;  %v10724_v9 = vadd.f32 %v10547_v46, %v3419_v27 }
 0x4ec   : > { %v8081_v38 = vpop.eup %8080  ;;  %8086 = vrsqrt.f32 %v3277_v12  ;;  %v3150_v34 = vsub.f32 %v3086_v4, %v3118_v60  ;;  %v3087_v15 = vmul.f32 0.00390625, %v3023_v28  ;;  %v10721_v12 = vadd.f32 %v10547_v46, %v3421_v41 }
 0x4ed   : > { %13873 = vst [vmem:[#allocation43_spill] sm:$0xff] %v10708_v58  ;;  %v2834_v30 = vpop.xlane.xlu0 %2833  ;;  %v3551_v17 = vpack.c.bf16 %v10708_v58, %v10705_v10  ;;  %v3349_v7 = vmul.f32 %v8081_v38, %v3221_v40  ;;  %v3348_v4 = vmul.f32 %v8081_v38, %v3220_v5  ;;  %v3225_v40 = vsub.f32 %v10227_v59, %v10646_v49 }
 0x4ee   : > { %v8083_v20 = vpop.eup %8082  ;;  %v3182_v32 = vmax.f32 %v3150_v34, 0.0  ;;  %v3151_v37 = vsub.f32 %v3087_v15, %v3119_v57  ;;  %v10718_v29 = vmul.f32 0.00390625, %v2834_v30  ;;  %v3226_v15 = vsub.f32 %v10231_v45, %v10659_v13 }
 0x4ef   : > { %v2837_v2 = vpop.xlane.xlu1 %2836  ;;  %3852 = vmatprep.mubr.bf16.mxu0 %v3551_v17  ;;  %v3351_v60 = vmul.f32 %v8083_v20, %v3223_v6  ;;  %v3424_v14 = vmul.f32 %v10527_v52, %v3349_v7  ;;  %v3350_v57 = vmul.f32 %v8083_v20, %v3222_v23  ;;  %v3550_v62 = vpack.c.bf16 %v10721_v12, %v10724_v9 }
 0x4f0   : > { %v3278_v28 = vadd.f32 1e-05, %v3182_v32  ;;  %v3183_v34 = vmax.f32 %v3151_v37, 0.0  ;;  %v10731_v41 = vmul.f32 0.00390625, %v2837_v2  ;;  %v3120_v5 = vmul.f32 %v10718_v29, %v10718_v29  ;;  %v13876_v2 = vld [vmem:[#allocation48_spill] sm:$0xff] }
 0x4f1   : > { %v3026_v27 = vpop.xlane.xlu0 %3025  ;;  %v3426_v6 = vmul.f32 %v10527_v52, %v3351_v60  ;;  %3853 = vmatmul.mubr.bf16.gmra.mrb[80].mxu0 %v3550_v62  ;;  %v10741_v45 = vadd.f32 %v10542_v35, %v3424_v14  ;;  %v3423_v38 = vmul.f32 %v10524_v63, %v3348_v4  ;;  %v3425_v37 = vmul.f32 %v10524_v63, %v3350_v57 }
 0x4f2   : > { %8088 = vrsqrt.f32 %v3278_v28  ;;  %v3279_v30 = vadd.f32 1e-05, %v3183_v34  ;;  %v3088_v59 = vmul.f32 0.00390625, %v3026_v27  ;;  %v3121_v49 = vmul.f32 %v10731_v41, %v10731_v41 }
 0x4f3   : > { %v3029_v32 = vpop.xlane.xlu1 %3028  ;;  %v10744_v23 = vadd.f32 %v10542_v35, %v3426_v6  ;;  %v3227_v60 = vsub.f32 %v13876_v2, %v10659_v13  ;;  %v3228_v28 = vsub.f32 %v10251_v24, %v10682_v22  ;;  %v10760_v13 = vadd.f32 %v10547_v46, %v3423_v38 }
 0x4f4   : > { %v8085_v17 = vpop.eup %8084  ;;  %8090 = vrsqrt.f32 %v3279_v30  ;;  %v3152_v7 = vsub.f32 %v3088_v59, %v3120_v5  ;;  %v3089_v20 = vmul.f32 0.00390625, %v3029_v32  ;;  %v10757_v30 = vadd.f32 %v10547_v46, %v3425_v37 }
 0x4f5   : > { %13875 = vst [vmem:[#allocation44_spill] sm:$0xff] %v10744_v23  ;;  %v2840_v34 = vpop.xlane.xlu0 %2839  ;;  %v3553_v14 = vpack.c.bf16 %v10744_v23, %v10741_v45  ;;  %v3353_v62 = vmul.f32 %v8085_v17, %v3225_v40  ;;  %v3352_v59 = vmul.f32 %v8085_v17, %v3224_v54  ;;  %v3229_v40 = vsub.f32 %v10255_v0, %v10682_v22 }
 0x4f6   : > { %v8087_v27 = vpop.eup %8086  ;;  %v3184_v6 = vmax.f32 %v3152_v7, 0.0  ;;  %v3153_v4 = vsub.f32 %v3089_v20, %v3121_v49  ;;  %v10754_v58 = vmul.f32 0.00390625, %v2840_v34  ;;  %13877 = vst [vmem:[#allocation45_spill] sm:$0xff] %v10757_v30  ;;  %v13878_v20 = vld [vmem:[#allocation47_spill] sm:$0xff]  ;;  %v3552_v34 = vpack.c.bf16 %v10757_v30, %v10760_v13 }
 0x4f7   : > { %v2843_v57 = vpop.xlane.xlu1 %2842  ;;  %3862 = vmatprep.mubr.bf16.mxu0 %v3553_v14  ;;  %v3355_v5 = vmul.f32 %v8087_v27, %v3227_v60  ;;  %v3428_v24 = vmul.f32 %v10527_v52, %v3353_v62  ;;  %v3354_v49 = vmul.f32 %v8087_v27, %v3226_v15  ;;  %v3230_v2 = vsub.f32 %v13878_v20, %v10695_v26 }
 0x4f8   : > { %v3280_v32 = vadd.f32 1e-05, %v3184_v6  ;;  %v3185_v7 = vmax.f32 %v3153_v4, 0.0  ;;  %v10767_v37 = vmul.f32 0.00390625, %v2843_v57  ;;  %v3122_v54 = vmul.f32 %v10754_v58, %v10754_v58 }
 0x4f9   : > { %v3032_v38 = vpop.xlane.xlu0 %3031  ;;  %v3430_v60 = vmul.f32 %v10527_v52, %v3355_v5  ;;  %3863 = vmatmul.mubr.bf16.gmra.mrb[84].mxu0 %v3552_v34  ;;  %v10777_v17 = vadd.f32 %v10542_v35, %v3428_v24  ;;  %v3427_v27 = vmul.f32 %v10524_v63, %v3352_v59  ;;  %v3429_v5 = vmul.f32 %v10524_v63, %v3354_v49 }
 0x4fa   : > { %8092 = vrsqrt.f32 %v3280_v32  ;;  %v3281_v14 = vadd.f32 1e-05, %v3185_v7  ;;  %v3090_v0 = vmul.f32 0.00390625, %v3032_v38  ;;  %v3123_v22 = vmul.f32 %v10767_v37, %v10767_v37  ;;  %v13880_v32 = vld [vmem:[#allocation49_spill] sm:$0xff] }
 0x4fb   : > { %v3035_v15 = vpop.xlane.xlu1 %3034  ;;  %v10780_v62 = vadd.f32 %v10542_v35, %v3430_v60  ;;  %v3231_v7 = vsub.f32 %v13880_v32, %v10695_v26  ;;  %v3232_v20 = vsub.f32 %v10279_v11, %v10718_v29  ;;  %v10796_v26 = vadd.f32 %v10547_v46, %v3427_v27 }
 0x4fc   : > { %v8089_v6 = vpop.eup %8088  ;;  %8094 = vrsqrt.f32 %v3281_v14  ;;  %v3154_v4 = vsub.f32 %v3090_v0, %v3122_v54  ;;  %v3091_v57 = vmul.f32 0.00390625, %v3035_v15  ;;  %v10793_v14 = vadd.f32 %v10547_v46, %v3429_v5 }
 0x4fd   : > { %13879 = vst [vmem:[#allocation46_spill] sm:$0xff] %v10780_v62  ;;  %v2846_v34 = vpop.xlane.xlu0 %2845  ;;  %v3555_v24 = vpack.c.bf16 %v10780_v62, %v10777_v17  ;;  %v3357_v38 = vmul.f32 %v8089_v6, %v3229_v40  ;;  %v3356_v0 = vmul.f32 %v8089_v6, %v3228_v28  ;;  %v3233_v40 = vsub.f32 %v10283_v51, %v10718_v29 }
 0x4fe   : > { %v8091_v60 = vpop.eup %8090  ;;  %v3186_v23 = vmax.f32 %v3154_v4, 0.0  ;;  %v3155_v59 = vsub.f32 %v3091_v57, %v3123_v22  ;;  %v10790_v30 = vmul.f32 0.00390625, %v2846_v34  ;;  %13881 = vst [vmem:[#allocation48_spill] sm:$0xff] %v10793_v14  ;;  %v13882_v57 = vld [vmem:[#allocation50_spill] sm:$0xff]  ;;  %v3554_v34 = vpack.c.bf16 %v10793_v14, %v10796_v26 }
 0x4ff   : > { %v2849_v49 = vpop.xlane.xlu1 %2848  ;;  %3872 = vmatprep.mubr.bf16.mxu0 %v3555_v24  ;;  %v3359_v54 = vmul.f32 %v8091_v60, %v3231_v7  ;;  %v3432_v11 = vmul.f32 %v10527_v52, %v3357_v38  ;;  %v3358_v22 = vmul.f32 %v8091_v60, %v3230_v2  ;;  %v3234_v32 = vsub.f32 %v13882_v57, %v10731_v41 }
 0x500   : > { %v3282_v15 = vadd.f32 1e-05, %v3186_v23  ;;  %v3187_v4 = vmax.f32 %v3155_v59, 0.0  ;;  %v10803_v5 = vmul.f32 0.00390625, %v2849_v49  ;;  %v3124_v28 = vmul.f32 %v10790_v30, %v10790_v30 }
 0x501   : > { %v3038_v27 = vpop.xlane.xlu0 %3037  ;;  %v3434_v7 = vmul.f32 %v10527_v52, %v3359_v54  ;;  %3873 = vmatmul.mubr.bf16.gmra.mrb[88].mxu0 %v3554_v34  ;;  %v10813_v2 = vadd.f32 %v10542_v35, %v3432_v11  ;;  %v3431_v38 = vmul.f32 %v10524_v63, %v3356_v0  ;;  %v3433_v54 = vmul.f32 %v10524_v63, %v3358_v22 }
 0x502   : > { %8096 = vrsqrt.f32 %v3282_v15  ;;  %v3283_v24 = vadd.f32 1e-05, %v3187_v4  ;;  %v3092_v51 = vmul.f32 0.00390625, %v3038_v27  ;;  %v3125_v29 = vmul.f32 %v10803_v5, %v10803_v5  ;;  %v13885_v15 = vld [vmem:[#allocation21_spill] sm:$0xff] }
 0x503   : > { %v3041_v23 = vpop.xlane.xlu1 %3040  ;;  %13883 = vst [vmem:[#allocation47_spill] sm:$0xff] %v10813_v2  ;;  %v10816_v6 = vadd.f32 %v10542_v35, %v3434_v7  ;;  %v3235_v4 = vsub.f32 %v13885_v15, %v10731_v41  ;;  %v3236_v57 = vsub.f32 %v10307_v43, %v10754_v58  ;;  %v10832_v41 = vadd.f32 %v10547_v46, %v3431_v38 }
 0x504   : > { %v8093_v60 = vpop.eup %8092  ;;  %8098 = vrsqrt.f32 %v3283_v24  ;;  %v3156_v59 = vsub.f32 %v3092_v51, %v3124_v28  ;;  %v3093_v49 = vmul.f32 0.00390625, %v3041_v23  ;;  %v10829_v24 = vadd.f32 %v10547_v46, %v3433_v54 }
 0x505   : > { %13884 = vst [vmem:[#allocation49_spill] sm:$0xff] %v10816_v6  ;;  %v2852_v34 = vpop.xlane.xlu0 %2851  ;;  %v3557_v11 = vpack.c.bf16 %v10816_v6, %v10813_v2  ;;  %v3361_v27 = vmul.f32 %v8093_v60, %v3233_v40  ;;  %v3360_v51 = vmul.f32 %v8093_v60, %v3232_v20  ;;  %v3237_v40 = vsub.f32 %v10311_v31, %v10754_v58 }
 0x506   : > { %v8095_v7 = vpop.eup %8094  ;;  %v3188_v62 = vmax.f32 %v3156_v59, 0.0  ;;  %v3157_v0 = vsub.f32 %v3093_v49, %v3125_v29  ;;  %v10826_v14 = vmul.f32 0.00390625, %v2852_v34  ;;  %13886 = vst [vmem:[#allocation50_spill] sm:$0xff] %v10829_v24  ;;  %v13887_v49 = vld [vmem:[#allocation22_spill] sm:$0xff]  ;;  %v3556_v34 = vpack.c.bf16 %v10829_v24, %v10832_v41 }
 0x507   : > { %v2855_v22 = vpop.xlane.xlu1 %2854  ;;  %3882 = vmatprep.mubr.bf16.mxu0 %v3557_v11  ;;  %v3363_v28 = vmul.f32 %v8095_v7, %v3235_v4  ;;  %v3436_v43 = vmul.f32 %v10527_v52, %v3361_v27  ;;  %v3362_v29 = vmul.f32 %v8095_v7, %v3234_v32  ;;  %v3238_v15 = vsub.f32 %v13887_v49, %v10767_v37  ;;  %v13891_v49 = vld [vmem:[#allocation24_spill] sm:$0xff] }
 0x508   : > { %v3284_v23 = vadd.f32 1e-05, %v3188_v62  ;;  %v3189_v59 = vmax.f32 %v3157_v0, 0.0  ;;  %v10839_v54 = vmul.f32 0.00390625, %v2855_v22  ;;  %v3126_v20 = vmul.f32 %v10826_v14, %v10826_v14 }
 0x509   : > { %v3044_v38 = vpop.xlane.xlu0 %3043  ;;  %v3438_v4 = vmul.f32 %v10527_v52, %v3363_v28  ;;  %3883 = vmatmul.mubr.bf16.gmra.mrb[92].mxu0 %v3556_v34  ;;  %v10849_v32 = vadd.f32 %v10542_v35, %v3436_v43  ;;  %v3435_v27 = vmul.f32 %v10524_v63, %v3360_v51  ;;  %v3437_v28 = vmul.f32 %v10524_v63, %v3362_v29 }
 0x50a   : > { %8100 = vrsqrt.f32 %v3284_v23  ;;  %v3285_v11 = vadd.f32 1e-05, %v3189_v59  ;;  %v3094_v31 = vmul.f32 0.00390625, %v3044_v38  ;;  %v3127_v58 = vmul.f32 %v10839_v54, %v10839_v54  ;;  %v13890_v23 = vld [vmem:[#allocation23_spill] sm:$0xff] }
 0x50b   : > { %v3047_v62 = vpop.xlane.xlu1 %3046  ;;  %13888 = vst [vmem:[#allocation21_spill] sm:$0xff] %v10849_v32  ;;  %v10852_v60 = vadd.f32 %v10542_v35, %v3438_v4  ;;  %v3239_v59 = vsub.f32 %v13890_v23, %v10767_v37  ;;  %v3240_v34 = vsub.f32 %v13891_v49, %v10790_v30  ;;  %v10868_v37 = vadd.f32 %v10547_v46, %v3435_v27  ;;  %v13893_v23 = vld [vmem:[#allocation25_spill] sm:$0xff] }
 0x50c   : > { %v8097_v7 = vpop.eup %8096  ;;  %8102 = vrsqrt.f32 %v3285_v11  ;;  %v3158_v0 = vsub.f32 %v3094_v31, %v3126_v20  ;;  %v3095_v22 = vmul.f32 0.00390625, %v3047_v62  ;;  %v10865_v11 = vadd.f32 %v10547_v46, %v3437_v28 }
 0x50d   : > { %13889 = vst [vmem:[#allocation22_spill] sm:$0xff] %v10852_v60  ;;  %v2858_v38 = vpop.xlane.xlu0 %2857  ;;  %v3559_v43 = vpack.c.bf16 %v10852_v60, %v10849_v32  ;;  %v3365_v4 = vmul.f32 %v8097_v7, %v3237_v40  ;;  %v3364_v62 = vmul.f32 %v8097_v7, %v3236_v57  ;;  %v3241_v40 = vsub.f32 %v13893_v23, %v10790_v30 }
 0x50e   : > { %v8099_v6 = vpop.eup %8098  ;;  %v3190_v24 = vmax.f32 %v3158_v0, 0.0  ;;  %v3159_v51 = vsub.f32 %v3095_v22, %v3127_v58  ;;  %v10862_v2 = vmul.f32 0.00390625, %v2858_v38  ;;  %13892 = vst [vmem:[#allocation23_spill] sm:$0xff] %v10865_v11  ;;  %v13894_v22 = vld [vmem:[#allocation26_spill] sm:$0xff] }
 0x50f   : > { %v2861_v29 = vpop.xlane.xlu1 %2860  ;;  %3892 = vmatprep.mubr.bf16.mxu0 %v3559_v43  ;;  %v3367_v20 = vmul.f32 %v8099_v6, %v3239_v59  ;;  %v3440_v31 = vmul.f32 %v10527_v52, %v3365_v4  ;;  %v3366_v58 = vmul.f32 %v8099_v6, %v3238_v15  ;;  %v3242_v38 = vsub.f32 %v13894_v22, %v10803_v5 }
 0x510   : > { %v3286_v49 = vadd.f32 1e-05, %v3190_v24  ;;  %v3191_v0 = vmax.f32 %v3159_v51, 0.0  ;;  %v10875_v28 = vmul.f32 0.00390625, %v2861_v29  ;;  %v3558_v43 = vpack.c.bf16 %v10865_v11, %v10868_v37 }
 0x511   : > { %v3050_v27 = vpop.xlane.xlu0 %3049  ;;  %v3442_v59 = vmul.f32 %v10527_v52, %v3367_v20  ;;  %v3128_v57 = vmul.f32 %v10862_v2, %v10862_v2  ;;  %v10885_v15 = vadd.f32 %v10542_v35, %v3440_v31  ;;  %v3439_v51 = vmul.f32 %v10524_v63, %v3364_v62 }
 0x512   : > { %8104 = vrsqrt.f32 %v3286_v49  ;;  %v3287_v4 = vadd.f32 1e-05, %v3191_v0  ;;  %v3096_v30 = vmul.f32 0.00390625, %v3050_v27  ;;  %3893 = vmatmul.mubr.bf16.gmra.mrb[96].mxu0 %v3558_v43  ;;  %v3129_v6 = vmul.f32 %v10875_v28, %v10875_v28  ;;  %v13895_v0 = vld [vmem:[#allocation27_spill] sm:$0xff] }
 0x513   : > { %v3053_v24 = vpop.xlane.xlu1 %3052  ;;  %v10888_v7 = vadd.f32 %v10542_v35, %v3442_v59  ;;  %v3441_v49 = vmul.f32 %v10524_v63, %v3366_v58  ;;  %v3243_v22 = vsub.f32 %v13895_v0, %v10803_v5  ;;  %v3244_v43 = vsub.f32 %v10363_v56, %v10826_v14 }
 0x514   : > { %v8101_v29 = vpop.eup %8100  ;;  %8106 = vrsqrt.f32 %v3287_v4  ;;  %v3160_v20 = vsub.f32 %v3096_v30, %v3128_v57  ;;  %v3097_v23 = vmul.f32 0.00390625, %v3053_v24  ;;  %v10904_v5 = vadd.f32 %v10547_v46, %v3439_v51 }
 0x515   : > { %v2864_v27 = vpop.xlane.xlu0 %2863  ;;  %v3561_v31 = vpack.c.bf16 %v10888_v7, %v10885_v15  ;;  %v3369_v59 = vmul.f32 %v8101_v29, %v3241_v40  ;;  %v10901_v4 = vadd.f32 %v10547_v46, %v3441_v49  ;;  %v3368_v30 = vmul.f32 %v8101_v29, %v3240_v34 }
 0x516   : > { %v8103_v60 = vpop.eup %8102  ;;  %v3192_v11 = vmax.f32 %v3160_v20, 0.0  ;;  %v3161_v62 = vsub.f32 %v3097_v23, %v3129_v6  ;;  %v10898_v32 = vmul.f32 0.00390625, %v2864_v27  ;;  %v3245_v40 = vsub.f32 %v10367_v50, %v10826_v14 }
 0x517   : > { %v2867_v58 = vpop.xlane.xlu1 %2866  ;;  %3902 = vmatprep.mubr.bf16.mxu0 %v3561_v31  ;;  %v3371_v57 = vmul.f32 %v8103_v60, %v3243_v22  ;;  %v3444_v56 = vmul.f32 %v10527_v52, %v3369_v59  ;;  %v3370_v6 = vmul.f32 %v8103_v60, %v3242_v38  ;;  %v3246_v23 = vsub.f32 %v10371_v16, %v10839_v54 }
 0x518   : > { %v3288_v24 = vadd.f32 1e-05, %v3192_v11  ;;  %v3193_v20 = vmax.f32 %v3161_v62, 0.0  ;;  %v10911_v49 = vmul.f32 0.00390625, %v2867_v58  ;;  %v3560_v0 = vpack.c.bf16 %v10901_v4, %v10904_v5 }
 0x519   : > { %v3056_v51 = vpop.xlane.xlu0 %3055  ;;  %v3446_v22 = vmul.f32 %v10527_v52, %v3371_v57  ;;  %v3130_v34 = vmul.f32 %v10898_v32, %v10898_v32  ;;  %v10921_v16 = vadd.f32 %v10542_v35, %v3444_v56  ;;  %v3443_v38 = vmul.f32 %v10524_v63, %v3368_v30 }
 0x51a   : > { %8108 = vrsqrt.f32 %v3288_v24  ;;  %v3289_v27 = vadd.f32 1e-05, %v3193_v20  ;;  %v3098_v50 = vmul.f32 0.00390625, %v3056_v51  ;;  %3903 = vmatmul.mubr.bf16.gmra.mrb[100].mxu0 %v3560_v0  ;;  %v3131_v14 = vmul.f32 %v10911_v49, %v10911_v49 }
 0x51b   : > { %v3059_v60 = vpop.xlane.xlu1 %3058  ;;  %v10924_v11 = vadd.f32 %v10542_v35, %v3446_v22  ;;  %v3445_v62 = vmul.f32 %v10524_v63, %v3370_v6  ;;  %v3247_v58 = vsub.f32 %v10374_v48, %v10839_v54  ;;  %v3248_v57 = vsub.f32 %v10391_v8, %v10862_v2 }
 0x51c   : > { %v8105_v29 = vpop.eup %8104  ;;  %8110 = vrsqrt.f32 %v3289_v27  ;;  %v3162_v31 = vsub.f32 %v3098_v50, %v3130_v34  ;;  %v3099_v59 = vmul.f32 0.00390625, %v3059_v60  ;;  %v10940_v48 = vadd.f32 %v10547_v46, %v3443_v38 }
 0x51d   : > { %13896 = vst [vmem:[#allocation24_spill] sm:$0xff] %v10924_v11  ;;  %v2870_v24 = vpop.xlane.xlu0 %2869  ;;  %v3563_v56 = vpack.c.bf16 %v10924_v11, %v10921_v16  ;;  %v3373_v20 = vmul.f32 %v8105_v29, %v3245_v40  ;;  %v10937_v27 = vadd.f32 %v10547_v46, %v3445_v62  ;;  %v3372_v34 = vmul.f32 %v8105_v29, %v3244_v43 }
 0x51e   : > { %v8107_v0 = vpop.eup %8106  ;;  %v3194_v51 = vmax.f32 %v3162_v31, 0.0  ;;  %v3163_v30 = vsub.f32 %v3099_v59, %v3131_v14  ;;  %v10934_v22 = vmul.f32 0.00390625, %v2870_v24  ;;  %v3249_v40 = vsub.f32 %v10395_v42, %v10862_v2 }
 0x51f   : > { %v2873_v6 = vpop.xlane.xlu1 %2872  ;;  %3912 = vmatprep.mubr.bf16.mxu0 %v3563_v56  ;;  %v3375_v54 = vmul.f32 %v8107_v0, %v3247_v58  ;;  %v3448_v8 = vmul.f32 %v10527_v52, %v3373_v20  ;;  %v3374_v14 = vmul.f32 %v8107_v0, %v3246_v23  ;;  %v3250_v31 = vsub.f32 %v10399_v55, %v10875_v28 }
 0x520   : > { %v3290_v50 = vadd.f32 1e-05, %v3194_v51  ;;  %v3195_v60 = vmax.f32 %v3163_v30, 0.0  ;;  %v10947_v59 = vmul.f32 0.00390625, %v2873_v6  ;;  %v3562_v62 = vpack.c.bf16 %v10937_v27, %v10940_v48 }
 0x521   : > { %v3062_v38 = vpop.xlane.xlu0 %3061  ;;  %v3450_v58 = vmul.f32 %v10527_v52, %v3375_v54  ;;  %v3132_v43 = vmul.f32 %v10934_v22, %v10934_v22  ;;  %v10957_v55 = vadd.f32 %v10542_v35, %v3448_v8  ;;  %v3447_v56 = vmul.f32 %v10524_v63, %v3372_v34 }
 0x522   : > { %8112 = vrsqrt.f32 %v3290_v50  ;;  %v3291_v24 = vadd.f32 1e-05, %v3195_v60  ;;  %v3100_v42 = vmul.f32 0.00390625, %v3062_v38  ;;  %3913 = vmatmul.mubr.bf16.gmra.mrb[104].mxu0 %v3562_v62  ;;  %v3133_v2 = vmul.f32 %v10947_v59, %v10947_v59 }
 0x523   : > { %v3065_v23 = vpop.xlane.xlu1 %3064  ;;  %v10960_v29 = vadd.f32 %v10542_v35, %v3450_v58  ;;  %v3449_v30 = vmul.f32 %v10524_v63, %v3374_v14  ;;  %v3251_v6 = vsub.f32 %v10402_v19, %v10875_v28  ;;  %v10976_v19 = vadd.f32 %v10547_v46, %v3447_v56 }
 0x524   : > { %v8109_v20 = vpop.eup %8108  ;;  %8114 = vrsqrt.f32 %v3291_v24  ;;  %v3164_v0 = vsub.f32 %v3100_v42, %v3132_v43  ;;  %v3101_v51 = vmul.f32 0.00390625, %v3065_v23  ;;  %v13899_v24 = vld [vmem:[#allocation28_spill] sm:$0xff] }
 0x525   : > { %13897 = vst [vmem:[#allocation25_spill] sm:$0xff] %v10960_v29  ;;  %v2876_v54 = vpop.xlane.xlu0 %2875  ;;  %v3565_v50 = vpack.c.bf16 %v10960_v29, %v10957_v55  ;;  %v3377_v8 = vmul.f32 %v8109_v20, %v3249_v40  ;;  %v3376_v60 = vmul.f32 %v8109_v20, %v3248_v57  ;;  %v10971_v34 = vadd.f32 %v10547_v46, %v3449_v30  ;;  %v13900_v57 = vld [vmem:[#allocation29_spill] sm:$0xff] }
 0x526   : > { %v8111_v62 = vpop.eup %8110  ;;  %v3196_v38 = vmax.f32 %v3164_v0, 0.0  ;;  %v3165_v58 = vsub.f32 %v3101_v51, %v3133_v2  ;;  %v10968_v11 = vmul.f32 0.00390625, %v2876_v54  ;;  %v3252_v14 = vsub.f32 %v13899_v24, %v10898_v32 }
 0x527   : > { %13898 = vst [vmem:[#allocation26_spill] sm:$0xff] %v10971_v34  ;;  %3922 = vmatprep.mubr.bf16.mxu0 %v3565_v50  ;;  %v2879_v43 = vpop.xlane.xlu1 %2878  ;;  %v3379_v28 = vmul.f32 %v8111_v62, %v3251_v6  ;;  %v3452_v40 = vmul.f32 %v10527_v52, %v3377_v8  ;;  %v3253_v42 = vsub.f32 %v13900_v57, %v10898_v32  ;;  %v13901_v32 = vld [vmem:[#allocation30_spill] sm:$0xff] }
 0x528   : > { %v3292_v2 = vadd.f32 1e-05, %v3196_v38  ;;  %v3197_v23 = vmax.f32 %v3165_v58, 0.0  ;;  %v3378_v20 = vmul.f32 %v8111_v62, %v3250_v31  ;;  %v10981_v0 = vmul.f32 0.00390625, %v2879_v43 }
 0x529   : > { %v3564_v51 = vpack.c.bf16 %v10971_v34, %v10976_v19  ;;  %v3068_v30 = vpop.xlane.xlu0 %3067  ;;  %v3454_v54 = vmul.f32 %v10527_v52, %v3379_v28  ;;  %v3451_v56 = vmul.f32 %v10524_v63, %v3376_v60  ;;  %v3134_v50 = vmul.f32 %v10968_v11, %v10968_v11 }
 0x52a   : > { %8116 = vrsqrt.f32 %v3292_v2  ;;  %v3293_v6 = vadd.f32 1e-05, %v3197_v23  ;;  %v3102_v8 = vmul.f32 0.00390625, %v3068_v30  ;;  %v3254_v38 = vsub.f32 %v13901_v32, %v10911_v49  ;;  %v13902_v2 = vld [vmem:[#allocation31_spill] sm:$0xff] }
 0x52b   : > { %3923 = vmatmul.mubr.bf16.gmra.mrb[108].mxu0 %v3564_v51  ;;  %v3135_v31 = vmul.f32 %v10981_v0, %v10981_v0  ;;  %v3071_v62 = vpop.xlane.xlu1 %3070  ;;  %v10994_v58 = vadd.f32 %v10542_v35, %v3452_v40  ;;  %v10997_v24 = vadd.f32 %v10542_v35, %v3454_v54  ;;  %v3453_v57 = vmul.f32 %v10524_v63, %v3378_v20 }
 0x52c   : > { %v8113_v60 = vpop.eup %8112  ;;  %8118 = vrsqrt.f32 %v3293_v6  ;;  %v3166_v43 = vsub.f32 %v3102_v8, %v3134_v50  ;;  %v3103_v28 = vmul.f32 0.00390625, %v3071_v62  ;;  %v3255_v23 = vsub.f32 %v13902_v2, %v10911_v49 }
 0x52d   : > { %v3567_v51 = vpack.c.bf16 %v10997_v24, %v10994_v58  ;;  %v3381_v30 = vmul.f32 %v8113_v60, %v3253_v42  ;;  %v3380_v32 = vmul.f32 %v8113_v60, %v3252_v14  ;;  %v11005_v54 = vadd.f32 %v10547_v46, %v3451_v56  ;;  %v13903_v60 = vld [vmem:[#allocation32_spill] sm:$0xff] }
 0x52e   : > { %v8115_v29 = vpop.eup %8114  ;;  %v3198_v40 = vmax.f32 %v3166_v43, 0.0  ;;  %v3167_v34 = vsub.f32 %v3103_v28, %v3135_v31  ;;  %v11008_v6 = vadd.f32 %v10547_v46, %v3453_v57  ;;  %v3256_v43 = vsub.f32 %v13903_v60, %v10934_v22  ;;  %v13904_v57 = vld [vmem:[#allocation33_spill] sm:$0xff] }
 0x52f   : > { %3932 = vmatprep.mubr.bf16.mxu0 %v3567_v51  ;;  %v3383_v50 = vmul.f32 %v8115_v29, %v3255_v23  ;;  %v3456_v20 = vmul.f32 %v10527_v52, %v3381_v30  ;;  %v3382_v8 = vmul.f32 %v8115_v29, %v3254_v38  ;;  %v3455_v31 = vmul.f32 %v10524_v63, %v3380_v32  ;;  %v13905_v51 = vld [vmem:[#allocation34_spill] sm:$0xff]  ;;  %v13906_v32 = vld [vmem:[#allocation37_spill] sm:$0xff] }
 0x530   : > { %v3294_v49 = vadd.f32 1e-05, %v3198_v40  ;;  %v3199_v62 = vmax.f32 %v3167_v34, 0.0  ;;  %v3566_v42 = vpack.c.bf16 %v11008_v6, %v11005_v54  ;;  %v3257_v2 = vsub.f32 %v13904_v57, %v10934_v22 }
 0x531   : > { %v3458_v14 = vmul.f32 %v10527_v52, %v3383_v50  ;;  %v3457_v56 = vmul.f32 %v10524_v63, %v3382_v8  ;;  %v11021_v29 = vadd.f32 %v10542_v35, %v3456_v20  ;;  %v3258_v30 = vsub.f32 %v13905_v51, %v10947_v59 }
 0x532   : > { %8120 = vrsqrt.f32 %v3294_v49  ;;  %v3295_v28 = vadd.f32 1e-05, %v3199_v62  ;;  %v3259_v40 = vsub.f32 %v13906_v32, %v10947_v59  ;;  %v11036_v50 = vadd.f32 %v10547_v46, %v3455_v31  ;;  %v13907_v31 = vld [vmem:[#allocation35_spill] sm:$0xff] }
 0x533   : > { %3933 = vmatmul.mubr.bf16.gmra.mrb[112].mxu0 %v3566_v42  ;;  %v11024_v34 = vadd.f32 %v10542_v35, %v3458_v14  ;;  %v11027_v38 = vadd.f32 %v10547_v46, %v3457_v56  ;;  %v3260_v57 = vsub.f32 %v13907_v31, %v10968_v11 }
 0x534   : > { %v8117_v23 = vpop.eup %8116  ;;  %8122 = vrsqrt.f32 %v3295_v28 }
 0x535   : > { %v3569_v22 = vpack.c.bf16 %v11024_v34, %v11021_v29  ;;  %v3385_v20 = vmul.f32 %v8117_v23, %v3257_v2  ;;  %v3384_v8 = vmul.f32 %v8117_v23, %v3256_v43  ;;  %v3568_v62 = vpack.c.bf16 %v11027_v38, %v11036_v50  ;;  %v13908_v43 = vld [vmem:[#allocation38_spill] sm:$0xff] }
 0x536   : > { %v8119_v49 = vpop.eup %8118  ;;  %v3261_v2 = vsub.f32 %v13908_v43, %v10968_v11 }
 0x537   : > { %3942 = vmatprep.mubr.bf16.mxu0 %v3569_v22  ;;  %v3387_v42 = vmul.f32 %v8119_v49, %v3259_v40  ;;  %v3460_v14 = vmul.f32 %v10527_v52, %v3385_v20  ;;  %v3386_v56 = vmul.f32 %v8119_v49, %v3258_v30  ;;  %v3459_v60 = vmul.f32 %v10524_v63, %v3384_v8  ;;  %v13909_v40 = vld [vmem:[#allocation36_spill] sm:$0xff]  ;;  %v13910_v20 = vld [vmem:[#allocation51_spill] sm:$0xff] }
 0x538   : > { %v3262_v22 = vsub.f32 %v13909_v40, %v10981_v0  ;;  %v3263_v8 = vsub.f32 %v13910_v20, %v10981_v0  ;;  %v13912_v20 = vld [vmem:[#allocation19_spill] sm:$0xff] }
 0x539   : > { %v3462_v59 = vmul.f32 %v10527_v52, %v3387_v42  ;;  %v3461_v28 = vmul.f32 %v10524_v63, %v3386_v56  ;;  %v11049_v23 = vadd.f32 %v10542_v35, %v3460_v14  ;;  %v11064_v49 = vadd.f32 %v10547_v46, %v3459_v60 }
 0x53b   : > { %3943 = vmatmul.mubr.bf16.gmra.mrb[116].mxu0 %v3568_v62  ;;  %v11052_v51 = vadd.f32 %v10542_v35, %v3462_v59  ;;  %v11055_v30 = vadd.f32 %v10547_v46, %v3461_v28 }
 0x53c   : > { %v8121_v32 = vpop.eup %8120 }
 0x53d   : > { %v3571_v11 = vpack.c.bf16 %v11052_v51, %v11049_v23  ;;  %v3389_v62 = vmul.f32 %v8121_v32, %v3261_v2  ;;  %v3388_v42 = vmul.f32 %v8121_v32, %v3260_v57  ;;  %v3570_v56 = vpack.c.bf16 %v11055_v30, %v11064_v49 }
 0x53e   : > { %v8123_v14 = vpop.eup %8122 }
 0x53f   : > { %3952 = vmatprep.mubr.bf16.mxu0 %v3571_v11  ;;  %v3391_v59 = vmul.f32 %v8123_v14, %v3263_v8  ;;  %v3464_v28 = vmul.f32 %v10527_v52, %v3389_v62  ;;  %v3390_v31 = vmul.f32 %v8123_v14, %v3262_v22  ;;  %v3463_v0 = vmul.f32 %v10524_v63, %v3388_v42  ;;  %v13913_v11 = vld [vmem:[#allocation20_spill] sm:$0xff]  ;;  %v7933_v14 = vld [vmem:[#allocation8 + $0x80] sm:$0xff]  }
 0x541   : > { %v3466_v43 = vmul.f32 %v10527_v52, %v3391_v59  ;;  %v3465_v40 = vmul.f32 %v10524_v63, %v3390_v31  ;;  %v11073_v60 = vadd.f32 %v10542_v35, %v3464_v28  ;;  %v11084_v22 = vadd.f32 %v10547_v46, %v3463_v0 }
 0x542   : > { %v13911_v63 = vmov 0  }
 0x543   : > { %3953 = vmatmul.mubr.bf16.gmra.mrb[120].mxu0 %v3570_v56  ;;  %v11076_v57 = vadd.f32 %v10542_v35, %v3466_v43  ;;  %v11079_v2 = vadd.f32 %v10547_v46, %v3465_v40  ;;  %v7133_v35 = vld [vmem:[%s13448_s2 + $0x2] sm:$0x3] }
 0x544   : > { %v11093_v8 = vrot.slane %v7133_v35, %v13912_v20  ;;  %v11096_v62 = vrot.slane %v7133_v35, %v13913_v11  ;;  %v7932_v46 = vld [vmem:[#allocation8 + $0xc0] sm:$0xff]  }
 0x545   : > { %v3573_v32 = vpack.c.bf16 %v11076_v57, %v11073_v60  ;;  %v3572_v52 = vpack.c.bf16 %v11079_v2, %v11084_v22  ;;  %7343 = vmatprep.subr.bf16.mxu1 %v7932_v46 }
 0x546   : > { %7344 = vmatpush3.bf16.msra.mxu1 %v7933_v14 }
 0x547   : > { %3962 = vmatprep.mubr.bf16.mxu0 %v3573_v32  ;;  %v13915_v32 = vld [vmem:[#allocation39_spill] sm:$0xff] }
 0x54b   : > { %3963 = vmatmul.mubr.bf16.gmra.mrb[124].mxu0 %v3572_v52 }
 0x54c   : > { %5319 = vmatprep.mubr.bf16.mxu0 %v13911_v63 }
 0x5a0   : > { %v3814_v42 = vpop.f32.mrb[64].mxu0 }
 0x5a1   : > { %v3815_v56 = vadd.f32 %v3814_v42, %v11093_v8  ;;  %v3816_v59 = vpop.f32.mrb[65].mxu0  ;;  %v13918_v42 = vld [vmem:[#allocation40_spill] sm:$0xff] }
 0x5a2   : > { %v3817_v28 = vadd.f32 %v3816_v59, %v11096_v62  ;;  %v3818_v31 = vpop.f32.mrb[66].mxu0 }
 0x5a3   : > { %v11101_v43 = vadd.f32 %v3815_v56, %v10571_v47  ;;  %v3819_v0 = vadd.f32 %v3818_v31, %v11093_v8  ;;  %v3820_v40 = vpop.f32.mrb[67].mxu0  ;;  %v7935_v31 = vld [vmem:[#allocation8 + $0x88] sm:$0xff]  }
 0x5a4   : > { %v11105_v52 = vadd.f32 %v3817_v28, %v13915_v32  ;;  %v3821_v35 = vadd.f32 %v3820_v40, %v11096_v62  ;;  %v7934_v28 = vld [vmem:[#allocation8 + $0xc8] sm:$0xff]  }
 0x5a5   : > { %13914 = vst [vmem:[#allocation27_spill] sm:$0xff] %v11101_v43  ;;  %v11109_v63 = vadd.f32 %v3819_v0, %v10574_v61  ;;  %v4169_v47 = vmul.f32 %v11101_v43, %v11101_v43  ;;  %7345 = vmatprep.subr.bf16.mxu1 %v7934_v28 }
 0x5a6   : > { %13916 = vst [vmem:[#allocation28_spill] sm:$0xff] %v11105_v52  ;;  %v11112_v11 = vadd.f32 %v3821_v35, %v13918_v42  ;;  %v4041_v46 = vadd.f32 %v11105_v52, %v11101_v43  ;;  %v4170_v14 = vmul.f32 %v11105_v52, %v11105_v52  ;;  %7346 = vmatpush3.bf16.msra.mxu1 %v7935_v31 }
 0x5a7   : > { %13917 = vst [vmem:[#allocation29_spill] sm:$0xff] %v11109_v63  ;;  %v4171_v61 = vmul.f32 %v11109_v63, %v11109_v63 }
 0x5a8   : > { %13919 = vst [vmem:[#allocation30_spill] sm:$0xff] %v11112_v11  ;;  %4042 = vadd.xlane.f32.xlu0 %v4041_v46  ;;  %v4044_v56 = vadd.f32 %v11112_v11, %v11109_v63  ;;  %v4172_v59 = vmul.f32 %v11112_v11, %v11112_v11  ;;  %v4233_v40 = vadd.f32 %v4170_v14, %v4169_v47 }
 0x5a9   : > { %v3824_v0 = vpop.f32.mrb[68].mxu0 }
 0x5aa   : > { %4045 = vadd.xlane.f32.xlu1 %v4044_v56  ;;  %v3825_v32 = vadd.f32 %v3824_v0, %v11093_v8  ;;  %v3826_v35 = vpop.f32.mrb[69].mxu0  ;;  %v4236_v52 = vadd.f32 %v4172_v59, %v4171_v61 }
 0x5ab   : > { %v3827_v42 = vadd.f32 %v3826_v35, %v11096_v62  ;;  %v3828_v46 = vpop.f32.mrb[70].mxu0 }
 0x5ac   : > { %4234 = vadd.xlane.f32.xlu0 %v4233_v40  ;;  %v11129_v63 = vadd.f32 %v3825_v32, %v10616_v36  ;;  %v3829_v11 = vadd.f32 %v3828_v46, %v11093_v8  ;;  %v3830_v43 = vpop.f32.mrb[71].mxu0 }
 0x5ad   : > { %v11133_v20 = vadd.f32 %v3827_v42, %v10597_v53  ;;  %v3831_v47 = vadd.f32 %v3830_v43, %v11096_v62 }
 0x5ae   : > { %4237 = vadd.xlane.f32.xlu1 %v4236_v52  ;;  %v11137_v14 = vadd.f32 %v3829_v11, %v10613_v44  ;;  %v4173_v36 = vmul.f32 %v11129_v63, %v11129_v63 }
 0x5af   : > { %v11140_v56 = vadd.f32 %v3831_v47, %v10600_v3  ;;  %v4047_v61 = vadd.f32 %v11133_v20, %v11129_v63  ;;  %v4174_v59 = vmul.f32 %v11133_v20, %v11133_v20 }
 0x5b0   : > { %v4175_v44 = vmul.f32 %v11137_v14, %v11137_v14 }
 0x5b1   : > { %4048 = vadd.xlane.f32.xlu0 %v4047_v61  ;;  %v4050_v43 = vadd.f32 %v11140_v56, %v11137_v14  ;;  %v4176_v3 = vmul.f32 %v11140_v56, %v11140_v56  ;;  %v4239_v0 = vadd.f32 %v4174_v59, %v4173_v36 }
 0x5b3   : > { %4051 = vadd.xlane.f32.xlu1 %v4050_v43  ;;  %v4242_v47 = vadd.f32 %v4176_v3, %v4175_v44 }
 0x5b4   : > { %v3834_v53 = vpop.f32.mrb[72].mxu0 }
 0x5b5   : > { %v3835_v11 = vadd.f32 %v3834_v53, %v11093_v8  ;;  %v3836_v52 = vpop.f32.mrb[73].mxu0  ;;  %4240 = vadd.xlane.f32.xlu0 %v4239_v0 }
 0x5b6   : > { %v3837_v28 = vadd.f32 %v3836_v52, %v11096_v62  ;;  %v3838_v31 = vpop.f32.mrb[74].mxu0 }
 0x5b7   : > { %v11157_v40 = vadd.f32 %v3835_v11, %v10652_v21  ;;  %v3839_v32 = vadd.f32 %v3838_v31, %v11093_v8  ;;  %v3840_v35 = vpop.f32.mrb[75].mxu0  ;;  %4243 = vadd.xlane.f32.xlu1 %v4242_v47 }
 0x5b8   : > { %v11161_v42 = vadd.f32 %v3837_v28, %v10633_v18  ;;  %v3841_v46 = vadd.f32 %v3840_v35, %v11096_v62 }
 0x5b9   : > { %v11165_v61 = vadd.f32 %v3839_v32, %v10649_v1  ;;  %v4177_v36 = vmul.f32 %v11157_v40, %v11157_v40 }
 0x5ba   : > { %v11168_v53 = vadd.f32 %v3841_v46, %v10636_v33  ;;  %v4053_v21 = vadd.f32 %v11161_v42, %v11157_v40  ;;  %v4178_v18 = vmul.f32 %v11161_v42, %v11161_v42 }
 0x5bb   : > { %13920 = vst [vmem:[#allocation31_spill] sm:$0xff] %v11165_v61  ;;  %v4179_v1 = vmul.f32 %v11165_v61, %v11165_v61 }
 0x5bc   : > { %v3844_v59 = vpop.f32.mrb[76].mxu0  ;;  %4054 = vadd.xlane.f32.xlu0 %v4053_v21  ;;  %v4056_v43 = vadd.f32 %v11168_v53, %v11165_v61  ;;  %v4180_v33 = vmul.f32 %v11168_v53, %v11168_v53  ;;  %v4245_v28 = vadd.f32 %v4178_v18, %v4177_v36  ;;  %v13921_v21 = vld [vmem:[#allocation41_spill] sm:$0xff]  ;;  %v7936_v18 = vld [vmem:[#allocation8 + $0xd0] sm:$0xff]  }
 0x5bd   : > { %v3845_v44 = vadd.f32 %v3844_v59, %v11093_v8  ;;  %v3846_v3 = vpop.f32.mrb[77].mxu0  ;;  %7347 = vmatprep.subr.bf16.mxu1 %v7936_v18 }
 0x5be   : > { %v3847_v11 = vadd.f32 %v3846_v3, %v11096_v62  ;;  %v3848_v52 = vpop.f32.mrb[78].mxu0  ;;  %4057 = vadd.xlane.f32.xlu1 %v4056_v43  ;;  %v4248_v47 = vadd.f32 %v4180_v33, %v4179_v1  ;;  %v13923_v3 = vld [vmem:[#allocation42_spill] sm:$0xff] }
 0x5bf   : > { %v11185_v31 = vadd.f32 %v3845_v44, %v10688_v39  ;;  %v3849_v0 = vadd.f32 %v3848_v52, %v11093_v8  ;;  %v3850_v32 = vpop.f32.mrb[79].mxu0 }
 0x5c0   : > { %v11189_v35 = vadd.f32 %v3847_v11, %v10669_v25  ;;  %v3851_v46 = vadd.f32 %v3850_v32, %v11096_v62  ;;  %4246 = vadd.xlane.f32.xlu0 %v4245_v28  ;;  %v7937_v11 = vld [vmem:[#allocation8 + $0x90] sm:$0xff]  }
 0x5c1   : > { %v11193_v59 = vadd.f32 %v3849_v0, %v13921_v21  ;;  %v4181_v36 = vmul.f32 %v11185_v31, %v11185_v31  ;;  %7348 = vmatpush3.bf16.msra.mxu1 %v7937_v11 }
 0x5c2   : > { %v11196_v61 = vadd.f32 %v3851_v46, %v13923_v3  ;;  %4249 = vadd.xlane.f32.xlu1 %v4248_v47  ;;  %v4059_v39 = vadd.f32 %v11189_v35, %v11185_v31  ;;  %v4182_v25 = vmul.f32 %v11189_v35, %v11189_v35 }
 0x5c3   : > { %13922 = vst [vmem:[#allocation32_spill] sm:$0xff] %v11193_v59  ;;  %v4183_v33 = vmul.f32 %v11193_v59, %v11193_v59 }
 0x5c4   : > { %13924 = vst [vmem:[#allocation33_spill] sm:$0xff] %v11196_v61  ;;  %v3854_v43 = vpop.f32.mrb[80].mxu0  ;;  %4060 = vadd.xlane.f32.xlu0 %v4059_v39  ;;  %v4062_v1 = vadd.f32 %v11196_v61, %v11193_v59  ;;  %v4184_v44 = vmul.f32 %v11196_v61, %v11196_v61  ;;  %v4251_v46 = vadd.f32 %v4182_v25, %v4181_v36  ;;  %v7938_v39 = vld [vmem:[#allocation8 + $0xd8] sm:$0xff]  }
 0x5c5   : > { %v3855_v52 = vadd.f32 %v3854_v43, %v11093_v8  ;;  %v3856_v28 = vpop.f32.mrb[81].mxu0  ;;  %v7939_v59 = vld [vmem:[#allocation8 + $0x98] sm:$0xff]   ;;  %7349 = vmatprep.subr.bf16.mxu1 %v7938_v39 }
 0x5c6   : > { %v3857_v0 = vadd.f32 %v3856_v28, %v11096_v62  ;;  %v3858_v32 = vpop.f32.mrb[82].mxu0  ;;  %4063 = vadd.xlane.f32.xlu1 %v4062_v1  ;;  %v4254_v18 = vadd.f32 %v4184_v44, %v4183_v33  ;;  %7350 = vmatpush3.bf16.msra.mxu1 %v7939_v59  ;;  %v7940_v33 = vld [vmem:[#allocation8 + $0xe0] sm:$0xff]  }
 0x5c7   : > { %v11213_v47 = vadd.f32 %v3855_v52, %v10724_v9  ;;  %v3859_v21 = vadd.f32 %v3858_v32, %v11093_v8  ;;  %v3860_v3 = vpop.f32.mrb[83].mxu0  ;;  %v13926_v9 = vld [vmem:[#allocation43_spill] sm:$0xff]  ;;  %7351 = vmatprep.subr.bf16.mxu1 %v7940_v33 }
 0x5c8   : > { %v11217_v61 = vadd.f32 %v3857_v0, %v10705_v10  ;;  %v3861_v43 = vadd.f32 %v3860_v3, %v11096_v62  ;;  %4252 = vadd.xlane.f32.xlu0 %v4251_v46  ;;  %v7941_v0 = vld [vmem:[#allocation8 + $0xa0] sm:$0xff]  }
 0x5c9   : > { %v11221_v28 = vadd.f32 %v3859_v21, %v10721_v12  ;;  %v4185_v36 = vmul.f32 %v11213_v47, %v11213_v47 }
 0x5ca   : > { %v11226_v25 = vadd.f32 %v3861_v43, %v13926_v9  ;;  %4255 = vadd.xlane.f32.xlu1 %v4254_v18  ;;  %v4065_v10 = vadd.f32 %v11217_v61, %v11213_v47  ;;  %v4186_v1 = vmul.f32 %v11217_v61, %v11217_v61  ;;  %7352 = vmatpush3.bf16.msra.mxu1 %v7941_v0  ;;  %v7942_v9 = vld [vmem:[#allocation8 + $0xe8] sm:$0xff]  }
 0x5cb   : > { %13925 = vst [vmem:[#allocation34_spill] sm:$0xff] %v11221_v28  ;;  %v4187_v11 = vmul.f32 %v11221_v28, %v11221_v28  ;;  %7353 = vmatprep.subr.bf16.mxu1 %v7942_v9 }
 0x5cc   : > { %13927 = vst [vmem:[#allocation37_spill] sm:$0xff] %v11226_v25  ;;  %v3864_v44 = vpop.f32.mrb[84].mxu0  ;;  %4066 = vadd.xlane.f32.xlu0 %v4065_v10  ;;  %v4068_v12 = vadd.f32 %v11226_v25, %v11221_v28  ;;  %v4188_v52 = vmul.f32 %v11226_v25, %v11226_v25  ;;  %v4257_v3 = vadd.f32 %v4186_v1, %v4185_v36  ;;  %v7943_v25 = vld [vmem:[#allocation8 + $0xa8] sm:$0xff]  }
 0x5cd   : > { %v3865_v32 = vadd.f32 %v3864_v44, %v11093_v8  ;;  %v3866_v46 = vpop.f32.mrb[85].mxu0 }
 0x5ce   : > { %v3867_v21 = vadd.f32 %v3866_v46, %v11096_v62  ;;  %v3868_v59 = vpop.f32.mrb[86].mxu0  ;;  %4069 = vadd.xlane.f32.xlu1 %v4068_v12  ;;  %v4260_v33 = vadd.f32 %v4188_v52, %v4187_v11  ;;  %v13928_v46 = vld [vmem:[#allocation45_spill] sm:$0xff]  ;;  %7354 = vmatpush3.bf16.msra.mxu1 %v7943_v25  ;;  %v7944_v11 = vld [vmem:[#allocation8 + $0xf0] sm:$0xff]  }
 0x5cf   : > { %v11241_v39 = vadd.f32 %v3865_v32, %v10760_v13  ;;  %v3869_v43 = vadd.f32 %v3868_v59, %v11093_v8  ;;  %v3870_v18 = vpop.f32.mrb[87].mxu0  ;;  %v13930_v13 = vld [vmem:[#allocation44_spill] sm:$0xff]  ;;  %7355 = vmatprep.subr.bf16.mxu1 %v7944_v11 }
 0x5d0   : > { %v11245_v10 = vadd.f32 %v3867_v21, %v10741_v45  ;;  %v3871_v44 = vadd.f32 %v3870_v18, %v11096_v62  ;;  %4258 = vadd.xlane.f32.xlu0 %v4257_v3  ;;  %v7945_v59 = vld [vmem:[#allocation8 + $0xb0] sm:$0xff]  }
 0x5d1   : > { %v11249_v28 = vadd.f32 %v3869_v43, %v13928_v46  ;;  %v4189_v36 = vmul.f32 %v11241_v39, %v11241_v39 }
 0x5d2   : > { %v11254_v1 = vadd.f32 %v3871_v44, %v13930_v13  ;;  %4261 = vadd.xlane.f32.xlu1 %v4260_v33  ;;  %v4071_v45 = vadd.f32 %v11245_v10, %v11241_v39  ;;  %v4190_v12 = vmul.f32 %v11245_v10, %v11245_v10  ;;  %7356 = vmatpush3.bf16.msra.mxu1 %v7945_v59  ;;  %v7946_v13 = vld [vmem:[#allocation8 + $0xf8] sm:$0xff]  }
 0x5d3   : > { %13929 = vst [vmem:[#allocation35_spill] sm:$0xff] %v11249_v28  ;;  %v4191_v32 = vmul.f32 %v11249_v28, %v11249_v28  ;;  %7357 = vmatprep.subr.bf16.mxu1 %v7946_v13 }
 0x5d4   : > { %13931 = vst [vmem:[#allocation38_spill] sm:$0xff] %v11254_v1  ;;  %v3874_v52 = vpop.f32.mrb[88].mxu0  ;;  %4072 = vadd.xlane.f32.xlu0 %v4071_v45  ;;  %v4074_v0 = vadd.f32 %v11254_v1, %v11249_v28  ;;  %v4192_v21 = vmul.f32 %v11254_v1, %v11254_v1  ;;  %v4263_v9 = vadd.f32 %v4190_v12, %v4189_v36  ;;  %v7947_v1 = vld [vmem:[#allocation8 + $0xb8] sm:$0xff]  }
 0x5d5   : > { %v3875_v3 = vadd.f32 %v3874_v52, %v11093_v8  ;;  %v3876_v43 = vpop.f32.mrb[89].mxu0 }
 0x5d6   : > { %v3877_v18 = vadd.f32 %v3876_v43, %v11096_v62  ;;  %v3878_v25 = vpop.f32.mrb[90].mxu0  ;;  %4075 = vadd.xlane.f32.xlu1 %v4074_v0  ;;  %v4266_v11 = vadd.f32 %v4192_v21, %v4191_v32  ;;  %v13932_v43 = vld [vmem:[#allocation48_spill] sm:$0xff]  ;;  %7358 = vmatpush3.bf16.msra.mxu1 %v7947_v1 }
 0x5d7   : > { %v11269_v44 = vadd.f32 %v3875_v3, %v10796_v26  ;;  %v3879_v33 = vadd.f32 %v3878_v25, %v11093_v8  ;;  %v3880_v46 = vpop.f32.mrb[91].mxu0  ;;  %v13934_v26 = vld [vmem:[#allocation46_spill] sm:$0xff] }
 0x5d8   : > { %v11273_v45 = vadd.f32 %v3877_v18, %v10777_v17  ;;  %v3881_v52 = vadd.f32 %v3880_v46, %v11096_v62  ;;  %4264 = vadd.xlane.f32.xlu0 %v4263_v9 }
 0x5d9   : > { %v11277_v28 = vadd.f32 %v3879_v33, %v13932_v43  ;;  %v4193_v36 = vmul.f32 %v11269_v44, %v11269_v44 }
 0x5da   : > { %v11282_v12 = vadd.f32 %v3881_v52, %v13934_v26  ;;  %4267 = vadd.xlane.f32.xlu1 %v4266_v11  ;;  %v4077_v17 = vadd.f32 %v11273_v45, %v11269_v44  ;;  %v4194_v0 = vmul.f32 %v11273_v45, %v11273_v45  ;;  %v13936_v11 = vld [vmem:[#allocation47_spill] sm:$0xff] }
 0x5db   : > { %13933 = vst [vmem:[#allocation36_spill] sm:$0xff] %v11277_v28  ;;  %v4195_v59 = vmul.f32 %v11277_v28, %v11277_v28 }
 0x5dc   : > { %13935 = vst [vmem:[#allocation51_spill] sm:$0xff] %v11282_v12  ;;  %v3884_v32 = vpop.f32.mrb[92].mxu0  ;;  %4078 = vadd.xlane.f32.xlu0 %v4077_v17  ;;  %v4080_v21 = vadd.f32 %v11282_v12, %v11277_v28  ;;  %v4196_v3 = vmul.f32 %v11282_v12, %v11282_v12  ;;  %v4269_v46 = vadd.f32 %v4194_v0, %v4193_v36 }
 0x5dd   : > { %v3885_v18 = vadd.f32 %v3884_v32, %v11093_v8  ;;  %v3886_v25 = vpop.f32.mrb[93].mxu0  ;;  %v13938_v32 = vld [vmem:[#allocation50_spill] sm:$0xff] }
 0x5de   : > { %v3887_v9 = vadd.f32 %v3886_v25, %v11096_v62  ;;  %v3888_v33 = vpop.f32.mrb[94].mxu0  ;;  %4081 = vadd.xlane.f32.xlu1 %v4080_v21  ;;  %v4272_v17 = vadd.f32 %v4196_v3, %v4195_v59  ;;  %v13940_v25 = vld [vmem:[#allocation49_spill] sm:$0xff] }
 0x5df   : > { %v11297_v1 = vadd.f32 %v3885_v18, %v10832_v41  ;;  %v3889_v13 = vadd.f32 %v3888_v33, %v11093_v8  ;;  %v3890_v52 = vpop.f32.mrb[95].mxu0 }
 0x5e0   : > { %v11301_v43 = vadd.f32 %v3887_v9, %v13936_v11  ;;  %v3891_v26 = vadd.f32 %v3890_v52, %v11096_v62  ;;  %4270 = vadd.xlane.f32.xlu0 %v4269_v46 }
 0x5e1   : > { %v11305_v12 = vadd.f32 %v3889_v13, %v13938_v32  ;;  %v4197_v36 = vmul.f32 %v11297_v1, %v11297_v1  ;;  %v13942_v32 = vld [vmem:[#allocation21_spill] sm:$0xff] }
 0x5e2   : > { %13937 = vst [vmem:[#allocation39_spill] sm:$0xff] %v11301_v43  ;;  %v11308_v28 = vadd.f32 %v3891_v26, %v13940_v25  ;;  %4273 = vadd.xlane.f32.xlu1 %v4272_v17  ;;  %v4083_v41 = vadd.f32 %v11301_v43, %v11297_v1  ;;  %v4198_v0 = vmul.f32 %v11301_v43, %v11301_v43 }
 0x5e3   : > { %13939 = vst [vmem:[#allocation40_spill] sm:$0xff] %v11305_v12  ;;  %v4199_v3 = vmul.f32 %v11305_v12, %v11305_v12 }
 0x5e4   : > { %13941 = vst [vmem:[#allocation41_spill] sm:$0xff] %v11308_v28  ;;  %4084 = vadd.xlane.f32.xlu0 %v4083_v41  ;;  %v4086_v59 = vadd.f32 %v11308_v28, %v11305_v12  ;;  %v4200_v18 = vmul.f32 %v11308_v28, %v11308_v28  ;;  %v4275_v52 = vadd.f32 %v4198_v0, %v4197_v36 }
 0x5e5   : > { %v3894_v21 = vpop.f32.mrb[96].mxu0 }
 0x5e6   : > { %v3895_v9 = vadd.f32 %v3894_v21, %v11093_v8  ;;  %v3896_v33 = vpop.f32.mrb[97].mxu0  ;;  %4087 = vadd.xlane.f32.xlu1 %v4086_v59  ;;  %v4278_v28 = vadd.f32 %v4200_v18, %v4199_v3  ;;  %v13943_v21 = vld [vmem:[#allocation23_spill] sm:$0xff] }
 0x5e7   : > { %v3897_v46 = vadd.f32 %v3896_v33, %v11096_v62  ;;  %v3898_v13 = vpop.f32.mrb[98].mxu0  ;;  %v13944_v33 = vld [vmem:[#allocation22_spill] sm:$0xff] }
 0x5e8   : > { %v11325_v11 = vadd.f32 %v3895_v9, %v10868_v37  ;;  %v3899_v26 = vadd.f32 %v3898_v13, %v11093_v8  ;;  %v3900_v17 = vpop.f32.mrb[99].mxu0  ;;  %4276 = vadd.xlane.f32.xlu0 %v4275_v52 }
 0x5e9   : > { %v11329_v25 = vadd.f32 %v3897_v46, %v13942_v32  ;;  %v3901_v41 = vadd.f32 %v3900_v17, %v11096_v62 }
 0x5ea   : > { %v11333_v12 = vadd.f32 %v3899_v26, %v13943_v21  ;;  %4279 = vadd.xlane.f32.xlu1 %v4278_v28  ;;  %v4201_v36 = vmul.f32 %v11325_v11, %v11325_v11 }
 0x5eb   : > { %v11336_v43 = vadd.f32 %v3901_v41, %v13944_v33  ;;  %v4089_v37 = vadd.f32 %v11329_v25, %v11325_v11  ;;  %v4202_v0 = vmul.f32 %v11329_v25, %v11329_v25 }
 0x5ec   : > { %v4203_v18 = vmul.f32 %v11333_v12, %v11333_v12 }
 0x5ed   : > { %v3904_v59 = vpop.f32.mrb[100].mxu0  ;;  %4090 = vadd.xlane.f32.xlu0 %v4089_v37  ;;  %v4092_v3 = vadd.f32 %v11336_v43, %v11333_v12  ;;  %v4204_v28 = vmul.f32 %v11336_v43, %v11336_v43  ;;  %v4281_v26 = vadd.f32 %v4202_v0, %v4201_v36 }
 0x5ee   : > { %v3905_v9 = vadd.f32 %v3904_v59, %v11093_v8  ;;  %v3906_v46 = vpop.f32.mrb[101].mxu0 }
 0x5ef   : > { %v3907_v13 = vadd.f32 %v3906_v46, %v11096_v62  ;;  %v3908_v52 = vpop.f32.mrb[102].mxu0  ;;  %4093 = vadd.xlane.f32.xlu1 %v4092_v3  ;;  %v4284_v37 = vadd.f32 %v4204_v28, %v4203_v18 }
 0x5f0   : > { %v11353_v17 = vadd.f32 %v3905_v9, %v10904_v5  ;;  %v3909_v32 = vadd.f32 %v3908_v52, %v11093_v8  ;;  %v3910_v41 = vpop.f32.mrb[103].mxu0 }
 0x5f1   : > { %v11357_v21 = vadd.f32 %v3907_v13, %v10885_v15  ;;  %v3911_v33 = vadd.f32 %v3910_v41, %v11096_v62  ;;  %4282 = vadd.xlane.f32.xlu0 %v4281_v26 }
 0x5f2   : > { %v11361_v59 = vadd.f32 %v3909_v32, %v10901_v4  ;;  %v4205_v36 = vmul.f32 %v11353_v17, %v11353_v17 }
 0x5f3   : > { %v11364_v46 = vadd.f32 %v3911_v33, %v10888_v7  ;;  %4285 = vadd.xlane.f32.xlu1 %v4284_v37  ;;  %v4095_v5 = vadd.f32 %v11357_v21, %v11353_v17  ;;  %v4206_v15 = vmul.f32 %v11357_v21, %v11357_v21 }
 0x5f4   : > { %v4207_v4 = vmul.f32 %v11361_v59, %v11361_v59 }
 0x5f5   : > { %13945 = vst [vmem:[#allocation42_spill] sm:$0xff] %v11364_v46  ;;  %v3914_v0 = vpop.f32.mrb[104].mxu0  ;;  %4096 = vadd.xlane.f32.xlu0 %v4095_v5  ;;  %v4098_v3 = vadd.f32 %v11364_v46, %v11361_v59  ;;  %v4208_v7 = vmul.f32 %v11364_v46, %v11364_v46  ;;  %v4287_v52 = vadd.f32 %v4206_v15, %v4205_v36 }
 0x5f6   : > { %v3915_v18 = vadd.f32 %v3914_v0, %v11093_v8  ;;  %v3916_v28 = vpop.f32.mrb[105].mxu0 }
 0x5f7   : > { %v3917_v9 = vadd.f32 %v3916_v28, %v11096_v62  ;;  %v3918_v13 = vpop.f32.mrb[106].mxu0  ;;  %4099 = vadd.xlane.f32.xlu1 %v4098_v3  ;;  %v4290_v5 = vadd.f32 %v4208_v7, %v4207_v4  ;;  %v13947_v28 = vld [vmem:[#allocation24_spill] sm:$0xff] }
 0x5f8   : > { %v11381_v26 = vadd.f32 %v3915_v18, %v10940_v48  ;;  %v3919_v32 = vadd.f32 %v3918_v13, %v11093_v8  ;;  %v3920_v41 = vpop.f32.mrb[107].mxu0 }
 0x5f9   : > { %v11385_v33 = vadd.f32 %v3917_v9, %v10921_v16  ;;  %v3921_v37 = vadd.f32 %v3920_v41, %v11096_v62  ;;  %4288 = vadd.xlane.f32.xlu0 %v4287_v52 }
 0x5fa   : > { %v11389_v0 = vadd.f32 %v3919_v32, %v10937_v27  ;;  %v4209_v36 = vmul.f32 %v11381_v26, %v11381_v26 }
 0x5fb   : > { %v11392_v46 = vadd.f32 %v3921_v37, %v13947_v28  ;;  %4291 = vadd.xlane.f32.xlu1 %v4290_v5  ;;  %v4101_v48 = vadd.f32 %v11385_v33, %v11381_v26  ;;  %v4210_v16 = vmul.f32 %v11385_v33, %v11385_v33 }
 0x5fc   : > { %13946 = vst [vmem:[#allocation43_spill] sm:$0xff] %v11389_v0  ;;  %v4211_v27 = vmul.f32 %v11389_v0, %v11389_v0 }
 0x5fd   : > { %13948 = vst [vmem:[#allocation45_spill] sm:$0xff] %v11392_v46  ;;  %4102 = vadd.xlane.f32.xlu0 %v4101_v48  ;;  %v4104_v3 = vadd.f32 %v11392_v46, %v11389_v0  ;;  %v4212_v4 = vmul.f32 %v11392_v46, %v11392_v46  ;;  %v4293_v52 = vadd.f32 %v4210_v16, %v4209_v36 }
 0x5fe   : > { %v3924_v15 = vpop.f32.mrb[108].mxu0 }
 0x5ff   : > { %v3925_v7 = vadd.f32 %v3924_v15, %v11093_v8  ;;  %v3926_v18 = vpop.f32.mrb[109].mxu0  ;;  %4105 = vadd.xlane.f32.xlu1 %v4104_v3  ;;  %v4296_v48 = vadd.f32 %v4212_v4, %v4211_v27  ;;  %v13949_v15 = vld [vmem:[#allocation26_spill] sm:$0xff] }
 0x600   : > { %v3927_v9 = vadd.f32 %v3926_v18, %v11096_v62  ;;  %v3928_v13 = vpop.f32.mrb[110].mxu0  ;;  %v13950_v18 = vld [vmem:[#allocation25_spill] sm:$0xff] }
 0x601   : > { %v11409_v32 = vadd.f32 %v3925_v7, %v10976_v19  ;;  %v3929_v41 = vadd.f32 %v3928_v13, %v11093_v8  ;;  %v3930_v37 = vpop.f32.mrb[111].mxu0  ;;  %4294 = vadd.xlane.f32.xlu0 %v4293_v52 }
 0x602   : > { %v11413_v5 = vadd.f32 %v3927_v9, %v10957_v55  ;;  %v3931_v28 = vadd.f32 %v3930_v37, %v11096_v62 }
 0x603   : > { %v11417_v46 = vadd.f32 %v3929_v41, %v13949_v15  ;;  %4297 = vadd.xlane.f32.xlu1 %v4296_v48  ;;  %v4213_v36 = vmul.f32 %v11409_v32, %v11409_v32 }
 0x604   : > { %v11420_v0 = vadd.f32 %v3931_v28, %v13950_v18  ;;  %v4107_v19 = vadd.f32 %v11413_v5, %v11409_v32  ;;  %v4214_v55 = vmul.f32 %v11413_v5, %v11413_v5 }
 0x605   : > { %v4215_v27 = vmul.f32 %v11417_v46, %v11417_v46 }
 0x606   : > { %v3934_v16 = vpop.f32.mrb[112].mxu0  ;;  %4108 = vadd.xlane.f32.xlu0 %v4107_v19  ;;  %v4110_v3 = vadd.f32 %v11420_v0, %v11417_v46  ;;  %v4216_v4 = vmul.f32 %v11420_v0, %v11420_v0  ;;  %v4299_v41 = vadd.f32 %v4214_v55, %v4213_v36 }
 0x607   : > { %v3935_v7 = vadd.f32 %v3934_v16, %v11093_v8  ;;  %v3936_v9 = vpop.f32.mrb[113].mxu0 }
 0x608   : > { %v3937_v13 = vadd.f32 %v3936_v9, %v11096_v62  ;;  %v3938_v52 = vpop.f32.mrb[114].mxu0  ;;  %4111 = vadd.xlane.f32.xlu1 %v4110_v3  ;;  %v4302_v19 = vadd.f32 %v4216_v4, %v4215_v27 }
 0x609   : > { %v11437_v37 = vadd.f32 %v3935_v7, %v11005_v54  ;;  %v3939_v28 = vadd.f32 %v3938_v52, %v11093_v8  ;;  %v3940_v48 = vpop.f32.mrb[115].mxu0 }
 0x60a   : > { %v11441_v15 = vadd.f32 %v3937_v13, %v10994_v58  ;;  %v3941_v18 = vadd.f32 %v3940_v48, %v11096_v62  ;;  %4300 = vadd.xlane.f32.xlu0 %v4299_v41 }
 0x60b   : > { %v11445_v16 = vadd.f32 %v3939_v28, %v11008_v6  ;;  %v4217_v36 = vmul.f32 %v11437_v37, %v11437_v37 }
 0x60c   : > { %v11448_v9 = vadd.f32 %v3941_v18, %v10997_v24  ;;  %4303 = vadd.xlane.f32.xlu1 %v4302_v19  ;;  %v4113_v54 = vadd.f32 %v11441_v15, %v11437_v37  ;;  %v4218_v58 = vmul.f32 %v11441_v15, %v11441_v15 }
 0x60d   : > { %13951 = vst [vmem:[#allocation44_spill] sm:$0xff] %v11445_v16  ;;  %v4219_v6 = vmul.f32 %v11445_v16, %v11445_v16 }
 0x60e   : > { %13952 = vst [vmem:[#allocation48_spill] sm:$0xff] %v11448_v9  ;;  %v3944_v55 = vpop.f32.mrb[116].mxu0  ;;  %4114 = vadd.xlane.f32.xlu0 %v4113_v54  ;;  %v4116_v3 = vadd.f32 %v11448_v9, %v11445_v16  ;;  %v4220_v24 = vmul.f32 %v11448_v9, %v11448_v9  ;;  %v4305_v52 = vadd.f32 %v4218_v58, %v4217_v36 }
 0x60f   : > { %v3945_v27 = vadd.f32 %v3944_v55, %v11093_v8  ;;  %v3946_v4 = vpop.f32.mrb[117].mxu0 }
 0x610   : > { %v3947_v7 = vadd.f32 %v3946_v4, %v11096_v62  ;;  %v3948_v13 = vpop.f32.mrb[118].mxu0  ;;  %4117 = vadd.xlane.f32.xlu1 %v4116_v3  ;;  %v4308_v54 = vadd.f32 %v4220_v24, %v4219_v6 }
 0x611   : > { %v11465_v41 = vadd.f32 %v3945_v27, %v11036_v50  ;;  %v3949_v28 = vadd.f32 %v3948_v13, %v11093_v8  ;;  %v3950_v48 = vpop.f32.mrb[119].mxu0 }
 0x612   : > { %v11469_v18 = vadd.f32 %v3947_v7, %v11021_v29  ;;  %v3951_v19 = vadd.f32 %v3950_v48, %v11096_v62  ;;  %4306 = vadd.xlane.f32.xlu0 %v4305_v52 }
 0x613   : > { %13953 = vst [vmem:[#allocation46_spill] sm:$0xff] %v11465_v41  ;;  %v11473_v55 = vadd.f32 %v3949_v28, %v11027_v38  ;;  %v4221_v36 = vmul.f32 %v11465_v41, %v11465_v41 }
 0x614   : > { %13954 = vst [vmem:[#allocation47_spill] sm:$0xff] %v11469_v18  ;;  %v11476_v4 = vadd.f32 %v3951_v19, %v11024_v34  ;;  %4309 = vadd.xlane.f32.xlu1 %v4308_v54  ;;  %v4119_v50 = vadd.f32 %v11469_v18, %v11465_v41  ;;  %v4222_v29 = vmul.f32 %v11469_v18, %v11469_v18 }
 0x615   : > { %13955 = vst [vmem:[#allocation50_spill] sm:$0xff] %v11473_v55  ;;  %v4223_v38 = vmul.f32 %v11473_v55, %v11473_v55 }
 0x616   : > { %13956 = vst [vmem:[#allocation49_spill] sm:$0xff] %v11476_v4  ;;  %v3954_v58 = vpop.f32.mrb[120].mxu0  ;;  %4120 = vadd.xlane.f32.xlu0 %v4119_v50  ;;  %v4122_v3 = vadd.f32 %v11476_v4, %v11473_v55  ;;  %v4224_v34 = vmul.f32 %v11476_v4, %v11476_v4  ;;  %v4311_v13 = vadd.f32 %v4222_v29, %v4221_v36 }
 0x617   : > { %v3955_v6 = vadd.f32 %v3954_v58, %v11093_v8  ;;  %v3956_v24 = vpop.f32.mrb[121].mxu0 }
 0x618   : > { %v3957_v27 = vadd.f32 %v3956_v24, %v11096_v62  ;;  %v3958_v7 = vpop.f32.mrb[122].mxu0  ;;  %4123 = vadd.xlane.f32.xlu1 %v4122_v3  ;;  %v4314_v50 = vadd.f32 %v4224_v34, %v4223_v38 }
 0x619   : > { %v11493_v52 = vadd.f32 %v3955_v6, %v11064_v49  ;;  %v3959_v28 = vadd.f32 %v3958_v7, %v11093_v8  ;;  %v3960_v48 = vpop.f32.mrb[123].mxu0 }
 0x61a   : > { %v11497_v19 = vadd.f32 %v3957_v27, %v11049_v23  ;;  %v3961_v54 = vadd.f32 %v3960_v48, %v11096_v62  ;;  %4312 = vadd.xlane.f32.xlu0 %v4311_v13 }
 0x61b   : > { %13957 = vst [vmem:[#allocation21_spill] sm:$0xff] %v11493_v52  ;;  %v11501_v58 = vadd.f32 %v3959_v28, %v11055_v30  ;;  %v4225_v36 = vmul.f32 %v11493_v52, %v11493_v52 }
 0x61c   : > { %13958 = vst [vmem:[#allocation23_spill] sm:$0xff] %v11497_v19  ;;  %v11504_v24 = vadd.f32 %v3961_v54, %v11052_v51  ;;  %4315 = vadd.xlane.f32.xlu1 %v4314_v50  ;;  %v4125_v49 = vadd.f32 %v11497_v19, %v11493_v52  ;;  %v4226_v23 = vmul.f32 %v11497_v19, %v11497_v19  ;;  %v13969_v19 = vld [vmem:[#allocation29_spill] sm:$0xff]  ;;  %v13970_v52 = vld [vmem:[#allocation30_spill] sm:$0xff] }
 0x61d   : > { %13959 = vst [vmem:[#allocation22_spill] sm:$0xff] %v11501_v58  ;;  %v4227_v30 = vmul.f32 %v11501_v58, %v11501_v58 }
 0x61e   : > { %13960 = vst [vmem:[#allocation24_spill] sm:$0xff] %v11504_v24  ;;  %4126 = vadd.xlane.f32.xlu0 %v4125_v49  ;;  %v3964_v29 = vpop.f32.mrb[124].mxu0  ;;  %v4128_v3 = vadd.f32 %v11504_v24, %v11501_v58  ;;  %v4228_v51 = vmul.f32 %v11504_v24, %v11504_v24  ;;  %v4317_v7 = vadd.f32 %v4226_v23, %v4225_v36 }
 0x61f   : > { %v3965_v38 = vadd.f32 %v3964_v29, %v11093_v8  ;;  %v3966_v34 = vpop.f32.mrb[125].mxu0 }
 0x620   : > { %v3967_v6 = vadd.f32 %v3966_v34, %v11096_v62  ;;  %4129 = vadd.xlane.f32.xlu1 %v4128_v3  ;;  %v3968_v27 = vpop.f32.mrb[126].mxu0  ;;  %v4320_v49 = vadd.f32 %v4228_v51, %v4227_v30 }
 0x621   : > { %v11521_v13 = vadd.f32 %v3965_v38, %v11084_v22  ;;  %v3969_v28 = vadd.f32 %v3968_v27, %v11093_v8  ;;  %v3970_v48 = vpop.f32.mrb[127].mxu0 }
 0x622   : > { %v11525_v54 = vadd.f32 %v3967_v6, %v11073_v60  ;;  %v3971_v50 = vadd.f32 %v3970_v48, %v11096_v62  ;;  %4318 = vadd.xlane.f32.xlu0 %v4317_v7 }
 0x623   : > { %13961 = vst [vmem:[#allocation26_spill] sm:$0xff] %v11521_v13  ;;  %v11529_v29 = vadd.f32 %v3969_v28, %v11079_v2  ;;  %v4229_v8 = vmul.f32 %v11521_v13, %v11521_v13 }
 0x624   : > { %13962 = vst [vmem:[#allocation25_spill] sm:$0xff] %v11525_v54  ;;  %v11532_v3 = vadd.f32 %v3971_v50, %v11076_v57  ;;  %4321 = vadd.xlane.f32.xlu1 %v4320_v49  ;;  %v4131_v22 = vadd.f32 %v11525_v54, %v11521_v13  ;;  %v4230_v60 = vmul.f32 %v11525_v54, %v11525_v54  ;;  %v13968_v13 = vld [vmem:[#allocation28_spill] sm:$0xff] }
 0x625   : > { %13963 = vst [vmem:[#allocation52_spill] sm:$0xff] %v11529_v29  ;;  %v4231_v2 = vmul.f32 %v11529_v29, %v11529_v29 }
 0x626   : > { %13964 = vst [vmem:[#allocation53_spill] sm:$0xff] %v11532_v3  ;;  %4132 = vadd.xlane.f32.xlu0 %v4131_v22  ;;  %v4134_v62 = vadd.f32 %v11532_v3, %v11529_v29  ;;  %v4232_v57 = vmul.f32 %v11532_v3, %v11532_v3  ;;  %v4323_v36 = vadd.f32 %v4230_v60, %v4229_v8 }
 0x628   : > { %4135 = vadd.xlane.f32.xlu1 %v4134_v62  ;;  %v4326_v23 = vadd.f32 %v4232_v57, %v4231_v2 }
 0x62a   : > { %4324 = vadd.xlane.f32.xlu0 %v4323_v36 }
 0x62c   : > { %4327 = vadd.xlane.f32.xlu1 %v4326_v23 }
 0x635   : > { %v4043_v30 = vpop.xlane.xlu0 %4042 }
 0x636   : > { %v4137_v51 = vmul.f32 0.00390625, %v4043_v30 }
 0x637   : > { %v4046_v38 = vpop.xlane.xlu1 %4045 }
 0x638   : > { %v4138_v34 = vmul.f32 0.00390625, %v4046_v38  ;;  %v4361_v27 = vmul.f32 %v4137_v51, %v4137_v51 }
 0x639   : > { %v4235_v6 = vpop.xlane.xlu0 %4234 }
 0x63a   : > { %v4329_v7 = vmul.f32 0.00390625, %v4235_v6  ;;  %v4362_v50 = vmul.f32 %v4138_v34, %v4138_v34  ;;  %v4460_v4 = vsub.f32 %v13970_v52, %v4138_v34 }
 0x63b   : > { %v4238_v28 = vpop.xlane.xlu1 %4237 }
 0x63c   : > { %v4393_v48 = vsub.f32 %v4329_v7, %v4361_v27  ;;  %v4330_v49 = vmul.f32 0.00390625, %v4238_v28 }
 0x63e   : > { %v4425_v22 = vmax.f32 %v4393_v48, 0.0  ;;  %v4394_v29 = vsub.f32 %v4330_v49, %v4362_v50  ;;  %v4049_v54 = vpop.xlane.xlu0 %4048  ;;  %v7167_v50 = vld [vmem:[%s13450_s4 + $0x2] sm:$0x3] }
 0x63f   : > { %v11546_v8 = vmul.f32 0.00390625, %v4049_v54  ;;  %v7166_v54 = vld [vmem:[%s13449_s3 + $0x2] sm:$0x3] }
 0x640   : > { %v4521_v3 = vadd.f32 1e-05, %v4425_v22  ;;  %v4426_v62 = vmax.f32 %v4394_v29, 0.0  ;;  %v4052_v60 = vpop.xlane.xlu1 %4051 }
 0x641   : > { %v11548_v57 = vmul.f32 0.00390625, %v4052_v60  ;;  %v4363_v23 = vmul.f32 %v11546_v8, %v11546_v8  ;;  %v13965_v60 = vld [vmem:[#allocation19_spill] sm:$0xff] }
 0x642   : > { %8124 = vrsqrt.f32 %v4521_v3  ;;  %v4522_v2 = vadd.f32 1e-05, %v4426_v62  ;;  %v4241_v36 = vpop.xlane.xlu0 %4240 }
 0x643   : > { %v4331_v30 = vmul.f32 0.00390625, %v4241_v36  ;;  %v4364_v27 = vmul.f32 %v11548_v57, %v11548_v57  ;;  %v13966_v36 = vld [vmem:[#allocation20_spill] sm:$0xff] }
 0x644   : > { %8126 = vrsqrt.f32 %v4522_v2  ;;  %v4244_v38 = vpop.xlane.xlu1 %4243  ;;  %v11563_v2 = vrot.slane %v7166_v54, %v13965_v60  ;;  %v11582_v9 = vrot.slane %v7167_v50, %v13966_v36 }
 0x645   : > { %v4395_v6 = vsub.f32 %v4331_v30, %v4363_v23  ;;  %v4332_v7 = vmul.f32 0.00390625, %v4244_v38  ;;  %v11566_v23 = vrot.slane %v7166_v54, %v13966_v36  ;;  %v13967_v30 = vld [vmem:[#allocation27_spill] sm:$0xff]  ;;  %v4459_v54 = vsub.f32 %v13969_v19, %v4138_v34 }
 0x646   : > { %v4457_v38 = vsub.f32 %v13967_v30, %v4137_v51 }
 0x647   : > { %v4427_v3 = vmax.f32 %v4395_v6, 0.0  ;;  %v4396_v28 = vsub.f32 %v4332_v7, %v4364_v27  ;;  %v4458_v6 = vsub.f32 %v13968_v13, %v4137_v51 }
 0x649   : > { %v4055_v29 = vpop.xlane.xlu0 %4054  ;;  %v4523_v22 = vadd.f32 1e-05, %v4427_v3  ;;  %v4428_v62 = vmax.f32 %v4396_v28, 0.0 }
 0x64a   : > { %v11557_v48 = vmul.f32 0.00390625, %v4055_v29  ;;  %v11573_v29 = vrot.slane %v7167_v50, %v13965_v60 }
 0x64b   : > { %v4058_v49 = vpop.xlane.xlu1 %4057  ;;  %8128 = vrsqrt.f32 %v4523_v22  ;;  %v4524_v3 = vadd.f32 1e-05, %v4428_v62 }
 0x64c   : > { %v11570_v27 = vmul.f32 0.00390625, %v4058_v49  ;;  %v8125_v24 = vpop.eup %8124  ;;  %v4365_v28 = vmul.f32 %v11557_v48, %v11557_v48 }
 0x64d   : > { %v4247_v7 = vpop.xlane.xlu0 %4246  ;;  %v4585_v30 = vmul.f32 %v8125_v24, %v4457_v38  ;;  %8130 = vrsqrt.f32 %v4524_v3  ;;  %v4586_v18 = vmul.f32 %v8125_v24, %v4458_v6  ;;  %v4461_v24 = vsub.f32 %v11129_v63, %v11546_v8 }
 0x64e   : > { %v4333_v58 = vmul.f32 0.00390625, %v4247_v7  ;;  %v4366_v13 = vmul.f32 %v11570_v27, %v11570_v27  ;;  %v8127_v49 = vpop.eup %8126 }
 0x64f   : > { %v4250_v51 = vpop.xlane.xlu1 %4249  ;;  %v4587_v22 = vmul.f32 %v8127_v49, %v4459_v54  ;;  %v4588_v41 = vmul.f32 %v8127_v49, %v4460_v4  ;;  %v4660_v19 = vmul.f32 %v11563_v2, %v4585_v30  ;;  %v4661_v38 = vmul.f32 %v11566_v23, %v4586_v18 }
 0x650   : > { %v4397_v60 = vsub.f32 %v4333_v58, %v4365_v28  ;;  %v4334_v55 = vmul.f32 0.00390625, %v4250_v51 }
 0x651   : > { %v4061_v62 = vpop.xlane.xlu0 %4060  ;;  %v4663_v3 = vmul.f32 %v11566_v23, %v4588_v41  ;;  %v4662_v58 = vmul.f32 %v11563_v2, %v4587_v22  ;;  %v11593_v50 = vadd.f32 %v11573_v29, %v4660_v19  ;;  %v11600_v18 = vadd.f32 %v11582_v9, %v4661_v38  ;;  %v7950_v19 = vld [vmem:[#allocation9 + $0x84] ss:$8 sps:$4 sm:$0xff]  }
 0x652   : > { %v4429_v7 = vmax.f32 %v4397_v60, 0.0  ;;  %v4398_v52 = vsub.f32 %v4334_v55, %v4366_v13  ;;  %v11585_v34 = vmul.f32 0.00390625, %v4061_v62  ;;  %v4463_v13 = vsub.f32 %v11137_v14, %v11548_v57  ;;  %v7948_v62 = vld [vmem:[#allocation9 + $0x80] ss:$8 sps:$4 sm:$0xff]   ;;  %5287 = vmatprep.subr.bf16.mxu0 %v7950_v19 }
 0x653   : > { %v4064_v16 = vpop.xlane.xlu1 %4063  ;;  %13971 = vst [vmem:[#allocation20_spill] sm:$0xff] %v11600_v18  ;;  %v11603_v41 = vadd.f32 %v11582_v9, %v4663_v3  ;;  %v11606_v30 = vadd.f32 %v11573_v29, %v4662_v58  ;;  %v4464_v14 = vsub.f32 %v11140_v56, %v11548_v57  ;;  %5288 = vmatpush1.bf16.msra.mxu0 %v7948_v62  ;;  %v7956_v56 = vld [vmem:[#allocation9 + $0xa4] ss:$8 sps:$4 sm:$0xff]  }
 0x654   : > { %v4525_v4 = vadd.f32 1e-05, %v4429_v7  ;;  %v4430_v6 = vmax.f32 %v4398_v52, 0.0  ;;  %v11595_v28 = vmul.f32 0.00390625, %v4064_v16  ;;  %v4367_v55 = vmul.f32 %v11585_v34, %v11585_v34 }
 0x655   : > { %v4253_v60 = vpop.xlane.xlu0 %4252  ;;  %13972 = vst [vmem:[#allocation27_spill] sm:$0xff] %v11603_v41  ;;  %13973 = vst [vmem:[#allocation28_spill] sm:$0xff] %v11606_v30  ;;  %v4462_v16 = vsub.f32 %v11133_v20, %v11546_v8  ;;  %v4800_v22 = vpack.c.bf16 %v11603_v41, %v11600_v18  ;;  %v8129_v7 = vpop.eup %8128  ;;  %v4799_v3 = vpack.c.bf16 %v11606_v30, %v11593_v50  ;;  %v7953_v20 = vld [vmem:[#allocation9 + $0x94] ss:$8 sps:$4 sm:$0xff]  }
 0x656   : > { %8132 = vrsqrt.f32 %v4525_v4  ;;  %v4526_v54 = vadd.f32 1e-05, %v4430_v6  ;;  %v4335_v63 = vmul.f32 0.00390625, %v4253_v60  ;;  %v4368_v51 = vmul.f32 %v11595_v28, %v11595_v28  ;;  %5289 = vmatprep.subr.bf16.mxu0 %v7953_v20 }
 0x657   : > { %v4256_v49 = vpop.xlane.xlu1 %4255  ;;  %5000 = vmatprep.mubr.bf16.mxu1 %v4800_v22  ;;  %v4590_v58 = vmul.f32 %v8129_v7, %v4462_v16  ;;  %v4589_v4 = vmul.f32 %v8129_v7, %v4461_v24  ;;  %v8131_v6 = vpop.eup %8130  ;;  %v4465_v57 = vsub.f32 %v11157_v40, %v11557_v48  ;;  %v4466_v40 = vsub.f32 %v11161_v42, %v11557_v48 }
 0x658   : > { %8134 = vrsqrt.f32 %v4526_v54  ;;  %v4399_v52 = vsub.f32 %v4335_v63, %v4367_v55  ;;  %v4336_v38 = vmul.f32 0.00390625, %v4256_v49  ;;  %5001 = vmatmul.mubr.bf16.vlgmr.msra.gmra.mrb[128].mxu1 %v4799_v3  ;;  %v7951_v55 = vld [vmem:[#allocation9 + $0x90] ss:$8 sps:$4 sm:$0xff]   ;;  %v4592_v63 = vmul.f32 %v8131_v6, %v4464_v14  ;;  %v7954_v3 = vld [vmem:[#allocation9 + $0xa0] ss:$8 sps:$4 sm:$0xff]  }
 0x659   : > { %v4067_v8 = vpop.xlane.xlu0 %4066  ;;  %v4665_v49 = vmul.f32 %v11566_v23, %v4590_v58  ;;  %v4591_v30 = vmul.f32 %v8131_v6, %v4463_v13  ;;  %v4664_v7 = vmul.f32 %v11563_v2, %v4589_v4  ;;  %5290 = vmatpush1.bf16.msra.mxu0 %v7951_v55 }
 0x65a   : > { %v4431_v60 = vmax.f32 %v4399_v52, 0.0  ;;  %v4400_v41 = vsub.f32 %v4336_v38, %v4368_v51  ;;  %v11620_v18 = vmul.f32 0.00390625, %v4067_v8  ;;  %v4667_v62 = vmul.f32 %v11566_v23, %v4592_v63  ;;  %5291 = vmatprep.subr.bf16.mxu0 %v7956_v56 }
 0x65b   : > { %v4070_v54 = vpop.xlane.xlu1 %4069  ;;  %v4666_v38 = vmul.f32 %v11563_v2, %v4591_v30  ;;  %v11637_v14 = vadd.f32 %v11582_v9, %v4665_v49  ;;  %v11647_v48 = vadd.f32 %v11573_v29, %v4664_v7  ;;  %v13974_v49 = vld [vmem:[#allocation31_spill] sm:$0xff] }
 0x65c   : > { %v4527_v24 = vadd.f32 1e-05, %v4431_v60  ;;  %v4432_v16 = vmax.f32 %v4400_v41, 0.0  ;;  %v11625_v22 = vmul.f32 0.00390625, %v4070_v54  ;;  %v4369_v51 = vmul.f32 %v11620_v18, %v11620_v18  ;;  %v7959_v60 = vld [vmem:[#allocation9 + $0xb4] ss:$8 sps:$4 sm:$0xff]  }
 0x65d   : > { %v4259_v19 = vpop.xlane.xlu0 %4258  ;;  %v4468_v41 = vsub.f32 %v11168_v53, %v11570_v27  ;;  %v11640_v8 = vadd.f32 %v11582_v9, %v4667_v62  ;;  %v11650_v55 = vadd.f32 %v11573_v29, %v4666_v38  ;;  %v4467_v56 = vsub.f32 %v13974_v49, %v11570_v27  ;;  %5292 = vmatpush1.bf16.msra.mxu0 %v7954_v3 }
 0x65e   : > { %8136 = vrsqrt.f32 %v4527_v24  ;;  %v4528_v52 = vadd.f32 1e-05, %v4432_v16  ;;  %v4337_v13 = vmul.f32 0.00390625, %v4259_v19  ;;  %v4370_v30 = vmul.f32 %v11625_v22, %v11625_v22  ;;  %v7957_v19 = vld [vmem:[#allocation9 + $0xb0] ss:$8 sps:$4 sm:$0xff]   ;;  %5293 = vmatprep.subr.bf16.mxu0 %v7959_v60 }
 0x65f   : > { %v4262_v20 = vpop.xlane.xlu1 %4261  ;;  %v4802_v53 = vpack.c.bf16 %v11640_v8, %v11637_v14  ;;  %v4801_v7 = vpack.c.bf16 %v11650_v55, %v11647_v48  ;;  %v4470_v3 = vsub.f32 %v11189_v35, %v11585_v34  ;;  %v7960_v60 = vld [vmem:[#allocation9 + $0xc0] ss:$8 sps:$4 sm:$0xff]  }
 0x660   : > { %v8133_v58 = vpop.eup %8132  ;;  %8138 = vrsqrt.f32 %v4528_v52  ;;  %v4401_v4 = vsub.f32 %v4337_v13, %v4369_v51  ;;  %v4338_v6 = vmul.f32 0.00390625, %v4262_v20  ;;  %v4469_v20 = vsub.f32 %v11185_v31, %v11585_v34 }
 0x661   : > { %v4073_v42 = vpop.xlane.xlu0 %4072  ;;  %v4594_v54 = vmul.f32 %v8133_v58, %v4466_v40  ;;  %5008 = vmatprep.mubr.bf16.mxu1 %v4802_v53  ;;  %v4593_v38 = vmul.f32 %v8133_v58, %v4465_v57  ;;  %v7962_v40 = vld [vmem:[#allocation9 + $0xc4] ss:$8 sps:$4 sm:$0xff]   ;;  %5294 = vmatpush1.bf16.msra.mxu0 %v7957_v19 }
 0x662   : > { %v8135_v63 = vpop.eup %8134  ;;  %v4433_v24 = vmax.f32 %v4401_v4, 0.0  ;;  %v4402_v16 = vsub.f32 %v4338_v6, %v4370_v30  ;;  %v11654_v51 = vmul.f32 0.00390625, %v4073_v42  ;;  %v13975_v6 = vld [vmem:[#allocation32_spill] sm:$0xff]  ;;  %5009 = vmatmul.mubr.bf16.gmra.mrb[132].mxu1 %v4801_v7  ;;  %5295 = vmatprep.subr.bf16.mxu0 %v7962_v40  ;;  %v13977_v7 = vld [vmem:[#allocation33_spill] sm:$0xff] }
 0x663   : > { %v4076_v62 = vpop.xlane.xlu1 %4075  ;;  %v4596_v52 = vmul.f32 %v8135_v63, %v4468_v41  ;;  %v4669_v13 = vmul.f32 %v11566_v23, %v4594_v54  ;;  %v4595_v30 = vmul.f32 %v8135_v63, %v4467_v56  ;;  %v4471_v42 = vsub.f32 %v13975_v6, %v11595_v28 }
 0x664   : > { %v4529_v27 = vadd.f32 1e-05, %v4433_v24  ;;  %v4434_v4 = vmax.f32 %v4402_v16, 0.0  ;;  %v11665_v53 = vmul.f32 0.00390625, %v4076_v62  ;;  %v4371_v31 = vmul.f32 %v11654_v51, %v11654_v51 }
 0x665   : > { %v4265_v41 = vpop.xlane.xlu0 %4264  ;;  %v4671_v57 = vmul.f32 %v11566_v23, %v4596_v52  ;;  %v11673_v63 = vadd.f32 %v11582_v9, %v4669_v13  ;;  %v4668_v56 = vmul.f32 %v11563_v2, %v4593_v38  ;;  %v4670_v19 = vmul.f32 %v11563_v2, %v4595_v30  ;;  %5296 = vmatpush1.bf16.msra.mxu0 %v7960_v60 }
 0x666   : > { %8140 = vrsqrt.f32 %v4529_v27  ;;  %v4530_v58 = vadd.f32 1e-05, %v4434_v4  ;;  %v4339_v54 = vmul.f32 0.00390625, %v4265_v41  ;;  %v4372_v35 = vmul.f32 %v11665_v53, %v11665_v53 }
 0x667   : > { %v4268_v34 = vpop.xlane.xlu1 %4267  ;;  %v11676_v49 = vadd.f32 %v11582_v9, %v4671_v57  ;;  %v4472_v52 = vsub.f32 %v13977_v7, %v11595_v28  ;;  %v4473_v27 = vsub.f32 %v11213_v47, %v11620_v18  ;;  %v11692_v28 = vadd.f32 %v11573_v29, %v4668_v56 }
 0x668   : > { %v8137_v24 = vpop.eup %8136  ;;  %8142 = vrsqrt.f32 %v4530_v58  ;;  %v4403_v16 = vsub.f32 %v4339_v54, %v4371_v31  ;;  %v4340_v62 = vmul.f32 0.00390625, %v4268_v34  ;;  %v11689_v58 = vadd.f32 %v11573_v29, %v4670_v19 }
 0x669   : > { %13976 = vst [vmem:[#allocation29_spill] sm:$0xff] %v11676_v49  ;;  %v4079_v13 = vpop.xlane.xlu0 %4078  ;;  %v4804_v4 = vpack.c.bf16 %v11676_v49, %v11673_v63  ;;  %v4598_v6 = vmul.f32 %v8137_v24, %v4470_v3  ;;  %v4597_v54 = vmul.f32 %v8137_v24, %v4469_v20  ;;  %v4474_v3 = vsub.f32 %v11217_v61, %v11620_v18 }
 0x66a   : > { %v8139_v41 = vpop.eup %8138  ;;  %v4435_v38 = vmax.f32 %v4403_v16, 0.0  ;;  %v4404_v40 = vsub.f32 %v4340_v62, %v4372_v35  ;;  %v11686_v57 = vmul.f32 0.00390625, %v4079_v13  ;;  %v13978_v62 = vld [vmem:[#allocation34_spill] sm:$0xff]  ;;  %v4803_v60 = vpack.c.bf16 %v11689_v58, %v11692_v28 }
 0x66b   : > { %v4082_v30 = vpop.xlane.xlu1 %4081  ;;  %5016 = vmatprep.mubr.bf16.mxu1 %v4804_v4  ;;  %v4600_v47 = vmul.f32 %v8139_v41, %v4472_v52  ;;  %v4673_v31 = vmul.f32 %v11566_v23, %v4598_v6  ;;  %v4599_v16 = vmul.f32 %v8139_v41, %v4471_v42  ;;  %v4475_v19 = vsub.f32 %v13978_v62, %v11625_v22 }
 0x66c   : > { %v4531_v34 = vadd.f32 1e-05, %v4435_v38  ;;  %v4436_v35 = vmax.f32 %v4404_v40, 0.0  ;;  %v11699_v7 = vmul.f32 0.00390625, %v4082_v30  ;;  %v4373_v20 = vmul.f32 %v11686_v57, %v11686_v57  ;;  %5017 = vmatmul.mubr.bf16.gmra.mrb[136].mxu1 %v4803_v60 }
 0x66d   : > { %v4271_v56 = vpop.xlane.xlu0 %4270  ;;  %v4675_v52 = vmul.f32 %v11566_v23, %v4600_v47  ;;  %v11709_v24 = vadd.f32 %v11582_v9, %v4673_v31  ;;  %v4672_v6 = vmul.f32 %v11563_v2, %v4597_v54  ;;  %v4674_v30 = vmul.f32 %v11563_v2, %v4599_v16  ;;  %v13980_v47 = vld [vmem:[#allocation37_spill] sm:$0xff] }
 0x66e   : > { %8144 = vrsqrt.f32 %v4531_v34  ;;  %v4532_v13 = vadd.f32 1e-05, %v4436_v35  ;;  %v4341_v61 = vmul.f32 0.00390625, %v4271_v56  ;;  %v4374_v18 = vmul.f32 %v11699_v7, %v11699_v7 }
 0x66f   : > { %v4274_v42 = vpop.xlane.xlu1 %4273  ;;  %v11712_v4 = vadd.f32 %v11582_v9, %v4675_v52  ;;  %v4476_v34 = vsub.f32 %v13980_v47, %v11625_v22  ;;  %v4477_v35 = vsub.f32 %v11241_v39, %v11654_v51  ;;  %v11728_v22 = vadd.f32 %v11573_v29, %v4672_v6 }
 0x670   : > { %v8141_v41 = vpop.eup %8140  ;;  %8146 = vrsqrt.f32 %v4532_v13  ;;  %v4405_v38 = vsub.f32 %v4341_v61, %v4373_v20  ;;  %v4342_v40 = vmul.f32 0.00390625, %v4274_v42  ;;  %v11725_v13 = vadd.f32 %v11573_v29, %v4674_v30 }
 0x671   : > { %13979 = vst [vmem:[#allocation30_spill] sm:$0xff] %v11712_v4  ;;  %v4085_v62 = vpop.xlane.xlu0 %4084  ;;  %v4806_v31 = vpack.c.bf16 %v11712_v4, %v11709_v24  ;;  %v4602_v60 = vmul.f32 %v8141_v41, %v4474_v3  ;;  %v4601_v61 = vmul.f32 %v8141_v41, %v4473_v27  ;;  %v4478_v3 = vsub.f32 %v11245_v10, %v11654_v51 }
 0x672   : > { %v8143_v56 = vpop.eup %8142  ;;  %v4437_v52 = vmax.f32 %v4405_v38, 0.0  ;;  %v4406_v54 = vsub.f32 %v4342_v40, %v4374_v18  ;;  %v11722_v49 = vmul.f32 0.00390625, %v4085_v62  ;;  %13981 = vst [vmem:[#allocation31_spill] sm:$0xff] %v11725_v13  ;;  %v13982_v40 = vld [vmem:[#allocation35_spill] sm:$0xff]  ;;  %v4805_v62 = vpack.c.bf16 %v11725_v13, %v11728_v22 }
 0x673   : > { %v4088_v16 = vpop.xlane.xlu1 %4087  ;;  %5024 = vmatprep.mubr.bf16.mxu1 %v4806_v31  ;;  %v4604_v20 = vmul.f32 %v8143_v56, %v4476_v34  ;;  %v4677_v39 = vmul.f32 %v11566_v23, %v4602_v60  ;;  %v4603_v18 = vmul.f32 %v8143_v56, %v4475_v19  ;;  %v4479_v47 = vsub.f32 %v13982_v40, %v11665_v53 }
 0x674   : > { %v4533_v42 = vadd.f32 1e-05, %v4437_v52  ;;  %v4438_v38 = vmax.f32 %v4406_v54, 0.0  ;;  %v11735_v30 = vmul.f32 0.00390625, %v4088_v16  ;;  %v4375_v27 = vmul.f32 %v11722_v49, %v11722_v49  ;;  %5025 = vmatmul.mubr.bf16.gmra.mrb[140].mxu1 %v4805_v62 }
 0x675   : > { %v4277_v6 = vpop.xlane.xlu0 %4276  ;;  %v4679_v34 = vmul.f32 %v11566_v23, %v4604_v20  ;;  %v11745_v41 = vadd.f32 %v11582_v9, %v4677_v39  ;;  %v4676_v56 = vmul.f32 %v11563_v2, %v4601_v61  ;;  %v4678_v20 = vmul.f32 %v11563_v2, %v4603_v18 }
 0x676   : > { %8148 = vrsqrt.f32 %v4533_v42  ;;  %v4534_v31 = vadd.f32 1e-05, %v4438_v38  ;;  %v4343_v10 = vmul.f32 0.00390625, %v4277_v6  ;;  %v4376_v51 = vmul.f32 %v11735_v30, %v11735_v30  ;;  %v13984_v42 = vld [vmem:[#allocation38_spill] sm:$0xff] }
 0x677   : > { %v4280_v19 = vpop.xlane.xlu1 %4279  ;;  %v11748_v60 = vadd.f32 %v11582_v9, %v4679_v34  ;;  %v4480_v38 = vsub.f32 %v13984_v42, %v11665_v53  ;;  %v4481_v40 = vsub.f32 %v11269_v44, %v11686_v57  ;;  %v11764_v53 = vadd.f32 %v11573_v29, %v4676_v56 }
 0x678   : > { %v8145_v52 = vpop.eup %8144  ;;  %8150 = vrsqrt.f32 %v4534_v31  ;;  %v4407_v54 = vsub.f32 %v4343_v10, %v4375_v27  ;;  %v4344_v16 = vmul.f32 0.00390625, %v4280_v19  ;;  %v11761_v31 = vadd.f32 %v11573_v29, %v4678_v20 }
 0x679   : > { %13983 = vst [vmem:[#allocation32_spill] sm:$0xff] %v11748_v60  ;;  %v4808_v39 = vpack.c.bf16 %v11748_v60, %v11745_v41  ;;  %v4606_v6 = vmul.f32 %v8145_v52, %v4478_v3  ;;  %v4605_v10 = vmul.f32 %v8145_v52, %v4477_v35  ;;  %v4482_v3 = vsub.f32 %v11273_v45, %v11686_v57 }
 0x67a   : > { %v4091_v62 = vpop.xlane.xlu0 %4090  ;;  %v8147_v34 = vpop.eup %8146  ;;  %v4439_v4 = vmax.f32 %v4407_v54, 0.0  ;;  %v4408_v61 = vsub.f32 %v4344_v16, %v4376_v51  ;;  %13985 = vst [vmem:[#allocation33_spill] sm:$0xff] %v11761_v31  ;;  %v13986_v16 = vld [vmem:[#allocation36_spill] sm:$0xff] }
 0x67b   : > { %v11758_v13 = vmul.f32 0.00390625, %v4091_v62  ;;  %5032 = vmatprep.mubr.bf16.mxu1 %v4808_v39  ;;  %v4608_v27 = vmul.f32 %v8147_v34, %v4480_v38  ;;  %v4681_v44 = vmul.f32 %v11566_v23, %v4606_v6  ;;  %v4607_v51 = vmul.f32 %v8147_v34, %v4479_v47 }
 0x67c   : > { %v4094_v18 = vpop.xlane.xlu1 %4093  ;;  %v4535_v19 = vadd.f32 1e-05, %v4439_v4  ;;  %v4440_v54 = vmax.f32 %v4408_v61, 0.0  ;;  %v4483_v42 = vsub.f32 %v13986_v16, %v11699_v7  ;;  %v4807_v62 = vpack.c.bf16 %v11761_v31, %v11764_v53 }
 0x67d   : > { %v11771_v20 = vmul.f32 0.00390625, %v4094_v18  ;;  %v4683_v38 = vmul.f32 %v11566_v23, %v4608_v27  ;;  %v4377_v35 = vmul.f32 %v11758_v13, %v11758_v13  ;;  %v11781_v47 = vadd.f32 %v11582_v9, %v4681_v44 }
 0x67e   : > { %v4283_v56 = vpop.xlane.xlu0 %4282  ;;  %8152 = vrsqrt.f32 %v4535_v19  ;;  %v4536_v39 = vadd.f32 1e-05, %v4440_v54  ;;  %5033 = vmatmul.mubr.bf16.gmra.mrb[144].mxu1 %v4807_v62  ;;  %v4680_v6 = vmul.f32 %v11563_v2, %v4605_v10  ;;  %v4682_v27 = vmul.f32 %v11563_v2, %v4607_v51  ;;  %v13989_v19 = vld [vmem:[#allocation51_spill] sm:$0xff] }
 0x67f   : > { %v4345_v45 = vmul.f32 0.00390625, %v4283_v56  ;;  %v4378_v57 = vmul.f32 %v11771_v20, %v11771_v20  ;;  %13987 = vst [vmem:[#allocation34_spill] sm:$0xff] %v11781_v47  ;;  %v11784_v52 = vadd.f32 %v11582_v9, %v4683_v38  ;;  %v4484_v54 = vsub.f32 %v13989_v19, %v11699_v7 }
 0x680   : > { %v4286_v4 = vpop.xlane.xlu1 %4285  ;;  %v8149_v34 = vpop.eup %8148  ;;  %8154 = vrsqrt.f32 %v4536_v39  ;;  %v4485_v16 = vsub.f32 %v11297_v1, %v11722_v49  ;;  %v11797_v39 = vadd.f32 %v11573_v29, %v4682_v27  ;;  %v11800_v7 = vadd.f32 %v11573_v29, %v4680_v6 }
 0x681   : > { %13988 = vst [vmem:[#allocation37_spill] sm:$0xff] %v11784_v52  ;;  %v4409_v61 = vsub.f32 %v4345_v45, %v4377_v35  ;;  %v4346_v18 = vmul.f32 0.00390625, %v4286_v4  ;;  %v4810_v44 = vpack.c.bf16 %v11784_v52, %v11781_v47  ;;  %v4610_v56 = vmul.f32 %v8149_v34, %v4482_v3  ;;  %v13991_v4 = vld [vmem:[#allocation39_spill] sm:$0xff] }
 0x682   : > { %v4097_v62 = vpop.xlane.xlu0 %4096  ;;  %v8151_v38 = vpop.eup %8150  ;;  %13990 = vst [vmem:[#allocation35_spill] sm:$0xff] %v11797_v39  ;;  %v4609_v45 = vmul.f32 %v8149_v34, %v4481_v40  ;;  %v4486_v3 = vsub.f32 %v13991_v4, %v11722_v49 }
 0x683   : > { %v4441_v60 = vmax.f32 %v4409_v61, 0.0  ;;  %v4410_v10 = vsub.f32 %v4346_v18, %v4378_v57  ;;  %v11794_v31 = vmul.f32 0.00390625, %v4097_v62  ;;  %5040 = vmatprep.mubr.bf16.mxu1 %v4810_v44  ;;  %v4612_v35 = vmul.f32 %v8151_v38, %v4484_v54  ;;  %v13992_v18 = vld [vmem:[#allocation40_spill] sm:$0xff] }
 0x684   : > { %v4100_v51 = vpop.xlane.xlu1 %4099  ;;  %v4685_v1 = vmul.f32 %v11566_v23, %v4610_v56  ;;  %v4611_v57 = vmul.f32 %v8151_v38, %v4483_v42  ;;  %v4487_v62 = vsub.f32 %v13992_v18, %v11735_v30  ;;  %v4809_v44 = vpack.c.bf16 %v11797_v39, %v11800_v7 }
 0x685   : > { %v4537_v19 = vadd.f32 1e-05, %v4441_v60  ;;  %v4442_v61 = vmax.f32 %v4410_v10, 0.0  ;;  %v11807_v27 = vmul.f32 0.00390625, %v4100_v51  ;;  %v4687_v54 = vmul.f32 %v11566_v23, %v4612_v35 }
 0x686   : > { %v4289_v6 = vpop.xlane.xlu0 %4288  ;;  %v4379_v40 = vmul.f32 %v11794_v31, %v11794_v31  ;;  %5041 = vmatmul.mubr.bf16.gmra.mrb[148].mxu1 %v4809_v44  ;;  %v11817_v34 = vadd.f32 %v11582_v9, %v4685_v1  ;;  %v4684_v10 = vmul.f32 %v11563_v2, %v4609_v45  ;;  %v4489_v44 = vsub.f32 %v11325_v11, %v11758_v13 }
 0x687   : > { %8156 = vrsqrt.f32 %v4537_v19  ;;  %v4538_v56 = vadd.f32 1e-05, %v4442_v61  ;;  %v4347_v49 = vmul.f32 0.00390625, %v4289_v6  ;;  %v4380_v60 = vmul.f32 %v11807_v27, %v11807_v27  ;;  %v13993_v61 = vld [vmem:[#allocation41_spill] sm:$0xff] }
 0x688   : > { %v4292_v42 = vpop.xlane.xlu1 %4291  ;;  %v11820_v38 = vadd.f32 %v11582_v9, %v4687_v54  ;;  %v8153_v51 = vpop.eup %8152  ;;  %v4686_v19 = vmul.f32 %v11563_v2, %v4611_v57  ;;  %v4488_v18 = vsub.f32 %v13993_v61, %v11735_v30  ;;  %v11836_v30 = vadd.f32 %v11573_v29, %v4684_v10 }
 0x689   : > { %8158 = vrsqrt.f32 %v4538_v56  ;;  %v4411_v35 = vsub.f32 %v4347_v49, %v4379_v40  ;;  %v4348_v4 = vmul.f32 0.00390625, %v4292_v42  ;;  %v4614_v54 = vmul.f32 %v8153_v51, %v4486_v3 }
 0x68a   : > { %v4103_v6 = vpop.xlane.xlu0 %4102  ;;  %v4812_v1 = vpack.c.bf16 %v11820_v38, %v11817_v34  ;;  %v8155_v52 = vpop.eup %8154  ;;  %v11833_v56 = vadd.f32 %v11573_v29, %v4686_v19  ;;  %v4613_v49 = vmul.f32 %v8153_v51, %v4485_v16  ;;  %v4490_v3 = vsub.f32 %v11329_v25, %v11758_v13 }
 0x68b   : > { %v4443_v39 = vmax.f32 %v4411_v35, 0.0  ;;  %v4412_v45 = vsub.f32 %v4348_v4, %v4380_v60  ;;  %v11830_v47 = vmul.f32 0.00390625, %v4103_v6  ;;  %v4616_v40 = vmul.f32 %v8155_v52, %v4488_v18 }
 0x68c   : > { %v4106_v57 = vpop.xlane.xlu1 %4105  ;;  %5048 = vmatprep.mubr.bf16.mxu1 %v4812_v1  ;;  %v4689_v11 = vmul.f32 %v11566_v23, %v4614_v54  ;;  %v4615_v60 = vmul.f32 %v8155_v52, %v4487_v62  ;;  %v4491_v4 = vsub.f32 %v11333_v12, %v11771_v20  ;;  %v4811_v61 = vpack.c.bf16 %v11833_v56, %v11836_v30 }
 0x68d   : > { %v4539_v42 = vadd.f32 1e-05, %v4443_v39  ;;  %v4444_v35 = vmax.f32 %v4412_v45, 0.0  ;;  %v11843_v19 = vmul.f32 0.00390625, %v4106_v57  ;;  %v4691_v18 = vmul.f32 %v11566_v23, %v4616_v40 }
 0x68e   : > { %v4295_v10 = vpop.xlane.xlu0 %4294  ;;  %v4381_v16 = vmul.f32 %v11830_v47, %v11830_v47  ;;  %5049 = vmatmul.mubr.bf16.gmra.mrb[152].mxu1 %v4811_v61  ;;  %v11853_v12 = vadd.f32 %v11582_v9, %v4689_v11  ;;  %v4688_v62 = vmul.f32 %v11563_v2, %v4613_v49  ;;  %v4690_v45 = vmul.f32 %v11563_v2, %v4615_v60 }
 0x68f   : > { %8160 = vrsqrt.f32 %v4539_v42  ;;  %v4540_v6 = vadd.f32 1e-05, %v4444_v35  ;;  %v4349_v25 = vmul.f32 0.00390625, %v4295_v10  ;;  %v4382_v13 = vmul.f32 %v11843_v19, %v11843_v19 }
 0x690   : > { %v4298_v52 = vpop.xlane.xlu1 %4297  ;;  %v11856_v39 = vadd.f32 %v11582_v9, %v4691_v18  ;;  %v4492_v57 = vsub.f32 %v11336_v43, %v11771_v20  ;;  %v4493_v40 = vsub.f32 %v11353_v17, %v11794_v31  ;;  %v11872_v43 = vadd.f32 %v11573_v29, %v4688_v62 }
 0x691   : > { %v8157_v51 = vpop.eup %8156  ;;  %8162 = vrsqrt.f32 %v4540_v6  ;;  %v4413_v1 = vsub.f32 %v4349_v25, %v4381_v16  ;;  %v4350_v54 = vmul.f32 0.00390625, %v4298_v52  ;;  %v11869_v6 = vadd.f32 %v11573_v29, %v4690_v45 }
 0x692   : > { %13994 = vst [vmem:[#allocation38_spill] sm:$0xff] %v11856_v39  ;;  %v4814_v11 = vpack.c.bf16 %v11856_v39, %v11853_v12  ;;  %v4618_v35 = vmul.f32 %v8157_v51, %v4490_v3  ;;  %v4617_v16 = vmul.f32 %v8157_v51, %v4489_v44  ;;  %v4494_v3 = vsub.f32 %v11357_v21, %v11794_v31 }
 0x693   : > { %v4109_v42 = vpop.xlane.xlu0 %4108  ;;  %v8159_v61 = vpop.eup %8158  ;;  %v4445_v10 = vmax.f32 %v4413_v1, 0.0  ;;  %v4414_v49 = vsub.f32 %v4350_v54, %v4382_v13  ;;  %v4495_v1 = vsub.f32 %v11361_v59, %v11807_v27  ;;  %v4813_v45 = vpack.c.bf16 %v11869_v6, %v11872_v43 }
 0x694   : > { %v11866_v18 = vmul.f32 0.00390625, %v4109_v42  ;;  %5056 = vmatprep.mubr.bf16.mxu1 %v4814_v11  ;;  %v4620_v20 = vmul.f32 %v8159_v61, %v4492_v57  ;;  %v4693_v17 = vmul.f32 %v11566_v23, %v4618_v35  ;;  %v4619_v13 = vmul.f32 %v8159_v61, %v4491_v4 }
 0x695   : > { %v4112_v60 = vpop.xlane.xlu1 %4111  ;;  %v4541_v25 = vadd.f32 1e-05, %v4445_v10  ;;  %v4446_v52 = vmax.f32 %v4414_v49, 0.0  ;;  %v4692_v11 = vmul.f32 %v11563_v2, %v4617_v16 }
 0x696   : > { %v11879_v54 = vmul.f32 0.00390625, %v4112_v60  ;;  %v4695_v57 = vmul.f32 %v11566_v23, %v4620_v20  ;;  %v4383_v44 = vmul.f32 %v11866_v18, %v11866_v18  ;;  %5057 = vmatmul.mubr.bf16.gmra.mrb[156].mxu1 %v4813_v45  ;;  %v11889_v59 = vadd.f32 %v11582_v9, %v4693_v17  ;;  %v13996_v60 = vld [vmem:[#allocation42_spill] sm:$0xff] }
 0x697   : > { %v4301_v62 = vpop.xlane.xlu0 %4300  ;;  %8164 = vrsqrt.f32 %v4541_v25  ;;  %v4542_v42 = vadd.f32 1e-05, %v4446_v52  ;;  %v4694_v49 = vmul.f32 %v11563_v2, %v4619_v13  ;;  %v4496_v20 = vsub.f32 %v13996_v60, %v11807_v27 }
 0x698   : > { %v4351_v21 = vmul.f32 0.00390625, %v4301_v62  ;;  %v4384_v31 = vmul.f32 %v11879_v54, %v11879_v54  ;;  %v11892_v51 = vadd.f32 %v11582_v9, %v4695_v57  ;;  %v4497_v25 = vsub.f32 %v11381_v26, %v11830_v47 }
 0x699   : > { %v4304_v4 = vpop.xlane.xlu1 %4303  ;;  %v8161_v35 = vpop.eup %8160  ;;  %8166 = vrsqrt.f32 %v4542_v42  ;;  %v11905_v42 = vadd.f32 %v11573_v29, %v4694_v49  ;;  %v11908_v27 = vadd.f32 %v11573_v29, %v4692_v11 }
 0x69a   : > { %13995 = vst [vmem:[#allocation36_spill] sm:$0xff] %v11892_v51  ;;  %v4415_v61 = vsub.f32 %v4351_v21, %v4383_v44  ;;  %v4352_v10 = vmul.f32 0.00390625, %v4304_v4  ;;  %v4816_v17 = vpack.c.bf16 %v11892_v51, %v11889_v59  ;;  %v4622_v45 = vmul.f32 %v8161_v35, %v4494_v3 }
 0x69b   : > { %v4115_v52 = vpop.xlane.xlu0 %4114  ;;  %v8163_v62 = vpop.eup %8162  ;;  %13997 = vst [vmem:[#allocation51_spill] sm:$0xff] %v11905_v42  ;;  %v4621_v21 = vmul.f32 %v8161_v35, %v4493_v40  ;;  %v4498_v3 = vsub.f32 %v11385_v33, %v11830_v47 }
 0x69c   : > { %v4447_v57 = vmax.f32 %v4415_v61, 0.0  ;;  %v4416_v16 = vsub.f32 %v4352_v10, %v4384_v31  ;;  %v11902_v39 = vmul.f32 0.00390625, %v4115_v52  ;;  %5064 = vmatprep.mubr.bf16.mxu1 %v4816_v17  ;;  %v4624_v44 = vmul.f32 %v8163_v62, %v4496_v20  ;;  %v13998_v10 = vld [vmem:[#allocation43_spill] sm:$0xff] }
 0x69d   : > { %v4118_v13 = vpop.xlane.xlu1 %4117  ;;  %v4697_v26 = vmul.f32 %v11566_v23, %v4622_v45  ;;  %v4623_v31 = vmul.f32 %v8163_v62, %v4495_v1  ;;  %v4499_v60 = vsub.f32 %v13998_v10, %v11843_v19  ;;  %v4815_v52 = vpack.c.bf16 %v11905_v42, %v11908_v27 }
 0x69e   : > { %v4543_v4 = vadd.f32 1e-05, %v4447_v57  ;;  %v4448_v61 = vmax.f32 %v4416_v16, 0.0  ;;  %v11915_v49 = vmul.f32 0.00390625, %v4118_v13  ;;  %v4699_v20 = vmul.f32 %v11566_v23, %v4624_v44 }
 0x69f   : > { %v4307_v11 = vpop.xlane.xlu0 %4306  ;;  %v4385_v40 = vmul.f32 %v11902_v39, %v11902_v39  ;;  %5065 = vmatmul.mubr.bf16.gmra.mrb[160].mxu1 %v4815_v52  ;;  %v11925_v35 = vadd.f32 %v11582_v9, %v4697_v26  ;;  %v4696_v62 = vmul.f32 %v11563_v2, %v4621_v21  ;;  %v4698_v44 = vmul.f32 %v11563_v2, %v4623_v31 }
 0x6a0   : > { %8168 = vrsqrt.f32 %v4543_v4  ;;  %v4544_v17 = vadd.f32 1e-05, %v4448_v61  ;;  %v4353_v33 = vmul.f32 0.00390625, %v4307_v11  ;;  %v4386_v47 = vmul.f32 %v11915_v49, %v11915_v49  ;;  %v13999_v4 = vld [vmem:[#allocation45_spill] sm:$0xff] }
 0x6a1   : > { %v4310_v1 = vpop.xlane.xlu1 %4309  ;;  %v11928_v45 = vadd.f32 %v11582_v9, %v4699_v20  ;;  %v8165_v57 = vpop.eup %8164  ;;  %v4500_v61 = vsub.f32 %v13999_v4, %v11843_v19  ;;  %v4501_v10 = vsub.f32 %v11409_v32, %v11866_v18  ;;  %v11944_v19 = vadd.f32 %v11573_v29, %v4696_v62 }
 0x6a2   : > { %8170 = vrsqrt.f32 %v4544_v17  ;;  %v4417_v16 = vsub.f32 %v4353_v33, %v4385_v40  ;;  %v4354_v13 = vmul.f32 0.00390625, %v4310_v1  ;;  %v4626_v11 = vmul.f32 %v8165_v57, %v4498_v3 }
 0x6a3   : > { %v4121_v52 = vpop.xlane.xlu0 %4120  ;;  %v4818_v26 = vpack.c.bf16 %v11928_v45, %v11925_v35  ;;  %v8167_v20 = vpop.eup %8166  ;;  %v11941_v17 = vadd.f32 %v11573_v29, %v4698_v44  ;;  %v4625_v33 = vmul.f32 %v8165_v57, %v4497_v25  ;;  %v4502_v3 = vsub.f32 %v11413_v5, %v11866_v18 }
 0x6a4   : > { %v4449_v51 = vmax.f32 %v4417_v16, 0.0  ;;  %v4418_v21 = vsub.f32 %v4354_v13, %v4386_v47  ;;  %v11938_v42 = vmul.f32 0.00390625, %v4121_v52  ;;  %v4628_v40 = vmul.f32 %v8167_v20, %v4500_v61 }
 0x6a5   : > { %v4124_v31 = vpop.xlane.xlu1 %4123  ;;  %5072 = vmatprep.mubr.bf16.mxu1 %v4818_v26  ;;  %v4701_v32 = vmul.f32 %v11566_v23, %v4626_v11  ;;  %v4627_v47 = vmul.f32 %v8167_v20, %v4499_v60  ;;  %v4503_v13 = vsub.f32 %v11417_v46, %v11879_v54  ;;  %v4817_v4 = vpack.c.bf16 %v11941_v17, %v11944_v19 }
 0x6a6   : > { %v4545_v1 = vadd.f32 1e-05, %v4449_v51  ;;  %v4450_v16 = vmax.f32 %v4418_v21, 0.0  ;;  %v11951_v44 = vmul.f32 0.00390625, %v4124_v31  ;;  %v4703_v61 = vmul.f32 %v11566_v23, %v4628_v40 }
 0x6a7   : > { %v4313_v62 = vpop.xlane.xlu0 %4312  ;;  %v4387_v25 = vmul.f32 %v11938_v42, %v11938_v42  ;;  %5073 = vmatmul.mubr.bf16.gmra.mrb[164].mxu1 %v4817_v4  ;;  %v11961_v46 = vadd.f32 %v11582_v9, %v4701_v32  ;;  %v4700_v57 = vmul.f32 %v11563_v2, %v4625_v33  ;;  %v4702_v21 = vmul.f32 %v11563_v2, %v4627_v47 }
 0x6a8   : > { %8172 = vrsqrt.f32 %v4545_v1  ;;  %v4546_v52 = vadd.f32 1e-05, %v4450_v16  ;;  %v4355_v5 = vmul.f32 0.00390625, %v4313_v62  ;;  %v4388_v18 = vmul.f32 %v11951_v44, %v11951_v44 }
 0x6a9   : > { %v4316_v51 = vpop.xlane.xlu1 %4315  ;;  %14000 = vst [vmem:[#allocation39_spill] sm:$0xff] %v11961_v46  ;;  %v11964_v60 = vadd.f32 %v11582_v9, %v4703_v61  ;;  %v4504_v31 = vsub.f32 %v11420_v0, %v11879_v54  ;;  %v4505_v40 = vsub.f32 %v11437_v37, %v11902_v39  ;;  %v11980_v0 = vadd.f32 %v11573_v29, %v4700_v57 }
 0x6aa   : > { %v8169_v26 = vpop.eup %8168  ;;  %8174 = vrsqrt.f32 %v4546_v52  ;;  %v4419_v11 = vsub.f32 %v4355_v5, %v4387_v25  ;;  %v4356_v20 = vmul.f32 0.00390625, %v4316_v51  ;;  %v11977_v52 = vadd.f32 %v11573_v29, %v4702_v21 }
 0x6ab   : > { %14001 = vst [vmem:[#allocation40_spill] sm:$0xff] %v11964_v60  ;;  %v4127_v1 = vpop.xlane.xlu0 %4126  ;;  %v4820_v32 = vpack.c.bf16 %v11964_v60, %v11961_v46  ;;  %v4630_v16 = vmul.f32 %v8169_v26, %v4502_v3  ;;  %14003 = vst [vmem:[#allocation42_spill] sm:$0xff] %v11980_v0  ;;  %v4629_v25 = vmul.f32 %v8169_v26, %v4501_v10 }
 0x6ac   : > { %v8171_v4 = vpop.eup %8170  ;;  %v4451_v62 = vmax.f32 %v4419_v11, 0.0  ;;  %v4420_v33 = vsub.f32 %v4356_v20, %v4388_v18  ;;  %v11974_v61 = vmul.f32 0.00390625, %v4127_v1  ;;  %14002 = vst [vmem:[#allocation41_spill] sm:$0xff] %v11977_v52  ;;  %v4506_v3 = vsub.f32 %v11441_v15, %v11902_v39  ;;  %v14004_v11 = vld [vmem:[#allocation44_spill] sm:$0xff] }
 0x6ad   : > { %v4130_v47 = vpop.xlane.xlu1 %4129  ;;  %5080 = vmatprep.mubr.bf16.mxu1 %v4820_v32  ;;  %v4632_v54 = vmul.f32 %v8171_v4, %v4504_v31  ;;  %v4705_v37 = vmul.f32 %v11566_v23, %v4630_v16  ;;  %v4631_v18 = vmul.f32 %v8171_v4, %v4503_v13  ;;  %v4507_v20 = vsub.f32 %v14004_v11, %v11915_v49  ;;  %v7963_v32 = vld [vmem:[#allocation9 + $0xd0] ss:$8 sps:$4 sm:$0xff]   ;;  %v7965_v16 = vld [vmem:[#allocation9 + $0xd4] ss:$8 sps:$4 sm:$0xff]  }
 0x6ae   : > { %v4547_v5 = vadd.f32 1e-05, %v4451_v62  ;;  %v4452_v51 = vmax.f32 %v4420_v33, 0.0  ;;  %v11987_v21 = vmul.f32 0.00390625, %v4130_v47  ;;  %v4819_v1 = vpack.c.bf16 %v11977_v52, %v11980_v0  ;;  %5297 = vmatprep.subr.bf16.mxu0 %v7965_v16  ;;  %v14007_v11 = vld [vmem:[#allocation48_spill] sm:$0xff] }
 0x6af   : > { %v4319_v57 = vpop.xlane.xlu0 %4318  ;;  %v4707_v31 = vmul.f32 %v11566_v23, %v4632_v54  ;;  %v4389_v15 = vmul.f32 %v11974_v61, %v11974_v61  ;;  %v11997_v4 = vadd.f32 %v11582_v9, %v4705_v37  ;;  %v4704_v33 = vmul.f32 %v11563_v2, %v4629_v25  ;;  %5298 = vmatpush1.bf16.msra.mxu0 %v7963_v32 }
 0x6b0   : > { %8176 = vrsqrt.f32 %v4547_v5  ;;  %v4548_v10 = vadd.f32 1e-05, %v4452_v51  ;;  %v4357_v39 = vmul.f32 0.00390625, %v4319_v57  ;;  %5081 = vmatmul.mubr.bf16.gmra.mrb[168].mxu1 %v4819_v1  ;;  %v4390_v13 = vmul.f32 %v11987_v21, %v11987_v21 }
 0x6b1   : > { %v4322_v26 = vpop.xlane.xlu1 %4321  ;;  %14005 = vst [vmem:[#allocation43_spill] sm:$0xff] %v11997_v4  ;;  %v12000_v62 = vadd.f32 %v11582_v9, %v4707_v31  ;;  %v4706_v51 = vmul.f32 %v11563_v2, %v4631_v18  ;;  %v4508_v1 = vsub.f32 %v14007_v11, %v11915_v49  ;;  %v14009_v18 = vld [vmem:[#allocation46_spill] sm:$0xff]  ;;  %v12016_v49 = vadd.f32 %v11573_v29, %v4704_v33 }
 0x6b2   : > { %v8173_v47 = vpop.eup %8172  ;;  %8178 = vrsqrt.f32 %v4548_v10  ;;  %v4421_v54 = vsub.f32 %v4357_v39, %v4389_v15  ;;  %v4358_v5 = vmul.f32 0.00390625, %v4322_v26  ;;  %v4509_v16 = vsub.f32 %v14009_v18, %v11938_v42 }
 0x6b3   : > { %14006 = vst [vmem:[#allocation45_spill] sm:$0xff] %v12000_v62  ;;  %v4133_v57 = vpop.xlane.xlu0 %4132  ;;  %v4822_v37 = vpack.c.bf16 %v12000_v62, %v11997_v4  ;;  %v4634_v60 = vmul.f32 %v8173_v47, %v4506_v3  ;;  %v4633_v52 = vmul.f32 %v8173_v47, %v4505_v40  ;;  %v12011_v10 = vadd.f32 %v11573_v29, %v4706_v51  ;;  %v14011_v3 = vld [vmem:[#allocation47_spill] sm:$0xff] }
 0x6b4   : > { %v8175_v31 = vpop.eup %8174  ;;  %v4453_v46 = vmax.f32 %v4421_v54, 0.0  ;;  %v4422_v25 = vsub.f32 %v4358_v5, %v4390_v13  ;;  %v12008_v0 = vmul.f32 0.00390625, %v4133_v57  ;;  %14010 = vst [vmem:[#allocation48_spill] sm:$0xff] %v12016_v49  ;;  %v4510_v32 = vsub.f32 %v14011_v3, %v11938_v42  ;;  %v7968_v57 = vld [vmem:[#allocation9 + $0xe4] ss:$8 sps:$4 sm:$0xff]  }
 0x6b5   : > { %14008 = vst [vmem:[#allocation44_spill] sm:$0xff] %v12011_v10  ;;  %v4136_v15 = vpop.xlane.xlu1 %4135  ;;  %5088 = vmatprep.mubr.bf16.mxu1 %v4822_v37  ;;  %v4636_v39 = vmul.f32 %v8175_v31, %v4508_v1  ;;  %v4709_v40 = vmul.f32 %v11566_v23, %v4634_v60  ;;  %v4635_v47 = vmul.f32 %v8175_v31, %v4507_v20  ;;  %v14012_v20 = vld [vmem:[#allocation50_spill] sm:$0xff] }
 0x6b6   : > { %v4549_v13 = vadd.f32 1e-05, %v4453_v46  ;;  %v4454_v26 = vmax.f32 %v4422_v25, 0.0  ;;  %v12021_v54 = vmul.f32 0.00390625, %v4136_v15  ;;  %v4821_v5 = vpack.c.bf16 %v12011_v10, %v12016_v49  ;;  %v7966_v46 = vld [vmem:[#allocation9 + $0xe0] ss:$8 sps:$4 sm:$0xff]   ;;  %5299 = vmatprep.subr.bf16.mxu0 %v7968_v57 }
 0x6b7   : > { %v4325_v51 = vpop.xlane.xlu0 %4324  ;;  %v4711_v11 = vmul.f32 %v11566_v23, %v4636_v39  ;;  %v4708_v33 = vmul.f32 %v11563_v2, %v4633_v52  ;;  %v4391_v60 = vmul.f32 %v12008_v0, %v12008_v0  ;;  %v4511_v37 = vsub.f32 %v14012_v20, %v11951_v44  ;;  %5300 = vmatpush1.bf16.msra.mxu0 %v7966_v46  ;;  %v7969_v10 = vld [vmem:[#allocation9 + $0xf0] ss:$8 sps:$4 sm:$0xff]  }
 0x6b8   : > { %8180 = vrsqrt.f32 %v4549_v13  ;;  %v4550_v1 = vadd.f32 1e-05, %v4454_v26  ;;  %v4359_v42 = vmul.f32 0.00390625, %v4325_v51  ;;  %5089 = vmatmul.mubr.bf16.gmra.mrb[172].mxu1 %v4821_v5  ;;  %v4392_v31 = vmul.f32 %v12021_v54, %v12021_v54  ;;  %v7971_v26 = vld [vmem:[#allocation9 + $0xf4] ss:$8 sps:$4 sm:$0xff]  }
 0x6b9   : > { %v4328_v25 = vpop.xlane.xlu1 %4327  ;;  %v12034_v18 = vadd.f32 %v11582_v9, %v4709_v40  ;;  %v12037_v52 = vadd.f32 %v11582_v9, %v4711_v11  ;;  %v4710_v13 = vmul.f32 %v11563_v2, %v4635_v47  ;;  %v14013_v5 = vld [vmem:[#allocation49_spill] sm:$0xff]  ;;  %5301 = vmatprep.subr.bf16.mxu0 %v7971_v26 }
 0x6ba   : > { %v8177_v15 = vpop.eup %8176  ;;  %8182 = vrsqrt.f32 %v4550_v1  ;;  %v4423_v39 = vsub.f32 %v4359_v42, %v4391_v60  ;;  %v4360_v3 = vmul.f32 0.00390625, %v4328_v25  ;;  %v4512_v51 = vsub.f32 %v14013_v5, %v11951_v44  ;;  %v14014_v25 = vld [vmem:[#allocation21_spill] sm:$0xff]  ;;  %v14017_v5 = vld [vmem:[#allocation24_spill] sm:$0xff] }
 0x6bb   : > { %v4824_v20 = vpack.c.bf16 %v12037_v52, %v12034_v18  ;;  %v4638_v62 = vmul.f32 %v8177_v15, %v4510_v32  ;;  %v4637_v40 = vmul.f32 %v8177_v15, %v4509_v16  ;;  %v12045_v1 = vadd.f32 %v11573_v29, %v4708_v33  ;;  %5302 = vmatpush1.bf16.msra.mxu0 %v7969_v10  ;;  %v14016_v10 = vld [vmem:[#allocation22_spill] sm:$0xff] }
 0x6bc   : > { %v8179_v11 = vpop.eup %8178  ;;  %v4455_v4 = vmax.f32 %v4423_v39, 0.0  ;;  %v4424_v49 = vsub.f32 %v4360_v3, %v4392_v31  ;;  %v12048_v47 = vadd.f32 %v11573_v29, %v4710_v13  ;;  %v4513_v15 = vsub.f32 %v14014_v25, %v11974_v61  ;;  %v14019_v25 = vld [vmem:[#allocation25_spill] sm:$0xff] }
 0x6bd   : > { %5096 = vmatprep.mubr.bf16.mxu1 %v4824_v20  ;;  %v4640_v57 = vmul.f32 %v8179_v11, %v4512_v51  ;;  %v4713_v44 = vmul.f32 %v11566_v23, %v4638_v62  ;;  %v4639_v60 = vmul.f32 %v8179_v11, %v4511_v37  ;;  %v4712_v31 = vmul.f32 %v11563_v2, %v4637_v40  ;;  %v14015_v62 = vld [vmem:[#allocation23_spill] sm:$0xff] }
 0x6be   : > { %v4551_v42 = vadd.f32 1e-05, %v4455_v4  ;;  %v4456_v32 = vmax.f32 %v4424_v49, 0.0  ;;  %v4823_v16 = vpack.c.bf16 %v12048_v47, %v12045_v1  ;;  %v4514_v37 = vsub.f32 %v14015_v62, %v11974_v61 }
 0x6bf   : > { %v4715_v46 = vmul.f32 %v11566_v23, %v4640_v57  ;;  %v4714_v33 = vmul.f32 %v11563_v2, %v4639_v60  ;;  %v12061_v4 = vadd.f32 %v11582_v9, %v4713_v44  ;;  %v4515_v26 = vsub.f32 %v14016_v10, %v11987_v21  ;;  %v14020_v10 = vld [vmem:[#allocation52_spill] sm:$0xff] }
 0x6c0   : > { %8184 = vrsqrt.f32 %v4551_v42  ;;  %v4552_v39 = vadd.f32 1e-05, %v4456_v32  ;;  %5097 = vmatmul.mubr.bf16.gmra.mrb[176].mxu1 %v4823_v16  ;;  %v4516_v51 = vsub.f32 %v14017_v5, %v11987_v21  ;;  %v12076_v20 = vadd.f32 %v11573_v29, %v4712_v31  ;;  %v14018_v31 = vld [vmem:[#allocation26_spill] sm:$0xff]  ;;  %v14021_v5 = vld [vmem:[#allocation53_spill] sm:$0xff] }
 0x6c1   : > { %v12064_v49 = vadd.f32 %v11582_v9, %v4715_v46  ;;  %v12067_v3 = vadd.f32 %v11573_v29, %v4714_v33  ;;  %v4517_v33 = vsub.f32 %v14018_v31, %v12008_v0 }
 0x6c2   : > { %v8181_v13 = vpop.eup %8180  ;;  %8186 = vrsqrt.f32 %v4552_v39 }
 0x6c3   : > { %v4826_v61 = vpack.c.bf16 %v12064_v49, %v12061_v4  ;;  %v4642_v40 = vmul.f32 %v8181_v13, %v4514_v37  ;;  %v4641_v11 = vmul.f32 %v8181_v13, %v4513_v15  ;;  %v4825_v44 = vpack.c.bf16 %v12067_v3, %v12076_v20 }
 0x6c4   : > { %v8183_v57 = vpop.eup %8182  ;;  %v4518_v15 = vsub.f32 %v14019_v25, %v12008_v0 }
 0x6c5   : > { %5104 = vmatprep.mubr.bf16.mxu1 %v4826_v61  ;;  %v4644_v60 = vmul.f32 %v8183_v57, %v4516_v51  ;;  %v4717_v42 = vmul.f32 %v11566_v23, %v4642_v40  ;;  %v4643_v32 = vmul.f32 %v8183_v57, %v4515_v26  ;;  %v4716_v16 = vmul.f32 %v11563_v2, %v4641_v11 }
 0x6c6   : > { %v4519_v26 = vsub.f32 %v14020_v10, %v12021_v54  ;;  %v4520_v51 = vsub.f32 %v14021_v5, %v12021_v54 }
 0x6c7   : > { %v4719_v21 = vmul.f32 %v11566_v23, %v4644_v60  ;;  %v4718_v46 = vmul.f32 %v11563_v2, %v4643_v32  ;;  %v12089_v39 = vadd.f32 %v11582_v9, %v4717_v42  ;;  %v12104_v61 = vadd.f32 %v11573_v29, %v4716_v16 }
 0x6c8   : > { %5105 = vmatmul.mubr.bf16.gmra.mrb[180].mxu1 %v4825_v44 }
 0x6c9   : > { %v12092_v62 = vadd.f32 %v11582_v9, %v4719_v21  ;;  %v12095_v37 = vadd.f32 %v11573_v29, %v4718_v46 }
 0x6ca   : > { %v8185_v13 = vpop.eup %8184 }
 0x6cb   : > { %v4828_v0 = vpack.c.bf16 %v12092_v62, %v12089_v39  ;;  %v4646_v40 = vmul.f32 %v8185_v13, %v4518_v15  ;;  %v4645_v11 = vmul.f32 %v8185_v13, %v4517_v33  ;;  %v4827_v44 = vpack.c.bf16 %v12095_v37, %v12104_v61 }
 0x6cc   : > { %v8187_v57 = vpop.eup %8186 }
 0x6cd   : > { %5112 = vmatprep.mubr.bf16.mxu1 %v4828_v0  ;;  %v4648_v60 = vmul.f32 %v8187_v57, %v4520_v51  ;;  %v4721_v42 = vmul.f32 %v11566_v23, %v4646_v40  ;;  %v4647_v32 = vmul.f32 %v8187_v57, %v4519_v26  ;;  %v4720_v54 = vmul.f32 %v11563_v2, %v4645_v11 }
 0x6cf   : > { %v4723_v21 = vmul.f32 %v11566_v23, %v4648_v60  ;;  %v4722_v46 = vmul.f32 %v11563_v2, %v4647_v32  ;;  %v12113_v16 = vadd.f32 %v11582_v9, %v4721_v42  ;;  %v12124_v15 = vadd.f32 %v11573_v29, %v4720_v54 }
 0x6d0   : > { %5113 = vmatmul.mubr.bf16.gmra.mrb[184].mxu1 %v4827_v44 }
 0x6d1   : > { %v12116_v31 = vadd.f32 %v11582_v9, %v4723_v21  ;;  %v12119_v33 = vadd.f32 %v11573_v29, %v4722_v46  ;;  %v12131_v9 = vld [vmem:[%s13452_s6 + $0x1] ss:$0 sm:$0xff]  ;;  %v14022_v21 = vmov 0  }
 0x6d3   : > { %v4830_v25 = vpack.c.bf16 %v12116_v31, %v12113_v16  ;;  %v4829_v2 = vpack.c.bf16 %v12119_v33, %v12124_v15 }
 0x6d5   : > { %5120 = vmatprep.mubr.bf16.mxu1 %v4830_v25 }
 0x6d8   : > { %5121 = vmatmul.mubr.bf16.gmra.mrb[188].mxu1 %v4829_v2 }
 0x72b   : > { %v7359_v23 = vpop.f32.mrb[128].mxu1 }
 0x72c   : > { %v7360_v13 = vpop.f32.mrb[129].mxu1 }
 0x72d   : > { %v7361_v10 = vadd.f32 %v7360_v13, %v7359_v23  ;;  %v7362_v26 = vpop.f32.mrb[130].mxu1 }
 0x72e   : > { %v7363_v5 = vpop.f32.mrb[131].mxu1 }
 0x72f   : > { %v5003_v51 = vadd.f32 %v7361_v10, %v12131_v9  ;;  %v7364_v0 = vadd.f32 %v7363_v5, %v7362_v26 }
 0x731   : > { %v5006_v29 = vadd.f32 %v7364_v0, %v12131_v9  ;;  %v5129_v40 = vmax.f32 %v5003_v51, 0.0 }
 0x733   : > { %v5130_v11 = vmax.f32 %v5006_v29, 0.0 }
 0x735   : > { %v5161_v57 = vpack.c.bf16 %v5130_v11, %v5129_v40  ;;  %v7365_v44 = vpop.f32.mrb[132].mxu1 }
 0x736   : > { %v7366_v60 = vpop.f32.mrb[133].mxu1 }
 0x737   : > { %5320 = vmatmul.mubr.bf16.vlgmr.msra.gmra.mrb[128].mxu0 %v5161_v57  ;;  %v7367_v42 = vadd.f32 %v7366_v60, %v7365_v44  ;;  %v7368_v32 = vpop.f32.mrb[134].mxu1 }
 0x738   : > { %5329 = vmatprep.mubr.bf16.mxu0 %v14022_v21  ;;  %v7369_v54 = vpop.f32.mrb[135].mxu1 }
 0x739   : > { %v5011_v46 = vadd.f32 %v7367_v42, %v12131_v9  ;;  %v7370_v25 = vadd.f32 %v7369_v54, %v7368_v32 }
 0x73b   : > { %v5014_v2 = vadd.f32 %v7370_v25, %v12131_v9  ;;  %v5131_v23 = vmax.f32 %v5011_v46, 0.0 }
 0x73d   : > { %v5132_v13 = vmax.f32 %v5014_v2, 0.0 }
 0x73f   : > { %v7371_v10 = vpop.f32.mrb[136].mxu1  ;;  %v5162_v26 = vpack.c.bf16 %v5132_v13, %v5131_v23 }
 0x740   : > { %v7372_v5 = vpop.f32.mrb[137].mxu1 }
 0x741   : > { %v7373_v51 = vadd.f32 %v7372_v5, %v7371_v10  ;;  %v7374_v0 = vpop.f32.mrb[138].mxu1  ;;  %5330 = vmatmul.mubr.bf16.gmra.mrb[132].mxu0 %v5162_v26 }
 0x742   : > { %v7375_v29 = vpop.f32.mrb[139].mxu1  ;;  %5339 = vmatprep.mubr.bf16.mxu0 %v14022_v21 }
 0x743   : > { %v5019_v40 = vadd.f32 %v7373_v51, %v12131_v9  ;;  %v7376_v11 = vadd.f32 %v7375_v29, %v7374_v0 }
 0x745   : > { %v5022_v57 = vadd.f32 %v7376_v11, %v12131_v9  ;;  %v5133_v44 = vmax.f32 %v5019_v40, 0.0 }
 0x747   : > { %v5134_v60 = vmax.f32 %v5022_v57, 0.0  ;;  %v7377_v42 = vpop.f32.mrb[140].mxu1 }
 0x748   : > { %v7378_v32 = vpop.f32.mrb[141].mxu1 }
 0x749   : > { %v7379_v54 = vadd.f32 %v7378_v32, %v7377_v42  ;;  %v7380_v46 = vpop.f32.mrb[142].mxu1  ;;  %v5163_v25 = vpack.c.bf16 %v5134_v60, %v5133_v44 }
 0x74a   : > { %v7381_v2 = vpop.f32.mrb[143].mxu1 }
 0x74b   : > { %v5027_v23 = vadd.f32 %v7379_v54, %v12131_v9  ;;  %v7382_v13 = vadd.f32 %v7381_v2, %v7380_v46  ;;  %5340 = vmatmul.mubr.bf16.gmra.mrb[136].mxu0 %v5163_v25 }
 0x74c   : > { %5349 = vmatprep.mubr.bf16.mxu0 %v14022_v21 }
 0x74d   : > { %v5030_v10 = vadd.f32 %v7382_v13, %v12131_v9  ;;  %v5135_v26 = vmax.f32 %v5027_v23, 0.0 }
 0x74f   : > { %v5136_v5 = vmax.f32 %v5030_v10, 0.0 }
 0x751   : > { %v7383_v51 = vpop.f32.mrb[144].mxu1  ;;  %v5164_v11 = vpack.c.bf16 %v5136_v5, %v5135_v26 }
 0x752   : > { %v7384_v0 = vpop.f32.mrb[145].mxu1 }
 0x753   : > { %v7385_v29 = vadd.f32 %v7384_v0, %v7383_v51  ;;  %v7386_v40 = vpop.f32.mrb[146].mxu1  ;;  %5350 = vmatmul.mubr.bf16.gmra.mrb[140].mxu0 %v5164_v11 }
 0x754   : > { %v7387_v57 = vpop.f32.mrb[147].mxu1  ;;  %5359 = vmatprep.mubr.bf16.mxu0 %v14022_v21 }
 0x755   : > { %v5035_v42 = vadd.f32 %v7385_v29, %v12131_v9  ;;  %v7388_v44 = vadd.f32 %v7387_v57, %v7386_v40 }
 0x757   : > { %v5038_v60 = vadd.f32 %v7388_v44, %v12131_v9  ;;  %v5137_v32 = vmax.f32 %v5035_v42, 0.0 }
 0x759   : > { %v5138_v54 = vmax.f32 %v5038_v60, 0.0  ;;  %v7389_v46 = vpop.f32.mrb[148].mxu1 }
 0x75a   : > { %v7390_v25 = vpop.f32.mrb[149].mxu1 }
 0x75b   : > { %v7391_v2 = vadd.f32 %v7390_v25, %v7389_v46  ;;  %v7392_v23 = vpop.f32.mrb[150].mxu1  ;;  %v5165_v13 = vpack.c.bf16 %v5138_v54, %v5137_v32 }
 0x75c   : > { %v7393_v10 = vpop.f32.mrb[151].mxu1 }
 0x75d   : > { %v5043_v51 = vadd.f32 %v7391_v2, %v12131_v9  ;;  %v7394_v26 = vadd.f32 %v7393_v10, %v7392_v23  ;;  %5360 = vmatmul.mubr.bf16.gmra.mrb[144].mxu0 %v5165_v13 }
 0x75e   : > { %5369 = vmatprep.mubr.bf16.mxu0 %v14022_v21 }
 0x75f   : > { %v5046_v5 = vadd.f32 %v7394_v26, %v12131_v9  ;;  %v5139_v0 = vmax.f32 %v5043_v51, 0.0 }
 0x761   : > { %v5140_v29 = vmax.f32 %v5046_v5, 0.0  ;;  %v7395_v40 = vpop.f32.mrb[152].mxu1 }
 0x762   : > { %v7396_v11 = vpop.f32.mrb[153].mxu1 }
 0x763   : > { %v7397_v57 = vadd.f32 %v7396_v11, %v7395_v40  ;;  %v7398_v42 = vpop.f32.mrb[154].mxu1  ;;  %v5166_v44 = vpack.c.bf16 %v5140_v29, %v5139_v0 }
 0x764   : > { %v7399_v60 = vpop.f32.mrb[155].mxu1 }
 0x765   : > { %v5051_v46 = vadd.f32 %v7397_v57, %v12131_v9  ;;  %v7400_v32 = vadd.f32 %v7399_v60, %v7398_v42  ;;  %5370 = vmatmul.mubr.bf16.gmra.mrb[148].mxu0 %v5166_v44 }
 0x766   : > { %5379 = vmatprep.mubr.bf16.mxu0 %v14022_v21 }
 0x767   : > { %v5054_v54 = vadd.f32 %v7400_v32, %v12131_v9  ;;  %v5141_v25 = vmax.f32 %v5051_v46, 0.0 }
 0x769   : > { %v5142_v2 = vmax.f32 %v5054_v54, 0.0  ;;  %v7401_v23 = vpop.f32.mrb[156].mxu1 }
 0x76a   : > { %v7402_v13 = vpop.f32.mrb[157].mxu1 }
 0x76b   : > { %v7403_v10 = vadd.f32 %v7402_v13, %v7401_v23  ;;  %v7404_v51 = vpop.f32.mrb[158].mxu1  ;;  %v5167_v26 = vpack.c.bf16 %v5142_v2, %v5141_v25 }
 0x76c   : > { %v7405_v5 = vpop.f32.mrb[159].mxu1 }
 0x76d   : > { %v5059_v40 = vadd.f32 %v7403_v10, %v12131_v9  ;;  %v7406_v0 = vadd.f32 %v7405_v5, %v7404_v51  ;;  %5380 = vmatmul.mubr.bf16.gmra.mrb[152].mxu0 %v5167_v26 }
 0x76e   : > { %5389 = vmatprep.mubr.bf16.mxu0 %v14022_v21 }
 0x76f   : > { %v5062_v29 = vadd.f32 %v7406_v0, %v12131_v9  ;;  %v5143_v11 = vmax.f32 %v5059_v40, 0.0 }
 0x771   : > { %v5144_v57 = vmax.f32 %v5062_v29, 0.0 }
 0x772   : > { %v7407_v42 = vpop.f32.mrb[160].mxu1 }
 0x773   : > { %v7408_v44 = vpop.f32.mrb[161].mxu1  ;;  %v5168_v32 = vpack.c.bf16 %v5144_v57, %v5143_v11 }
 0x774   : > { %v7409_v60 = vadd.f32 %v7408_v44, %v7407_v42  ;;  %v7410_v46 = vpop.f32.mrb[162].mxu1 }
 0x775   : > { %v7411_v54 = vpop.f32.mrb[163].mxu1  ;;  %5390 = vmatmul.mubr.bf16.gmra.mrb[156].mxu0 %v5168_v32 }
 0x776   : > { %v5067_v23 = vadd.f32 %v7409_v60, %v12131_v9  ;;  %v7412_v25 = vadd.f32 %v7411_v54, %v7410_v46  ;;  %5399 = vmatprep.mubr.bf16.mxu0 %v14022_v21 }
 0x778   : > { %v5070_v2 = vadd.f32 %v7412_v25, %v12131_v9  ;;  %v5145_v13 = vmax.f32 %v5067_v23, 0.0 }
 0x77a   : > { %v5146_v10 = vmax.f32 %v5070_v2, 0.0  ;;  %v7413_v51 = vpop.f32.mrb[164].mxu1 }
 0x77b   : > { %v7414_v26 = vpop.f32.mrb[165].mxu1 }
 0x77c   : > { %v7415_v5 = vadd.f32 %v7414_v26, %v7413_v51  ;;  %v7416_v40 = vpop.f32.mrb[166].mxu1  ;;  %v5169_v0 = vpack.c.bf16 %v5146_v10, %v5145_v13 }
 0x77d   : > { %v7417_v29 = vpop.f32.mrb[167].mxu1 }
 0x77e   : > { %v5075_v42 = vadd.f32 %v7415_v5, %v12131_v9  ;;  %v7418_v11 = vadd.f32 %v7417_v29, %v7416_v40  ;;  %5400 = vmatmul.mubr.bf16.gmra.mrb[160].mxu0 %v5169_v0 }
 0x77f   : > { %5409 = vmatprep.mubr.bf16.mxu0 %v14022_v21 }
 0x780   : > { %v5078_v57 = vadd.f32 %v7418_v11, %v12131_v9  ;;  %v5147_v44 = vmax.f32 %v5075_v42, 0.0 }
 0x782   : > { %v5148_v60 = vmax.f32 %v5078_v57, 0.0 }
 0x783   : > { %v7419_v46 = vpop.f32.mrb[168].mxu1 }
 0x784   : > { %v7420_v32 = vpop.f32.mrb[169].mxu1  ;;  %v5170_v25 = vpack.c.bf16 %v5148_v60, %v5147_v44 }
 0x785   : > { %v7421_v54 = vadd.f32 %v7420_v32, %v7419_v46  ;;  %v7422_v23 = vpop.f32.mrb[170].mxu1 }
 0x786   : > { %v7423_v2 = vpop.f32.mrb[171].mxu1  ;;  %5410 = vmatmul.mubr.bf16.gmra.mrb[164].mxu0 %v5170_v25 }
 0x787   : > { %v5083_v51 = vadd.f32 %v7421_v54, %v12131_v9  ;;  %v7424_v13 = vadd.f32 %v7423_v2, %v7422_v23  ;;  %5419 = vmatprep.mubr.bf16.mxu0 %v14022_v21 }
 0x789   : > { %v5086_v10 = vadd.f32 %v7424_v13, %v12131_v9  ;;  %v5149_v26 = vmax.f32 %v5083_v51, 0.0 }
 0x78b   : > { %v5150_v5 = vmax.f32 %v5086_v10, 0.0  ;;  %v7425_v40 = vpop.f32.mrb[172].mxu1 }
 0x78c   : > { %v7426_v0 = vpop.f32.mrb[173].mxu1 }
 0x78d   : > { %v7427_v29 = vadd.f32 %v7426_v0, %v7425_v40  ;;  %v7428_v42 = vpop.f32.mrb[174].mxu1  ;;  %v5171_v11 = vpack.c.bf16 %v5150_v5, %v5149_v26 }
 0x78e   : > { %v7429_v57 = vpop.f32.mrb[175].mxu1 }
 0x78f   : > { %v5091_v46 = vadd.f32 %v7427_v29, %v12131_v9  ;;  %v7430_v44 = vadd.f32 %v7429_v57, %v7428_v42  ;;  %5420 = vmatmul.mubr.bf16.gmra.mrb[168].mxu0 %v5171_v11 }
 0x790   : > { %5429 = vmatprep.mubr.bf16.mxu0 %v14022_v21 }
 0x791   : > { %v5094_v60 = vadd.f32 %v7430_v44, %v12131_v9  ;;  %v5151_v32 = vmax.f32 %v5091_v46, 0.0 }
 0x793   : > { %v5152_v54 = vmax.f32 %v5094_v60, 0.0  ;;  %v7431_v23 = vpop.f32.mrb[176].mxu1 }
 0x794   : > { %v7432_v25 = vpop.f32.mrb[177].mxu1 }
 0x795   : > { %v7433_v2 = vadd.f32 %v7432_v25, %v7431_v23  ;;  %v7434_v51 = vpop.f32.mrb[178].mxu1  ;;  %v5172_v13 = vpack.c.bf16 %v5152_v54, %v5151_v32 }
 0x796   : > { %v7435_v10 = vpop.f32.mrb[179].mxu1 }
 0x797   : > { %v5099_v40 = vadd.f32 %v7433_v2, %v12131_v9  ;;  %v7436_v26 = vadd.f32 %v7435_v10, %v7434_v51  ;;  %5430 = vmatmul.mubr.bf16.gmra.mrb[172].mxu0 %v5172_v13 }
 0x798   : > { %5439 = vmatprep.mubr.bf16.mxu0 %v14022_v21 }
 0x799   : > { %v5102_v5 = vadd.f32 %v7436_v26, %v12131_v9  ;;  %v5153_v0 = vmax.f32 %v5099_v40, 0.0 }
 0x79b   : > { %v5154_v29 = vmax.f32 %v5102_v5, 0.0  ;;  %v7437_v42 = vpop.f32.mrb[180].mxu1 }
 0x79c   : > { %v7438_v11 = vpop.f32.mrb[181].mxu1 }
 0x79d   : > { %v7439_v57 = vadd.f32 %v7438_v11, %v7437_v42  ;;  %v7440_v46 = vpop.f32.mrb[182].mxu1  ;;  %v5173_v44 = vpack.c.bf16 %v5154_v29, %v5153_v0 }
 0x79e   : > { %v7441_v60 = vpop.f32.mrb[183].mxu1 }
 0x79f   : > { %v5107_v23 = vadd.f32 %v7439_v57, %v12131_v9  ;;  %v7442_v32 = vadd.f32 %v7441_v60, %v7440_v46  ;;  %5440 = vmatmul.mubr.bf16.gmra.mrb[176].mxu0 %v5173_v44 }
 0x7a0   : > { %5449 = vmatprep.mubr.bf16.mxu0 %v14022_v21 }
 0x7a1   : > { %v5110_v54 = vadd.f32 %v7442_v32, %v12131_v9  ;;  %v5155_v25 = vmax.f32 %v5107_v23, 0.0 }
 0x7a3   : > { %v5156_v2 = vmax.f32 %v5110_v54, 0.0  ;;  %v7443_v51 = vpop.f32.mrb[184].mxu1 }
 0x7a4   : > { %v7444_v13 = vpop.f32.mrb[185].mxu1 }
 0x7a5   : > { %v7445_v10 = vadd.f32 %v7444_v13, %v7443_v51  ;;  %v7446_v40 = vpop.f32.mrb[186].mxu1  ;;  %v5174_v26 = vpack.c.bf16 %v5156_v2, %v5155_v25 }
 0x7a6   : > { %v7447_v5 = vpop.f32.mrb[187].mxu1 }
 0x7a7   : > { %v5115_v42 = vadd.f32 %v7445_v10, %v12131_v9  ;;  %v7448_v0 = vadd.f32 %v7447_v5, %v7446_v40  ;;  %5450 = vmatmul.mubr.bf16.gmra.mrb[180].mxu0 %v5174_v26  ;;  %v7186_v26 = vld [vmem:[%s13454_s8 + $0x2] sm:$0x3]  ;;  %v14023_v5 = vld [vmem:[#allocation19_spill] sm:$0xff] }
 0x7a8   : > { %5459 = vmatprep.mubr.bf16.mxu0 %v14022_v21 }
 0x7a9   : > { %v5118_v29 = vadd.f32 %v7448_v0, %v12131_v9  ;;  %v5157_v11 = vmax.f32 %v5115_v42, 0.0  ;;  %v12185_v42 = vrot.slane %v7186_v26, %v14023_v5  ;;  %v12188_v0 = vrot.slane %v7186_v26, %v13966_v36 }
 0x7ab   : > { %v5158_v57 = vmax.f32 %v5118_v29, 0.0  ;;  %v7449_v46 = vpop.f32.mrb[188].mxu1 }
 0x7ac   : > { %v7450_v44 = vpop.f32.mrb[189].mxu1 }
 0x7ad   : > { %v7451_v60 = vadd.f32 %v7450_v44, %v7449_v46  ;;  %v7452_v23 = vpop.f32.mrb[190].mxu1  ;;  %v5175_v32 = vpack.c.bf16 %v5158_v57, %v5157_v11 }
 0x7ae   : > { %v7453_v54 = vpop.f32.mrb[191].mxu1 }
 0x7af   : > { %v5123_v51 = vadd.f32 %v7451_v60, %v12131_v9  ;;  %v7454_v25 = vadd.f32 %v7453_v54, %v7452_v23  ;;  %5460 = vmatmul.mubr.bf16.gmra.mrb[184].mxu0 %v5175_v32  ;;  %v14024_v32 = vld [vmem:[#allocation20_spill] sm:$0xff] }
 0x7b0   : > { %5469 = vmatprep.mubr.bf16.mxu0 %v14022_v21 }
 0x7b1   : > { %v5126_v2 = vadd.f32 %v7454_v25, %v12131_v9  ;;  %v5159_v13 = vmax.f32 %v5123_v51, 0.0  ;;  %v14025_v25 = vld [vmem:[#allocation28_spill] sm:$0xff] }
 0x7b3   : > { %v5160_v10 = vmax.f32 %v5126_v2, 0.0 }
 0x7b5   : > { %v5176_v40 = vpack.c.bf16 %v5160_v10, %v5159_v13  ;;  %v14026_v13 = vld [vmem:[#allocation27_spill] sm:$0xff] }
 0x7b7   : > { %5470 = vmatmul.mubr.bf16.gmra.mrb[188].mxu0 %v5176_v40 }
 0x7b8   : > { %6862 = vmatprep.mubr.bf16.mxu0 %v14022_v21 }
 0x80a   : > { %v5321_v29 = vpop.f32.mrb[128].mxu0 }
 0x80b   : > { %v5322_v11 = vadd.f32 %v5321_v29, %v12185_v42  ;;  %v5323_v9 = vpop.f32.mrb[129].mxu0 }
 0x80c   : > { %v5324_v57 = vadd.f32 %v5323_v9, %v12188_v0  ;;  %v5325_v46 = vpop.f32.mrb[130].mxu0 }
 0x80d   : > { %v12193_v44 = vadd.f32 %v5322_v11, %v11593_v50  ;;  %v5326_v60 = vadd.f32 %v5325_v46, %v12185_v42  ;;  %v5327_v23 = vpop.f32.mrb[131].mxu0 }
 0x80e   : > { %v12197_v54 = vadd.f32 %v5324_v57, %v14024_v32  ;;  %v5328_v51 = vadd.f32 %v5327_v23, %v12188_v0 }
 0x80f   : > { %v12201_v2 = vadd.f32 %v5326_v60, %v14025_v25  ;;  %v5676_v50 = vmul.f32 %v12193_v44, %v12193_v44 }
 0x810   : > { %v12204_v10 = vadd.f32 %v5328_v51, %v14026_v13  ;;  %v5548_v40 = vadd.f32 %v12197_v54, %v12193_v44  ;;  %v5677_v26 = vmul.f32 %v12197_v54, %v12197_v54 }
 0x811   : > { %v5678_v9 = vmul.f32 %v12201_v2, %v12201_v2 }
 0x812   : > { %5549 = vadd.xlane.f32.xlu1 %v5548_v40  ;;  %v5551_v29 = vadd.f32 %v12204_v10, %v12201_v2  ;;  %v5740_v11 = vadd.f32 %v5677_v26, %v5676_v50  ;;  %v5679_v57 = vmul.f32 %v12204_v10, %v12204_v10 }
 0x814   : > { %5552 = vadd.xlane.f32.xlu0 %v5551_v29  ;;  %v5331_v46 = vpop.f32.mrb[132].mxu0  ;;  %v5743_v50 = vadd.f32 %v5679_v57, %v5678_v9 }
 0x815   : > { %v5332_v60 = vadd.f32 %v5331_v46, %v12185_v42  ;;  %v5333_v23 = vpop.f32.mrb[133].mxu0 }
 0x816   : > { %5741 = vadd.xlane.f32.xlu1 %v5740_v11  ;;  %v5334_v32 = vadd.f32 %v5333_v23, %v12188_v0  ;;  %v5335_v51 = vpop.f32.mrb[134].mxu0 }
 0x817   : > { %v12221_v25 = vadd.f32 %v5332_v60, %v11647_v48  ;;  %v5336_v13 = vadd.f32 %v5335_v51, %v12185_v42  ;;  %v5337_v40 = vpop.f32.mrb[135].mxu0 }
 0x818   : > { %v12225_v26 = vadd.f32 %v5334_v32, %v11637_v14  ;;  %v5338_v29 = vadd.f32 %v5337_v40, %v12188_v0 }
 0x819   : > { %v12229_v21 = vadd.f32 %v5336_v13, %v11650_v55  ;;  %v5680_v11 = vmul.f32 %v12221_v25, %v12221_v25 }
 0x81a   : > { %5744 = vadd.xlane.f32.xlu1 %v5743_v50  ;;  %v12234_v46 = vadd.f32 %v5338_v29, %v11640_v8  ;;  %v5554_v48 = vadd.f32 %v12225_v26, %v12221_v25  ;;  %v5681_v9 = vmul.f32 %v12225_v26, %v12225_v26 }
 0x81b   : > { %v5682_v57 = vmul.f32 %v12229_v21, %v12229_v21 }
 0x81c   : > { %5555 = vadd.xlane.f32.xlu0 %v5554_v48  ;;  %v5746_v14 = vadd.f32 %v5681_v9, %v5680_v11  ;;  %v5683_v55 = vmul.f32 %v12234_v46, %v12234_v46  ;;  %v5557_v8 = vadd.f32 %v12234_v46, %v12229_v21 }
 0x81e   : > { %v5341_v60 = vpop.f32.mrb[136].mxu0  ;;  %5747 = vadd.xlane.f32.xlu1 %v5746_v14  ;;  %v5749_v40 = vadd.f32 %v5683_v55, %v5682_v57 }
 0x81f   : > { %v5342_v23 = vadd.f32 %v5341_v60, %v12185_v42  ;;  %v5343_v32 = vpop.f32.mrb[137].mxu0 }
 0x820   : > { %v5344_v51 = vadd.f32 %v5343_v32, %v12188_v0  ;;  %v5345_v13 = vpop.f32.mrb[138].mxu0  ;;  %5558 = vadd.xlane.f32.xlu0 %v5557_v8  ;;  %v14029_v8 = vld [vmem:[#allocation29_spill] sm:$0xff] }
 0x821   : > { %v12249_v50 = vadd.f32 %v5342_v23, %v11692_v28  ;;  %v5346_v29 = vadd.f32 %v5345_v13, %v12185_v42  ;;  %v5347_v11 = vpop.f32.mrb[139].mxu0 }
 0x822   : > { %v12253_v48 = vadd.f32 %v5344_v51, %v11673_v63  ;;  %v5348_v9 = vadd.f32 %v5347_v11, %v12188_v0  ;;  %5750 = vadd.xlane.f32.xlu1 %v5749_v40 }
 0x823   : > { %v12257_v14 = vadd.f32 %v5346_v29, %v11689_v58  ;;  %v5684_v60 = vmul.f32 %v12249_v50, %v12249_v50 }
 0x824   : > { %14027 = vst [vmem:[#allocation46_spill] sm:$0xff] %v12253_v48  ;;  %v12262_v57 = vadd.f32 %v5348_v9, %v14029_v8  ;;  %v5560_v28 = vadd.f32 %v12253_v48, %v12249_v50  ;;  %v5685_v55 = vmul.f32 %v12253_v48, %v12253_v48  ;;  %v14031_v48 = vld [vmem:[#allocation31_spill] sm:$0xff] }
 0x825   : > { %14028 = vst [vmem:[#allocation47_spill] sm:$0xff] %v12257_v14  ;;  %v5686_v32 = vmul.f32 %v12257_v14, %v12257_v14 }
 0x826   : > { %14030 = vst [vmem:[#allocation50_spill] sm:$0xff] %v12262_v57  ;;  %5561 = vadd.xlane.f32.xlu0 %v5560_v28  ;;  %v5351_v63 = vpop.f32.mrb[140].mxu0  ;;  %v5752_v23 = vadd.f32 %v5685_v55, %v5684_v60  ;;  %v5687_v58 = vmul.f32 %v12262_v57, %v12262_v57  ;;  %v5563_v11 = vadd.f32 %v12262_v57, %v12257_v14  ;;  %v14033_v57 = vld [vmem:[#allocation30_spill] sm:$0xff] }
 0x827   : > { %v5352_v51 = vadd.f32 %v5351_v63, %v12185_v42  ;;  %v5353_v13 = vpop.f32.mrb[141].mxu0 }
 0x828   : > { %v5354_v40 = vadd.f32 %v5353_v13, %v12188_v0  ;;  %v5355_v29 = vpop.f32.mrb[142].mxu0  ;;  %5753 = vadd.xlane.f32.xlu1 %v5752_v23  ;;  %v5755_v63 = vadd.f32 %v5687_v58, %v5686_v32 }
 0x829   : > { %v12277_v9 = vadd.f32 %v5352_v51, %v11728_v22  ;;  %v5356_v60 = vadd.f32 %v5355_v29, %v12185_v42  ;;  %v5357_v8 = vpop.f32.mrb[143].mxu0 }
 0x82a   : > { %v12281_v28 = vadd.f32 %v5354_v40, %v11709_v24  ;;  %v5358_v55 = vadd.f32 %v5357_v8, %v12188_v0  ;;  %5564 = vadd.xlane.f32.xlu0 %v5563_v11 }
 0x82b   : > { %v12285_v13 = vadd.f32 %v5356_v60, %v14031_v48  ;;  %v5688_v23 = vmul.f32 %v12277_v9, %v12277_v9 }
 0x82c   : > { %v12290_v14 = vadd.f32 %v5358_v55, %v14033_v57  ;;  %5756 = vadd.xlane.f32.xlu1 %v5755_v63  ;;  %v5566_v22 = vadd.f32 %v12281_v28, %v12277_v9  ;;  %v5689_v24 = vmul.f32 %v12281_v28, %v12281_v28 }
 0x82d   : > { %14032 = vst [vmem:[#allocation49_spill] sm:$0xff] %v12285_v13  ;;  %v5690_v48 = vmul.f32 %v12285_v13, %v12285_v13 }
 0x82e   : > { %14034 = vst [vmem:[#allocation21_spill] sm:$0xff] %v12290_v14  ;;  %5567 = vadd.xlane.f32.xlu0 %v5566_v22  ;;  %v5758_v40 = vadd.f32 %v5689_v24, %v5688_v23  ;;  %v5691_v32 = vmul.f32 %v12290_v14, %v12290_v14  ;;  %v5569_v60 = vadd.f32 %v12290_v14, %v12285_v13  ;;  %v14038_v14 = vld [vmem:[#allocation32_spill] sm:$0xff] }
 0x830   : > { %v5361_v51 = vpop.f32.mrb[144].mxu0  ;;  %5759 = vadd.xlane.f32.xlu1 %v5758_v40  ;;  %v5761_v24 = vadd.f32 %v5691_v32, %v5690_v48 }
 0x831   : > { %v5362_v58 = vadd.f32 %v5361_v51, %v12185_v42  ;;  %v5363_v57 = vpop.f32.mrb[145].mxu0  ;;  %v14036_v51 = vld [vmem:[#allocation33_spill] sm:$0xff] }
 0x832   : > { %v5364_v29 = vadd.f32 %v5363_v57, %v12188_v0  ;;  %v5365_v11 = vpop.f32.mrb[146].mxu0  ;;  %5570 = vadd.xlane.f32.xlu0 %v5569_v60 }
 0x833   : > { %v12305_v8 = vadd.f32 %v5362_v58, %v11764_v53  ;;  %v5366_v55 = vadd.f32 %v5365_v11, %v12185_v42  ;;  %v5367_v63 = vpop.f32.mrb[147].mxu0 }
 0x834   : > { %v12309_v23 = vadd.f32 %v5364_v29, %v11745_v41  ;;  %v5368_v22 = vadd.f32 %v5367_v63, %v12188_v0  ;;  %5762 = vadd.xlane.f32.xlu1 %v5761_v24 }
 0x835   : > { %v12313_v57 = vadd.f32 %v5366_v55, %v14036_v51  ;;  %v5692_v40 = vmul.f32 %v12305_v8, %v12305_v8 }
 0x836   : > { %14035 = vst [vmem:[#allocation23_spill] sm:$0xff] %v12309_v23  ;;  %v12318_v13 = vadd.f32 %v5368_v22, %v14038_v14  ;;  %v5572_v53 = vadd.f32 %v12309_v23, %v12305_v8  ;;  %v5693_v41 = vmul.f32 %v12309_v23, %v12309_v23  ;;  %v14041_v23 = vld [vmem:[#allocation35_spill] sm:$0xff] }
 0x837   : > { %14037 = vst [vmem:[#allocation22_spill] sm:$0xff] %v12313_v57  ;;  %v5694_v48 = vmul.f32 %v12313_v57, %v12313_v57 }
 0x838   : > { %14039 = vst [vmem:[#allocation24_spill] sm:$0xff] %v12318_v13  ;;  %5573 = vadd.xlane.f32.xlu0 %v5572_v53  ;;  %v5371_v58 = vpop.f32.mrb[148].mxu0  ;;  %v5764_v29 = vadd.f32 %v5693_v41, %v5692_v40  ;;  %v5695_v32 = vmul.f32 %v12318_v13, %v12318_v13  ;;  %v5575_v63 = vadd.f32 %v12318_v13, %v12313_v57  ;;  %v14040_v40 = vld [vmem:[#allocation34_spill] sm:$0xff]  ;;  %v14042_v13 = vld [vmem:[#allocation37_spill] sm:$0xff] }
 0x839   : > { %v5372_v11 = vadd.f32 %v5371_v58, %v12185_v42  ;;  %v5373_v14 = vpop.f32.mrb[149].mxu0 }
 0x83a   : > { %v5374_v60 = vadd.f32 %v5373_v14, %v12188_v0  ;;  %v5375_v55 = vpop.f32.mrb[150].mxu0  ;;  %5765 = vadd.xlane.f32.xlu1 %v5764_v29  ;;  %v5767_v58 = vadd.f32 %v5695_v32, %v5694_v48 }
 0x83b   : > { %v12333_v22 = vadd.f32 %v5372_v11, %v11800_v7  ;;  %v5376_v24 = vadd.f32 %v5375_v55, %v12185_v42  ;;  %v5377_v51 = vpop.f32.mrb[151].mxu0 }
 0x83c   : > { %v12337_v53 = vadd.f32 %v5374_v60, %v14040_v40  ;;  %v5378_v41 = vadd.f32 %v5377_v51, %v12188_v0  ;;  %5576 = vadd.xlane.f32.xlu0 %v5575_v63 }
 0x83d   : > { %v12341_v14 = vadd.f32 %v5376_v24, %v14041_v23  ;;  %v5696_v29 = vmul.f32 %v12333_v22, %v12333_v22 }
 0x83e   : > { %v12346_v57 = vadd.f32 %v5378_v41, %v14042_v13  ;;  %5768 = vadd.xlane.f32.xlu1 %v5767_v58  ;;  %v5578_v7 = vadd.f32 %v12337_v53, %v12333_v22  ;;  %v5697_v11 = vmul.f32 %v12337_v53, %v12337_v53 }
 0x83f   : > { %v5698_v23 = vmul.f32 %v12341_v14, %v12341_v14 }
 0x840   : > { %5579 = vadd.xlane.f32.xlu0 %v5578_v7  ;;  %v5381_v60 = vpop.f32.mrb[152].mxu0  ;;  %v5770_v55 = vadd.f32 %v5697_v11, %v5696_v29  ;;  %v5699_v48 = vmul.f32 %v12346_v57, %v12346_v57  ;;  %v5581_v51 = vadd.f32 %v12346_v57, %v12341_v14 }
 0x841   : > { %v5382_v32 = vadd.f32 %v5381_v60, %v12185_v42  ;;  %v5383_v13 = vpop.f32.mrb[153].mxu0 }
 0x842   : > { %v5384_v63 = vadd.f32 %v5383_v13, %v12188_v0  ;;  %v5385_v24 = vpop.f32.mrb[154].mxu0  ;;  %5771 = vadd.xlane.f32.xlu1 %v5770_v55  ;;  %v5773_v11 = vadd.f32 %v5699_v48, %v5698_v23 }
 0x843   : > { %v12361_v40 = vadd.f32 %v5382_v32, %v11836_v30  ;;  %v5386_v41 = vadd.f32 %v5385_v24, %v12185_v42  ;;  %v5387_v58 = vpop.f32.mrb[155].mxu0 }
 0x844   : > { %v12365_v29 = vadd.f32 %v5384_v63, %v11817_v34  ;;  %v5388_v7 = vadd.f32 %v5387_v58, %v12188_v0  ;;  %5582 = vadd.xlane.f32.xlu0 %v5581_v51 }
 0x845   : > { %v12369_v60 = vadd.f32 %v5386_v41, %v11833_v56  ;;  %v5700_v55 = vmul.f32 %v12361_v40, %v12361_v40 }
 0x846   : > { %v12374_v13 = vadd.f32 %v5388_v7, %v11820_v38  ;;  %5774 = vadd.xlane.f32.xlu1 %v5773_v11  ;;  %v5584_v30 = vadd.f32 %v12365_v29, %v12361_v40  ;;  %v5701_v34 = vmul.f32 %v12365_v29, %v12365_v29 }
 0x847   : > { %v5702_v56 = vmul.f32 %v12369_v60, %v12369_v60 }
 0x848   : > { %14043 = vst [vmem:[#allocation26_spill] sm:$0xff] %v12374_v13  ;;  %5585 = vadd.xlane.f32.xlu0 %v5584_v30  ;;  %v5391_v32 = vpop.f32.mrb[156].mxu0  ;;  %v5776_v63 = vadd.f32 %v5701_v34, %v5700_v55  ;;  %v5703_v23 = vmul.f32 %v12374_v13, %v12374_v13  ;;  %v5587_v41 = vadd.f32 %v12374_v13, %v12369_v60 }
 0x849   : > { %v5392_v48 = vadd.f32 %v5391_v32, %v12185_v42  ;;  %v5393_v38 = vpop.f32.mrb[157].mxu0 }
 0x84a   : > { %v5394_v24 = vadd.f32 %v5393_v38, %v12188_v0  ;;  %v5395_v51 = vpop.f32.mrb[158].mxu0  ;;  %5777 = vadd.xlane.f32.xlu1 %v5776_v63  ;;  %v5779_v34 = vadd.f32 %v5703_v23, %v5702_v56  ;;  %v14045_v38 = vld [vmem:[#allocation38_spill] sm:$0xff] }
 0x84b   : > { %v12389_v58 = vadd.f32 %v5392_v48, %v11872_v43  ;;  %v5396_v7 = vadd.f32 %v5395_v51, %v12185_v42  ;;  %v5397_v11 = vpop.f32.mrb[159].mxu0 }
 0x84c   : > { %v12393_v55 = vadd.f32 %v5394_v24, %v11853_v12  ;;  %v5398_v30 = vadd.f32 %v5397_v11, %v12188_v0  ;;  %5588 = vadd.xlane.f32.xlu0 %v5587_v41 }
 0x84d   : > { %v5704_v32 = vmul.f32 %v12389_v58, %v12389_v58  ;;  %v12399_v63 = vadd.f32 %v5396_v7, %v11869_v6 }
 0x84e   : > { %v12402_v13 = vadd.f32 %v5398_v30, %v14045_v38  ;;  %5780 = vadd.xlane.f32.xlu1 %v5779_v34  ;;  %v5590_v43 = vadd.f32 %v12393_v55, %v12389_v58  ;;  %v5705_v12 = vmul.f32 %v12393_v55, %v12393_v55  ;;  %v14048_v38 = vld [vmem:[#allocation51_spill] sm:$0xff] }
 0x84f   : > { %14044 = vst [vmem:[#allocation25_spill] sm:$0xff] %v12399_v63 }
 0x850   : > { %14046 = vst [vmem:[#allocation52_spill] sm:$0xff] %v12402_v13  ;;  %5591 = vadd.xlane.f32.xlu0 %v5590_v43  ;;  %v5782_v24 = vadd.f32 %v5705_v12, %v5704_v32  ;;  %v5593_v41 = vadd.f32 %v12402_v13, %v12399_v63 }
 0x851   : > { %v5401_v48 = vpop.f32.mrb[160].mxu0 }
 0x852   : > { %v5402_v56 = vadd.f32 %v5401_v48, %v12185_v42  ;;  %v5403_v23 = vpop.f32.mrb[161].mxu0  ;;  %5783 = vadd.xlane.f32.xlu1 %v5782_v24  ;;  %v14049_v48 = vld [vmem:[#allocation36_spill] sm:$0xff] }
 0x853   : > { %v5404_v51 = vadd.f32 %v5403_v23, %v12188_v0  ;;  %v5405_v6 = vpop.f32.mrb[162].mxu0 }
 0x854   : > { %v12413_v7 = vadd.f32 %v5402_v56, %v11908_v27  ;;  %v5406_v11 = vadd.f32 %v5405_v6, %v12185_v42  ;;  %v5407_v30 = vpop.f32.mrb[163].mxu0  ;;  %5594 = vadd.xlane.f32.xlu0 %v5593_v41 }
 0x855   : > { %v12417_v34 = vadd.f32 %v5404_v51, %v11889_v59  ;;  %v5408_v32 = vadd.f32 %v5407_v30, %v12188_v0 }
 0x856   : > { %v12421_v43 = vadd.f32 %v5406_v11, %v14048_v38  ;;  %v5708_v12 = vmul.f32 %v12413_v7, %v12413_v7 }
 0x857   : > { %14047 = vst [vmem:[#allocation53_spill] sm:$0xff] %v12417_v34  ;;  %v12426_v24 = vadd.f32 %v5408_v32, %v14049_v48  ;;  %v5596_v27 = vadd.f32 %v12417_v34, %v12413_v7  ;;  %v5709_v56 = vmul.f32 %v12417_v34, %v12417_v34 }
 0x858   : > { %v5710_v51 = vmul.f32 %v12421_v43, %v12421_v43 }
 0x859   : > { %14050 = vst [vmem:[#allocation20_spill] sm:$0xff] %v12426_v24  ;;  %5597 = vadd.xlane.f32.xlu0 %v5596_v27  ;;  %v5411_v59 = vpop.f32.mrb[164].mxu0  ;;  %v5788_v23 = vadd.f32 %v5709_v56, %v5708_v12  ;;  %v5711_v6 = vmul.f32 %v12426_v24, %v12426_v24  ;;  %v5599_v38 = vadd.f32 %v12426_v24, %v12421_v43 }
 0x85a   : > { %v5412_v41 = vadd.f32 %v5411_v59, %v12185_v42  ;;  %v5413_v11 = vpop.f32.mrb[165].mxu0 }
 0x85b   : > { %v5414_v30 = vadd.f32 %v5413_v11, %v12188_v0  ;;  %5789 = vadd.xlane.f32.xlu1 %v5788_v23  ;;  %v5415_v32 = vpop.f32.mrb[166].mxu0  ;;  %v5791_v59 = vadd.f32 %v5711_v6, %v5710_v51 }
 0x85c   : > { %v12441_v48 = vadd.f32 %v5412_v41, %v11944_v19  ;;  %v5416_v12 = vadd.f32 %v5415_v32, %v12185_v42  ;;  %v5417_v27 = vpop.f32.mrb[167].mxu0 }
 0x85d   : > { %v12445_v56 = vadd.f32 %v5414_v30, %v11925_v35  ;;  %v5418_v34 = vadd.f32 %v5417_v27, %v12188_v0  ;;  %5600 = vadd.xlane.f32.xlu0 %v5599_v38 }
 0x85e   : > { %14051 = vst [vmem:[#allocation28_spill] sm:$0xff] %v12441_v48  ;;  %v12449_v11 = vadd.f32 %v5416_v12, %v11941_v17  ;;  %v5712_v23 = vmul.f32 %v12441_v48, %v12441_v48  ;;  %v14055_v12 = vld [vmem:[#allocation42_spill] sm:$0xff] }
 0x85f   : > { %14052 = vst [vmem:[#allocation27_spill] sm:$0xff] %v12445_v56  ;;  %v12454_v24 = vadd.f32 %v5418_v34, %v11928_v45  ;;  %5792 = vadd.xlane.f32.xlu1 %v5791_v59  ;;  %v5602_v19 = vadd.f32 %v12445_v56, %v12441_v48  ;;  %v5713_v35 = vmul.f32 %v12445_v56, %v12445_v56  ;;  %v14059_v48 = vld [vmem:[#allocation41_spill] sm:$0xff] }
 0x860   : > { %14053 = vst [vmem:[#allocation29_spill] sm:$0xff] %v12449_v11  ;;  %v5714_v17 = vmul.f32 %v12449_v11, %v12449_v11 }
 0x861   : > { %14054 = vst [vmem:[#allocation31_spill] sm:$0xff] %v12454_v24  ;;  %5603 = vadd.xlane.f32.xlu0 %v5602_v19  ;;  %v5794_v30 = vadd.f32 %v5713_v35, %v5712_v23  ;;  %v5715_v51 = vmul.f32 %v12454_v24, %v12454_v24  ;;  %v5605_v38 = vadd.f32 %v12454_v24, %v12449_v11  ;;  %v14057_v19 = vld [vmem:[#allocation39_spill] sm:$0xff]  ;;  %v14061_v24 = vld [vmem:[#allocation40_spill] sm:$0xff] }
 0x862   : > { %v5421_v41 = vpop.f32.mrb[168].mxu0 }
 0x863   : > { %v5422_v6 = vadd.f32 %v5421_v41, %v12185_v42  ;;  %v5423_v45 = vpop.f32.mrb[169].mxu0  ;;  %5795 = vadd.xlane.f32.xlu1 %v5794_v30  ;;  %v5797_v41 = vadd.f32 %v5715_v51, %v5714_v17 }
 0x864   : > { %v5424_v34 = vadd.f32 %v5423_v45, %v12188_v0  ;;  %v5425_v32 = vpop.f32.mrb[170].mxu0 }
 0x865   : > { %v12469_v27 = vadd.f32 %v5422_v6, %v14055_v12  ;;  %v5426_v59 = vadd.f32 %v5425_v32, %v12185_v42  ;;  %v5427_v23 = vpop.f32.mrb[171].mxu0  ;;  %5606 = vadd.xlane.f32.xlu0 %v5605_v38 }
 0x866   : > { %v12473_v35 = vadd.f32 %v5424_v34, %v14057_v19  ;;  %v5428_v56 = vadd.f32 %v5427_v23, %v12188_v0  ;;  %v14063_v23 = vld [vmem:[#allocation48_spill] sm:$0xff] }
 0x867   : > { %14056 = vst [vmem:[#allocation30_spill] sm:$0xff] %v12469_v27  ;;  %v12477_v45 = vadd.f32 %v5426_v59, %v14059_v48  ;;  %v5716_v30 = vmul.f32 %v12469_v27, %v12469_v27  ;;  %5798 = vadd.xlane.f32.xlu1 %v5797_v41 }
 0x868   : > { %14058 = vst [vmem:[#allocation33_spill] sm:$0xff] %v12473_v35  ;;  %v12482_v11 = vadd.f32 %v5428_v56, %v14061_v24  ;;  %v5608_v6 = vadd.f32 %v12473_v35, %v12469_v27  ;;  %v5717_v34 = vmul.f32 %v12473_v35, %v12473_v35  ;;  %v14065_v27 = vld [vmem:[#allocation44_spill] sm:$0xff] }
 0x869   : > { %14060 = vst [vmem:[#allocation32_spill] sm:$0xff] %v12477_v45  ;;  %v5718_v48 = vmul.f32 %v12477_v45, %v12477_v45 }
 0x86a   : > { %14062 = vst [vmem:[#allocation34_spill] sm:$0xff] %v12482_v11  ;;  %5609 = vadd.xlane.f32.xlu0 %v5608_v6  ;;  %v5431_v32 = vpop.f32.mrb[172].mxu0  ;;  %v5800_v38 = vadd.f32 %v5717_v34, %v5716_v30  ;;  %v5719_v17 = vmul.f32 %v12482_v11, %v12482_v11  ;;  %v5611_v59 = vadd.f32 %v12482_v11, %v12477_v45  ;;  %v14064_v6 = vld [vmem:[#allocation43_spill] sm:$0xff]  ;;  %v14067_v11 = vld [vmem:[#allocation45_spill] sm:$0xff] }
 0x86b   : > { %v5432_v51 = vadd.f32 %v5431_v32, %v12185_v42  ;;  %v5433_v24 = vpop.f32.mrb[173].mxu0 }
 0x86c   : > { %v5434_v56 = vadd.f32 %v5433_v24, %v12188_v0  ;;  %5801 = vadd.xlane.f32.xlu1 %v5800_v38  ;;  %v5435_v12 = vpop.f32.mrb[174].mxu0  ;;  %v5803_v32 = vadd.f32 %v5719_v17, %v5718_v48 }
 0x86d   : > { %v12497_v19 = vadd.f32 %v5432_v51, %v14063_v23  ;;  %v5436_v41 = vadd.f32 %v5435_v12, %v12185_v42  ;;  %v5437_v30 = vpop.f32.mrb[175].mxu0 }
 0x86e   : > { %v12501_v34 = vadd.f32 %v5434_v56, %v14064_v6  ;;  %v5438_v35 = vadd.f32 %v5437_v30, %v12188_v0  ;;  %5612 = vadd.xlane.f32.xlu0 %v5611_v59 }
 0x86f   : > { %v12505_v24 = vadd.f32 %v5436_v41, %v14065_v27  ;;  %v5720_v38 = vmul.f32 %v12497_v19, %v12497_v19 }
 0x870   : > { %v12510_v45 = vadd.f32 %v5438_v35, %v14067_v11  ;;  %5804 = vadd.xlane.f32.xlu1 %v5803_v32  ;;  %v5614_v51 = vadd.f32 %v12501_v34, %v12497_v19  ;;  %v5721_v56 = vmul.f32 %v12501_v34, %v12501_v34 }
 0x871   : > { %14066 = vst [vmem:[#allocation35_spill] sm:$0xff] %v12505_v24  ;;  %v5722_v27 = vmul.f32 %v12505_v24, %v12505_v24 }
 0x872   : > { %14068 = vst [vmem:[#allocation37_spill] sm:$0xff] %v12510_v45  ;;  %5615 = vadd.xlane.f32.xlu0 %v5614_v51  ;;  %v5441_v12 = vpop.f32.mrb[176].mxu0  ;;  %v5806_v59 = vadd.f32 %v5721_v56, %v5720_v38  ;;  %v5723_v48 = vmul.f32 %v12510_v45, %v12510_v45  ;;  %v5617_v41 = vadd.f32 %v12510_v45, %v12505_v24 }
 0x873   : > { %v5442_v17 = vadd.f32 %v5441_v12, %v12185_v42  ;;  %v5443_v11 = vpop.f32.mrb[177].mxu0 }
 0x874   : > { %v5444_v35 = vadd.f32 %v5443_v11, %v12188_v0  ;;  %5807 = vadd.xlane.f32.xlu1 %v5806_v59  ;;  %v5445_v23 = vpop.f32.mrb[178].mxu0  ;;  %v5809_v56 = vadd.f32 %v5723_v48, %v5722_v27 }
 0x875   : > { %v12525_v30 = vadd.f32 %v5442_v17, %v12045_v1  ;;  %v5446_v6 = vadd.f32 %v5445_v23, %v12185_v42  ;;  %v5447_v32 = vpop.f32.mrb[179].mxu0 }
 0x876   : > { %v12529_v38 = vadd.f32 %v5444_v35, %v12034_v18  ;;  %v5448_v51 = vadd.f32 %v5447_v32, %v12188_v0  ;;  %5618 = vadd.xlane.f32.xlu0 %v5617_v41 }
 0x877   : > { %14069 = vst [vmem:[#allocation38_spill] sm:$0xff] %v12525_v30  ;;  %v12533_v12 = vadd.f32 %v5446_v6, %v12048_v47  ;;  %v5724_v59 = vmul.f32 %v12525_v30, %v12525_v30 }
 0x878   : > { %14070 = vst [vmem:[#allocation51_spill] sm:$0xff] %v12529_v38  ;;  %v12538_v11 = vadd.f32 %v5448_v51, %v12037_v52  ;;  %5810 = vadd.xlane.f32.xlu1 %v5809_v56  ;;  %v5620_v1 = vadd.f32 %v12529_v38, %v12525_v30  ;;  %v5725_v18 = vmul.f32 %v12529_v38, %v12529_v38 }
 0x879   : > { %14071 = vst [vmem:[#allocation36_spill] sm:$0xff] %v12533_v12  ;;  %v5726_v47 = vmul.f32 %v12533_v12, %v12533_v12 }
 0x87a   : > { %14072 = vst [vmem:[#allocation42_spill] sm:$0xff] %v12538_v11  ;;  %5621 = vadd.xlane.f32.xlu0 %v5620_v1  ;;  %v5451_v17 = vpop.f32.mrb[180].mxu0  ;;  %v5812_v35 = vadd.f32 %v5725_v18, %v5724_v59  ;;  %v5727_v27 = vmul.f32 %v12538_v11, %v12538_v11  ;;  %v5623_v6 = vadd.f32 %v12538_v11, %v12533_v12 }
 0x87b   : > { %v5452_v48 = vadd.f32 %v5451_v17, %v12185_v42  ;;  %v5453_v52 = vpop.f32.mrb[181].mxu0 }
 0x87c   : > { %v5454_v23 = vadd.f32 %v5453_v52, %v12188_v0  ;;  %5813 = vadd.xlane.f32.xlu1 %v5812_v35  ;;  %v5455_v41 = vpop.f32.mrb[182].mxu0  ;;  %v5815_v18 = vadd.f32 %v5727_v27, %v5726_v47 }
 0x87d   : > { %v12553_v32 = vadd.f32 %v5452_v48, %v12076_v20  ;;  %v5456_v51 = vadd.f32 %v5455_v41, %v12185_v42  ;;  %v5457_v56 = vpop.f32.mrb[183].mxu0 }
 0x87e   : > { %v12557_v59 = vadd.f32 %v5454_v23, %v12061_v4  ;;  %v5458_v1 = vadd.f32 %v5457_v56, %v12188_v0  ;;  %5624 = vadd.xlane.f32.xlu0 %v5623_v6 }
 0x87f   : > { %14073 = vst [vmem:[#allocation39_spill] sm:$0xff] %v12553_v32  ;;  %v12561_v17 = vadd.f32 %v5456_v51, %v12067_v3  ;;  %v5728_v35 = vmul.f32 %v12553_v32, %v12553_v32 }
 0x880   : > { %14074 = vst [vmem:[#allocation41_spill] sm:$0xff] %v12557_v59  ;;  %v12566_v52 = vadd.f32 %v5458_v1, %v12064_v49  ;;  %5816 = vadd.xlane.f32.xlu1 %v5815_v18  ;;  %v5626_v20 = vadd.f32 %v12557_v59, %v12553_v32  ;;  %v5729_v4 = vmul.f32 %v12557_v59, %v12557_v59 }
 0x881   : > { %14075 = vst [vmem:[#allocation40_spill] sm:$0xff] %v12561_v17  ;;  %v5730_v3 = vmul.f32 %v12561_v17, %v12561_v17 }
 0x882   : > { %14076 = vst [vmem:[#allocation48_spill] sm:$0xff] %v12566_v52  ;;  %5627 = vadd.xlane.f32.xlu0 %v5626_v20  ;;  %v5461_v48 = vpop.f32.mrb[184].mxu0  ;;  %v5818_v23 = vadd.f32 %v5729_v4, %v5728_v35  ;;  %v5731_v47 = vmul.f32 %v12566_v52, %v12566_v52  ;;  %v5629_v51 = vadd.f32 %v12566_v52, %v12561_v17 }
 0x883   : > { %v5462_v27 = vadd.f32 %v5461_v48, %v12185_v42  ;;  %v5463_v49 = vpop.f32.mrb[185].mxu0 }
 0x884   : > { %v5464_v41 = vadd.f32 %v5463_v49, %v12188_v0  ;;  %5819 = vadd.xlane.f32.xlu1 %v5818_v23  ;;  %v5465_v6 = vpop.f32.mrb[186].mxu0  ;;  %v5821_v4 = vadd.f32 %v5731_v47, %v5730_v3 }
 0x885   : > { %v12581_v56 = vadd.f32 %v5462_v27, %v12104_v61  ;;  %v5466_v1 = vadd.f32 %v5465_v6, %v12185_v42  ;;  %v5467_v18 = vpop.f32.mrb[187].mxu0 }
 0x886   : > { %v12585_v35 = vadd.f32 %v5464_v41, %v12089_v39  ;;  %v5468_v20 = vadd.f32 %v5467_v18, %v12188_v0  ;;  %5630 = vadd.xlane.f32.xlu0 %v5629_v51 }
 0x887   : > { %14077 = vst [vmem:[#allocation43_spill] sm:$0xff] %v12581_v56  ;;  %v12589_v48 = vadd.f32 %v5466_v1, %v12095_v37  ;;  %v5732_v23 = vmul.f32 %v12581_v56, %v12581_v56 }
 0x888   : > { %14078 = vst [vmem:[#allocation44_spill] sm:$0xff] %v12585_v35  ;;  %v12594_v49 = vadd.f32 %v5468_v20, %v12092_v62  ;;  %5822 = vadd.xlane.f32.xlu1 %v5821_v4  ;;  %v5632_v61 = vadd.f32 %v12585_v35, %v12581_v56  ;;  %v5733_v39 = vmul.f32 %v12585_v35, %v12585_v35 }
 0x889   : > { %14079 = vst [vmem:[#allocation45_spill] sm:$0xff] %v12589_v48  ;;  %v5734_v37 = vmul.f32 %v12589_v48, %v12589_v48 }
 0x88a   : > { %14080 = vst [vmem:[#allocation54_spill] sm:$0xff] %v12594_v49  ;;  %5633 = vadd.xlane.f32.xlu0 %v5632_v61  ;;  %v5471_v27 = vpop.f32.mrb[188].mxu0  ;;  %v5824_v41 = vadd.f32 %v5733_v39, %v5732_v23  ;;  %v5735_v3 = vmul.f32 %v12594_v49, %v12594_v49  ;;  %v5635_v1 = vadd.f32 %v12594_v49, %v12589_v48 }
 0x88b   : > { %v5472_v47 = vadd.f32 %v5471_v27, %v12185_v42  ;;  %v5473_v62 = vpop.f32.mrb[189].mxu0 }
 0x88c   : > { %v5474_v6 = vadd.f32 %v5473_v62, %v12188_v0  ;;  %5825 = vadd.xlane.f32.xlu1 %v5824_v41  ;;  %v5475_v51 = vpop.f32.mrb[190].mxu0  ;;  %v5827_v39 = vadd.f32 %v5735_v3, %v5734_v37  ;;  %v5707_v37 = vmul.f32 %v12402_v13, %v12402_v13 }
 0x88d   : > { %v12609_v18 = vadd.f32 %v5472_v47, %v12124_v15  ;;  %v5476_v20 = vadd.f32 %v5475_v51, %v12185_v42  ;;  %v5477_v4 = vpop.f32.mrb[191].mxu0 }
 0x88e   : > { %v12613_v23 = vadd.f32 %v5474_v6, %v12113_v16  ;;  %v5478_v61 = vadd.f32 %v5477_v4, %v12188_v0  ;;  %5636 = vadd.xlane.f32.xlu0 %v5635_v1  ;;  %v5706_v0 = vmul.f32 %v12399_v63, %v12399_v63 }
 0x88f   : > { %14081 = vst [vmem:[#allocation55_spill] sm:$0xff] %v12609_v18  ;;  %v5736_v27 = vmul.f32 %v12609_v18, %v12609_v18  ;;  %v12619_v41 = vadd.f32 %v5476_v20, %v12119_v33 }
 0x890   : > { %14082 = vst [vmem:[#allocation56_spill] sm:$0xff] %v12613_v23  ;;  %v12622_v62 = vadd.f32 %v5478_v61, %v12116_v31  ;;  %5828 = vadd.xlane.f32.xlu1 %v5827_v39  ;;  %v5638_v15 = vadd.f32 %v12613_v23, %v12609_v18  ;;  %v5737_v16 = vmul.f32 %v12613_v23, %v12613_v23 }
 0x891   : > { %14083 = vst [vmem:[#allocation57_spill] sm:$0xff] %v12619_v41  ;;  %v5738_v33 = vmul.f32 %v12619_v41, %v12619_v41  ;;  %v5785_v47 = vadd.f32 %v5707_v37, %v5706_v0 }
 0x892   : > { %14084 = vst [vmem:[#allocation58_spill] sm:$0xff] %v12622_v62  ;;  %5639 = vadd.xlane.f32.xlu0 %v5638_v15  ;;  %v5830_v42 = vadd.f32 %v5737_v16, %v5736_v27  ;;  %v5641_v31 = vadd.f32 %v12622_v62, %v12619_v41  ;;  %v5739_v3 = vmul.f32 %v12622_v62, %v12622_v62 }
 0x894   : > { %5831 = vadd.xlane.f32.xlu1 %v5830_v42  ;;  %v5833_v6 = vadd.f32 %v5739_v3, %v5738_v33 }
 0x896   : > { %5642 = vadd.xlane.f32.xlu0 %v5641_v31 }
 0x898   : > { %5786 = vadd.xlane.f32.xlu1 %v5785_v47 }
 0x89a   : > { %5834 = vadd.xlane.f32.xlu0 %v5833_v6 }
 0x89f   : > { %v5550_v51 = vpop.xlane.xlu1 %5549 }
 0x8a0   : > { %v12638_v61 = vmul.f32 0.00390625, %v5550_v51 }
 0x8a1   : > { %v5553_v20 = vpop.xlane.xlu0 %5552 }
 0x8a2   : > { %v5868_v16 = vmul.f32 %v12638_v61, %v12638_v61  ;;  %v12642_v41 = vmul.f32 0.00390625, %v5553_v20 }
 0x8a3   : > { %v5742_v1 = vpop.xlane.xlu1 %5741 }
 0x8a4   : > { %v5836_v27 = vmul.f32 0.00390625, %v5742_v1  ;;  %v5869_v3 = vmul.f32 %v12642_v41, %v12642_v41 }
 0x8a6   : > { %v5900_v31 = vsub.f32 %v5836_v27, %v5868_v16 }
 0x8a7   : > { %v5745_v4 = vpop.xlane.xlu1 %5744 }
 0x8a8   : > { %v5837_v37 = vmul.f32 0.00390625, %v5745_v4  ;;  %v5932_v33 = vmax.f32 %v5900_v31, 0.0 }
 0x8a9   : > { %v5556_v39 = vpop.xlane.xlu0 %5555 }
 0x8aa   : > { %v5901_v6 = vsub.f32 %v5837_v37, %v5869_v3  ;;  %v12646_v62 = vmul.f32 0.00390625, %v5556_v39  ;;  %v6028_v1 = vadd.f32 1e-05, %v5932_v33 }
 0x8ab   : > { %v5748_v15 = vpop.xlane.xlu1 %5747 }
 0x8ac   : > { %v5838_v63 = vmul.f32 0.00390625, %v5748_v15  ;;  %v5933_v23 = vmax.f32 %v5901_v6, 0.0  ;;  %v5870_v27 = vmul.f32 %v12646_v62, %v12646_v62  ;;  %8188 = vrsqrt.f32 %v6028_v1  ;;  %v7203_v6 = vld [vmem:[%s13858_s19 + $0x2] sm:$0x3] }
 0x8ad   : > { %v5559_v42 = vpop.xlane.xlu0 %5558 }
 0x8ae   : > { %v12648_v18 = vmul.f32 0.00390625, %v5559_v42  ;;  %v5902_v31 = vsub.f32 %v5838_v63, %v5870_v27  ;;  %v6029_v39 = vadd.f32 1e-05, %v5933_v23  ;;  %v7204_v63 = vld [vmem:[%s13861_s25 + $0x2] sm:$0x3]  ;;  %v12665_v27 = vrot.slane %v7203_v6, %v13966_v36 }
 0x8af   : > { %v5751_v0 = vpop.xlane.xlu1 %5750  ;;  %v12675_v35 = vrot.slane %v7204_v63, %v13966_v36 }
 0x8b0   : > { %v5839_v4 = vmul.f32 0.00390625, %v5751_v0  ;;  %v5871_v37 = vmul.f32 %v12648_v18, %v12648_v18  ;;  %v5934_v48 = vmax.f32 %v5902_v31, 0.0  ;;  %8190 = vrsqrt.f32 %v6029_v39 }
 0x8b1   : > { %v5965_v31 = vsub.f32 %v12197_v54, %v12638_v61  ;;  %v12678_v39 = vrot.slane %v7204_v63, %v14023_v5 }
 0x8b2   : > { %v5903_v49 = vsub.f32 %v5839_v4, %v5871_v37  ;;  %v5964_v4 = vsub.f32 %v12193_v44, %v12638_v61 }
 0x8b3   : > { %v5562_v47 = vpop.xlane.xlu0 %5561 }
 0x8b4   : > { %v12654_v3 = vmul.f32 0.00390625, %v5562_v47  ;;  %v5935_v1 = vmax.f32 %v5903_v49, 0.0  ;;  %v5966_v49 = vsub.f32 %v12201_v2, %v12642_v41 }
 0x8b5   : > { %v5754_v51 = vpop.xlane.xlu1 %5753 }
 0x8b6   : > { %v5840_v15 = vmul.f32 0.00390625, %v5754_v51  ;;  %v5872_v0 = vmul.f32 %v12654_v3, %v12654_v3  ;;  %v12668_v51 = vrot.slane %v7203_v6, %v14023_v5  ;;  %v6030_v6 = vadd.f32 1e-05, %v5934_v48  ;;  %v8189_v44 = vpop.eup %8188 }
 0x8b7   : > { %v5565_v13 = vpop.xlane.xlu0 %5564  ;;  %v6031_v2 = vadd.f32 1e-05, %v5935_v1  ;;  %v6093_v17 = vmul.f32 %v8189_v44, %v5965_v31  ;;  %v6092_v59 = vmul.f32 %v8189_v44, %v5964_v4  ;;  %v14085_v4 = vld [vmem:[#allocation46_spill] sm:$0xff] }
 0x8b8   : > { %v5904_v23 = vsub.f32 %v5840_v15, %v5872_v0  ;;  %v5967_v15 = vsub.f32 %v12204_v10, %v12642_v41  ;;  %v12692_v63 = vmul.f32 0.00390625, %v5565_v13  ;;  %8192 = vrsqrt.f32 %v6030_v6 }
 0x8b9   : > { %v5757_v20 = vpop.xlane.xlu1 %5756  ;;  %8194 = vrsqrt.f32 %v6031_v2 }
 0x8ba   : > { %v5936_v56 = vmax.f32 %v5904_v23, 0.0  ;;  %v5841_v41 = vmul.f32 0.00390625, %v5757_v20  ;;  %v8191_v32 = vpop.eup %8190 }
 0x8bb   : > { %v5568_v16 = vpop.xlane.xlu0 %5567  ;;  %v6095_v38 = vmul.f32 %v8191_v32, %v5967_v15 }
 0x8bc   : > { %v12694_v52 = vmul.f32 0.00390625, %v5568_v16  ;;  %v5873_v16 = vmul.f32 %v12692_v63, %v12692_v63  ;;  %v6032_v20 = vadd.f32 1e-05, %v5936_v56 }
 0x8bd   : > { %v5760_v33 = vpop.xlane.xlu1 %5759 }
 0x8be   : > { %v5842_v61 = vmul.f32 0.00390625, %v5760_v33  ;;  %v5905_v11 = vsub.f32 %v5841_v41, %v5873_v16  ;;  %8196 = vrsqrt.f32 %v6032_v20  ;;  %v14087_v20 = vld [vmem:[#allocation50_spill] sm:$0xff] }
 0x8bf   : > { %v5571_v42 = vpop.xlane.xlu0 %5570 }
 0x8c0   : > { %v5937_v30 = vmax.f32 %v5905_v11, 0.0 }
 0x8c1   : > { %v5763_v47 = vpop.xlane.xlu1 %5762 }
 0x8c2   : > { %v5843_v1 = vmul.f32 0.00390625, %v5763_v47  ;;  %v8193_v11 = vpop.eup %8192 }
 0x8c5   : > { %v5574_v37 = vpop.xlane.xlu0 %5573 }
 0x8c6   : > { %v12684_v0 = vmul.f32 0.00390625, %v5574_v37  ;;  %v12698_v37 = vmul.f32 0.00390625, %v5571_v42  ;;  %v5874_v42 = vmul.f32 %v12694_v52, %v12694_v52 }
 0x8c7   : > { %v5766_v5 = vpop.xlane.xlu1 %5765 }
 0x8c8   : > { %v5844_v10 = vmul.f32 0.00390625, %v5766_v5  ;;  %v5876_v54 = vmul.f32 %v12684_v0, %v12684_v0  ;;  %v5875_v33 = vmul.f32 %v12698_v37, %v12698_v37  ;;  %v5906_v44 = vsub.f32 %v5842_v61, %v5874_v42 }
 0x8c9   : > { %v5577_v36 = vpop.xlane.xlu0 %5576  ;;  %v6167_v61 = vmul.f32 %v12668_v51, %v6092_v59 }
 0x8ca   : > { %v12702_v13 = vmul.f32 0.00390625, %v5577_v36  ;;  %v5908_v5 = vsub.f32 %v5844_v10, %v5876_v54  ;;  %v5907_v2 = vsub.f32 %v5843_v1, %v5875_v33  ;;  %v5938_v42 = vmax.f32 %v5906_v44, 0.0  ;;  %v14086_v33 = vld [vmem:[#allocation47_spill] sm:$0xff]  ;;  %v8195_v44 = vpop.eup %8194 }
 0x8cb   : > { %v5769_v23 = vpop.xlane.xlu1 %5768 }
 0x8cc   : > { %v5845_v48 = vmul.f32 0.00390625, %v5769_v23  ;;  %v5940_v6 = vmax.f32 %v5908_v5, 0.0  ;;  %v5877_v31 = vmul.f32 %v12702_v13, %v12702_v13  ;;  %v6168_v23 = vmul.f32 %v12665_v27, %v6093_v17 }
 0x8cd   : > { %v5580_v36 = vpop.xlane.xlu0 %5579 }
 0x8ce   : > { %v12716_v54 = vmul.f32 0.00390625, %v5580_v36  ;;  %v6036_v10 = vadd.f32 1e-05, %v5940_v6  ;;  %v5909_v41 = vsub.f32 %v5845_v48, %v5877_v31  ;;  %v6094_v48 = vmul.f32 %v8191_v32, %v5966_v49 }
 0x8cf   : > { %v5772_v16 = vpop.xlane.xlu1 %5771  ;;  %v5939_v31 = vmax.f32 %v5907_v2, 0.0  ;;  %v12729_v56 = vadd.f32 %v12675_v35, %v6168_v23  ;;  %v12735_v49 = vadd.f32 %v12678_v39, %v6167_v61 }
 0x8d0   : > { %v5846_v5 = vmul.f32 0.00390625, %v5772_v16  ;;  %v5878_v12 = vmul.f32 %v12716_v54, %v12716_v54  ;;  %8198 = vrsqrt.f32 %v6036_v10  ;;  %v5941_v47 = vmax.f32 %v5909_v41, 0.0 }
 0x8d1   : > { %v5583_v45 = vpop.xlane.xlu0 %5582  ;;  %v5984_v24 = vsub.f32 %v12333_v22, %v12716_v54 }
 0x8d2   : > { %v5910_v36 = vsub.f32 %v5846_v5, %v5878_v12  ;;  %v12722_v1 = vmul.f32 0.00390625, %v5583_v45  ;;  %v6037_v16 = vadd.f32 1e-05, %v5941_v47  ;;  %v6170_v12 = vmul.f32 %v12665_v27, %v6095_v38 }
 0x8d3   : > { %v5775_v15 = vpop.xlane.xlu1 %5774  ;;  %v6033_v45 = vadd.f32 1e-05, %v5937_v30  ;;  %v6034_v47 = vadd.f32 1e-05, %v5938_v42  ;;  %v6035_v38 = vadd.f32 1e-05, %v5939_v31  ;;  %v14088_v42 = vsub.f32 %v12225_v26, %v12646_v62 }
 0x8d4   : > { %v5942_v10 = vmax.f32 %v5910_v36, 0.0  ;;  %v5847_v41 = vmul.f32 0.00390625, %v5775_v15  ;;  %8200 = vrsqrt.f32 %v6037_v16  ;;  %v5879_v32 = vmul.f32 %v12722_v1, %v12722_v1 }
 0x8d5   : > { %v5586_v59 = vpop.xlane.xlu0 %5585  ;;  %v6169_v36 = vmul.f32 %v12668_v51, %v6094_v48  ;;  %v12745_v61 = vadd.f32 %v12675_v35, %v6170_v12  ;;  %v14089_v31 = vsub.f32 %v12221_v25, %v12646_v62  ;;  %v14090_v26 = vsub.f32 %v12234_v46, %v12648_v18 }
 0x8d6   : > { %v6038_v2 = vadd.f32 1e-05, %v5942_v10  ;;  %v12737_v5 = vmul.f32 0.00390625, %v5586_v59  ;;  %v5911_v16 = vsub.f32 %v5847_v41, %v5879_v32  ;;  %v6097_v10 = vmul.f32 %v8193_v11, %v14088_v42  ;;  %v8197_v32 = vpop.eup %8196 }
 0x8d7   : > { %v5778_v15 = vpop.xlane.xlu1 %5777  ;;  %v6096_v41 = vmul.f32 %v8193_v11, %v14089_v31  ;;  %v12758_v12 = vadd.f32 %v12678_v39, %v6169_v36  ;;  %v14091_v25 = vsub.f32 %v12229_v21, %v12648_v18  ;;  %v5980_v11 = vsub.f32 %v12305_v8, %v12684_v0 }
 0x8d8   : > { %8202 = vrsqrt.f32 %v6038_v2  ;;  %v5848_v17 = vmul.f32 0.00390625, %v5778_v15  ;;  %v5943_v48 = vmax.f32 %v5911_v16, 0.0  ;;  %v5880_v59 = vmul.f32 %v12737_v5, %v12737_v5 }
 0x8d9   : > { %8204 = vrsqrt.f32 %v6033_v45  ;;  %v5589_v23 = vpop.xlane.xlu0 %5588  ;;  %v6099_v45 = vmul.f32 %v8195_v44, %v14090_v26  ;;  %v6098_v62 = vmul.f32 %v8195_v44, %v14091_v25  ;;  %v14094_v25 = vld [vmem:[#allocation22_spill] sm:$0xff] }
 0x8da   : > { %8206 = vrsqrt.f32 %v6034_v47  ;;  %v12755_v2 = vmul.f32 0.00390625, %v5589_v23  ;;  %v8199_v16 = vpop.eup %8198  ;;  %v6039_v15 = vadd.f32 1e-05, %v5943_v48  ;;  %v5912_v42 = vsub.f32 %v5848_v17, %v5880_v59  ;;  %v14092_v47 = vld [vmem:[#allocation23_spill] sm:$0xff] }
 0x8db   : > { %8208 = vrsqrt.f32 %v6035_v38  ;;  %v5781_v30 = vpop.xlane.xlu1 %5780  ;;  %v5981_v36 = vsub.f32 %v14092_v47, %v12684_v0  ;;  %v6172_v17 = vmul.f32 %v12665_v27, %v6097_v10  ;;  %v14093_v48 = vsub.f32 %v14085_v4, %v12654_v3  ;;  %v14095_v47 = vld [vmem:[#allocation24_spill] sm:$0xff] }
 0x8dc   : > { %v5849_v23 = vmul.f32 0.00390625, %v5781_v30  ;;  %v5881_v46 = vmul.f32 %v12755_v2, %v12755_v2  ;;  %8210 = vrsqrt.f32 %v6039_v15  ;;  %v5944_v31 = vmax.f32 %v5912_v42, 0.0 }
 0x8dd   : > { %v5592_v38 = vpop.xlane.xlu0 %5591  ;;  %v6101_v21 = vmul.f32 %v8197_v32, %v14093_v48  ;;  %v12778_v8 = vmul.f32 %v8199_v16, %v5981_v36  ;;  %v12780_v59 = vmul.f32 %v8199_v16, %v5980_v11  ;;  %v6171_v15 = vmul.f32 %v12668_v51, %v6096_v41 }
 0x8de   : > { %v5913_v18 = vsub.f32 %v5849_v23, %v5881_v46  ;;  %v12776_v44 = vmul.f32 0.00390625, %v5592_v38  ;;  %v8201_v0 = vpop.eup %8200  ;;  %v6040_v30 = vadd.f32 1e-05, %v5944_v31  ;;  %v6174_v42 = vmul.f32 %v12665_v27, %v6099_v45  ;;  %v14096_v31 = vld [vmem:[#allocation49_spill] sm:$0xff] }
 0x8df   : > { %v5784_v26 = vpop.xlane.xlu1 %5783  ;;  %v6173_v10 = vmul.f32 %v12668_v51, %v6098_v62  ;;  %v5982_v4 = vsub.f32 %v14094_v25, %v12702_v13  ;;  %v5983_v23 = vsub.f32 %v14095_v47, %v12702_v13  ;;  %v5985_v16 = vsub.f32 %v12337_v53, %v12716_v54  ;;  %v14097_v53 = vld [vmem:[#allocation21_spill] sm:$0xff] }
 0x8e0   : > { %v5945_v46 = vmax.f32 %v5913_v18, 0.0  ;;  %v5850_v36 = vmul.f32 0.00390625, %v5784_v26  ;;  %8212 = vrsqrt.f32 %v6040_v30  ;;  %v5882_v11 = vmul.f32 %v12776_v44, %v12776_v44 }
 0x8e1   : > { %v12793_v41 = vpop.xlane.xlu0 %5594  ;;  %v6176_v45 = vmul.f32 %v12665_v27, %v6101_v21  ;;  %v5978_v38 = vsub.f32 %v14096_v31, %v12698_v37  ;;  %v12798_v25 = vmul.f32 %v8201_v0, %v5983_v23  ;;  %v12800_v13 = vmul.f32 %v8201_v0, %v5982_v4 }
 0x8e2   : > { %v8203_v62 = vpop.eup %8202  ;;  %v6041_v48 = vadd.f32 1e-05, %v5945_v46  ;;  %v5979_v30 = vsub.f32 %v14097_v53, %v12698_v37  ;;  %v5914_v26 = vsub.f32 %v5850_v36, %v5882_v11  ;;  %v12805_v47 = vadd.f32 %v12675_v35, %v6172_v17 }
 0x8e3   : > { %v8205_v18 = vpop.eup %8204  ;;  %v12807_v6 = vmul.f32 %v8203_v62, %v5985_v16  ;;  %v12812_v23 = vadd.f32 %v12678_v39, %v6171_v15  ;;  %v12815_v0 = vadd.f32 %v12675_v35, %v6174_v42  ;;  %v12818_v36 = vadd.f32 %v12678_v39, %v6173_v10 }
 0x8e4   : > { %v8207_v21 = vpop.eup %8206  ;;  %8214 = vrsqrt.f32 %v6041_v48  ;;  %v5946_v46 = vmax.f32 %v5914_v26, 0.0  ;;  %v12821_v17 = vadd.f32 %v12675_v35, %v6176_v45  ;;  %v14098_v16 = vsub.f32 %v12249_v50, %v12654_v3 }
 0x8e5   : > { %v8209_v4 = vpop.eup %8208  ;;  %v14099_v15 = vsub.f32 %v14087_v20, %v12692_v63  ;;  %v14100_v11 = vsub.f32 %v14086_v33, %v12692_v63  ;;  %v12834_v48 = vmul.f32 %v8203_v62, %v5984_v24  ;;  %v5986_v45 = vsub.f32 %v12341_v14, %v12722_v1 }
 0x8e6   : > { %v5598_v37 = vpop.xlane.xlu0 %5597  ;;  %v6100_v22 = vmul.f32 %v8197_v32, %v14098_v16  ;;  %v8211_v10 = vpop.eup %8210  ;;  %v5987_v50 = vsub.f32 %v12346_v57, %v12722_v1  ;;  %v6042_v3 = vadd.f32 1e-05, %v5946_v46  ;;  %v14101_v53 = vsub.f32 %v12281_v28, %v12694_v52 }
 0x8e7   : > { %v12826_v54 = vmul.f32 0.00390625, %v5598_v37  ;;  %v6103_v42 = vmul.f32 %v8205_v18, %v14099_v15  ;;  %v6102_v31 = vmul.f32 %v8205_v18, %v14100_v11  ;;  %v14102_v24 = vsub.f32 %v12277_v9, %v12694_v52 }
 0x8e8   : > { %v5790_v32 = vpop.xlane.xlu1 %5789  ;;  %v6105_v20 = vmul.f32 %v8207_v21, %v14101_v53  ;;  %v6107_v62 = vmul.f32 %v8209_v4, %v5979_v30  ;;  %8216 = vrsqrt.f32 %v6042_v3  ;;  %v6175_v18 = vmul.f32 %v12668_v51, %v6100_v22 }
 0x8e9   : > { %v5852_v26 = vmul.f32 0.00390625, %v5790_v32  ;;  %v5884_v63 = vmul.f32 %v12826_v54, %v12826_v54  ;;  %v6104_v33 = vmul.f32 %v8207_v21, %v14102_v24  ;;  %v12849_v57 = vmul.f32 %v8211_v10, %v5987_v50 }
 0x8ea   : > { %v5601_v14 = vpop.xlane.xlu0 %5600  ;;  %v12851_v1 = vmul.f32 %v8211_v10, %v5986_v45  ;;  %v6178_v37 = vmul.f32 %v12665_v27, %v6103_v42  ;;  %v6106_v16 = vmul.f32 %v8209_v4, %v5978_v38  ;;  %v8213_v15 = vpop.eup %8212  ;;  %v5988_v9 = vsub.f32 %v12361_v40, %v12737_v5  ;;  %v14103_v4 = vld [vmem:[#allocation26_spill] sm:$0xff] }
 0x8eb   : > { %v5916_v46 = vsub.f32 %v5852_v26, %v5884_v63  ;;  %v12853_v28 = vmul.f32 0.00390625, %v5601_v14  ;;  %v5989_v52 = vsub.f32 %v12365_v29, %v12737_v5  ;;  %v6177_v21 = vmul.f32 %v12668_v51, %v6102_v31 }
 0x8ec   : > { %v5793_v30 = vpop.xlane.xlu1 %5792  ;;  %v6180_v22 = vmul.f32 %v12665_v27, %v6105_v20  ;;  %v6179_v45 = vmul.f32 %v12668_v51, %v6104_v33  ;;  %v6182_v50 = vmul.f32 %v12665_v27, %v6107_v62  ;;  %v5990_v38 = vsub.f32 %v12369_v60, %v12755_v2 }
 0x8ed   : > { %v5948_v11 = vmax.f32 %v5916_v46, 0.0  ;;  %v5853_v10 = vmul.f32 0.00390625, %v5793_v30  ;;  %v5991_v40 = vsub.f32 %v14103_v4, %v12755_v2  ;;  %v5885_v29 = vmul.f32 %v12853_v28, %v12853_v28 }
 0x8ee   : > { %v5604_v5 = vpop.xlane.xlu0 %5603  ;;  %v12870_v42 = vmul.f32 %v8213_v15, %v5989_v52  ;;  %v8215_v31 = vpop.eup %8214  ;;  %v6181_v53 = vmul.f32 %v12668_v51, %v6106_v16  ;;  %v12875_v20 = vmul.f32 %v8213_v15, %v5988_v9  ;;  %v12878_v60 = vadd.f32 %v12678_v39, %v6175_v18 }
 0x8ef   : > { %v6044_v3 = vadd.f32 1e-05, %v5948_v11  ;;  %v12872_v32 = vmul.f32 0.00390625, %v5604_v5  ;;  %v5917_v26 = vsub.f32 %v5853_v10, %v5885_v29  ;;  %v12880_v2 = vmul.f32 %v8215_v31, %v5991_v40 }
 0x8f0   : > { %14104 = vst [vmem:[#allocation46_spill] sm:$0xff] %v12875_v20  ;;  %v5796_v63 = vpop.xlane.xlu1 %5795  ;;  %v12882_v24 = vmul.f32 %v8215_v31, %v5990_v38  ;;  %v12885_v62 = vadd.f32 %v12675_v35, %v6178_v37  ;;  %v12888_v14 = vadd.f32 %v12678_v39, %v6177_v21  ;;  %v12893_v18 = vadd.f32 %v12675_v35, %v6180_v22 }
 0x8f1   : > { %14105 = vst [vmem:[#allocation47_spill] sm:$0xff] %v12880_v2  ;;  %8218 = vrsqrt.f32 %v6044_v3  ;;  %v5854_v33 = vmul.f32 0.00390625, %v5796_v63  ;;  %v5949_v46 = vmax.f32 %v5917_v26, 0.0  ;;  %v5886_v16 = vmul.f32 %v12872_v32, %v12872_v32 }
 0x8f2   : > { %14106 = vst [vmem:[#allocation50_spill] sm:$0xff] %v12882_v24  ;;  %v5607_v15 = vpop.xlane.xlu0 %5606  ;;  %v12896_v9 = vadd.f32 %v12678_v39, %v6179_v45  ;;  %v5992_v52 = vsub.f32 %v12389_v58, %v12776_v44  ;;  %v12903_v37 = vadd.f32 %v12675_v35, %v6182_v50  ;;  %v12906_v21 = vadd.f32 %v12678_v39, %v6181_v53  ;;  %v8217_v11 = vpop.eup %8216 }
 0x8f3   : > { %v12900_v30 = vmul.f32 0.00390625, %v5607_v15  ;;  %v6045_v10 = vadd.f32 1e-05, %v5949_v46  ;;  %v5918_v38 = vsub.f32 %v5854_v33, %v5886_v16  ;;  %v6184_v22 = vmul.f32 %v12665_v27, %v12778_v8 }
 0x8f4   : > { %v5799_v4 = vpop.xlane.xlu1 %5798  ;;  %v6183_v45 = vmul.f32 %v12668_v51, %v12780_v59  ;;  %v5993_v58 = vsub.f32 %v12393_v55, %v12776_v44  ;;  %v12915_v40 = vmul.f32 0.00390625, %v12793_v41  ;;  %v6186_v3 = vmul.f32 %v12665_v27, %v12798_v25 }
 0x8f5   : > { %v5855_v50 = vmul.f32 0.00390625, %v5799_v4  ;;  %v5887_v29 = vmul.f32 %v12900_v30, %v12900_v30  ;;  %8220 = vrsqrt.f32 %v6045_v10  ;;  %v5950_v5 = vmax.f32 %v5918_v38, 0.0 }
 0x8f6   : > { %14107 = vst [vmem:[#allocation23_spill] sm:$0xff] %v12915_v40  ;;  %v6185_v8 = vmul.f32 %v12668_v51, %v12800_v13  ;;  %v12925_v55 = vmul.f32 %v8217_v11, %v5993_v58  ;;  %v12927_v44 = vmul.f32 %v8217_v11, %v5992_v52  ;;  %v12930_v63 = vadd.f32 %v12675_v35, %v6184_v22  ;;  %v14110_v11 = vld [vmem:[#allocation53_spill] sm:$0xff] }
 0x8f7   : > { %v5610_v31 = vpop.xlane.xlu0 %5609  ;;  %v5919_v59 = vsub.f32 %v5855_v50, %v5887_v29  ;;  %v6046_v41 = vadd.f32 1e-05, %v5950_v5  ;;  %v12933_v33 = vadd.f32 %v12678_v39, %v6183_v45  ;;  %v6188_v25 = vmul.f32 %v12665_v27, %v12807_v6 }
 0x8f8   : > { %v12923_v53 = vmul.f32 0.00390625, %v5610_v31  ;;  %14108 = vst [vmem:[#allocation22_spill] sm:$0xff] %v12925_v55  ;;  %14109 = vst [vmem:[#allocation24_spill] sm:$0xff] %v12927_v44  ;;  %v12939_v16 = vmul.f32 %v12915_v40, %v12915_v40  ;;  %v6187_v15 = vmul.f32 %v12668_v51, %v12834_v48  ;;  %v5996_v52 = vsub.f32 %v12413_v7, %v12826_v54  ;;  %v14114_v55 = vld [vmem:[#allocation29_spill] sm:$0xff] }
 0x8f9   : > { %v5802_v26 = vpop.xlane.xlu1 %5801  ;;  %v5951_v46 = vmax.f32 %v5919_v59, 0.0  ;;  %v5997_v10 = vsub.f32 %v14110_v11, %v12826_v54  ;;  %8222 = vrsqrt.f32 %v6046_v41  ;;  %v12952_v58 = vadd.f32 %v12675_v35, %v6186_v3 }
 0x8fa   : > { %v5856_v13 = vmul.f32 0.00390625, %v5802_v26  ;;  %v5888_v38 = vmul.f32 %v12923_v53, %v12923_v53  ;;  %v12955_v48 = vadd.f32 %v12678_v39, %v6185_v8  ;;  %v12958_v54 = vadd.f32 %v12675_v35, %v6188_v25 }
 0x8fb   : > { %v5613_v6 = vpop.xlane.xlu0 %5612  ;;  %v8219_v4 = vpop.eup %8218  ;;  %v6047_v22 = vadd.f32 1e-05, %v5951_v46  ;;  %v12961_v59 = vadd.f32 %v12678_v39, %v6187_v15  ;;  %v12965_v41 = vmul.f32 %v12665_v27, %v12849_v57  ;;  %v5998_v25 = vsub.f32 %v12421_v43, %v12853_v28 }
 0x8fc   : > { %v12949_v45 = vmul.f32 0.00390625, %v5613_v6  ;;  %v5920_v50 = vsub.f32 %v5856_v13, %v5888_v38  ;;  %v6125_v29 = vmul.f32 %v8219_v4, %v5997_v10  ;;  %v6124_v5 = vmul.f32 %v8219_v4, %v5996_v52  ;;  %v14111_v52 = vld [vmem:[#allocation20_spill] sm:$0xff] }
 0x8fd   : > { %v5805_v7 = vpop.xlane.xlu1 %5804  ;;  %8224 = vrsqrt.f32 %v6047_v22  ;;  %v5999_v15 = vsub.f32 %v14111_v52, %v12853_v28  ;;  %v12979_v57 = vmul.f32 %v12668_v51, %v12851_v1 }
 0x8fe   : > { %v5857_v31 = vmul.f32 0.00390625, %v5805_v7  ;;  %v5952_v3 = vmax.f32 %v5920_v50, 0.0  ;;  %v5889_v8 = vmul.f32 %v12949_v45, %v12949_v45  ;;  %v6200_v46 = vmul.f32 %v12665_v27, %v6125_v29  ;;  %v14112_v7 = vld [vmem:[#allocation28_spill] sm:$0xff]  ;;  %v14113_v29 = vld [vmem:[#allocation27_spill] sm:$0xff] }
 0x8ff   : > { %v5616_v26 = vpop.xlane.xlu0 %5615  ;;  %v6199_v13 = vmul.f32 %v12668_v51, %v6124_v5  ;;  %v8221_v10 = vpop.eup %8220  ;;  %v6000_v43 = vsub.f32 %v14112_v7, %v12872_v32  ;;  %v6001_v28 = vsub.f32 %v14113_v29, %v12872_v32  ;;  %v6002_v32 = vsub.f32 %v14114_v55, %v12900_v30 }
 0x900   : > { %v12975_v11 = vmul.f32 0.00390625, %v5616_v26  ;;  %v6048_v38 = vadd.f32 1e-05, %v5952_v3  ;;  %v5921_v6 = vsub.f32 %v5857_v31, %v5889_v8  ;;  %v6275_v22 = vadd.f32 %v12675_v35, %v6200_v46 }
 0x901   : > { %v5808_v4 = vpop.xlane.xlu1 %5807  ;;  %v6274_v50 = vadd.f32 %v12678_v39, %v6199_v13  ;;  %v6127_v13 = vmul.f32 %v8221_v10, %v5999_v15  ;;  %v6126_v44 = vmul.f32 %v8221_v10, %v5998_v25  ;;  %v14118_v15 = vld [vmem:[#allocation32_spill] sm:$0xff]  ;;  %v14119_v25 = vld [vmem:[#allocation34_spill] sm:$0xff] }
 0x902   : > { %v5858_v5 = vmul.f32 0.00390625, %v5808_v4  ;;  %v5890_v26 = vmul.f32 %v12975_v11, %v12975_v11  ;;  %8226 = vrsqrt.f32 %v6048_v38  ;;  %v5953_v1 = vmax.f32 %v5921_v6, 0.0  ;;  %v14115_v4 = vld [vmem:[#allocation31_spill] sm:$0xff]  ;;  %v14116_v38 = vld [vmem:[#allocation30_spill] sm:$0xff] }
 0x903   : > { %v5619_v52 = vpop.xlane.xlu0 %5618  ;;  %v7650_v31 = vpack.i.bf16 %v12729_v56, %v6275_v22  ;;  %v7538_v3 = vpack.i.bf16 %v12735_v49, %v6274_v50  ;;  %v8223_v7 = vpop.eup %8222  ;;  %v6003_v29 = vsub.f32 %v14115_v4, %v12900_v30  ;;  %v14117_v56 = vld [vmem:[#allocation33_spill] sm:$0xff]  ;;  %v6202_v50 = vmul.f32 %v12665_v27, %v6127_v13 }
 0x904   : > { %v5922_v8 = vsub.f32 %v5858_v5, %v5890_v26  ;;  %v12991_v46 = vmul.f32 0.00390625, %v5619_v52  ;;  %v6049_v24 = vadd.f32 1e-05, %v5953_v1  ;;  %v6005_v49 = vsub.f32 %v14117_v56, %v12923_v53 }
 0x905   : > { %v5811_v40 = vpop.xlane.xlu1 %5810  ;;  %7651 = vxpose.xlu1.b32.start [1/16] %v7650_v31, 128  ;;  %7539 = vxpose.xlu0.b32.start [1/16] %v7538_v3, 128  ;;  %v6201_v5 = vmul.f32 %v12668_v51, %v6126_v44  ;;  %v6129_v31 = vmul.f32 %v8223_v7, %v6001_v28  ;;  %v6128_v3 = vmul.f32 %v8223_v7, %v6000_v43 }
 0x906   : > { %v5954_v10 = vmax.f32 %v5922_v8, 0.0  ;;  %v5859_v22 = vmul.f32 0.00390625, %v5811_v40  ;;  %8228 = vrsqrt.f32 %v6049_v24  ;;  %v5891_v55 = vmul.f32 %v12991_v46, %v12991_v46 }
 0x907   : > { %v5622_v30 = vpop.xlane.xlu0 %5621  ;;  %v8225_v26 = vpop.eup %8224  ;;  %v6277_v8 = vadd.f32 %v12675_v35, %v6202_v50  ;;  %v6276_v24 = vadd.f32 %v12678_v39, %v6201_v5  ;;  %v6007_v6 = vsub.f32 %v14119_v25, %v12949_v45  ;;  %v6203_v25 = vmul.f32 %v12668_v51, %v6128_v3 }
 0x908   : > { %v6050_v1 = vadd.f32 1e-05, %v5954_v10  ;;  %v13007_v52 = vmul.f32 0.00390625, %v5622_v30  ;;  %v5923_v4 = vsub.f32 %v5859_v22, %v5891_v55  ;;  %v6131_v40 = vmul.f32 %v8225_v26, %v6003_v29 }
 0x909   : > { %v5814_v56 = vpop.xlane.xlu1 %5813  ;;  %v7652_v43 = vpack.i.bf16 %v12745_v61, %v6277_v8  ;;  %v7540_v7 = vpack.i.bf16 %v12758_v12, %v6276_v24  ;;  %v6204_v29 = vmul.f32 %v12665_v27, %v6129_v31  ;;  %v6009_v5 = vsub.f32 %v12501_v34, %v12975_v11  ;;  %v14120_v12 = vld [vmem:[#allocation35_spill] sm:$0xff]  ;;  %v14121_v24 = vld [vmem:[#allocation37_spill] sm:$0xff] }
 0x90a   : > { %8230 = vrsqrt.f32 %v6050_v1  ;;  %v5860_v44 = vmul.f32 0.00390625, %v5814_v56  ;;  %v5955_v10 = vmax.f32 %v5923_v4, 0.0  ;;  %v5892_v28 = vmul.f32 %v13007_v52, %v13007_v52 }
 0x90b   : > { %v5625_v22 = vpop.xlane.xlu0 %5624  ;;  %v6206_v30 = vmul.f32 %v12665_v27, %v6131_v40  ;;  %7653 = vxpose.xlu1.b32.cont [2/16] %v7652_v43, 128  ;;  %7541 = vxpose.xlu0.b32.cont [2/16] %v7540_v7, 128  ;;  %v6130_v56 = vmul.f32 %v8225_v26, %v6002_v32  ;;  %v6279_v34 = vadd.f32 %v12675_v35, %v6204_v29  ;;  %v14122_v29 = vld [vmem:[#allocation38_spill] sm:$0xff] }
 0x90c   : > { %v13019_v55 = vmul.f32 0.00390625, %v5625_v22  ;;  %v8227_v50 = vpop.eup %8226  ;;  %v6051_v1 = vadd.f32 1e-05, %v5955_v10  ;;  %v5924_v4 = vsub.f32 %v5860_v44, %v5892_v28  ;;  %v6278_v44 = vadd.f32 %v12678_v39, %v6203_v25  ;;  %v14123_v25 = vld [vmem:[#allocation51_spill] sm:$0xff] }
 0x90d   : > { %v5817_v61 = vpop.xlane.xlu1 %5816  ;;  %v6281_v32 = vadd.f32 %v12675_v35, %v6206_v30  ;;  %v6205_v26 = vmul.f32 %v12668_v51, %v6130_v56 }
 0x90e   : > { %v5861_v22 = vmul.f32 0.00390625, %v5817_v61  ;;  %v5893_v3 = vmul.f32 %v13019_v55, %v13019_v55  ;;  %8232 = vrsqrt.f32 %v6051_v1  ;;  %v5956_v40 = vmax.f32 %v5924_v4, 0.0 }
 0x90f   : > { %v5628_v10 = vpop.xlane.xlu0 %5627  ;;  %v7654_v61 = vpack.i.bf16 %v12805_v47, %v6279_v34  ;;  %v7542_v31 = vpack.i.bf16 %v12812_v23, %v6278_v44  ;;  %v6133_v4 = vmul.f32 %v8227_v50, %v6005_v49  ;;  %v7656_v56 = vpack.i.bf16 %v12815_v0, %v6281_v32 }
 0x910   : > { %v5925_v28 = vsub.f32 %v5861_v22, %v5893_v3  ;;  %v13034_v43 = vmul.f32 0.00390625, %v5628_v10  ;;  %v8229_v7 = vpop.eup %8228  ;;  %v6052_v8 = vadd.f32 1e-05, %v5956_v40  ;;  %v6280_v47 = vadd.f32 %v12678_v39, %v6205_v26  ;;  %v14126_v26 = vld [vmem:[#allocation36_spill] sm:$0xff] }
 0x911   : > { %v5820_v1 = vpop.xlane.xlu1 %5819  ;;  %7655 = vxpose.xlu1.b32.cont [3/16] %v7654_v61, 128  ;;  %7543 = vxpose.xlu0.b32.cont [3/16] %v7542_v31, 128  ;;  %v6208_v34 = vmul.f32 %v12665_v27, %v6133_v4  ;;  %v14124_v44 = vsub.f32 %v14116_v38, %v12923_v53  ;;  %v6135_v13 = vmul.f32 %v8229_v7, %v6007_v6 }
 0x912   : > { %v5957_v3 = vmax.f32 %v5925_v28, 0.0  ;;  %v5862_v10 = vmul.f32 0.00390625, %v5820_v1  ;;  %v5894_v30 = vmul.f32 %v13034_v43, %v13034_v43  ;;  %8234 = vrsqrt.f32 %v6052_v8 }
 0x913   : > { %v5631_v23 = vpop.xlane.xlu0 %5630  ;;  %v6132_v28 = vmul.f32 %v8227_v50, %v14124_v44  ;;  %v7544_v31 = vpack.i.bf16 %v12818_v36, %v6280_v47  ;;  %v14125_v0 = vsub.f32 %v14118_v15, %v12949_v45  ;;  %v6014_v8 = vsub.f32 %v14126_v26, %v13019_v55 }
 0x914   : > { %v8231_v40 = vpop.eup %8230  ;;  %v13048_v49 = vmul.f32 0.00390625, %v5631_v23  ;;  %v5926_v61 = vsub.f32 %v5862_v10, %v5894_v30  ;;  %v14127_v23 = vld [vmem:[#allocation42_spill] sm:$0xff]  ;;  %v6053_v4 = vadd.f32 1e-05, %v5957_v3  ;;  %v6283_v53 = vadd.f32 %v12675_v35, %v6208_v34  ;;  %v14128_v34 = vld [vmem:[#allocation39_spill] sm:$0xff] }
 0x915   : > { %v5823_v1 = vpop.xlane.xlu1 %5822  ;;  %v6134_v32 = vmul.f32 %v8229_v7, %v14125_v0  ;;  %v6015_v22 = vsub.f32 %v14127_v23, %v13019_v55  ;;  %7657 = vxpose.xlu1.b32.cont [4/16] %v7656_v56, 128  ;;  %7545 = vxpose.xlu0.b32.cont [4/16] %v7544_v31, 128  ;;  %v6207_v38 = vmul.f32 %v12668_v51, %v6132_v28 }
 0x916   : > { %v5863_v2 = vmul.f32 0.00390625, %v5823_v1  ;;  %v5958_v20 = vmax.f32 %v5926_v61, 0.0  ;;  %v5895_v36 = vmul.f32 %v13048_v49, %v13048_v49  ;;  %v6210_v15 = vmul.f32 %v12665_v27, %v6135_v13 }
 0x917   : > { %v5634_v45 = vpop.xlane.xlu0 %5633  ;;  %v6209_v50 = vmul.f32 %v12668_v51, %v6134_v32  ;;  %v6137_v7 = vmul.f32 %v8231_v40, %v6009_v5  ;;  %v7658_v56 = vpack.i.bf16 %v12821_v17, %v6283_v53  ;;  %v6282_v47 = vadd.f32 %v12678_v39, %v6207_v38 }
 0x918   : > { %v13066_v6 = vmul.f32 0.00390625, %v5634_v45  ;;  %v8233_v3 = vpop.eup %8232  ;;  %v6054_v10 = vadd.f32 1e-05, %v5958_v20  ;;  %v5927_v30 = vsub.f32 %v5863_v2, %v5895_v36  ;;  %8236 = vrsqrt.f32 %v6053_v4 }
 0x919   : > { %v5826_v44 = vpop.xlane.xlu1 %5825  ;;  %v6016_v28 = vsub.f32 %v14128_v34, %v13034_v43  ;;  %7659 = vxpose.xlu1.b32.cont [5/16] %v7658_v56, 128  ;;  %v7546_v5 = vpack.i.bf16 %v12878_v60, %v6282_v47  ;;  %v6285_v20 = vadd.f32 %v12675_v35, %v6210_v15  ;;  %v6284_v1 = vadd.f32 %v12678_v39, %v6209_v50  ;;  %v14131_v50 = vld [vmem:[#allocation41_spill] sm:$0xff]  ;;  %v14132_v56 = vld [vmem:[#allocation40_spill] sm:$0xff] }
 0x91a   : > { %v5864_v61 = vmul.f32 0.00390625, %v5826_v44  ;;  %v5896_v31 = vmul.f32 %v13066_v6, %v13066_v6  ;;  %8238 = vrsqrt.f32 %v6054_v10  ;;  %v5959_v13 = vmax.f32 %v5927_v30, 0.0 }
 0x91b   : > { %v5637_v2 = vpop.xlane.xlu0 %5636  ;;  %v6212_v32 = vmul.f32 %v12665_v27, %v6137_v7  ;;  %7547 = vxpose.xlu0.b32.cont [5/16] %v7546_v5, 128  ;;  %v7660_v36 = vpack.i.bf16 %v12885_v62, %v6285_v20  ;;  %v14129_v38 = vsub.f32 %v12497_v19, %v12975_v11  ;;  %v14130_v60 = vsub.f32 %v14121_v24, %v12991_v46 }
 0x91c   : > { %v5928_v17 = vsub.f32 %v5864_v61, %v5896_v31  ;;  %v13079_v0 = vmul.f32 0.00390625, %v5637_v2  ;;  %v6055_v4 = vadd.f32 1e-05, %v5959_v13  ;;  %v8235_v10 = vpop.eup %8234  ;;  %v6017_v30 = vsub.f32 %v14131_v50, %v13034_v43 }
 0x91d   : > { %v5829_v53 = vpop.xlane.xlu1 %5828  ;;  %v6136_v45 = vmul.f32 %v8231_v40, %v14129_v38  ;;  %v6139_v15 = vmul.f32 %v8233_v3, %v14130_v60  ;;  %v6018_v7 = vsub.f32 %v14132_v56, %v13048_v49  ;;  %v7548_v44 = vpack.i.bf16 %v12888_v14, %v6284_v1  ;;  %7661 = vxpose.xlu1.b32.cont [6/16] %v7660_v36, 128 }
 0x91e   : > { %v5960_v47 = vmax.f32 %v5928_v17, 0.0  ;;  %8240 = vrsqrt.f32 %v6055_v4  ;;  %v5865_v62 = vmul.f32 0.00390625, %v5829_v53  ;;  %v5897_v19 = vmul.f32 %v13079_v0, %v13079_v0  ;;  %v14135_v4 = vld [vmem:[#allocation48_spill] sm:$0xff]  ;;  %v14136_v53 = vld [vmem:[#allocation43_spill] sm:$0xff] }
 0x91f   : > { %v6287_v11 = vadd.f32 %v12675_v35, %v6212_v32  ;;  %v5640_v24 = vpop.xlane.xlu0 %5639  ;;  %v6211_v61 = vmul.f32 %v12668_v51, %v6136_v45  ;;  %v6214_v13 = vmul.f32 %v12665_v27, %v6139_v15  ;;  %7549 = vxpose.xlu0.b32.cont [6/16] %v7548_v44, 128  ;;  %v14133_v2 = vsub.f32 %v14120_v12, %v12991_v46 }
 0x920   : > { %v6056_v40 = vadd.f32 1e-05, %v5960_v47  ;;  %v13098_v31 = vmul.f32 0.00390625, %v5640_v24  ;;  %v5929_v5 = vsub.f32 %v5865_v62, %v5897_v19  ;;  %v14134_v1 = vsub.f32 %v14123_v25, %v13007_v52 }
 0x921   : > { %v7662_v14 = vpack.i.bf16 %v12893_v18, %v6287_v11  ;;  %v5832_v20 = vpop.xlane.xlu1 %5831  ;;  %v6138_v17 = vmul.f32 %v8233_v3, %v14133_v2  ;;  %v6019_v36 = vsub.f32 %v14135_v4, %v13048_v49  ;;  %v6020_v38 = vsub.f32 %v14136_v53, %v13066_v6  ;;  %v14142_v53 = vld [vmem:[#allocation46_spill] sm:$0xff] }
 0x922   : > { %v6141_v32 = vmul.f32 %v8235_v10, %v14134_v1  ;;  %8242 = vrsqrt.f32 %v6056_v40  ;;  %v6286_v45 = vadd.f32 %v12678_v39, %v6211_v61  ;;  %v5961_v60 = vmax.f32 %v5929_v5, 0.0  ;;  %v8237_v25 = vpop.eup %8236 }
 0x923   : > { %7663 = vxpose.xlu1.b32.cont [7/16] %v7662_v14, 128  ;;  %v5866_v18 = vmul.f32 0.00390625, %v5832_v20  ;;  %v5898_v46 = vmul.f32 %v13098_v31, %v13098_v31  ;;  %v6289_v12 = vadd.f32 %v12675_v35, %v6214_v13  ;;  %v5643_v3 = vpop.xlane.xlu0 %5642  ;;  %v6213_v47 = vmul.f32 %v12668_v51, %v6138_v17  ;;  %v14138_v14 = vld [vmem:[#allocation44_spill] sm:$0xff] }
 0x924   : > { %v7550_v15 = vpack.i.bf16 %v12896_v9, %v6286_v45  ;;  %v13118_v44 = vmul.f32 0.00390625, %v5643_v3  ;;  %v6216_v62 = vmul.f32 %v12665_v27, %v6141_v32  ;;  %v8239_v19 = vpop.eup %8238  ;;  %v6057_v11 = vadd.f32 1e-05, %v5961_v60  ;;  %v14139_v9 = vld [vmem:[#allocation45_spill] sm:$0xff] }
 0x925   : > { %v5930_v24 = vsub.f32 %v5866_v18, %v5898_v46  ;;  %v7664_v40 = vpack.i.bf16 %v12903_v37, %v6289_v12  ;;  %v5787_v61 = vpop.xlane.xlu1 %5786  ;;  %v14137_v5 = vsub.f32 %v14122_v29, %v13007_v52  ;;  %v6021_v20 = vsub.f32 %v14138_v14, %v13066_v6 }
 0x926   : > { %v6022_v2 = vsub.f32 %v14139_v9, %v13079_v0  ;;  %7551 = vxpose.xlu0.b32.cont [7/16] %v7550_v15, 128  ;;  %v6288_v17 = vadd.f32 %v12678_v39, %v6213_v47  ;;  %v5851_v1 = vmul.f32 0.00390625, %v5787_v61  ;;  %8244 = vrsqrt.f32 %v6057_v11 }
 0x927   : > { %v6140_v13 = vmul.f32 %v8235_v10, %v14137_v5  ;;  %v5962_v32 = vmax.f32 %v5930_v24, 0.0  ;;  %7665 = vxpose.xlu1.b32.cont [8/16] %v7664_v40, 128  ;;  %v6291_v37 = vadd.f32 %v12675_v35, %v6216_v62  ;;  %v5835_v45 = vpop.xlane.xlu0 %5834  ;;  %v5899_v10 = vmul.f32 %v13118_v44, %v13118_v44 }
 0x928   : > { %v7552_v52 = vpack.i.bf16 %v12906_v21, %v6288_v17  ;;  %v5915_v29 = vsub.f32 %v5851_v1, %v12939_v16  ;;  %v5867_v60 = vmul.f32 0.00390625, %v5835_v45  ;;  %v8241_v18 = vpop.eup %8240  ;;  %v6143_v15 = vmul.f32 %v8237_v25, %v6015_v22  ;;  %v14143_v45 = vld [vmem:[#allocation47_spill] sm:$0xff] }
 0x929   : > { %v6215_v4 = vmul.f32 %v12668_v51, %v6140_v13  ;;  %v6058_v46 = vadd.f32 1e-05, %v5962_v32  ;;  %v7666_v12 = vpack.i.bf16 %v12930_v63, %v6291_v37  ;;  %v6142_v21 = vmul.f32 %v8237_v25, %v6014_v8  ;;  %v14141_v37 = vld [vmem:[#allocation56_spill] sm:$0xff] }
 0x92a   : > { %7553 = vxpose.xlu0.b32.cont [8/16] %v7552_v52, 128  ;;  %v5947_v47 = vmax.f32 %v5915_v29, 0.0  ;;  %v5931_v62 = vsub.f32 %v5867_v60, %v5899_v10  ;;  %v6145_v16 = vmul.f32 %v8239_v19, %v6017_v30  ;;  %v6218_v11 = vmul.f32 %v12665_v27, %v6143_v15  ;;  %v14146_v15 = vld [vmem:[#allocation25_spill] sm:$0xff] }
 0x92b   : > { %v6290_v3 = vadd.f32 %v12678_v39, %v6215_v4  ;;  %8246 = vrsqrt.f32 %v6058_v46  ;;  %7667 = vxpose.xlu1.b32.cont [9/16] %v7666_v12, 128  ;;  %v6144_v22 = vmul.f32 %v8239_v19, %v6016_v28  ;;  %v6217_v55 = vmul.f32 %v12668_v51, %v6142_v21 }
 0x92c   : > { %v8243_v23 = vpop.eup %8242  ;;  %v6043_v24 = vadd.f32 1e-05, %v5947_v47  ;;  %v5963_v40 = vmax.f32 %v5931_v62, 0.0  ;;  %v6220_v26 = vmul.f32 %v12665_v27, %v6145_v16  ;;  %v6293_v8 = vadd.f32 %v12675_v35, %v6218_v11  ;;  %v14147_v16 = vld [vmem:[#allocation52_spill] sm:$0xff]  ;;  %v14148_v11 = vld [vmem:[#allocation57_spill] sm:$0xff] }
 0x92d   : > { %v7554_v63 = vpack.i.bf16 %v12933_v33, %v6290_v3  ;;  %v6219_v50 = vmul.f32 %v12668_v51, %v6144_v22  ;;  %v6147_v30 = vmul.f32 %v8241_v18, %v6019_v36  ;;  %v6146_v33 = vmul.f32 %v8241_v18, %v6018_v7  ;;  %v14140_v36 = vld [vmem:[#allocation54_spill] sm:$0xff]  ;;  %v14145_v3 = vld [vmem:[#allocation23_spill] sm:$0xff] }
 0x92e   : > { %8248 = vrsqrt.f32 %v6043_v24  ;;  %v6059_v43 = vadd.f32 1e-05, %v5963_v40  ;;  %v6292_v34 = vadd.f32 %v12678_v39, %v6217_v55  ;;  %v6295_v28 = vadd.f32 %v12675_v35, %v6220_v26  ;;  %v14149_v24 = vld [vmem:[#allocation50_spill] sm:$0xff] }
 0x92f   : > { %7555 = vxpose.xlu0.b32.cont [9/16] %v7554_v63, 128  ;;  %v7668_v25 = vpack.i.bf16 %v12952_v58, %v6293_v8  ;;  %v6294_v19 = vadd.f32 %v12678_v39, %v6219_v50  ;;  %v6222_v61 = vmul.f32 %v12665_v27, %v6147_v30  ;;  %v6221_v5 = vmul.f32 %v12668_v51, %v6146_v33  ;;  %v14150_v55 = vld [vmem:[#allocation58_spill] sm:$0xff] }
 0x930   : > { %v6023_v13 = vsub.f32 %v14140_v36, %v13079_v0  ;;  %8250 = vrsqrt.f32 %v6059_v43  ;;  %v7556_v49 = vpack.i.bf16 %v12955_v48, %v6292_v34  ;;  %v6149_v56 = vmul.f32 %v8243_v23, %v6021_v20  ;;  %v8245_v7 = vpop.eup %8244 }
 0x931   : > { %7669 = vxpose.xlu1.b32.cont [10/16] %v7668_v25, 128  ;;  %v7670_v14 = vpack.i.bf16 %v12958_v54, %v6295_v28  ;;  %v7558_v9 = vpack.i.bf16 %v12961_v59, %v6294_v19  ;;  %v6297_v58 = vadd.f32 %v12675_v35, %v6222_v61  ;;  %v6148_v17 = vmul.f32 %v8243_v23, %v6020_v38  ;;  %v14151_v19 = vld [vmem:[#allocation22_spill] sm:$0xff] }
 0x932   : > { %v6296_v1 = vadd.f32 %v12678_v39, %v6221_v5  ;;  %v6224_v0 = vmul.f32 %v12665_v27, %v6149_v56  ;;  %v6151_v32 = vmul.f32 %v8245_v7, %v6023_v13  ;;  %v6150_v48 = vmul.f32 %v8245_v7, %v6022_v2 }
 0x933   : > { %7557 = vxpose.xlu0.b32.cont [10/16] %v7556_v49, 128  ;;  %v6265_v20 = vadd.f32 %v12675_v35, %v12965_v41  ;;  %v6192_v54 = vmul.f32 %v12665_v27, %v12870_v42  ;;  %v6223_v59 = vmul.f32 %v12668_v51, %v6148_v17  ;;  %v6025_v4 = vsub.f32 %v14141_v37, %v13098_v31  ;;  %v14144_v41 = vld [vmem:[#allocation55_spill] sm:$0xff]  ;;  %v14152_v49 = vld [vmem:[#allocation24_spill] sm:$0xff] }
 0x934   : > { %v6264_v6 = vadd.f32 %v12678_v39, %v12979_v57  ;;  %v6191_v38 = vmul.f32 %v12668_v51, %v14142_v53  ;;  %v6194_v2 = vmul.f32 %v12665_v27, %v14143_v45  ;;  %v6024_v29 = vsub.f32 %v14144_v41, %v13098_v31 }
 0x935   : > { %v8247_v52 = vpop.eup %8246  ;;  %7671 = vxpose.xlu1.b32.cont [11/16] %v7670_v14, 128  ;;  %v7672_v42 = vpack.i.bf16 %v6265_v20, %v6297_v58  ;;  %v6299_v10 = vadd.f32 %v12675_v35, %v6224_v0  ;;  %v6226_v60 = vmul.f32 %v12665_v27, %v6151_v32  ;;  %v6298_v57 = vadd.f32 %v12678_v39, %v6223_v59 }
 0x936   : > { %v7560_v18 = vpack.i.bf16 %v6264_v6, %v6296_v1  ;;  %v6225_v46 = vmul.f32 %v12668_v51, %v6150_v48  ;;  %v6153_v12 = vmul.f32 %v8247_v52, %v6025_v4  ;;  %v5994_v47 = vsub.f32 %v14146_v15, %v14145_v3 }
 0x937   : > { %7559 = vxpose.xlu0.b32.cont [11/16] %v7558_v9, 128  ;;  %v6267_v62 = vadd.f32 %v12675_v35, %v6192_v54  ;;  %v6152_v21 = vmul.f32 %v8247_v52, %v6024_v29  ;;  %v5995_v63 = vsub.f32 %v14147_v16, %v14145_v3  ;;  %v6026_v22 = vsub.f32 %v14148_v11, %v13118_v44 }
 0x938   : > { %v8249_v31 = vpop.eup %8248  ;;  %v6266_v23 = vadd.f32 %v12678_v39, %v6191_v38  ;;  %v6193_v40 = vmul.f32 %v12668_v51, %v14149_v24  ;;  %v6027_v26 = vsub.f32 %v14150_v55, %v13118_v44  ;;  %v6301_v50 = vadd.f32 %v12675_v35, %v6226_v60 }
 0x939   : > { %7673 = vxpose.xlu1.b32.cont [12/16] %v7672_v42, 128  ;;  %v7674_v8 = vpack.i.bf16 %v6267_v62, %v6299_v10  ;;  %v6228_v30 = vmul.f32 %v12665_v27, %v6153_v12  ;;  %v6269_v34 = vadd.f32 %v12675_v35, %v6194_v2  ;;  %v6300_v28 = vadd.f32 %v12678_v39, %v6225_v46 }
 0x93a   : > { %v8251_v33 = vpop.eup %8250  ;;  %v7562_v43 = vpack.i.bf16 %v6266_v23, %v6298_v57  ;;  %v6227_v25 = vmul.f32 %v12668_v51, %v6152_v21  ;;  %v6196_v61 = vmul.f32 %v12665_v27, %v14151_v19  ;;  %v6123_v5 = vmul.f32 %v8249_v31, %v5995_v63 }
 0x93b   : > { %7561 = vxpose.xlu0.b32.cont [12/16] %v7560_v18, 128  ;;  %v6155_v44 = vmul.f32 %v8251_v33, %v6027_v26  ;;  %v6154_v36 = vmul.f32 %v8251_v33, %v6026_v22  ;;  %v6268_v13 = vadd.f32 %v12678_v39, %v6193_v40  ;;  %v6195_v56 = vmul.f32 %v12668_v51, %v14152_v49 }
 0x93c   : > { %v6122_v7 = vmul.f32 %v8249_v31, %v5994_v47  ;;  %v7676_v14 = vpack.i.bf16 %v6269_v34, %v6301_v50  ;;  %v6303_v9 = vadd.f32 %v12675_v35, %v6228_v30  ;;  %v6302_v1 = vadd.f32 %v12678_v39, %v6227_v25  ;;  %v6483_v50 = vld [vmem:[%s14155_s9 + $0x8] sm:$0xff] }
 0x93d   : > { %7675 = vxpose.xlu1.b32.cont [13/16] %v7674_v8, 128  ;;  %v6230_v58 = vmul.f32 %v12665_v27, %v6155_v44  ;;  %v7564_v17 = vpack.i.bf16 %v6268_v13, %v6300_v28  ;;  %v6229_v0 = vmul.f32 %v12668_v51, %v6154_v36  ;;  %v6271_v32 = vadd.f32 %v12675_v35, %v6196_v61  ;;  %v6484_v36 = vld [vmem:[%s14155_s9 + $0x10] sm:$0xff]  ;;  %v6482_v13 = vld [vmem:[%s14155_s9] sm:$0xff] }
 0x93e   : > { %v6198_v48 = vmul.f32 %v12665_v27, %v6123_v5  ;;  %v6270_v20 = vadd.f32 %v12678_v39, %v6195_v56  ;;  %v6197_v54 = vmul.f32 %v12668_v51, %v6122_v7  ;;  %v14153_v2 = vmov 0   ;;  %v7974_v51 = vld [vmem:[%s14154_s24 + $0x4] ss:$8 sps:$4 sm:$0xff]  }
 0x93f   : > { %7563 = vxpose.xlu0.b32.cont [13/16] %v7562_v43, 128  ;;  %v7678_v59 = vpack.i.bf16 %v6271_v32, %v6303_v9  ;;  %v6305_v37 = vadd.f32 %v12675_v35, %v6230_v58  ;;  %v6304_v6 = vadd.f32 %v12678_v39, %v6229_v0  ;;  %6690 = vmatprep.mubr.bf16.mxu1 %v7974_v51  ;;  %v6486_v58 = vld [vmem:[%s14155_s9 + $0x20] sm:$0xff] }
 0x940   : > { %v7566_v4 = vpack.i.bf16 %v6270_v20, %v6302_v1  ;;  %v6273_v53 = vadd.f32 %v12675_v35, %v6198_v48  ;;  %v6272_v38 = vadd.f32 %v12678_v39, %v6197_v54  ;;  %v6487_v1 = vld [vmem:[%s14155_s9 + $0x28] sm:$0xff]  ;;  %v6488_v20 = vld [vmem:[%s14155_s9 + $0x30] sm:$0xff] }
 0x941   : > { %7677 = vxpose.xlu1.b32.cont [14/16] %v7676_v14, 128  ;;  %v6485_v14 = vld [vmem:[%s14155_s9 + $0x18] sm:$0xff] }
 0x942   : > { %v7680_v45 = vpack.i.bf16 %v6273_v53, %v6305_v37  ;;  %v7568_v27 = vpack.i.bf16 %v6272_v38, %v6304_v6  ;;  %v6489_v53 = vld [vmem:[%s14155_s9 + $0x38] sm:$0xff] }
 0x943   : > { %7565 = vxpose.xlu0.b32.cont [14/16] %v7564_v17, 128 }
 0x945   : > { %7679 = vxpose.xlu1.b32.cont [15/16] %v7678_v59, 128 }
 0x947   : > { %7567 = vxpose.xlu0.b32.cont [15/16] %v7566_v4, 128 }
 0x949   : > { %7681 = vxpose.xlu1.b32.end [16/16] %v7680_v45, 128  ;;  %v6490_v45 = vld [vmem:[%s14155_s9 + $0x40] sm:$0xff] }
 0x94b   : > { %7569 = vxpose.xlu0.b32.end [16/16] %v7568_v27, 128 }
 0x967   : > { %7763 = vset.pattern.permute.xlu1 %v14153_v2 }
 0x968   : > { %6505 = vperm.xlu1 %7763, %v6483_v50   ;;  %v6497_v50 = vld [vmem:[%s14155_s9 + $0x78] sm:$0xff] }
 0x96c   : > { %6510 = vperm.xlu1 %7763, %v6484_v36  }
 0x970   : > { %6515 = vperm.xlu1 %7763, %v6485_v14  }
 0x974   : > { %7762 = vset.pattern.permute.xlu0 %v14153_v2  ;;  %6525 = vperm.xlu1 %7763, %v6487_v1   ;;  %v6491_v2 = vld [vmem:[%s14155_s9 + $0x48] sm:$0xff] }
 0x975   : > { %6500 = vperm.xlu0 %7762, %v6482_v13  }
 0x978   : > { %6535 = vperm.xlu1 %7763, %v6489_v53  }
 0x979   : > { %6520 = vperm.xlu0 %7762, %v6486_v58  }
 0x97c   : > { %6545 = vperm.xlu1 %7763, %v6491_v2  }
 0x97d   : > { %6530 = vperm.xlu0 %7762, %v6488_v20  }
 0x981   : > { %6540 = vperm.xlu0 %7762, %v6490_v45  }
 0x98d   : > { %v13234_v52 = vpop.trf.xlu1 }
 0x98e   : > { %v7686_v14 = vunpack.i.h.bf16 %v13234_v52 }
 0x98f   : > { %v7570_v35 = vpop.trf.xlu0 }
 0x990   : > { %v7574_v39 = vunpack.i.h.bf16 %v7570_v35  ;;  %v7571_v29 = vunpack.i.l.bf16 %v7570_v35 }
 0x991   : > { %v13236_v41 = vpop.trf.xlu1 }
 0x993   : > { %v7575_v42 = vpop.trf.xlu0 }
 0x994   : > { %v7579_v10 = vunpack.i.h.bf16 %v7575_v42  ;;  %v7576_v60 = vunpack.i.l.bf16 %v7575_v42 }
 0x995   : > { %v13238_v46 = vpop.trf.xlu1 }
 0x996   : > { %v6435_v18 = vpack.c.bf16 %v7576_v60, %v7571_v29  ;;  %v6434_v57 = vpack.c.bf16 %v7579_v10, %v7574_v39  ;;  %v6492_v29 = vld [vmem:[%s14155_s9 + $0x50] sm:$0xff]  ;;  %v7693_v58 = vunpack.i.l.bf16 %v13238_v46 }
 0x997   : > { %v7580_v12 = vpop.trf.xlu0  ;;  %6550 = vperm.xlu0 %7762, %v6492_v29  }
 0x998   : > { %6658 = vmatprep.subr.bf16.mxu1 %v6435_v18  ;;  %v7584_v15 = vunpack.i.h.bf16 %v7580_v12  ;;  %v7581_v47 = vunpack.i.l.bf16 %v7580_v12  ;;  %v6493_v12 = vld [vmem:[%s14155_s9 + $0x58] sm:$0xff] }
 0x999   : > { %6659 = vmatpush1.bf16.msra.mxu1 %v6434_v57  ;;  %v13240_v3 = vpop.trf.xlu1  ;;  %6555 = vperm.xlu1 %7763, %v6493_v12  }
 0x99a   : > { %v7698_v1 = vunpack.i.l.bf16 %v13240_v3 }
 0x99b   : > { %v7585_v62 = vpop.trf.xlu0 }
 0x99c   : > { %v7589_v21 = vunpack.i.h.bf16 %v7585_v62  ;;  %v7586_v31 = vunpack.i.l.bf16 %v7585_v62 }
 0x99d   : > { %v13242_v11 = vpop.trf.xlu1 }
 0x99e   : > { %v6437_v16 = vpack.c.bf16 %v7586_v31, %v7581_v47  ;;  %v6436_v63 = vpack.c.bf16 %v7589_v21, %v7584_v15  ;;  %v6494_v47 = vld [vmem:[%s14155_s9 + $0x60] sm:$0xff]  ;;  %v6495_v21 = vld [vmem:[%s14155_s9 + $0x68] sm:$0xff] }
 0x99f   : > { %v7590_v22 = vpop.trf.xlu0  ;;  %6560 = vperm.xlu0 %7762, %v6494_v47   ;;  %6565 = vperm.xlu1 %7763, %v6495_v21  }
 0x9a0   : > { %6660 = vmatprep.subr.bf16.mxu1 %v6437_v16  ;;  %v7594_v24 = vunpack.i.h.bf16 %v7590_v22  ;;  %v7591_v40 = vunpack.i.l.bf16 %v7590_v22  ;;  %v6496_v22 = vld [vmem:[%s14155_s9 + $0x70] sm:$0xff] }
 0x9a1   : > { %6661 = vmatpush1.bf16.msra.mxu1 %v6436_v63  ;;  %v13244_v23 = vpop.trf.xlu1 }
 0x9a3   : > { %v7595_v55 = vpop.trf.xlu0  ;;  %6570 = vperm.xlu0 %7762, %v6496_v22   ;;  %6575 = vperm.xlu1 %7763, %v6497_v50   ;;  %v7981_v50 = vld [vmem:[%s14154_s24 + $0x34] ss:$8 sps:$4 sm:$0xff]  }
 0x9a4   : > { %v7599_v26 = vunpack.i.h.bf16 %v7595_v55  ;;  %v7596_v8 = vunpack.i.l.bf16 %v7595_v55 }
 0x9a5   : > { %v13249_v43 = vpop.trf.xlu1 }
 0x9a6   : > { %v6439_v30 = vpack.c.bf16 %v7596_v8, %v7591_v40  ;;  %v6438_v33 = vpack.c.bf16 %v7599_v26, %v7594_v24  ;;  %v7713_v53 = vunpack.i.l.bf16 %v13249_v43 }
 0x9a7   : > { %v7600_v34 = vpop.trf.xlu0 }
 0x9a8   : > { %6662 = vmatprep.subr.bf16.mxu1 %v6439_v30  ;;  %v7604_v25 = vunpack.i.h.bf16 %v7600_v34  ;;  %v7601_v19 = vunpack.i.l.bf16 %v7600_v34  ;;  %v7683_v34 = vunpack.i.l.bf16 %v13234_v52  ;;  %v6453_v52 = vpack.c.bf16 %v7698_v1, %v7693_v58 }
 0x9a9   : > { %6663 = vmatpush1.bf16.msra.mxu1 %v6438_v33  ;;  %v13251_v28 = vpop.trf.xlu1  ;;  %v6820_v33 = vld [vmem:[#allocation2] sm:$0x1] }
 0x9aa   : > { %6823 = vperm.xlu0 %7762, %v6820_v33   ;;  %v7721_v45 = vunpack.i.h.bf16 %v13251_v28  ;;  %v7984_v33 = vld [vmem:[%s14154_s24 + $0x44] ss:$8 sps:$4 sm:$0xff]  }
 0x9ab   : > { %v7605_v61 = vpop.trf.xlu0 }
 0x9ac   : > { %v7609_v5 = vunpack.i.h.bf16 %v7605_v61  ;;  %v7606_v44 = vunpack.i.l.bf16 %v7605_v61 }
 0x9ad   : > { %v13259_v7 = vpop.trf.xlu1 }
 0x9ae   : > { %v6441_v49 = vpack.c.bf16 %v7606_v44, %v7601_v19  ;;  %v6440_v56 = vpack.c.bf16 %v7609_v5, %v7604_v25  ;;  %v7688_v25 = vunpack.i.l.bf16 %v13236_v41 }
 0x9af   : > { %v7610_v9 = vpop.trf.xlu0 }
 0x9b0   : > { %6664 = vmatprep.subr.bf16.mxu1 %v6441_v49  ;;  %v7614_v0 = vunpack.i.h.bf16 %v7610_v9  ;;  %v7611_v32 = vunpack.i.l.bf16 %v7610_v9  ;;  %v7691_v9 = vunpack.i.h.bf16 %v13236_v41  ;;  %v7706_v41 = vunpack.i.h.bf16 %v13242_v11 }
 0x9b1   : > { %6665 = vmatpush1.bf16.msra.mxu1 %v6440_v56  ;;  %v13267_v17 = vpop.trf.xlu1 }
 0x9b2   : > { %v6450_v20 = vpack.c.bf16 %v7691_v9, %v7686_v14 }
 0x9b3   : > { %v7615_v48 = vpop.trf.xlu0 }
 0x9b4   : > { %v7619_v54 = vunpack.i.h.bf16 %v7615_v48  ;;  %v7616_v59 = vunpack.i.l.bf16 %v7615_v48  ;;  %v7701_v48 = vunpack.i.h.bf16 %v13240_v3  ;;  %v7716_v3 = vunpack.i.h.bf16 %v13249_v43 }
 0x9b5   : > { %v13275_v6 = vpop.trf.xlu1 }
 0x9b6   : > { %v6443_v37 = vpack.c.bf16 %v7616_v59, %v7611_v32  ;;  %v6442_v4 = vpack.c.bf16 %v7619_v54, %v7614_v0  ;;  %v6451_v0 = vpack.c.bf16 %v7688_v25, %v7683_v34  ;;  %v7696_v32 = vunpack.i.h.bf16 %v13238_v46  ;;  %v7986_v34 = vld [vmem:[%s14154_s24 + $0x40] ss:$8 sps:$4 sm:$0xff]   ;;  %v7987_v25 = vld [vmem:[%s14154_s24 + $0x54] ss:$8 sps:$4 sm:$0xff]  }
 0x9b7   : > { %v7620_v38 = vpop.trf.xlu0  ;;  %v7703_v54 = vunpack.i.l.bf16 %v13242_v11  ;;  %v7708_v59 = vunpack.i.l.bf16 %v13244_v23  ;;  %v6456_v29 = vpack.c.bf16 %v7721_v45, %v7716_v3 }
 0x9b8   : > { %6666 = vmatprep.subr.bf16.mxu1 %v6443_v37  ;;  %v7624_v51 = vunpack.i.h.bf16 %v7620_v38  ;;  %v7621_v35 = vunpack.i.l.bf16 %v7620_v38  ;;  %v7711_v37 = vunpack.i.h.bf16 %v13244_v23  ;;  %v7718_v38 = vunpack.i.l.bf16 %v13251_v28 }
 0x9b9   : > { %6667 = vmatpush1.bf16.msra.mxu1 %v6442_v4  ;;  %v13283_v27 = vpop.trf.xlu1  ;;  %v6452_v4 = vpack.c.bf16 %v7701_v48, %v7696_v32  ;;  %v6455_v46 = vpack.c.bf16 %v7708_v59, %v7703_v54  ;;  %v7726_v23 = vunpack.i.h.bf16 %v13259_v7  ;;  %v7736_v28 = vunpack.i.h.bf16 %v13275_v6 }
 0x9ba   : > { %v6454_v2 = vpack.c.bf16 %v7711_v37, %v7706_v41  ;;  %v6457_v11 = vpack.c.bf16 %v7718_v38, %v7713_v53 }
 0x9bb   : > { %v7625_v39 = vpop.trf.xlu0 }
 0x9bc   : > { %v7629_v42 = vunpack.i.h.bf16 %v7625_v39  ;;  %v7626_v10 = vunpack.i.l.bf16 %v7625_v39  ;;  %v7731_v39 = vunpack.i.h.bf16 %v13267_v17 }
 0x9bd   : > { %v13291_v57 = vpop.trf.xlu1 }
 0x9be   : > { %v6445_v60 = vpack.c.bf16 %v7626_v10, %v7621_v35  ;;  %v6444_v18 = vpack.c.bf16 %v7629_v42, %v7624_v51  ;;  %v7723_v51 = vunpack.i.l.bf16 %v13259_v7  ;;  %v7728_v35 = vunpack.i.l.bf16 %v13267_v17 }
 0x9bf   : > { %v7630_v15 = vpop.trf.xlu0  ;;  %v7733_v42 = vunpack.i.l.bf16 %v13275_v6  ;;  %v7738_v10 = vunpack.i.l.bf16 %v13283_v27  ;;  %v7743_v12 = vunpack.i.l.bf16 %v13291_v57  ;;  %v7746_v17 = vunpack.i.h.bf16 %v13291_v57  ;;  %v7972_v57 = vld [vmem:[%s14154_s24] ss:$8 sps:$4 sm:$0xff]  }
 0x9c0   : > { %6668 = vmatprep.subr.bf16.mxu1 %v6445_v60  ;;  %v7634_v31 = vunpack.i.h.bf16 %v7630_v15  ;;  %v7631_v16 = vunpack.i.l.bf16 %v7630_v15  ;;  %v6459_v43 = vpack.c.bf16 %v7728_v35, %v7723_v51  ;;  %v7741_v60 = vunpack.i.h.bf16 %v13283_v27 }
 0x9c1   : > { %6669 = vmatpush1.bf16.msra.mxu1 %v6444_v18  ;;  %v13299_v62 = vpop.trf.xlu1  ;;  %v6458_v18 = vpack.c.bf16 %v7731_v39, %v7726_v23  ;;  %v6461_v7 = vpack.c.bf16 %v7738_v10, %v7733_v42 }
 0x9c2   : > { %v7748_v15 = vunpack.i.l.bf16 %v13299_v62  ;;  %v7751_v47 = vunpack.i.h.bf16 %v13299_v62  ;;  %v6460_v21 = vpack.c.bf16 %v7741_v60, %v7736_v28  ;;  %v7975_v62 = vld [vmem:[%s14154_s24 + $0x14] ss:$8 sps:$4 sm:$0xff]  }
 0x9c3   : > { %v7635_v63 = vpop.trf.xlu0 }
 0x9c4   : > { %v7639_v24 = vunpack.i.h.bf16 %v7635_v63  ;;  %v7636_v40 = vunpack.i.l.bf16 %v7635_v63  ;;  %v6463_v6 = vpack.c.bf16 %v7748_v15, %v7743_v12  ;;  %v6462_v22 = vpack.c.bf16 %v7751_v47, %v7746_v17 }
 0x9c5   : > { %v13307_v8 = vpop.trf.xlu1 }
 0x9c6   : > { %v6447_v55 = vpack.c.bf16 %v7636_v40, %v7631_v16  ;;  %v6446_v26 = vpack.c.bf16 %v7639_v24, %v7634_v31  ;;  %v7753_v31 = vunpack.i.l.bf16 %v13307_v8  ;;  %v7756_v27 = vunpack.i.h.bf16 %v13307_v8  ;;  %v7980_v8 = vld [vmem:[%s14154_s24 + $0x20] ss:$8 sps:$4 sm:$0xff]  }
 0x9c7   : > { %v7640_v30 = vpop.trf.xlu0 }
 0x9c8   : > { %6670 = vmatprep.subr.bf16.mxu1 %v6447_v55  ;;  %v7644_v61 = vunpack.i.h.bf16 %v7640_v30  ;;  %v7641_v5 = vunpack.i.l.bf16 %v7640_v30  ;;  %v7977_v55 = vld [vmem:[%s14154_s24 + $0x10] ss:$8 sps:$4 sm:$0xff]  }
 0x9c9   : > { %6671 = vmatpush1.bf16.msra.mxu1 %v6446_v26  ;;  %v13314_v19 = vpop.trf.xlu1  ;;  %v7978_v26 = vld [vmem:[%s14154_s24 + $0x24] ss:$8 sps:$4 sm:$0xff]   ;;  %v7983_v30 = vld [vmem:[%s14154_s24 + $0x30] ss:$8 sps:$4 sm:$0xff]  }
 0x9ca   : > { %v7758_v16 = vunpack.i.l.bf16 %v13314_v19  ;;  %v7761_v63 = vunpack.i.h.bf16 %v13314_v19  ;;  %v7989_v19 = vld [vmem:[%s14154_s24 + $0x50] ss:$8 sps:$4 sm:$0xff]  }
 0x9cb   : > { %v7645_v44 = vpop.trf.xlu0 }
 0x9cc   : > { %v7649_v36 = vunpack.i.h.bf16 %v7645_v44  ;;  %v7646_v13 = vunpack.i.l.bf16 %v7645_v44  ;;  %v6465_v24 = vpack.c.bf16 %v7758_v16, %v7753_v31  ;;  %v6464_v40 = vpack.c.bf16 %v7761_v63, %v7756_v27  ;;  %v7993_v44 = vld [vmem:[%s14154_s24 + $0x74] ss:$8 sps:$4 sm:$0xff]  }
 0x9ce   : > { %v6449_v49 = vpack.c.bf16 %v7646_v13, %v7641_v5  ;;  %v6448_v56 = vpack.c.bf16 %v7649_v36, %v7644_v61  ;;  %v7990_v61 = vld [vmem:[%s14154_s24 + $0x64] ss:$8 sps:$4 sm:$0xff]   ;;  %v7992_v5 = vld [vmem:[%s14154_s24 + $0x60] ss:$8 sps:$4 sm:$0xff]   ;;  %v7995_v36 = vld [vmem:[%s14154_s24 + $0x70] ss:$8 sps:$4 sm:$0xff]  }
 0x9d0   : > { %6672 = vmatprep.subr.bf16.mxu1 %v6449_v49 }
 0x9d1   : > { %6673 = vmatpush1.bf16.msra.mxu1 %v6448_v56 }
 0x9d2   : > { %6674 = vmatprep.subr.bf16.mxu1 %v6451_v0 }
 0x9d5   : > { %6675 = vmatpush1.bf16.msra.mxu1 %v6450_v20 }
 0x9d6   : > { %6676 = vmatprep.subr.bf16.mxu1 %v6453_v52 }
 0x9d9   : > { %6677 = vmatpush1.bf16.msra.mxu1 %v6452_v4 }
 0x9da   : > { %6678 = vmatprep.subr.bf16.mxu1 %v6455_v46 }
 0x9dd   : > { %6679 = vmatpush1.bf16.msra.mxu1 %v6454_v2 }
 0x9de   : > { %6680 = vmatprep.subr.bf16.mxu1 %v6457_v11 }
 0x9e1   : > { %6681 = vmatpush1.bf16.msra.mxu1 %v6456_v29 }
 0x9e2   : > { %6682 = vmatprep.subr.bf16.mxu1 %v6459_v43 }
 0x9e5   : > { %6683 = vmatpush1.bf16.msra.mxu1 %v6458_v18 }
 0x9e6   : > { %6684 = vmatprep.subr.bf16.mxu1 %v6461_v7 }
 0x9e7   : > { %v6506_v13 = vpop.permute.xlu1 %6505 }
 0x9e9   : > { %6685 = vmatpush1.bf16.msra.mxu1 %v6460_v21 }
 0x9ea   : > { %6686 = vmatprep.subr.bf16.mxu1 %v6463_v6 }
 0x9eb   : > { %v6511_v48 = vpop.permute.xlu1 %6510 }
 0x9ed   : > { %6687 = vmatpush1.bf16.msra.mxu1 %v6462_v22 }
 0x9ee   : > { %6688 = vmatprep.subr.bf16.mxu1 %v6465_v24 }
 0x9ef   : > { %v6516_v3 = vpop.permute.xlu1 %6515 }
 0x9f1   : > { %6689 = vmatpush1.bf16.msra.mxu1 %v6464_v40 }
 0x9f3   : > { %v6526_v15 = vpop.permute.xlu1 %6525 }
 0x9f4   : > { %6691 = vmatmul.mubr.bf16.vlgmr.msra.gmra.mrb[192].mxu1 %v7972_v57  ;;  %v6501_v49 = vpop.permute.xlu0 %6500 }
 0x9f5   : > { %6700 = vmatprep.mubr.bf16.mxu1 %v7975_v62 }
 0x9f8   : > { %v6521_v43 = vpop.permute.xlu0 %6520 }
 0x9fc   : > { %6701 = vmatmul.mubr.bf16.gmra.mrb[196].mxu1 %v7977_v55  ;;  %v6531_v24 = vpop.permute.xlu0 %6530 }
 0x9fd   : > { %6710 = vmatprep.mubr.bf16.mxu1 %v7978_v26  ;;  %v6536_v26 = vpop.permute.xlu1 %6535 }
 0xa04   : > { %6711 = vmatmul.mubr.bf16.gmra.mrb[200].mxu1 %v7980_v8 }
 0xa05   : > { %6720 = vmatprep.mubr.bf16.mxu1 %v7981_v50 }
 0xa0c   : > { %6721 = vmatmul.mubr.bf16.gmra.mrb[204].mxu1 %v7983_v30 }
 0xa0d   : > { %6730 = vmatprep.mubr.bf16.mxu1 %v7984_v33 }
 0xa14   : > { %6731 = vmatmul.mubr.bf16.gmra.mrb[208].mxu1 %v7986_v34 }
 0xa15   : > { %6740 = vmatprep.mubr.bf16.mxu1 %v7987_v25 }
 0xa1c   : > { %6741 = vmatmul.mubr.bf16.gmra.mrb[212].mxu1 %v7989_v19 }
 0xa1d   : > { %6750 = vmatprep.mubr.bf16.mxu1 %v7990_v61 }
 0xa24   : > { %6751 = vmatmul.mubr.bf16.gmra.mrb[216].mxu1 %v7992_v5 }
 0xa25   : > { %6760 = vmatprep.mubr.bf16.mxu1 %v7993_v44 }
 0xa2c   : > { %6761 = vmatmul.mubr.bf16.gmra.mrb[220].mxu1 %v7995_v36  ;;  %v6541_v36 = vpop.permute.xlu0 %6540 }
 0xac7   : > { %v6692_v56 = vpop.f32.mrb[192].mxu1 }
 0xac8   : > { %v6693_v14 = vadd.f32 %v6692_v56, %v6501_v49  ;;  %v6694_v9 = vpop.f32.mrb[193].mxu1 }
 0xac9   : > { %v6695_v58 = vadd.f32 %v6694_v9, %v6501_v49  ;;  %v6696_v1 = vpop.f32.mrb[194].mxu1  ;;  %v6546_v9 = vpop.permute.xlu1 %6545 }
 0xaca   : > { %v6697_v0 = vadd.f32 %v6696_v1, %v6506_v13  ;;  %v6698_v32 = vpop.f32.mrb[195].mxu1  ;;  %v6771_v54 = vmax.f32 %v6693_v14, 0.0 }
 0xacb   : > { %v6699_v20 = vadd.f32 %v6698_v32, %v6506_v13  ;;  %v6772_v52 = vmax.f32 %v6695_v58, 0.0 }
 0xacc   : > { %v6773_v59 = vmax.f32 %v6697_v0, 0.0 }
 0xacd   : > { %v6774_v41 = vmax.f32 %v6699_v20, 0.0 }
 0xace   : > { %v6804_v37 = vpack.c.bf16 %v6773_v59, %v6771_v54 }
 0xacf   : > { %v6805_v4 = vpack.c.bf16 %v6774_v41, %v6772_v52  ;;  %v6702_v53 = vpop.f32.mrb[196].mxu1 }
 0xad0   : > { %v6703_v38 = vadd.f32 %v6702_v53, %v6511_v48  ;;  %v6704_v46 = vpop.f32.mrb[197].mxu1 }
 0xad1   : > { %v6705_v45 = vadd.f32 %v6704_v46, %v6511_v48  ;;  %v6706_v2 = vpop.f32.mrb[198].mxu1  ;;  %6830 = vmatprep.subr.bf16.mxu0 %v6805_v4 }
 0xad2   : > { %v6707_v51 = vadd.f32 %v6706_v2, %v6516_v3  ;;  %v6708_v35 = vpop.f32.mrb[199].mxu1  ;;  %6831 = vmatpush1.bf16.msra.mxu0 %v6804_v37  ;;  %v6775_v23 = vmax.f32 %v6703_v38, 0.0  ;;  %v6551_v37 = vpop.permute.xlu0 %6550 }
 0xad3   : > { %v6709_v11 = vadd.f32 %v6708_v35, %v6516_v3  ;;  %v6776_v29 = vmax.f32 %v6705_v45, 0.0  ;;  %v6556_v3 = vpop.permute.xlu1 %6555 }
 0xad4   : > { %v6777_v39 = vmax.f32 %v6707_v51, 0.0 }
 0xad5   : > { %v6778_v42 = vmax.f32 %v6709_v11, 0.0 }
 0xad6   : > { %v6806_v10 = vpack.c.bf16 %v6777_v39, %v6775_v23 }
 0xad7   : > { %v6807_v28 = vpack.c.bf16 %v6778_v42, %v6776_v29  ;;  %v6712_v60 = vpop.f32.mrb[200].mxu1 }
 0xad8   : > { %v6713_v18 = vadd.f32 %v6712_v60, %v6521_v43  ;;  %v6714_v12 = vpop.f32.mrb[201].mxu1 }
 0xad9   : > { %v6715_v7 = vadd.f32 %v6714_v12, %v6521_v43  ;;  %v6716_v17 = vpop.f32.mrb[202].mxu1  ;;  %6832 = vmatprep.subr.bf16.mxu0 %v6807_v28  ;;  %v6561_v43 = vpop.permute.xlu0 %6560 }
 0xada   : > { %v6717_v47 = vadd.f32 %v6716_v17, %v6526_v15  ;;  %v6718_v21 = vpop.f32.mrb[203].mxu1  ;;  %6833 = vmatpush1.bf16.msra.mxu0 %v6806_v10  ;;  %v6779_v16 = vmax.f32 %v6713_v18, 0.0 }
 0xadb   : > { %v6719_v31 = vadd.f32 %v6718_v21, %v6526_v15  ;;  %v6780_v27 = vmax.f32 %v6715_v7, 0.0  ;;  %v6566_v15 = vpop.permute.xlu1 %6565 }
 0xadc   : > { %v6781_v6 = vmax.f32 %v6717_v47, 0.0 }
 0xadd   : > { %v6782_v63 = vmax.f32 %v6719_v31, 0.0 }
 0xade   : > { %v6808_v22 = vpack.c.bf16 %v6781_v6, %v6779_v16 }
 0xadf   : > { %v6809_v40 = vpack.c.bf16 %v6782_v63, %v6780_v27  ;;  %v6722_v57 = vpop.f32.mrb[204].mxu1 }
 0xae0   : > { %v6723_v62 = vadd.f32 %v6722_v57, %v6531_v24  ;;  %v6724_v55 = vpop.f32.mrb[205].mxu1 }
 0xae1   : > { %v6725_v8 = vadd.f32 %v6724_v55, %v6531_v24  ;;  %v6726_v50 = vpop.f32.mrb[206].mxu1  ;;  %6834 = vmatprep.subr.bf16.mxu0 %v6809_v40  ;;  %v6571_v24 = vpop.permute.xlu0 %6570 }
 0xae2   : > { %v6727_v30 = vadd.f32 %v6726_v50, %v6536_v26  ;;  %v6728_v33 = vpop.f32.mrb[207].mxu1  ;;  %6835 = vmatpush1.bf16.msra.mxu0 %v6808_v22  ;;  %v6783_v25 = vmax.f32 %v6723_v62, 0.0 }
 0xae3   : > { %v6729_v34 = vadd.f32 %v6728_v33, %v6536_v26  ;;  %v6784_v61 = vmax.f32 %v6725_v8, 0.0  ;;  %v6576_v26 = vpop.permute.xlu1 %6575 }
 0xae4   : > { %v6785_v19 = vmax.f32 %v6727_v30, 0.0 }
 0xae5   : > { %v6786_v5 = vmax.f32 %v6729_v34, 0.0 }
 0xae6   : > { %v6810_v44 = vpack.c.bf16 %v6785_v19, %v6783_v25 }
 0xae7   : > { %v6811_v13 = vpack.c.bf16 %v6786_v5, %v6784_v61  ;;  %v6732_v49 = vpop.f32.mrb[208].mxu1 }
 0xae8   : > { %v6733_v56 = vadd.f32 %v6732_v49, %v6541_v36  ;;  %v6734_v14 = vpop.f32.mrb[209].mxu1  ;;  %v6824_v49 = vpop.permute.xlu0 %6823 }
 0xae9   : > { %v6735_v58 = vadd.f32 %v6734_v14, %v6541_v36  ;;  %v6736_v1 = vpop.f32.mrb[210].mxu1  ;;  %6836 = vmatprep.subr.bf16.mxu0 %v6811_v13  ;;  %v6803_v13 = vld [vmem:[%s14156_s18] sm:$0x1]  ;;  %s8378_s18 = sshll.u32 %s8460_s14, 4  ;;  %s8379_s18 = int_to_ptr.vmem [resolvable:$false] %s8378_s18 }
 0xaea   : > { %v6737_v0 = vadd.f32 %v6736_v1, %v6546_v9  ;;  %v6738_v32 = vpop.f32.mrb[211].mxu1  ;;  %6837 = vmatpush1.bf16.msra.mxu0 %v6810_v44  ;;  %v6787_v20 = vmax.f32 %v6733_v56, 0.0  ;;  %v14157_v56 = vld [vmem:[#allocation19_spill] sm:$0xff]  ;;  %s8380_s15 = scalar_lea.vmem %s8379_s18, 64  ;;  %p8381_p12 = scmp.lt.s32.totalorder %s13404_s11, %s8379_s18 }
 0xaeb   : > { %v6739_v48 = vadd.f32 %v6738_v32, %v6546_v9  ;;  %v6788_v59 = vmax.f32 %v6735_v58, 0.0  ;;  %v6829_v14 = vrot.slane %v6824_v49, %v14157_v56  ;;  %p8382_p1 = scmp.lt.s32.totalorder %s8380_s15, %s8374_s27 }
 0xaec   : > { %v6789_v54 = vmax.f32 %v6737_v0, 0.0 }
 0xaed   : > { %v6790_v52 = vmax.f32 %v6739_v48, 0.0  ;;  %p8383_p2 = por %p8382_p1, %p8381_p12 }
 0xaee   : > { %v6812_v41 = vpack.c.bf16 %v6789_v54, %v6787_v20 }
 0xaef   : > { %v6813_v4 = vpack.c.bf16 %v6790_v52, %v6788_v59  ;;  %v6742_v53 = vpop.f32.mrb[212].mxu1  ;;  %p8384_p4 = pnand %p8383_p2, %p8377_p7 }
 0xaf0   : > { %v6743_v38 = vadd.f32 %v6742_v53, %v6551_v37  ;;  %v6744_v46 = vpop.f32.mrb[213].mxu1 }
 0xaf1   : > { %v6745_v45 = vadd.f32 %v6744_v46, %v6551_v37  ;;  %v6746_v2 = vpop.f32.mrb[214].mxu1  ;;  %6838 = vmatprep.subr.bf16.mxu0 %v6813_v4  ;;  %v8459_v4 = vmov 1966171168  }
 0xaf2   : > { %v6747_v51 = vadd.f32 %v6746_v2, %v6556_v3  ;;  %v6748_v35 = vpop.f32.mrb[215].mxu1  ;;  %6839 = vmatpush1.bf16.msra.mxu0 %v6812_v41  ;;  %v6791_v23 = vmax.f32 %v6743_v38, 0.0  ;;  %v6887_v53 = vunpack.c.l.s4 %v8459_v4 }
 0xaf3   : > { %v6749_v11 = vadd.f32 %v6748_v35, %v6556_v3  ;;  %v6792_v29 = vmax.f32 %v6745_v45, 0.0  ;;  %v14158_v3 = vld [vmem:[#allocation18_spill] sm:$0xff] }
 0xaf4   : > { %v6793_v39 = vmax.f32 %v6747_v51, 0.0  ;;  %v6888_v38 = vunpack.c.0.s8 %v6887_v53 }
 0xaf5   : > { %v6794_v42 = vmax.f32 %v6749_v11, 0.0  ;;  %v14159_v11 = vlaneseq }
 0xaf6   : > { %v6814_v10 = vpack.c.bf16 %v6793_v39, %v6791_v23  ;;  %v6891_v45 = vsub.s32 %v6888_v38, %v14158_v3 }
 0xaf7   : > { %v6815_v28 = vpack.c.bf16 %v6794_v42, %v6792_v29  ;;  %v6752_v60 = vpop.f32.mrb[216].mxu1  ;;  %vm6903_vm0 = vcmp.lt.s32.totalorder %v14159_v11, 256 }
 0xaf8   : > { %v6753_v18 = vadd.f32 %v6752_v60, %v6561_v43  ;;  %v6754_v12 = vpop.f32.mrb[217].mxu1 }
 0xaf9   : > { %v6755_v7 = vadd.f32 %v6754_v12, %v6561_v43  ;;  %v6756_v17 = vpop.f32.mrb[218].mxu1  ;;  %6840 = vmatprep.subr.bf16.mxu0 %v6815_v28 }
 0xafa   : > { %v6757_v47 = vadd.f32 %v6756_v17, %v6566_v15  ;;  %v6758_v21 = vpop.f32.mrb[219].mxu1  ;;  %6841 = vmatpush1.bf16.msra.mxu0 %v6814_v10  ;;  %v6795_v16 = vmax.f32 %v6753_v18, 0.0 }
 0xafb   : > { %v6759_v31 = vadd.f32 %v6758_v21, %v6566_v15  ;;  %v6796_v27 = vmax.f32 %v6755_v7, 0.0 }
 0xafc   : > { %v6797_v6 = vmax.f32 %v6757_v47, 0.0 }
 0xafd   : > { %v6798_v63 = vmax.f32 %v6759_v31, 0.0 }
 0xafe   : > { %v6816_v22 = vpack.c.bf16 %v6797_v6, %v6795_v16 }
 0xaff   : > { %v6817_v40 = vpack.c.bf16 %v6798_v63, %v6796_v27  ;;  %v6762_v57 = vpop.f32.mrb[220].mxu1 }
 0xb00   : > { %v6763_v62 = vadd.f32 %v6762_v57, %v6571_v24  ;;  %v6764_v55 = vpop.f32.mrb[221].mxu1 }
 0xb01   : > { %v6765_v8 = vadd.f32 %v6764_v55, %v6571_v24  ;;  %v6766_v50 = vpop.f32.mrb[222].mxu1  ;;  %6842 = vmatprep.subr.bf16.mxu0 %v6817_v40 }
 0xb02   : > { %v6767_v30 = vadd.f32 %v6766_v50, %v6576_v26  ;;  %v6768_v33 = vpop.f32.mrb[223].mxu1  ;;  %6843 = vmatpush1.bf16.msra.mxu0 %v6816_v22  ;;  %v6799_v25 = vmax.f32 %v6763_v62, 0.0 }
 0xb03   : > { %v6769_v34 = vadd.f32 %v6768_v33, %v6576_v26  ;;  %v6800_v61 = vmax.f32 %v6765_v8, 0.0 }
 0xb04   : > { %v6801_v19 = vmax.f32 %v6767_v30, 0.0 }
 0xb05   : > { %v6802_v5 = vmax.f32 %v6769_v34, 0.0 }
 0xb06   : > { %v6818_v44 = vpack.c.bf16 %v6801_v19, %v6799_v25 }
 0xb07   : > { %v6819_v36 = vpack.c.bf16 %v6802_v5, %v6800_v61 }
 0xb09   : > { %6844 = vmatprep.subr.bf16.mxu0 %v6819_v36 }
 0xb0a   : > { %6845 = vmatpush1.bf16.msra.mxu0 %v6818_v44 }
 0xb0d   : > { %6863 = vmatmul.mubr.bf16.vlgmr.msra.gmra.mrb[192].mxu0 %v6803_v13 }
 0xbe0   : > { %v6864_v9 = vpop.f32.mrb[192].mxu0 }
 0xbe1   : > { %v6865_v58 = vadd.f32 %v6864_v9, %v6829_v14  ;;  %v6866_v1 = vpop.f32.mrb[193].mxu0 }
 0xbe2   : > { %v6867_v0 = vadd.f32 %v6866_v1, %v6829_v14  ;;  %v6868_v32 = vpop.f32.mrb[194].mxu0 }
 0xbe3   : > { %v7221_v48 = vmul.f32 -1.442695, %v6865_v58  ;;  %v6869_v20 = vpop.f32.mrb[195].mxu0 }
 0xbe4   : > { %v7222_v54 = vmul.f32 -1.442695, %v6867_v0 }
 0xbe5   : > { %8252 = vpow2.f32 %v7221_v48 }
 0xbe6   : > { %8254 = vpow2.f32 %v7222_v54 }
 0xbef   : > { %v8253_v59 = vpop.eup %8252 }
 0xbf0   : > { %v8255_v52 = vpop.eup %8254  ;;  %v6877_v41 = vadd.f32 1.0, %v8253_v59 }
 0xbf1   : > { %v6878_v37 = vadd.f32 1.0, %v8255_v52 }
 0xbf2   : > { %8256 = vrcp.f32 %v6877_v41 }
 0xbf3   : > { %8258 = vrcp.f32 %v6878_v37 }
 0xbfc   : > { %v8257_v46 = vpop.eup %8256 }
 0xbfd   : > { %v8259_v2 = vpop.eup %8258 }
 0xbfe   : > { %v6885_v51 = vcombine.low %v8257_v46, %v8259_v2 }
 0xc00   : > { %v6892_v35 = vrot.slane %v6885_v51, %v6891_v45 }
 0xc02   : > { %v6899_v23 = vrot.slane %v6892_v35, %v6891_v45 }
 0xc04   : > { %6905 = vst.msk [vmem:[%s559_s1] sm:$0x3] %vm6903_vm0, %v6899_v23 }
 0xc05   : > { %8387 = shalt.err (!%p8384_p4)
}
 0xc06   : > { %s8388_s20 = scalar_lea.hbm %s13402_s16, 32  ;;  %s8392_s29 = scalar_lea.hbm %s14160_s13, 64 }
 0xc07   : > { %p8389_p9 = scmp.ne.s32.totalorder %s13402_s16, %s8388_s20  ;;  %p8393_p8 = scmp.lt.u32.totalorder %s13402_s16, %s14160_s13 }
 0xc08   : > { %p8394_p13 = scmp.lt.u32.totalorder %s8392_s29, %s8388_s20  ;;  %p8396_p10 = scmp.lt.u32.totalorder %s8388_s20, %s13402_s16 }
 0xc09   : > { %p8390_p0 = pnand %p8389_p9, %p8692_p5 }
 0xc0a   : > { %p8395_p6 = por %p8394_p13, %p8393_p8 }
 0xc0b   : > { %p8391_p11 = pneg %p8390_p0 }
 0xc0c   : > { %p8397_p3 = por %p8396_p10, %p8395_p6 }
 0xc0e   : > { %p8398_p7 = pnand %p8397_p3, %p8391_p11 }
 0xc10   : > { %8401 = shalt.err (!%p8398_p7)
}
 0xc11   : > { %7469 = dma.vmem_to_hbm [thread:$0]  (%p8692_p5), %s13404_s11, 32, %s13402_s16, %s6907_s26  }
 0xc12 PF: > { %s14161_s27 = sld [smem:[#allocation16_spill]]  ;;  %s14162_s18 = sld [smem:[#allocation17_spill]] }
 0xc13   : > { %p14164_p1 = scmp.ge.s32.totalorder %s8448_s23, 2 }
 0xc18   : > { %s6933_s15 = sand.u32 1, %s14161_s27   ;;  %p14163_p12 = scmp.ne.s32.totalorder %s14162_s18, 0 }
 0xc19   : > { %s6934_s17 = scalar_lea.sflag [#allocation5], %s6933_s15 }
 0xc1a   : > { %p7486_p2 = pnand %p14164_p1, %p14163_p12 }
 0xc1c   : > { %8431 = dma.done.wait (!%p7486_p2), %s6934_s17, 32  }
 0xc1d   : > { %8433 = vsyncadd (!%p7486_p2), %s6934_s17, 4294967264  ;;  %p32_p4 = scmp.ge.s32.totalorder %s8657_s28, 4   ;;  %s14165_s20 = smov %s8440_s21 }
 0xc1e   : > { %s14166_s21 = smov %s8444_s22  ;;  %s14167_s22 = smov %s8688_s12 }
 0xc1f   : > { %s14168_s23 = smov %s8657_s28  ;;  %34 = sbr.rel (!%p32_p4) target bundleno = 15 (0xf), region = 147 }
 0xc26   :  { %6939 = vsyncpa [#allocation4], 1 }
 0xc27   :  { %6941 = vsyncpa [#allocation4 + $0x1], 1 }
 0xc28   :  { %6942 = vsyncpa [#allocation7], 1 }
 0xc29   :  { %6943 = vsyncpa [#allocation10], 1 }
 0xc2a   :  { %6944 = vsyncpa [#allocation5], 1 }
 0xc2b   :  { %6946 = vsyncpa [#allocation5 + $0x1], 1 }

</bundles_post_ra>
